<compile_context>
chip_gen: v7x
topology: tpu7x:2x2x1
jax: 0.10.0
libtpu: 0.0.40
codegen_flags: <defaults>
</compile_context>

<pallas_src>
import functools

import jax
import jax.numpy as jnp
import numpy as np
from jax.experimental import pallas as pl
from jax.experimental.pallas import tpu as pltpu

HIDDEN = 512  # fixed by the PyTorch module


def _scoring_kernel(x_all_ref, wih_ref, whh_ref, bias_ref, wout_ref, bout_ref,
                    out_ref, *, B, C, H):
    """Whole-problem kernel.

    x_all_ref : (3B + C*B, IN)  VMEM bf16   rows = [A(b=0..B), B(..), C(..), D(c*B+b)]
    wih_ref   : (IN, 4H)        VMEM bf16   (transposed weight_ih_l0)
    whh_ref   : (H, 4H)         VMEM bf16   (transposed weight_hh_l0)
    bias_ref  : (1, 4H)         VMEM f32    (bias_ih_l0 + bias_hh_l0)
    wout_ref  : (H, 1)          VMEM f32    (transposed score_out.weight)
    bout_ref  : (1, 1)          SMEM f32    (score_out.bias)
    out_ref   : (C*B, 1)        VMEM f32    row c*B+b -> score for (batch b, choice c)
    """
    x_all = x_all_ref[...]          # (3B + C*B, IN) bf16
    wih = wih_ref[...]              # (IN, 4H)       bf16
    whh = whh_ref[...]              # (H, 4H)        bf16
    bias = bias_ref[...]            # (1, 4H)        f32
    wout = wout_ref[...]            # (H, 1)         f32

    # One batched input projection for all 3 + C timesteps; bias broadcast once.
    x_proj = jnp.dot(x_all, wih, preferred_element_type=jnp.float32) + bias

    def lstm_cell(gates, c_prev):
        # PyTorch gate order: i, f, g, o
        i_g = jax.nn.sigmoid(gates[:, 0 * H:1 * H])
        g_g = jnp.tanh(gates[:, 2 * H:3 * H])
        o_g = jax.nn.sigmoid(gates[:, 3 * H:4 * H])
        if c_prev is None:          # h0 = c0 = 0: forget gate contributes nothing
            c_new = i_g * g_g
        else:
            f_g = jax.nn.sigmoid(gates[:, 1 * H:2 * H])
            c_new = f_g * c_prev + i_g * g_g
        h_new = o_g * jnp.tanh(c_new)
        return h_new, c_new

    # ---- shared A/B/C prefix, computed once ----
    h, c = lstm_cell(x_proj[0:B], None)                      # t = 0 (no h @ whh needed)
    for t in (1, 2):                                         # t = 1, 2
        hg = jnp.dot(h.astype(jnp.bfloat16), whh,
                     preferred_element_type=jnp.float32)     # (B, 4H)
        h, c = lstm_cell(x_proj[t * B:(t + 1) * B] + hg, c)

    # ---- final step: fold the C choices into the batch dimension ----
    hg = jnp.dot(h.astype(jnp.bfloat16), whh,
                 preferred_element_type=jnp.float32)         # (B, 4H), computed once
    gates_d = x_proj[3 * B:] + jnp.concatenate([hg] * C, axis=0)   # (C*B, 4H)
    c_rep = jnp.concatenate([c] * C, axis=0)                       # (C*B, H)
    h_f, _ = lstm_cell(gates_d, c_rep)                             # (C*B, H)

    # scorer: Linear(H, 1) as a single batched matmul + scalar bias from SMEM.
    out_ref[...] = (jnp.dot(h_f, wout, preferred_element_type=jnp.float32)
                    + bout_ref[0, 0])


@jax.jit
def scoring_model_forward(ABC, D_choices, params):
    """Pallas forward of scoring_model (mlp_encoder=False, 1-layer LSTM)."""
    B, S, IN = ABC.shape
    C = D_choices.shape[1]

    # PyTorch layouts -> kernel layouts (transposed for row-major MXU matmuls).
    wih_t = params["w_ih"].T.astype(jnp.bfloat16)                       # (IN, 4H)
    whh_t = params["w_hh"].T.astype(jnp.bfloat16)                       # (H, 4H)
    bias = (params["b_ih"] + params["b_hh"]).reshape(1, 4 * HIDDEN)     # (1, 4H) f32
    wout_t = params["w_out"].T.astype(jnp.float32)                      # (H, 1)
    bout = params["b_out"].reshape(1, 1).astype(jnp.float32)            # (1, 1)

    # Choice-major flattening of D so the shared (B, ·) prefix state can be
    # replicated with a plain sublane-aligned concatenate inside the kernel.
    abc_flat = jnp.transpose(ABC, (1, 0, 2)).reshape(3 * B, IN)         # rows: t-major
    d_flat = jnp.transpose(D_choices, (1, 0, 2)).reshape(C * B, IN)     # rows: c*B + b
    x_all = jnp.concatenate([abc_flat, d_flat], axis=0).astype(jnp.bfloat16)

    kernel = functools.partial(_scoring_kernel, B=B, C=C, H=HIDDEN)
    vmem = pl.BlockSpec(memory_space=pltpu.MemorySpace.VMEM)
    smem = pl.BlockSpec(memory_space=pltpu.MemorySpace.SMEM)

    flat_scores = pl.pallas_call(
        kernel,
        out_shape=jax.ShapeDtypeStruct((C * B, 1), jnp.float32),
        in_specs=[vmem, vmem, vmem, vmem, vmem, smem],
        out_specs=vmem,
    )(x_all, wih_t, whh_t, bias, wout_t, bout)

    return flat_scores.reshape(C, B).T                                  # (B, C)


def reference_forward(ABC, D_choices, params):
    """Pure-JAX f32 reference matching torch.nn.LSTM semantics."""
    B, _, IN = ABC.shape
    C = D_choices.shape[1]
    H = HIDDEN
    w_ih, w_hh = params["w_ih"], params["w_hh"]
    b = params["b_ih"] + params["b_hh"]
    w_out, b_out = params["w_out"], params["b_out"]

    scores = []
    for d in range(C):
        x_seq = jnp.concatenate([ABC, D_choices[:, d:d + 1, :]], axis=1)  # (B,4,IN)
        h = jnp.zeros((B, H), jnp.float32)
        c = jnp.zeros((B, H), jnp.float32)
        for t in range(4):
            gates = x_seq[:, t, :] @ w_ih.T + h @ w_hh.T + b
            i_g = jax.nn.sigmoid(gates[:, 0 * H:1 * H])
            f_g = jax.nn.sigmoid(gates[:, 1 * H:2 * H])
            g_g = jnp.tanh(gates[:, 2 * H:3 * H])
            o_g = jax.nn.sigmoid(gates[:, 3 * H:4 * H])
            c = f_g * c + i_g * g_g
            h = o_g * jnp.tanh(c)
        scores.append(h @ w_out.T + b_out)  # (B, 1)
    return jnp.concatenate(scores, axis=1)  # (B, C)


def init_params(key, in_dim):
    """Deterministic parameter init with PyTorch-default-like uniform ranges."""
    ks = jax.random.split(key, 6)
    k_lstm = 1.0 / np.sqrt(HIDDEN)
    k_lin = 1.0 / np.sqrt(HIDDEN)
    u = lambda k, shape, bound: jax.random.uniform(
        k, shape, jnp.float32, -bound, bound)
    return {
        "w_ih": u(ks[0], (4 * HIDDEN, in_dim), k_lstm),
        "w_hh": u(ks[1], (4 * HIDDEN, HIDDEN), k_lstm),
        "b_ih": u(ks[2], (4 * HIDDEN,), k_lstm),
        "b_hh": u(ks[3], (4 * HIDDEN,), k_lstm),
        "w_out": u(ks[4], (1, HIDDEN), k_lin),
        "b_out": u(ks[5], (1,), k_lin),
    }


if __name__ == "__main__":
    key = jax.random.PRNGKey(0)
    k_abc, k_d, k_p = jax.random.split(key, 3)

    B, IN, C = 8, 64, 4  # batch, in_dim, number of D choices
    ABC = jax.random.normal(k_abc, (B, 3, IN), jnp.float32)
    D_choices = jax.random.normal(k_d, (B, C, IN), jnp.float32)
    params = init_params(k_p, IN)

    scores = scoring_model_forward(ABC, D_choices, params)
    jax.block_until_ready(scores)

    ref = reference_forward(ABC, D_choices, params)
    # Tolerance loosened vs the pure-f32 reference because the kernel runs its
    # matmuls with bf16 operands (f32 accumulation); observed error is ~1e-3.
    np.testing.assert_allclose(np.asarray(scores), np.asarray(ref),
                               rtol=2e-2, atol=2e-2)
    assert scores.shape == (B, C)
    print("KERNEL_OK")
</pallas_src>

<mosaic_0001>
module attributes {stable_mosaic.version = 11 : i64} {
  func.func @_scoring_kernel(%arg0: memref<56x64xbf16, #tpu.memory_space<vmem>>, %arg1: memref<64x2048xbf16, #tpu.memory_space<vmem>>, %arg2: memref<512x2048xbf16, #tpu.memory_space<vmem>>, %arg3: memref<1x2048xf32, #tpu.memory_space<vmem>>, %arg4: memref<512x1xf32, #tpu.memory_space<vmem>>, %arg5: memref<1x1xf32, #tpu.memory_space<smem>>, %arg6: memref<32x1xf32, #tpu.memory_space<vmem>>) attributes {dimension_semantics = [], scalar_prefetch = 0 : i64, scratch_operands = 0 : i64, tpu.core_type = #tpu.core_type<tc>} {
    %c0 = arith.constant 0 : index
    %c0_0 = arith.constant 0 : index
    %0 = vector.load %arg0[%c0, %c0_0] : memref<56x64xbf16, #tpu.memory_space<vmem>>, vector<56x64xbf16>
    %c0_1 = arith.constant 0 : index
    %c0_2 = arith.constant 0 : index
    %1 = vector.load %arg1[%c0_1, %c0_2] : memref<64x2048xbf16, #tpu.memory_space<vmem>>, vector<64x2048xbf16>
    %c0_3 = arith.constant 0 : index
    %c0_4 = arith.constant 0 : index
    %2 = vector.load %arg2[%c0_3, %c0_4] : memref<512x2048xbf16, #tpu.memory_space<vmem>>, vector<512x2048xbf16>
    %c0_5 = arith.constant 0 : index
    %c0_6 = arith.constant 0 : index
    %3 = vector.load %arg3[%c0_5, %c0_6] : memref<1x2048xf32, #tpu.memory_space<vmem>>, vector<1x2048xf32>
    %c0_7 = arith.constant 0 : index
    %c0_8 = arith.constant 0 : index
    %4 = vector.load %arg4[%c0_7, %c0_8] : memref<512x1xf32, #tpu.memory_space<vmem>>, vector<512x1xf32>
    %cst = arith.constant dense<0.000000e+00> : vector<56x2048xf32>
    %5 = tpu.matmul %0, %1, %cst {dimension_numbers = #tpu.dot_dimension_numbers<[1], [0], [0], [1], [0, 0, 1, 1], [], []>} : vector<56x64xbf16>, vector<64x2048xbf16>, vector<56x2048xf32> -> vector<56x2048xf32>
    %6 = vector.broadcast %3 : vector<1x2048xf32> to vector<56x2048xf32>
    %7 = arith.addf %5, %6 : vector<56x2048xf32>
    %8 = vector.extract_strided_slice %7 {offsets = [0, 0], sizes = [8, 2048], strides = [1, 1]} : vector<56x2048xf32> to vector<8x2048xf32>
    %9 = vector.extract_strided_slice %8 {offsets = [0, 0], sizes = [8, 512], strides = [1, 1]} : vector<8x2048xf32> to vector<8x512xf32>
    %10 = arith.negf %9 : vector<8x512xf32>
    %11 = math.exp %10 : vector<8x512xf32>
    %cst_9 = arith.constant 1.000000e+00 : f32
    %12 = vector.broadcast %cst_9 : f32 to vector<8x512xf32>
    %13 = arith.addf %12, %11 : vector<8x512xf32>
    %14 = arith.divf %12, %13 : vector<8x512xf32>
    %15 = vector.extract_strided_slice %8 {offsets = [0, 1024], sizes = [8, 512], strides = [1, 1]} : vector<8x2048xf32> to vector<8x512xf32>
    %16 = math.tanh %15 : vector<8x512xf32>
    %17 = vector.extract_strided_slice %8 {offsets = [0, 1536], sizes = [8, 512], strides = [1, 1]} : vector<8x2048xf32> to vector<8x512xf32>
    %18 = arith.negf %17 : vector<8x512xf32>
    %19 = math.exp %18 : vector<8x512xf32>
    %cst_10 = arith.constant 1.000000e+00 : f32
    %20 = vector.broadcast %cst_10 : f32 to vector<8x512xf32>
    %21 = arith.addf %20, %19 : vector<8x512xf32>
    %22 = arith.divf %20, %21 : vector<8x512xf32>
    %23 = arith.mulf %14, %16 : vector<8x512xf32>
    %24 = math.tanh %23 : vector<8x512xf32>
    %25 = arith.mulf %22, %24 : vector<8x512xf32>
    %26 = arith.truncf %25 : vector<8x512xf32> to vector<8x512xbf16>
    %cst_11 = arith.constant dense<0.000000e+00> : vector<8x2048xf32>
    %27 = tpu.matmul %26, %2, %cst_11 {dimension_numbers = #tpu.dot_dimension_numbers<[1], [0], [0], [1], [0, 0, 1, 1], [], []>} : vector<8x512xbf16>, vector<512x2048xbf16>, vector<8x2048xf32> -> vector<8x2048xf32>
    %28 = vector.extract_strided_slice %7 {offsets = [8, 0], sizes = [8, 2048], strides = [1, 1]} : vector<56x2048xf32> to vector<8x2048xf32>
    %29 = arith.addf %28, %27 : vector<8x2048xf32>
    %30 = vector.extract_strided_slice %29 {offsets = [0, 0], sizes = [8, 512], strides = [1, 1]} : vector<8x2048xf32> to vector<8x512xf32>
    %31 = arith.negf %30 : vector<8x512xf32>
    %32 = math.exp %31 : vector<8x512xf32>
    %cst_12 = arith.constant 1.000000e+00 : f32
    %33 = vector.broadcast %cst_12 : f32 to vector<8x512xf32>
    %34 = arith.addf %33, %32 : vector<8x512xf32>
    %35 = arith.divf %33, %34 : vector<8x512xf32>
    %36 = vector.extract_strided_slice %29 {offsets = [0, 1024], sizes = [8, 512], strides = [1, 1]} : vector<8x2048xf32> to vector<8x512xf32>
    %37 = math.tanh %36 : vector<8x512xf32>
    %38 = vector.extract_strided_slice %29 {offsets = [0, 1536], sizes = [8, 512], strides = [1, 1]} : vector<8x2048xf32> to vector<8x512xf32>
    %39 = arith.negf %38 : vector<8x512xf32>
    %40 = math.exp %39 : vector<8x512xf32>
    %cst_13 = arith.constant 1.000000e+00 : f32
    %41 = vector.broadcast %cst_13 : f32 to vector<8x512xf32>
    %42 = arith.addf %41, %40 : vector<8x512xf32>
    %43 = arith.divf %41, %42 : vector<8x512xf32>
    %44 = vector.extract_strided_slice %29 {offsets = [0, 512], sizes = [8, 512], strides = [1, 1]} : vector<8x2048xf32> to vector<8x512xf32>
    %45 = arith.negf %44 : vector<8x512xf32>
    %46 = math.exp %45 : vector<8x512xf32>
    %cst_14 = arith.constant 1.000000e+00 : f32
    %47 = vector.broadcast %cst_14 : f32 to vector<8x512xf32>
    %48 = arith.addf %47, %46 : vector<8x512xf32>
    %49 = arith.divf %47, %48 : vector<8x512xf32>
    %50 = arith.mulf %49, %23 : vector<8x512xf32>
    %51 = arith.mulf %35, %37 : vector<8x512xf32>
    %52 = arith.addf %50, %51 : vector<8x512xf32>
    %53 = math.tanh %52 : vector<8x512xf32>
    %54 = arith.mulf %43, %53 : vector<8x512xf32>
    %55 = arith.truncf %54 : vector<8x512xf32> to vector<8x512xbf16>
    %cst_15 = arith.constant dense<0.000000e+00> : vector<8x2048xf32>
    %56 = tpu.matmul %55, %2, %cst_15 {dimension_numbers = #tpu.dot_dimension_numbers<[1], [0], [0], [1], [0, 0, 1, 1], [], []>} : vector<8x512xbf16>, vector<512x2048xbf16>, vector<8x2048xf32> -> vector<8x2048xf32>
    %57 = vector.extract_strided_slice %7 {offsets = [16, 0], sizes = [8, 2048], strides = [1, 1]} : vector<56x2048xf32> to vector<8x2048xf32>
    %58 = arith.addf %57, %56 : vector<8x2048xf32>
    %59 = vector.extract_strided_slice %58 {offsets = [0, 0], sizes = [8, 512], strides = [1, 1]} : vector<8x2048xf32> to vector<8x512xf32>
    %60 = arith.negf %59 : vector<8x512xf32>
    %61 = math.exp %60 : vector<8x512xf32>
    %cst_16 = arith.constant 1.000000e+00 : f32
    %62 = vector.broadcast %cst_16 : f32 to vector<8x512xf32>
    %63 = arith.addf %62, %61 : vector<8x512xf32>
    %64 = arith.divf %62, %63 : vector<8x512xf32>
    %65 = vector.extract_strided_slice %58 {offsets = [0, 1024], sizes = [8, 512], strides = [1, 1]} : vector<8x2048xf32> to vector<8x512xf32>
    %66 = math.tanh %65 : vector<8x512xf32>
    %67 = vector.extract_strided_slice %58 {offsets = [0, 1536], sizes = [8, 512], strides = [1, 1]} : vector<8x2048xf32> to vector<8x512xf32>
    %68 = arith.negf %67 : vector<8x512xf32>
    %69 = math.exp %68 : vector<8x512xf32>
    %cst_17 = arith.constant 1.000000e+00 : f32
    %70 = vector.broadcast %cst_17 : f32 to vector<8x512xf32>
    %71 = arith.addf %70, %69 : vector<8x512xf32>
    %72 = arith.divf %70, %71 : vector<8x512xf32>
    %73 = vector.extract_strided_slice %58 {offsets = [0, 512], sizes = [8, 512], strides = [1, 1]} : vector<8x2048xf32> to vector<8x512xf32>
    %74 = arith.negf %73 : vector<8x512xf32>
    %75 = math.exp %74 : vector<8x512xf32>
    %cst_18 = arith.constant 1.000000e+00 : f32
    %76 = vector.broadcast %cst_18 : f32 to vector<8x512xf32>
    %77 = arith.addf %76, %75 : vector<8x512xf32>
    %78 = arith.divf %76, %77 : vector<8x512xf32>
    %79 = arith.mulf %78, %52 : vector<8x512xf32>
    %80 = arith.mulf %64, %66 : vector<8x512xf32>
    %81 = arith.addf %79, %80 : vector<8x512xf32>
    %82 = math.tanh %81 : vector<8x512xf32>
    %83 = arith.mulf %72, %82 : vector<8x512xf32>
    %84 = arith.truncf %83 : vector<8x512xf32> to vector<8x512xbf16>
    %cst_19 = arith.constant dense<0.000000e+00> : vector<8x2048xf32>
    %85 = tpu.matmul %84, %2, %cst_19 {dimension_numbers = #tpu.dot_dimension_numbers<[1], [0], [0], [1], [0, 0, 1, 1], [], []>} : vector<8x512xbf16>, vector<512x2048xbf16>, vector<8x2048xf32> -> vector<8x2048xf32>
    %86 = vector.extract_strided_slice %7 {offsets = [24, 0], sizes = [32, 2048], strides = [1, 1]} : vector<56x2048xf32> to vector<32x2048xf32>
    %87 = tpu.concatenate %85, %85, %85, %85 in 0 : vector<8x2048xf32>, vector<8x2048xf32>, vector<8x2048xf32>, vector<8x2048xf32> -> vector<32x2048xf32>
    %88 = arith.addf %86, %87 : vector<32x2048xf32>
    %89 = tpu.concatenate %81, %81, %81, %81 in 0 : vector<8x512xf32>, vector<8x512xf32>, vector<8x512xf32>, vector<8x512xf32> -> vector<32x512xf32>
    %90 = vector.extract_strided_slice %88 {offsets = [0, 0], sizes = [32, 512], strides = [1, 1]} : vector<32x2048xf32> to vector<32x512xf32>
    %91 = arith.negf %90 : vector<32x512xf32>
    %92 = math.exp %91 : vector<32x512xf32>
    %cst_20 = arith.constant 1.000000e+00 : f32
    %93 = vector.broadcast %cst_20 : f32 to vector<32x512xf32>
    %94 = arith.addf %93, %92 : vector<32x512xf32>
    %95 = arith.divf %93, %94 : vector<32x512xf32>
    %96 = vector.extract_strided_slice %88 {offsets = [0, 1024], sizes = [32, 512], strides = [1, 1]} : vector<32x2048xf32> to vector<32x512xf32>
    %97 = math.tanh %96 : vector<32x512xf32>
    %98 = vector.extract_strided_slice %88 {offsets = [0, 1536], sizes = [32, 512], strides = [1, 1]} : vector<32x2048xf32> to vector<32x512xf32>
    %99 = arith.negf %98 : vector<32x512xf32>
    %100 = math.exp %99 : vector<32x512xf32>
    %cst_21 = arith.constant 1.000000e+00 : f32
    %101 = vector.broadcast %cst_21 : f32 to vector<32x512xf32>
    %102 = arith.addf %101, %100 : vector<32x512xf32>
    %103 = arith.divf %101, %102 : vector<32x512xf32>
    %104 = vector.extract_strided_slice %88 {offsets = [0, 512], sizes = [32, 512], strides = [1, 1]} : vector<32x2048xf32> to vector<32x512xf32>
    %105 = arith.negf %104 : vector<32x512xf32>
    %106 = math.exp %105 : vector<32x512xf32>
    %cst_22 = arith.constant 1.000000e+00 : f32
    %107 = vector.broadcast %cst_22 : f32 to vector<32x512xf32>
    %108 = arith.addf %107, %106 : vector<32x512xf32>
    %109 = arith.divf %107, %108 : vector<32x512xf32>
    %110 = arith.mulf %109, %89 : vector<32x512xf32>
    %111 = arith.mulf %95, %97 : vector<32x512xf32>
    %112 = arith.addf %110, %111 : vector<32x512xf32>
    %113 = math.tanh %112 : vector<32x512xf32>
    %114 = arith.mulf %103, %113 : vector<32x512xf32>
    %cst_23 = arith.constant dense<0.000000e+00> : vector<32x1xf32>
    %115 = tpu.matmul %114, %4, %cst_23 {dimension_numbers = #tpu.dot_dimension_numbers<[1], [0], [0], [1], [0, 0, 1, 1], [], []>} : vector<32x512xf32>, vector<512x1xf32>, vector<32x1xf32> -> vector<32x1xf32>
    %c0_24 = arith.constant 0 : index
    %c0_25 = arith.constant 0 : index
    %116 = memref.load %arg5[%c0_24, %c0_25] : memref<1x1xf32, #tpu.memory_space<smem>>
    %117 = vector.broadcast %116 : f32 to vector<32x1xf32>
    %118 = arith.addf %115, %117 : vector<32x1xf32>
    %c0_26 = arith.constant 0 : index
    %c0_27 = arith.constant 0 : index
    %119 = vector.load %arg6[%c0_26, %c0_27] : memref<32x1xf32, #tpu.memory_space<vmem>>, vector<32x1xf32>
    tpu.vector_store %arg6[%c0_26, %c0_27], %118 {strides = array<i32>} : memref<32x1xf32, #tpu.memory_space<vmem>>, vector<32x1xf32>,
    return
  }
}

</mosaic_0001>

<bundles_post_ra>
// kernel: scoring_model_forward.1
= control target key start
LH: loop header
LB: loop body
LE: loop exit
PB: predicated region body
PF: predicated region fallthrough
CT: control target
= control target key end

     0   :  { %v8505_v3 = vmov 0   ;;  %vm1094_vm0 = vcmask 523264   ;;  %vm7119_vm1 = vcmask 7168   ;;  %s14180_s1 = inlined_call_operand.vmem [shape: bf16[64,2048], index: 1, kind: input, shape index: {}]   ;;  %s14181_s0 = inlined_call_operand.vmem [shape: bf16[56,64], index: 0, kind: input, shape index: {}]   ;;  %s14182_s2 = inlined_call_operand.vmem [shape: bf16[512,2048], index: 2, kind: input, shape index: {}]   ;;  %s14183_s3 = inlined_call_operand.vmem [shape: f32[1,2048], index: 3, kind: input, shape index: {}]   ;;  %s14184_s4 = inlined_call_operand.vmem [shape: f32[512,1], index: 4, kind: input, shape index: {}]   ;;  %s14185_s5 = inlined_call_operand.<no memory space> [shape: f32[1,1], index: 5, kind: input, shape index: {}]   ;;  %s14186_s6 = inlined_call_operand.vmem [shape: f32[32,1], index: 6, kind: output, shape index: {}]  }
   0x1   :  { %v32_v0 = vld [vmem:[%s14180_s1] sm:$0xff]  ;;  %v33_v2 = vld [vmem:[%s14180_s1 + $0x8] sm:$0xff]  ;;  %1139 = vmatprep.mubr.bf16.mxu0 %v8505_v3  ;;  %1210 = vmatprep.mubr.bf16.mxu1 %v8505_v3  ;;  %v34_v31 = vld [vmem:[%s14180_s1 + $0x10] sm:$0xff] }
   0x2   :  { %v40_v1 = vld [vmem:[%s14180_s1 + $0x40] sm:$0xff]  ;;  %v41_v5 = vld [vmem:[%s14180_s1 + $0x48] sm:$0xff]  ;;  %v42_v32 = vld [vmem:[%s14180_s1 + $0x50] sm:$0xff] }
   0x3   :  { %v7133_v4 = vcombine.high %v32_v0, %v40_v1  ;;  %v7132_v6 = vcombine.low %v32_v0, %v40_v1  ;;  %v48_v7 = vld [vmem:[%s14180_s1 + $0x80] sm:$0xff]  ;;  %v7135_v9 = vcombine.high %v33_v2, %v41_v5  ;;  %v7134_v10 = vcombine.low %v33_v2, %v41_v5  ;;  %v49_v12 = vld [vmem:[%s14180_s1 + $0x88] sm:$0xff]  ;;  %v35_v33 = vld [vmem:[%s14180_s1 + $0x18] sm:$0xff] }
   0x4   :  { %v56_v8 = vld [vmem:[%s14180_s1 + $0xc0] sm:$0xff]  ;;  %v57_v13 = vld [vmem:[%s14180_s1 + $0xc8] sm:$0xff]  ;;  %v43_v34 = vld [vmem:[%s14180_s1 + $0x58] sm:$0xff]  ;;  %v7137_v37 = vcombine.high %v34_v31, %v42_v32  ;;  %v7136_v42 = vcombine.low %v34_v31, %v42_v32 }
   0x5   :  { %v7149_v11 = vcombine.high %v48_v7, %v56_v8  ;;  %v64_v14 = vld [vmem:[%s14180_s1 + $0x100] sm:$0xff]  ;;  %1107 = vmatprep.subr.bf16.mxu0 %v7133_v4  ;;  %v7151_v15 = vcombine.high %v49_v12, %v57_v13  ;;  %v65_v17 = vld [vmem:[%s14180_s1 + $0x108] sm:$0xff]  ;;  %1178 = vmatprep.subr.bf16.mxu1 %v7135_v9  ;;  %v7148_v19 = vcombine.low %v48_v7, %v56_v8  ;;  %v50_v40 = vld [vmem:[%s14180_s1 + $0x90] sm:$0xff] }
   0x6   :  { %v72_v16 = vld [vmem:[%s14180_s1 + $0x140] sm:$0xff]  ;;  %v73_v18 = vld [vmem:[%s14180_s1 + $0x148] sm:$0xff]  ;;  %1108 = vmatpush1.bf16.msra.mxu0 %v7132_v6  ;;  %1179 = vmatpush1.bf16.msra.mxu1 %v7134_v10  ;;  %v7150_v20 = vcombine.low %v49_v12, %v57_v13  ;;  %v7139_v38 = vcombine.high %v35_v33, %v43_v34  ;;  %v58_v41 = vld [vmem:[%s14180_s1 + $0xd0] sm:$0xff]  ;;  %v7138_v48 = vcombine.low %v35_v33, %v43_v34 }
   0x7   :  { %1109 = vmatprep.subr.bf16.mxu0 %v7149_v11  ;;  %v7165_v21 = vcombine.high %v64_v14, %v72_v16  ;;  %1180 = vmatprep.subr.bf16.mxu1 %v7151_v15  ;;  %v7167_v22 = vcombine.high %v65_v17, %v73_v18  ;;  %v80_v23 = vld [vmem:[%s14180_s1 + $0x180] sm:$0xff]  ;;  %v81_v25 = vld [vmem:[%s14180_s1 + $0x188] sm:$0xff]  ;;  %v7164_v27 = vcombine.low %v64_v14, %v72_v16  ;;  %v51_v43 = vld [vmem:[%s14180_s1 + $0x98] sm:$0xff] }
   0x8   :  { %v88_v24 = vld [vmem:[%s14180_s1 + $0x1c0] sm:$0xff]  ;;  %v89_v26 = vld [vmem:[%s14180_s1 + $0x1c8] sm:$0xff]  ;;  %v7166_v28 = vcombine.low %v65_v17, %v73_v18  ;;  %v59_v44 = vld [vmem:[%s14180_s1 + $0xd8] sm:$0xff]  ;;  %v7153_v45 = vcombine.high %v50_v40, %v58_v41  ;;  %v7152_v50 = vcombine.low %v50_v40, %v58_v41 }
   0x9   :  { %v7181_v29 = vcombine.high %v80_v23, %v88_v24  ;;  %v7183_v30 = vcombine.high %v81_v25, %v89_v26  ;;  %v7180_v35 = vcombine.low %v80_v23, %v88_v24  ;;  %v7182_v36 = vcombine.low %v81_v25, %v89_v26  ;;  %v8606_v39 = vld [vmem:[%s14181_s0] sm:$0xff]   ;;  %v66_v46 = vld [vmem:[%s14180_s1 + $0x110] sm:$0xff]  ;;  %v67_v51 = vld [vmem:[%s14180_s1 + $0x118] sm:$0xff] }
   0xa   :  { %1110 = vmatpush1.bf16.msra.mxu0 %v7148_v19  ;;  %1181 = vmatpush1.bf16.msra.mxu1 %v7150_v20  ;;  %v74_v47 = vld [vmem:[%s14180_s1 + $0x150] sm:$0xff]  ;;  %v7155_v49 = vcombine.high %v51_v43, %v59_v44  ;;  %v75_v52 = vld [vmem:[%s14180_s1 + $0x158] sm:$0xff]  ;;  %v7154_v54 = vcombine.low %v51_v43, %v59_v44  ;;  %v8641_v55 = vld [vmem:[%s14181_s0 + $0x8] sm:$0xff]  }
   0xb   :  { %1111 = vmatprep.subr.bf16.mxu0 %v7165_v21  ;;  %1182 = vmatprep.subr.bf16.mxu1 %v7167_v22  ;;  %v7169_v53 = vcombine.high %v66_v46, %v74_v47  ;;  %v82_v56 = vld [vmem:[%s14180_s1 + $0x190] sm:$0xff]  ;;  %v7171_v58 = vcombine.high %v67_v51, %v75_v52  ;;  %v83_v59 = vld [vmem:[%s14180_s1 + $0x198] sm:$0xff]  ;;  %v7168_v61 = vcombine.low %v66_v46, %v74_v47  ;;  %v36_v1 = vld [vmem:[%s14180_s1 + $0x20] sm:$0xff] }
   0xc   :  { %v90_v57 = vld [vmem:[%s14180_s1 + $0x1d0] sm:$0xff]  ;;  %v91_v60 = vld [vmem:[%s14180_s1 + $0x1d8] sm:$0xff]  ;;  %v7170_v63 = vcombine.low %v67_v51, %v75_v52  ;;  %v44_v2 = vld [vmem:[%s14180_s1 + $0x60] sm:$0xff] }
   0xd   :  { %v7185_v62 = vcombine.high %v82_v56, %v90_v57  ;;  %v7187_v0 = vcombine.high %v83_v59, %v91_v60  ;;  %v37_v4 = vld [vmem:[%s14180_s1 + $0x28] sm:$0xff]  ;;  %v7184_v6 = vcombine.low %v82_v56, %v90_v57  ;;  %v7186_v7 = vcombine.low %v83_v59, %v91_v60  ;;  %v8676_v9 = vld [vmem:[%s14181_s0 + $0x10] sm:$0xff]   ;;  %v8687_v11 = vld [vmem:[%s14181_s0 + $0x18] ss:$0 sps:$4 sm:$0xff]  }
   0xe   :  { %1112 = vmatpush1.bf16.msra.mxu0 %v7164_v27  ;;  %1183 = vmatpush1.bf16.msra.mxu1 %v7166_v28  ;;  %v45_v5 = vld [vmem:[%s14180_s1 + $0x68] sm:$0xff]  ;;  %v7141_v8 = vcombine.high %v36_v1, %v44_v2  ;;  %v52_v12 = vld [vmem:[%s14180_s1 + $0xa0] sm:$0xff]  ;;  %v7140_v14 = vcombine.low %v36_v1, %v44_v2  ;;  %v47_v40 = vld [vmem:[%s14180_s1 + $0x78] sm:$0xff] }
   0xf   :  { %1113 = vmatprep.subr.bf16.mxu0 %v7181_v29  ;;  %1184 = vmatprep.subr.bf16.mxu1 %v7183_v30  ;;  %v7143_v10 = vcombine.high %v37_v4, %v45_v5  ;;  %v60_v13 = vld [vmem:[%s14180_s1 + $0xe0] sm:$0xff]  ;;  %v53_v15 = vld [vmem:[%s14180_s1 + $0xa8] sm:$0xff]  ;;  %v7142_v20 = vcombine.low %v37_v4, %v45_v5  ;;  %v62_v46 = vld [vmem:[%s14180_s1 + $0xf0] sm:$0xff] }
  0x10   :  { %v61_v16 = vld [vmem:[%s14180_s1 + $0xe8] sm:$0xff]  ;;  %v7157_v17 = vcombine.high %v52_v12, %v60_v13  ;;  %v68_v18 = vld [vmem:[%s14180_s1 + $0x120] sm:$0xff]  ;;  %v7156_v22 = vcombine.low %v52_v12, %v60_v13  ;;  %v70_v51 = vld [vmem:[%s14180_s1 + $0x130] sm:$0xff] }
  0x11   :  { %v76_v19 = vld [vmem:[%s14180_s1 + $0x160] sm:$0xff]  ;;  %v7159_v21 = vcombine.high %v53_v15, %v61_v16  ;;  %v69_v23 = vld [vmem:[%s14180_s1 + $0x128] sm:$0xff]  ;;  %v7158_v26 = vcombine.low %v53_v15, %v61_v16  ;;  %v78_v52 = vld [vmem:[%s14180_s1 + $0x170] sm:$0xff] }
  0x12   :  { %1114 = vmatpush1.bf16.msra.mxu0 %v7180_v35  ;;  %1185 = vmatpush1.bf16.msra.mxu1 %v7182_v36  ;;  %v77_v24 = vld [vmem:[%s14180_s1 + $0x168] sm:$0xff]  ;;  %v7173_v25 = vcombine.high %v68_v18, %v76_v19  ;;  %v84_v27 = vld [vmem:[%s14180_s1 + $0x1a0] sm:$0xff]  ;;  %v7172_v32 = vcombine.low %v68_v18, %v76_v19  ;;  %v38_v36 = vld [vmem:[%s14180_s1 + $0x30] sm:$0xff]  ;;  %v7177_v59 = vcombine.high %v70_v51, %v78_v52 }
  0x13   :  { %1249 = vmatprep.subr.bf16.mxu0 %v7137_v37  ;;  %1318 = vmatprep.subr.bf16.mxu1 %v7139_v38  ;;  %v92_v28 = vld [vmem:[%s14180_s1 + $0x1e0] sm:$0xff]  ;;  %v7175_v29 = vcombine.high %v69_v23, %v77_v24  ;;  %v85_v30 = vld [vmem:[%s14180_s1 + $0x1a8] sm:$0xff]  ;;  %v7174_v34 = vcombine.low %v69_v23, %v77_v24  ;;  %v46_v37 = vld [vmem:[%s14180_s1 + $0x70] sm:$0xff]  ;;  %v7176_v2 = vcombine.low %v70_v51, %v78_v52 }
  0x14   :  { %v93_v31 = vld [vmem:[%s14180_s1 + $0x1e8] sm:$0xff]  ;;  %v7189_v33 = vcombine.high %v84_v27, %v92_v28  ;;  %v39_v38 = vld [vmem:[%s14180_s1 + $0x38] sm:$0xff]  ;;  %v7188_v41 = vcombine.low %v84_v27, %v92_v28  ;;  %v7145_v43 = vcombine.high %v38_v36, %v46_v37  ;;  %v7144_v47 = vcombine.low %v38_v36, %v46_v37  ;;  %v120_v15 = vld [vmem:[%s14182_s2 + $0xc0] sm:$0xff] }
  0x15   :  { %7196 = vmatmul.mubr.msk.bf16.vlgmr.msra.gmra.mrb[0].mxu0 %vm1094_vm0, %v8606_v39  ;;  %7200 = vmatmul.mubr.msk.bf16.vlgmr.msra.gmra.mrb[0].mxu1 %vm1094_vm0, %v8606_v39  ;;  %v7191_v35 = vcombine.high %v85_v30, %v93_v31  ;;  %v7147_v44 = vcombine.high %v39_v38, %v47_v40  ;;  %v71_v57 = vld [vmem:[%s14180_s1 + $0x138] sm:$0xff]  ;;  %v113_v16 = vld [vmem:[%s14182_s2 + $0x88] sm:$0xff]  ;;  %v136_v23 = vld [vmem:[%s14182_s2 + $0x140] sm:$0xff] }
  0x16   :  { %1250 = vmatpush1.bf16.msra.mxu0 %v7136_v42  ;;  %1149 = vmatprep.mubr.bf16.mxu0 %v8505_v3  ;;  %v7190_v42 = vcombine.low %v85_v30, %v93_v31  ;;  %v95_v1 = vld [vmem:[%s14180_s1 + $0x1f8] sm:$0xff]  ;;  %v121_v18 = vld [vmem:[%s14182_s2 + $0xc8] sm:$0xff]  ;;  %v144_v30 = vld [vmem:[%s14182_s2 + $0x180] sm:$0xff] }
  0x17   :  { %1220 = vmatprep.mubr.bf16.mxu1 %v8505_v3  ;;  %1251 = vmatprep.subr.bf16.mxu0 %v7153_v45  ;;  %v54_v45 = vld [vmem:[%s14180_s1 + $0xb0] sm:$0xff]  ;;  %v129_v24 = vld [vmem:[%s14182_s2 + $0x108] sm:$0xff]  ;;  %v152_v31 = vld [vmem:[%s14182_s2 + $0x1c0] sm:$0xff] }
  0x18   :  { %1319 = vmatpush1.bf16.msra.mxu1 %v7138_v48  ;;  %v55_v48 = vld [vmem:[%s14180_s1 + $0xb8] sm:$0xff]  ;;  %v7160_v56 = vcombine.low %v54_v45, %v62_v46  ;;  %v185_v52 = vld [vmem:[%s14182_s2 + $0x2c8] sm:$0xff] }
  0x19   :  { %1320 = vmatprep.subr.bf16.mxu1 %v7155_v49  ;;  %v63_v49 = vld [vmem:[%s14180_s1 + $0xf8] sm:$0xff] }
  0x1a   :  { %1252 = vmatpush1.bf16.msra.mxu0 %v7152_v50  ;;  %v7161_v50 = vcombine.high %v54_v45, %v62_v46  ;;  %v7162_v60 = vcombine.low %v55_v48, %v63_v49 }
  0x1b   :  { %1253 = vmatprep.subr.bf16.mxu0 %v7169_v53  ;;  %v7146_v53 = vcombine.low %v39_v38, %v47_v40  ;;  %v160_v38 = vld [vmem:[%s14182_s2 + $0x200] sm:$0xff] }
  0x1c   :  { %1321 = vmatpush1.bf16.msra.mxu1 %v7154_v54  ;;  %v7163_v54 = vcombine.high %v55_v48, %v63_v49  ;;  %v168_v40 = vld [vmem:[%s14182_s2 + $0x240] sm:$0xff]  ;;  %v177_v49 = vld [vmem:[%s14182_s2 + $0x288] sm:$0xff] }
  0x1d   :  { %7197 = vmatmul.mubr.msk.bf16.gmra.mrb[4].mxu0 %vm1094_vm0, %v8641_v55  ;;  %1322 = vmatprep.subr.bf16.mxu1 %v7171_v58  ;;  %v79_v58 = vld [vmem:[%s14180_s1 + $0x178] sm:$0xff]  ;;  %v184_v48 = vld [vmem:[%s14182_s2 + $0x2c0] sm:$0xff] }
  0x1e   :  { %7201 = vmatmul.mubr.msk.bf16.gmra.mrb[4].mxu1 %vm1094_vm0, %v8641_v55  ;;  %1159 = vmatprep.mubr.bf16.mxu0 %v8505_v3  ;;  %v7178_v5 = vcombine.low %v71_v57, %v79_v58 }
  0x1f   :  { %1230 = vmatprep.mubr.bf16.mxu1 %v8505_v3  ;;  %1254 = vmatpush1.bf16.msra.mxu0 %v7168_v61  ;;  %v86_v61 = vld [vmem:[%s14180_s1 + $0x1b0] sm:$0xff] }
  0x20   :  { %1255 = vmatprep.subr.bf16.mxu0 %v7185_v62  ;;  %1323 = vmatpush1.bf16.msra.mxu1 %v7170_v63  ;;  %v94_v62 = vld [vmem:[%s14180_s1 + $0x1f0] sm:$0xff]  ;;  %v7179_v63 = vcombine.high %v71_v57, %v79_v58  ;;  %v200_v57 = vld [vmem:[%s14182_s2 + $0x340] sm:$0xff]  ;;  %v193_v58 = vld [vmem:[%s14182_s2 + $0x308] sm:$0xff] }
  0x21   :  { %1324 = vmatprep.subr.bf16.mxu1 %v7187_v0  ;;  %v87_v0 = vld [vmem:[%s14180_s1 + $0x1b8] sm:$0xff]  ;;  %v7193_v4 = vcombine.high %v86_v61, %v94_v62 }
  0x23   :  { %1256 = vmatpush1.bf16.msra.mxu0 %v7184_v6  ;;  %v7195_v6 = vcombine.high %v87_v0, %v95_v1 }
  0x24   :  { %1325 = vmatpush1.bf16.msra.mxu1 %v7186_v7  ;;  %1387 = vmatprep.subr.bf16.mxu0 %v7141_v8  ;;  %v7192_v7 = vcombine.low %v86_v61, %v94_v62  ;;  %v7194_v8 = vcombine.low %v87_v0, %v95_v1  ;;  %v208_v0 = vld [vmem:[%s14182_s2 + $0x380] sm:$0xff] }
  0x25   :  { %7198 = vmatmul.mubr.msk.bf16.gmra.mrb[8].mxu0 %vm1094_vm0, %v8676_v9  ;;  %1458 = vmatprep.subr.bf16.mxu1 %v7143_v10  ;;  %v216_v1 = vld [vmem:[%s14182_s2 + $0x3c0] sm:$0xff] }
  0x26   :  { %7202 = vmatmul.mubr.msk.bf16.gmra.mrb[8].mxu1 %vm1094_vm0, %v8676_v9  ;;  %1169 = vmatprep.mubr.bf16.mxu0 %v8505_v3 }
  0x27   :  { %1240 = vmatprep.mubr.bf16.mxu1 %v8505_v3 }
  0x2d   :  { %7199 = vmatmul.mubr.msk.bf16.gmra.mrb[12].mxu0 %vm1094_vm0, %v8687_v11 }
  0x2e   :  { %7203 = vmatmul.mubr.msk.bf16.gmra.mrb[12].mxu1 %vm1094_vm0, %v8687_v11  ;;  %1281 = vmatprep.mubr.bf16.mxu0 %v8505_v3 }
  0x2f   :  { %1350 = vmatprep.mubr.bf16.mxu1 %v8505_v3 }
  0x35   :  { %7204 = vmatmul.mubr.msk.bf16.vlgmr.msra.gmra.mrb[16].mxu0 %vm1094_vm0, %v8606_v39 }
  0x36   :  { %7208 = vmatmul.mubr.msk.bf16.vlgmr.msra.gmra.mrb[16].mxu1 %vm1094_vm0, %v8606_v39  ;;  %1388 = vmatpush1.bf16.msra.mxu0 %v7140_v14  ;;  %v112_v14 = vld [vmem:[%s14182_s2 + $0x80] sm:$0xff] }
  0x37   :  { %1289 = vmatprep.mubr.bf16.mxu0 %v8505_v3  ;;  %1358 = vmatprep.mubr.bf16.mxu1 %v8505_v3  ;;  %v8887_v19 = vcombine.low %v112_v14, %v120_v15 }
  0x38   :  { %1389 = vmatprep.subr.bf16.mxu0 %v7157_v17  ;;  %1459 = vmatpush1.bf16.msra.mxu1 %v7142_v20  ;;  %v8882_v17 = vcombine.high %v112_v14, %v120_v15  ;;  %v8889_v20 = vcombine.low %v113_v16, %v121_v18  ;;  %v233_v14 = vld [vmem:[%s14182_s2 + $0x448] sm:$0xff] }
  0x39   :  { %1460 = vmatprep.subr.bf16.mxu1 %v7159_v21  ;;  %v8891_v21 = vcombine.high %v113_v16, %v121_v18 }
  0x3a   :  { %1390 = vmatpush1.bf16.msra.mxu0 %v7156_v22  ;;  %v128_v22 = vld [vmem:[%s14182_s2 + $0x100] sm:$0xff] }
  0x3b   :  { %1391 = vmatprep.subr.bf16.mxu0 %v7173_v25  ;;  %v8906_v25 = vcombine.high %v128_v22, %v136_v23  ;;  %v8911_v27 = vcombine.low %v128_v22, %v136_v23  ;;  %v240_v22 = vld [vmem:[%s14182_s2 + $0x480] sm:$0xff] }
  0x3c   :  { %1461 = vmatpush1.bf16.msra.mxu1 %v7158_v26  ;;  %v137_v26 = vld [vmem:[%s14182_s2 + $0x148] sm:$0xff]  ;;  %v248_v23 = vld [vmem:[%s14182_s2 + $0x4c0] sm:$0xff] }
  0x3d   :  { %7205 = vmatmul.mubr.msk.bf16.gmra.mrb[20].mxu0 %vm1094_vm0, %v8641_v55  ;;  %1462 = vmatprep.subr.bf16.mxu1 %v7175_v29  ;;  %v8913_v28 = vcombine.low %v129_v24, %v137_v26  ;;  %v8915_v29 = vcombine.high %v129_v24, %v137_v26  ;;  %v241_v24 = vld [vmem:[%s14182_s2 + $0x488] sm:$0xff]  ;;  %v9074_v26 = vcombine.high %v240_v22, %v248_v23 }
  0x3e   :  { %7209 = vmatmul.mubr.msk.bf16.gmra.mrb[20].mxu1 %vm1094_vm0, %v8641_v55  ;;  %1299 = vmatprep.mubr.bf16.mxu0 %v8505_v3 }
  0x3f   :  { %1368 = vmatprep.mubr.bf16.mxu1 %v8505_v3  ;;  %1392 = vmatpush1.bf16.msra.mxu0 %v7172_v32  ;;  %v145_v32 = vld [vmem:[%s14182_s2 + $0x188] sm:$0xff]  ;;  %15174 = vst [vmem:[#allocation22_spill] sm:$0xff] %v9074_v26 }
  0x40   :  { %1393 = vmatprep.subr.bf16.mxu0 %v7189_v33  ;;  %1463 = vmatpush1.bf16.msra.mxu1 %v7174_v34  ;;  %v8930_v33 = vcombine.high %v144_v30, %v152_v31  ;;  %v153_v34 = vld [vmem:[%s14182_s2 + $0x1c8] sm:$0xff] }
  0x41   :  { %1464 = vmatprep.subr.bf16.mxu1 %v7191_v35  ;;  %v8935_v35 = vcombine.low %v144_v30, %v152_v31  ;;  %v8937_v36 = vcombine.low %v145_v32, %v153_v34  ;;  %v8939_v37 = vcombine.high %v145_v32, %v153_v34  ;;  %v249_v30 = vld [vmem:[%s14182_s2 + $0x4c8] sm:$0xff]  ;;  %v9079_v31 = vcombine.low %v240_v22, %v248_v23 }
  0x42   :  { %v9081_v32 = vcombine.low %v241_v24, %v249_v30  ;;  %v9083_v34 = vcombine.high %v241_v24, %v249_v30  ;;  %v297_v22 = vld [vmem:[%s14182_s2 + $0x648] sm:$0xff] }
  0x43   :  { %1394 = vmatpush1.bf16.msra.mxu0 %v7188_v41  ;;  %v161_v41 = vld [vmem:[%s14182_s2 + $0x208] sm:$0xff]  ;;  %15175 = vst [vmem:[#allocation23_spill] sm:$0xff] %v9079_v31 }
  0x44   :  { %1465 = vmatpush1.bf16.msra.mxu1 %v7190_v42  ;;  %1529 = vmatprep.subr.bf16.mxu0 %v7145_v43  ;;  %v8954_v42 = vcombine.high %v160_v38, %v168_v40  ;;  %v169_v43 = vld [vmem:[%s14182_s2 + $0x248] sm:$0xff]  ;;  %15176 = vst [vmem:[#allocation24_spill] sm:$0xff] %v9081_v32  ;;  %15177 = vst [vmem:[#allocation25_spill] sm:$0xff] %v9083_v34 }
  0x45   :  { %7206 = vmatmul.mubr.msk.bf16.gmra.mrb[24].mxu0 %vm1094_vm0, %v8676_v9  ;;  %1600 = vmatprep.subr.bf16.mxu1 %v7147_v44  ;;  %v8959_v44 = vcombine.low %v160_v38, %v168_v40  ;;  %v8961_v45 = vcombine.low %v161_v41, %v169_v43  ;;  %v8964_v46 = vcombine.high %v161_v41, %v169_v43  ;;  %v256_v38 = vld [vmem:[%s14182_s2 + $0x500] sm:$0xff]  ;;  %v257_v41 = vld [vmem:[%s14182_s2 + $0x508] sm:$0xff] }
  0x46   :  { %7210 = vmatmul.mubr.msk.bf16.gmra.mrb[24].mxu1 %vm1094_vm0, %v8676_v9  ;;  %1309 = vmatprep.mubr.bf16.mxu0 %v8505_v3  ;;  %v264_v40 = vld [vmem:[%s14182_s2 + $0x540] sm:$0xff] }
  0x47   :  { %1378 = vmatprep.mubr.bf16.mxu1 %v8505_v3  ;;  %15155 = vst [vmem:[#allocation3_spill] sm:$0xff] %v8959_v44  ;;  %15156 = vst [vmem:[#allocation4_spill] sm:$0xff] %v8961_v45  ;;  %v9098_v43 = vcombine.high %v256_v38, %v264_v40 }
  0x48   :  { %15157 = vst [vmem:[#allocation5_spill] sm:$0xff] %v8964_v46 }
  0x49   :  { %15178 = vst [vmem:[#allocation26_spill] sm:$0xff] %v9098_v43 }
  0x4d   :  { %7207 = vmatmul.mubr.msk.bf16.gmra.mrb[28].mxu0 %vm1094_vm0, %v8687_v11 }
  0x4e   :  { %7211 = vmatmul.mubr.msk.bf16.gmra.mrb[28].mxu1 %vm1094_vm0, %v8687_v11  ;;  %1419 = vmatprep.mubr.bf16.mxu0 %v8505_v3 }
  0x4f   :  { %1490 = vmatprep.mubr.bf16.mxu1 %v8505_v3 }
  0x55   :  { %7212 = vmatmul.mubr.msk.bf16.vlgmr.msra.gmra.mrb[32].mxu0 %vm1094_vm0, %v8606_v39 }
  0x56   :  { %7216 = vmatmul.mubr.msk.bf16.vlgmr.msra.gmra.mrb[32].mxu1 %vm1094_vm0, %v8606_v39  ;;  %1530 = vmatpush1.bf16.msra.mxu0 %v7144_v47  ;;  %v176_v47 = vld [vmem:[%s14182_s2 + $0x280] sm:$0xff] }
  0x57   :  { %1429 = vmatprep.mubr.bf16.mxu0 %v8505_v3  ;;  %1500 = vmatprep.mubr.bf16.mxu1 %v8505_v3  ;;  %v8979_v51 = vcombine.high %v176_v47, %v184_v48 }
  0x58   :  { %1531 = vmatprep.subr.bf16.mxu0 %v7161_v50  ;;  %1601 = vmatpush1.bf16.msra.mxu1 %v7146_v53  ;;  %v8977_v50 = vcombine.low %v176_v47, %v184_v48  ;;  %v8985_v53 = vcombine.low %v177_v49, %v185_v52  ;;  %v265_v47 = vld [vmem:[%s14182_s2 + $0x548] sm:$0xff]  ;;  %v9103_v48 = vcombine.low %v256_v38, %v264_v40  ;;  %v676_v38 = vlaneseq  ;;  %v304_v40 = vld [vmem:[%s14182_s2 + $0x680] sm:$0xff] }
  0x59   :  { %1602 = vmatprep.subr.bf16.mxu1 %v7163_v54  ;;  %15159 = vst [vmem:[#allocation7_spill] sm:$0xff] %v8979_v51  ;;  %v8987_v54 = vcombine.high %v177_v49, %v185_v52  ;;  %v9105_v49 = vcombine.low %v257_v41, %v265_v47  ;;  %v9107_v52 = vcombine.high %v257_v41, %v265_v47  ;;  %v312_v41 = vld [vmem:[%s14182_s2 + $0x6c0] sm:$0xff]  ;;  %v305_v47 = vld [vmem:[%s14182_s2 + $0x688] sm:$0xff] }
  0x5a   :  { %1532 = vmatpush1.bf16.msra.mxu0 %v7160_v56  ;;  %15158 = vst [vmem:[#allocation6_spill] sm:$0xff] %v8977_v50  ;;  %15160 = vst [vmem:[#allocation8_spill] sm:$0xff] %v8985_v53  ;;  %v192_v56 = vld [vmem:[%s14182_s2 + $0x300] sm:$0xff] }
  0x5b   :  { %1533 = vmatprep.subr.bf16.mxu0 %v7177_v59  ;;  %15161 = vst [vmem:[#allocation9_spill] sm:$0xff] %v8987_v54  ;;  %v9001_v59 = vcombine.high %v192_v56, %v200_v57  ;;  %v9007_v61 = vcombine.low %v192_v56, %v200_v57  ;;  %15179 = vst [vmem:[#allocation27_spill] sm:$0xff] %v9103_v48  ;;  %v272_v56 = vld [vmem:[%s14182_s2 + $0x580] sm:$0xff] }
  0x5c   :  { %1603 = vmatpush1.bf16.msra.mxu1 %v7162_v60  ;;  %v201_v60 = vld [vmem:[%s14182_s2 + $0x348] sm:$0xff]  ;;  %15180 = vst [vmem:[#allocation28_spill] sm:$0xff] %v9105_v49  ;;  %15181 = vst [vmem:[#allocation29_spill] sm:$0xff] %v9107_v52  ;;  %v280_v57 = vld [vmem:[%s14182_s2 + $0x5c0] sm:$0xff] }
  0x5d   :  { %7213 = vmatmul.mubr.msk.bf16.gmra.mrb[36].mxu0 %vm1094_vm0, %v8641_v55  ;;  %1604 = vmatprep.subr.bf16.mxu1 %v7179_v63  ;;  %15162 = vst [vmem:[#allocation10_spill] sm:$0xff] %v9001_v59  ;;  %15163 = vst [vmem:[#allocation11_spill] sm:$0xff] %v9007_v61  ;;  %v9009_v62 = vcombine.low %v193_v58, %v201_v60  ;;  %v9011_v63 = vcombine.high %v193_v58, %v201_v60  ;;  %v273_v58 = vld [vmem:[%s14182_s2 + $0x588] sm:$0xff] }
  0x5e   :  { %7217 = vmatmul.mubr.msk.bf16.gmra.mrb[36].mxu1 %vm1094_vm0, %v8641_v55  ;;  %1439 = vmatprep.mubr.bf16.mxu0 %v8505_v3  ;;  %v9122_v60 = vcombine.high %v272_v56, %v280_v57 }
  0x5f   :  { %1510 = vmatprep.mubr.bf16.mxu1 %v8505_v3  ;;  %1534 = vmatpush1.bf16.msra.mxu0 %v7176_v2  ;;  %15164 = vst [vmem:[#allocation12_spill] sm:$0xff] %v9009_v62  ;;  %15165 = vst [vmem:[#allocation13_spill] sm:$0xff] %v9011_v63  ;;  %v209_v2 = vld [vmem:[%s14182_s2 + $0x388] sm:$0xff] }
  0x60   :  { %1535 = vmatprep.subr.bf16.mxu0 %v7193_v4  ;;  %1605 = vmatpush1.bf16.msra.mxu1 %v7178_v5  ;;  %v9025_v4 = vcombine.low %v208_v0, %v216_v1  ;;  %v9027_v5 = vcombine.high %v208_v0, %v216_v1  ;;  %15182 = vst [vmem:[#allocation30_spill] sm:$0xff] %v9122_v60  ;;  %v281_v0 = vld [vmem:[%s14182_s2 + $0x5c8] sm:$0xff] }
  0x61   :  { %1606 = vmatprep.subr.bf16.mxu1 %v7195_v6  ;;  %v217_v6 = vld [vmem:[%s14182_s2 + $0x3c8] sm:$0xff]  ;;  %v9127_v1 = vcombine.low %v272_v56, %v280_v57  ;;  %v9170_v56 = vcombine.high %v304_v40, %v312_v41 }
  0x62   :  { %15166 = vst [vmem:[#allocation14_spill] sm:$0xff] %v9025_v4  ;;  %15167 = vst [vmem:[#allocation15_spill] sm:$0xff] %v9027_v5  ;;  %v313_v57 = vld [vmem:[%s14182_s2 + $0x6c8] sm:$0xff] }
  0x63   :  { %1536 = vmatpush1.bf16.msra.mxu0 %v7192_v7  ;;  %v9032_v7 = vcombine.high %v209_v2, %v217_v6  ;;  %15183 = vst [vmem:[#allocation31_spill] sm:$0xff] %v9127_v1  ;;  %15190 = vst [vmem:[#allocation38_spill] sm:$0xff] %v9170_v56 }
  0x64   :  { %1607 = vmatpush1.bf16.msra.mxu1 %v7194_v8  ;;  %v9036_v8 = vcombine.low %v209_v2, %v217_v6  ;;  %v9129_v2 = vcombine.low %v273_v58, %v281_v0  ;;  %v9131_v6 = vcombine.high %v273_v58, %v281_v0  ;;  %v9175_v58 = vcombine.low %v304_v40, %v312_v41  ;;  %v321_v40 = vld [vmem:[%s14182_s2 + $0x708] sm:$0xff] }
  0x65   :  { %7214 = vmatmul.mubr.msk.bf16.gmra.mrb[40].mxu0 %vm1094_vm0, %v8676_v9  ;;  %15168 = vst [vmem:[#allocation16_spill] sm:$0xff] %v9032_v7  ;;  %v9177_v0 = vcombine.low %v305_v47, %v313_v57  ;;  %v329_v41 = vld [vmem:[%s14182_s2 + $0x748] sm:$0xff] }
  0x66   :  { %7218 = vmatmul.mubr.msk.bf16.gmra.mrb[40].mxu1 %vm1094_vm0, %v8676_v9  ;;  %1449 = vmatprep.mubr.bf16.mxu0 %v8505_v3  ;;  %15169 = vst [vmem:[#allocation17_spill] sm:$0xff] %v9036_v8  ;;  %15184 = vst [vmem:[#allocation32_spill] sm:$0xff] %v9129_v2 }
  0x67   :  { %1520 = vmatprep.mubr.bf16.mxu1 %v8505_v3  ;;  %15185 = vst [vmem:[#allocation33_spill] sm:$0xff] %v9131_v6  ;;  %15191 = vst [vmem:[#allocation39_spill] sm:$0xff] %v9175_v58 }
  0x68   :  { %15192 = vst [vmem:[#allocation40_spill] sm:$0xff] %v9177_v0 }
  0x6d   :  { %7215 = vmatmul.mubr.msk.bf16.gmra.mrb[44].mxu0 %vm1094_vm0, %v8687_v11 }
  0x6e   :  { %7219 = vmatmul.mubr.msk.bf16.gmra.mrb[44].mxu1 %vm1094_vm0, %v8687_v11  ;;  %1561 = vmatprep.mubr.bf16.mxu0 %v8505_v3 }
  0x6f   :  { %1632 = vmatprep.mubr.bf16.mxu1 %v8505_v3 }
  0x75   :  { %7220 = vmatmul.mubr.msk.bf16.vlgmr.msra.gmra.mrb[48].mxu0 %vm1094_vm0, %v8606_v39 }
  0x76   :  { %7224 = vmatmul.mubr.msk.bf16.vlgmr.msra.gmra.mrb[48].mxu1 %vm1094_vm0, %v8606_v39  ;;  %1571 = vmatprep.mubr.bf16.mxu0 %v8505_v3  ;;  %v96_v39 = vld [vmem:[%s14182_s2] sm:$0xff] }
  0x77   :  { %1642 = vmatprep.mubr.bf16.mxu1 %v8505_v3 }
  0x7d   :  { %7221 = vmatmul.mubr.msk.bf16.gmra.mrb[52].mxu0 %vm1094_vm0, %v8641_v55 }
  0x7e   :  { %7225 = vmatmul.mubr.msk.bf16.gmra.mrb[52].mxu1 %vm1094_vm0, %v8641_v55  ;;  %1581 = vmatprep.mubr.bf16.mxu0 %v8505_v3  ;;  %v104_v55 = vld [vmem:[%s14182_s2 + $0x40] sm:$0xff] }
  0x7f   :  { %1652 = vmatprep.mubr.bf16.mxu1 %v8505_v3  ;;  %v8858_v10 = vcombine.high %v96_v39, %v104_v55  ;;  %v8863_v12 = vcombine.low %v96_v39, %v104_v55  ;;  %v224_v39 = vld [vmem:[%s14182_s2 + $0x400] sm:$0xff] }
  0x80   :  { %v232_v55 = vld [vmem:[%s14182_s2 + $0x440] sm:$0xff] }
  0x81   :  { %4299 = vmatprep.subr.bf16.mxu0 %v8858_v10  ;;  %v9055_v15 = vcombine.low %v224_v39, %v232_v55 }
  0x82   :  { %4300 = vmatpush1.bf16.msra.mxu0 %v8863_v12 }
  0x83   :  { %4301 = vmatprep.subr.bf16.mxu0 %v8882_v17  ;;  %15171 = vst [vmem:[#allocation19_spill] sm:$0xff] %v9055_v15 }
  0x85   :  { %7222 = vmatmul.mubr.msk.bf16.gmra.mrb[56].mxu0 %vm1094_vm0, %v8676_v9 }
  0x86   :  { %7226 = vmatmul.mubr.msk.bf16.gmra.mrb[56].mxu1 %vm1094_vm0, %v8676_v9  ;;  %1591 = vmatprep.mubr.bf16.mxu0 %v8505_v3  ;;  %v97_v9 = vld [vmem:[%s14182_s2 + $0x8] sm:$0xff] }
  0x87   :  { %1662 = vmatprep.mubr.bf16.mxu1 %v8505_v3  ;;  %v105_v3 = vld [vmem:[%s14182_s2 + $0x48] sm:$0xff]  ;;  %4302 = vmatpush1.bf16.msra.mxu0 %v8887_v19 }
  0x88   :  { %v8867_v13 = vcombine.high %v97_v9, %v105_v3  ;;  %4303 = vmatprep.subr.bf16.mxu0 %v8906_v25 }
  0x8a   :  { %4381 = vmatprep.subr.bf16.mxu1 %v8867_v13 }
  0x8b   :  { %4304 = vmatpush1.bf16.msra.mxu0 %v8911_v27 }
  0x8c   :  { %4305 = vmatprep.subr.bf16.mxu0 %v8930_v33 }
  0x8d   :  { %7223 = vmatmul.mubr.msk.bf16.gmra.mrb[60].mxu0 %vm1094_vm0, %v8687_v11 }
  0x8e   :  { %7227 = vmatmul.mubr.msk.bf16.gmra.mrb[60].mxu1 %vm1094_vm0, %v8687_v11  ;;  %v8865_v11 = vcombine.low %v97_v9, %v105_v3  ;;  %v225_v9 = vld [vmem:[%s14182_s2 + $0x408] sm:$0xff]  ;;  %v9050_v3 = vcombine.high %v224_v39, %v232_v55  ;;  %v288_v39 = vld [vmem:[%s14182_s2 + $0x600] sm:$0xff] }
  0x8f   :  { %4306 = vmatpush1.bf16.msra.mxu0 %v8935_v35  ;;  %v9057_v16 = vcombine.low %v225_v9, %v233_v14  ;;  %v9059_v18 = vcombine.high %v225_v9, %v233_v14  ;;  %v296_v55 = vld [vmem:[%s14182_s2 + $0x640] sm:$0xff]  ;;  %v289_v9 = vld [vmem:[%s14182_s2 + $0x608] sm:$0xff] }
  0x90   :  { %4382 = vmatpush1.bf16.msra.mxu1 %v8865_v11  ;;  %4307 = vmatprep.subr.bf16.mxu0 %v8954_v42  ;;  %15170 = vst [vmem:[#allocation18_spill] sm:$0xff] %v9050_v3  ;;  %v9146_v14 = vcombine.high %v288_v39, %v296_v55  ;;  %v9151_v23 = vcombine.low %v288_v39, %v296_v55  ;;  %v9182_v55 = vshrl.u32 %v676_v38, 7 }
  0x91   :  { %4383 = vmatprep.subr.bf16.mxu1 %v8891_v21  ;;  %15172 = vst [vmem:[#allocation20_spill] sm:$0xff] %v9057_v16  ;;  %15173 = vst [vmem:[#allocation21_spill] sm:$0xff] %v9059_v18  ;;  %v9153_v24 = vcombine.low %v289_v9, %v297_v22  ;;  %v9155_v30 = vcombine.high %v289_v9, %v297_v22  ;;  %v9179_v39 = vcombine.high %v305_v47, %v313_v57  ;;  %v320_v9 = vld [vmem:[%s14182_s2 + $0x700] sm:$0xff] }
  0x92   :  { %15186 = vst [vmem:[#allocation34_spill] sm:$0xff] %v9146_v14  ;;  %15187 = vst [vmem:[#allocation35_spill] sm:$0xff] %v9151_v23  ;;  %v328_v22 = vld [vmem:[%s14182_s2 + $0x740] sm:$0xff]  ;;  %v9203_v57 = vcombine.low %v321_v40, %v329_v41 }
  0x93   :  { %4308 = vmatpush1.bf16.msra.mxu0 %v8959_v44  ;;  %15188 = vst [vmem:[#allocation36_spill] sm:$0xff] %v9153_v24  ;;  %15189 = vst [vmem:[#allocation37_spill] sm:$0xff] %v9155_v30  ;;  %v9196_v38 = vcombine.high %v320_v9, %v328_v22  ;;  %v9201_v47 = vcombine.low %v320_v9, %v328_v22  ;;  %v336_v9 = vld [vmem:[%s14182_s2 + $0x780] sm:$0xff] }
  0x94   :  { %4384 = vmatpush1.bf16.msra.mxu1 %v8889_v20  ;;  %4309 = vmatprep.subr.bf16.mxu0 %v8979_v51  ;;  %15193 = vst [vmem:[#allocation41_spill] sm:$0xff] %v9179_v39  ;;  %15196 = vst [vmem:[#allocation44_spill] sm:$0xff] %v9203_v57  ;;  %v344_v22 = vld [vmem:[%s14182_s2 + $0x7c0] sm:$0xff] }
  0x95   :  { %4385 = vmatprep.subr.bf16.mxu1 %v8915_v29  ;;  %15194 = vst [vmem:[#allocation42_spill] sm:$0xff] %v9196_v38  ;;  %15195 = vst [vmem:[#allocation43_spill] sm:$0xff] %v9201_v47 }
  0x97   :  { %4310 = vmatpush1.bf16.msra.mxu0 %v8977_v50 }
  0x98   :  { %4386 = vmatpush1.bf16.msra.mxu1 %v8913_v28  ;;  %4311 = vmatprep.subr.bf16.mxu0 %v9001_v59 }
  0x99   :  { %4387 = vmatprep.subr.bf16.mxu1 %v8939_v37 }
  0x9b   :  { %4312 = vmatpush1.bf16.msra.mxu0 %v9007_v61 }
  0x9c   :  { %4388 = vmatpush1.bf16.msra.mxu1 %v8937_v36  ;;  %4313 = vmatprep.subr.bf16.mxu0 %v9027_v5 }
  0x9d   :  { %4389 = vmatprep.subr.bf16.mxu1 %v8964_v46 }
  0x9f   :  { %4314 = vmatpush1.bf16.msra.mxu0 %v9025_v4 }
  0xa0   :  { %4390 = vmatpush1.bf16.msra.mxu1 %v8961_v45  ;;  %4315 = vmatprep.subr.bf16.mxu0 %v9050_v3 }
  0xa1   :  { %4391 = vmatprep.subr.bf16.mxu1 %v8987_v54 }
  0xa3   :  { %4316 = vmatpush1.bf16.msra.mxu0 %v9055_v15 }
  0xa4   :  { %4392 = vmatpush1.bf16.msra.mxu1 %v8985_v53  ;;  %4317 = vmatprep.subr.bf16.mxu0 %v9074_v26 }
  0xa5   :  { %4393 = vmatprep.subr.bf16.mxu1 %v9011_v63 }
  0xa7   :  { %4318 = vmatpush1.bf16.msra.mxu0 %v9079_v31 }
  0xa8   :  { %4394 = vmatpush1.bf16.msra.mxu1 %v9009_v62  ;;  %4319 = vmatprep.subr.bf16.mxu0 %v9098_v43 }
  0xa9   :  { %4395 = vmatprep.subr.bf16.mxu1 %v9032_v7 }
  0xab   :  { %4320 = vmatpush1.bf16.msra.mxu0 %v9103_v48 }
  0xac   :  { %4396 = vmatpush1.bf16.msra.mxu1 %v9036_v8  ;;  %4321 = vmatprep.subr.bf16.mxu0 %v9122_v60 }
  0xad   :  { %4397 = vmatprep.subr.bf16.mxu1 %v9059_v18 }
  0xaf   :  { %4322 = vmatpush1.bf16.msra.mxu0 %v9127_v1  ;;  %v361_v1 = vld [vmem:[%s14182_s2 + $0x848] sm:$0xff] }
  0xb0   :  { %4398 = vmatpush1.bf16.msra.mxu1 %v9057_v16  ;;  %4323 = vmatprep.subr.bf16.mxu0 %v9146_v14  ;;  %v14253_v16 = vsub.s32 6, %v9182_v55 }
  0xb1   :  { %4399 = vmatprep.subr.bf16.mxu1 %v9083_v34 }
  0xb3   :  { %4324 = vmatpush1.bf16.msra.mxu0 %v9151_v23  ;;  %v15202_v23 = vsub.s32 2, %v9182_v55 }
  0xb4   :  { %4400 = vmatpush1.bf16.msra.mxu1 %v9081_v32  ;;  %4325 = vmatprep.subr.bf16.mxu0 %v9170_v56  ;;  %v9229_v56 = vcombine.high %v336_v9, %v344_v22 }
  0xb5   :  { %4401 = vmatprep.subr.bf16.mxu1 %v9107_v52 }
  0xb6   :  { %15198 = vst [vmem:[#allocation46_spill] sm:$0xff] %v9229_v56 }
  0xb7   :  { %4326 = vmatpush1.bf16.msra.mxu0 %v9175_v58  ;;  %v9205_v58 = vcombine.high %v321_v40, %v329_v41  ;;  %v337_v40 = vld [vmem:[%s14182_s2 + $0x788] sm:$0xff]  ;;  %v9225_v41 = vld [vmem:[%s14183_s3] sm:$0xff] }
  0xb8   :  { %4402 = vmatpush1.bf16.msra.mxu1 %v9105_v49  ;;  %4327 = vmatprep.subr.bf16.mxu0 %v9196_v38 }
  0xb9   :  { %4403 = vmatprep.subr.bf16.mxu1 %v9131_v6  ;;  %15197 = vst [vmem:[#allocation45_spill] sm:$0xff] %v9205_v58 }
  0xbb   :  { %4328 = vmatpush1.bf16.msra.mxu0 %v9201_v47  ;;  %v9234_v47 = vcombine.low %v336_v9, %v344_v22 }
  0xbc   :  { %4404 = vmatpush1.bf16.msra.mxu1 %v9129_v2  ;;  %4329 = vmatprep.subr.bf16.mxu0 %v9229_v56  ;;  %v15205_v56 = vsub.s32 1, %v9182_v55 }
  0xbd   :  { %4405 = vmatprep.subr.bf16.mxu1 %v9155_v30  ;;  %15199 = vst [vmem:[#allocation47_spill] sm:$0xff] %v9234_v47 }
  0xbe   :  { %v9273_v14 = vrot.slane %v9225_v41, %v15205_v56 }
  0xbf   :  { %4330 = vmatpush1.bf16.msra.mxu0 %v9234_v47  ;;  %v353_v47 = vld [vmem:[%s14182_s2 + $0x808] sm:$0xff] }
  0xc0   :  { %4406 = vmatpush1.bf16.msra.mxu1 %v9153_v24  ;;  %v9301_v32 = vcombine.low %v353_v47, %v361_v1 }
  0xc1   :  { %4407 = vmatprep.subr.bf16.mxu1 %v9179_v39  ;;  %v345_v39 = vld [vmem:[%s14182_s2 + $0x7c8] sm:$0xff] }
  0xc2   :  { %v9238_v38 = vcombine.high %v337_v40, %v345_v39  ;;  %15208 = vst [vmem:[#allocation52_spill] sm:$0xff] %v9301_v32 }
  0xc4   :  { %4408 = vmatpush1.bf16.msra.mxu1 %v9177_v0  ;;  %15201 = vst [vmem:[#allocation49_spill] sm:$0xff] %v9238_v38  ;;  %v9245_v0 = vrot.slane %v9225_v41, %v15202_v23  ;;  %v352_v23 = vld [vmem:[%s14182_s2 + $0x800] sm:$0xff] }
  0xc5   :  { %4409 = vmatprep.subr.bf16.mxu1 %v9205_v58  ;;  %v9236_v58 = vcombine.low %v337_v40, %v345_v39  ;;  %v15204_v39 = vsub.s32 3, %v9182_v55 }
  0xc7   :  { %15200 = vst [vmem:[#allocation48_spill] sm:$0xff] %v9236_v58  ;;  %v9260_v40 = vrot.slane %v9225_v41, %v15204_v39 }
  0xc8   :  { %4410 = vmatpush1.bf16.msra.mxu1 %v9203_v57  ;;  %v15203_v57 = vsub.s32 0, %v9182_v55 }
  0xc9   :  { %4411 = vmatprep.subr.bf16.mxu1 %v9238_v38 }
  0xca   :  { %v9251_v30 = vrot.slane %v9225_v41, %v15203_v57  ;;  %v360_v57 = vld [vmem:[%s14182_s2 + $0x840] sm:$0xff] }
  0xcb   :  { %v9278_v38 = vcombine.high %v352_v23, %v360_v57  ;;  %v9289_v49 = vcombine.low %v352_v23, %v360_v57 }
  0xcc   :  { %4412 = vmatpush1.bf16.msra.mxu1 %v9236_v58 }
  0xcd   :  { %15206 = vst [vmem:[#allocation50_spill] sm:$0xff] %v9278_v38  ;;  %15207 = vst [vmem:[#allocation51_spill] sm:$0xff] %v9289_v49  ;;  %4340 = vmatprep.subr.bf16.mxu0 %v9278_v38 }
  0xe8   :  { %v9240_v24 = vpop.f32.mrb[0].mxu0  ;;  %v9255_v22 = vpop.f32.mrb[0].mxu1 }
  0xe9   :  { %v9253_v9 = vpop.f32.mrb[1].mxu0  ;;  %v9275_v39 = vpop.f32.mrb[1].mxu1 }
  0xea   :  { %v1145_v2 = vpop.f32.mrb[2].mxu0  ;;  %v1216_v60 = vpop.f32.mrb[2].mxu1 }
  0xeb   :  { %v9287_v6 = vadd.f32 %v1145_v2, %v9251_v30  ;;  %v1147_v56 = vpop.f32.mrb[3].mxu0  ;;  %v9295_v58 = vadd.f32 %v1216_v60, %v9245_v0  ;;  %v1218_v52 = vpop.f32.mrb[3].mxu1  ;;  %v9303_v2 = vcombine.high %v353_v47, %v361_v1 }
  0xec   :  { %v9292_v48 = vadd.f32 %v1147_v56, %v9273_v14  ;;  %v9299_v43 = vadd.f32 %v1218_v52, %v9260_v40 }
  0xed   :  { %15209 = vst [vmem:[#allocation53_spill] sm:$0xff] %v9303_v2  ;;  %4422 = vmatprep.subr.bf16.mxu1 %v9303_v2 }
  0xf0   :  { %v1151_v31 = vpop.f32.mrb[4].mxu0 }
  0xf1   :  { %v9307_v23 = vadd.f32 %v1151_v31, %v9251_v30  ;;  %v1153_v57 = vpop.f32.mrb[5].mxu0  ;;  %v1222_v56 = vpop.f32.mrb[4].mxu1 }
  0xf2   :  { %v9310_v60 = vadd.f32 %v1153_v57, %v9273_v14  ;;  %v1155_v34 = vpop.f32.mrb[6].mxu0  ;;  %v9313_v38 = vadd.f32 %v1222_v56, %v9245_v0  ;;  %v1224_v52 = vpop.f32.mrb[5].mxu1 }
  0xf3   :  { %15210 = vst [vmem:[#allocation54_spill] sm:$0xff] %v9307_v23  ;;  %v9316_v26 = vadd.f32 %v1155_v34, %v9251_v30  ;;  %v1157_v1 = vpop.f32.mrb[7].mxu0  ;;  %v9319_v47 = vadd.f32 %v1224_v52, %v9260_v40  ;;  %v1226_v2 = vpop.f32.mrb[6].mxu1 }
  0xf4   :  { %15211 = vst [vmem:[#allocation55_spill] sm:$0xff] %v9310_v60  ;;  %15212 = vst [vmem:[#allocation56_spill] sm:$0xff] %v9313_v38  ;;  %v9322_v31 = vadd.f32 %v1157_v1, %v9273_v14  ;;  %v9325_v23 = vadd.f32 %v1226_v2, %v9245_v0  ;;  %v1228_v57 = vpop.f32.mrb[7].mxu1 }
  0xf5   :  { %15213 = vst [vmem:[#allocation57_spill] sm:$0xff] %v9316_v26  ;;  %15214 = vst [vmem:[#allocation58_spill] sm:$0xff] %v9319_v47  ;;  %v9328_v60 = vadd.f32 %v1228_v57, %v9260_v40 }
  0xf6   :  { %15215 = vst [vmem:[#allocation59_spill] sm:$0xff] %v9322_v31  ;;  %15216 = vst [vmem:[#allocation60_spill] sm:$0xff] %v9325_v23 }
  0xf7   :  { %15217 = vst [vmem:[#allocation61_spill] sm:$0xff] %v9328_v60 }
  0xf8   :  { %v1161_v56 = vpop.f32.mrb[8].mxu0 }
  0xf9   :  { %v9331_v38 = vadd.f32 %v1161_v56, %v9251_v30  ;;  %v1163_v34 = vpop.f32.mrb[9].mxu0  ;;  %v1232_v26 = vpop.f32.mrb[8].mxu1 }
  0xfa   :  { %v9334_v52 = vadd.f32 %v1163_v34, %v9273_v14  ;;  %v1165_v47 = vpop.f32.mrb[10].mxu0  ;;  %v9337_v1 = vadd.f32 %v1232_v26, %v9245_v0  ;;  %v1234_v31 = vpop.f32.mrb[9].mxu1 }
  0xfb   :  { %15218 = vst [vmem:[#allocation62_spill] sm:$0xff] %v9331_v38  ;;  %v9340_v2 = vadd.f32 %v1165_v47, %v9251_v30  ;;  %v1167_v23 = vpop.f32.mrb[11].mxu0  ;;  %v9343_v57 = vadd.f32 %v1234_v31, %v9260_v40  ;;  %v1236_v60 = vpop.f32.mrb[10].mxu1 }
  0xfc   :  { %15219 = vst [vmem:[#allocation63_spill] sm:$0xff] %v9334_v52  ;;  %15220 = vst [vmem:[#allocation64_spill] sm:$0xff] %v9337_v1  ;;  %v9346_v56 = vadd.f32 %v1167_v23, %v9273_v14  ;;  %v9349_v38 = vadd.f32 %v1236_v60, %v9245_v0  ;;  %v1238_v34 = vpop.f32.mrb[11].mxu1 }
  0xfd   :  { %15221 = vst [vmem:[#allocation65_spill] sm:$0xff] %v9340_v2  ;;  %15222 = vst [vmem:[#allocation66_spill] sm:$0xff] %v9343_v57  ;;  %v9352_v52 = vadd.f32 %v1238_v34, %v9260_v40 }
  0xfe   :  { %15223 = vst [vmem:[#allocation67_spill] sm:$0xff] %v9346_v56  ;;  %15224 = vst [vmem:[#allocation68_spill] sm:$0xff] %v9349_v38  ;;  %v14249_v38 = vsub.s32 4, %v9182_v55 }
  0xff   :  { %15225 = vst [vmem:[#allocation69_spill] sm:$0xff] %v9352_v52 }
 0x100   :  { %v1171_v26 = vpop.f32.mrb[12].mxu0 }
 0x101   :  { %v9355_v1 = vadd.f32 %v1171_v26, %v9251_v30  ;;  %v1173_v47 = vpop.f32.mrb[13].mxu0  ;;  %v1242_v2 = vpop.f32.mrb[12].mxu1  ;;  %v14250_v26 = vsub.s32 5, %v9182_v55 }
 0x102   :  { %v9358_v31 = vadd.f32 %v1173_v47, %v9273_v14  ;;  %v1175_v57 = vpop.f32.mrb[14].mxu0  ;;  %v9361_v23 = vadd.f32 %v1242_v2, %v9245_v0  ;;  %v1244_v56 = vpop.f32.mrb[13].mxu1  ;;  %v14254_v47 = vsub.s32 7, %v9182_v55  ;;  %v9373_v2 = vrot.slane %v9225_v41, %v14249_v38 }
 0x103   :  { %15226 = vst [vmem:[#allocation70_spill] sm:$0xff] %v9355_v1  ;;  %v1176_v60 = vpop.f32.mrb[15].mxu0  ;;  %v9365_v34 = vadd.f32 %v1244_v56, %v9260_v40  ;;  %v1246_v52 = vpop.f32.mrb[14].mxu1 }
 0x104   :  { %15227 = vst [vmem:[#allocation71_spill] sm:$0xff] %v9358_v31  ;;  %15228 = vst [vmem:[#allocation72_spill] sm:$0xff] %v9361_v23  ;;  %v1247_v1 = vpop.f32.mrb[15].mxu1  ;;  %v9378_v60 = vrot.slane %v9225_v41, %v14250_v26  ;;  %v9383_v52 = vrot.slane %v9225_v41, %v14253_v16 }
 0x105   :  { %15229 = vst [vmem:[#allocation73_spill] sm:$0xff] %v9365_v34  ;;  %v9388_v34 = vrot.slane %v9225_v41, %v14254_v47  ;;  %v1142_v41 = vadd.f32 %v9240_v24, %v9251_v30  ;;  %v1213_v47 = vadd.f32 %v9255_v22, %v9245_v0 }
 0x108   :  { %v1283_v57 = vpop.f32.mrb[16].mxu0 }
 0x109   :  { %v1284_v1 = vpop.f32.mrb[17].mxu0  ;;  %v1352_v56 = vpop.f32.mrb[16].mxu1 }
 0x10a   :  { %v1285_v38 = vpop.f32.mrb[18].mxu0  ;;  %v1353_v31 = vpop.f32.mrb[17].mxu1 }
 0x10b   :  { %v9391_v57 = vadd.f32 %v1285_v38, %v9373_v2  ;;  %v1287_v23 = vpop.f32.mrb[19].mxu0  ;;  %v1354_v26 = vpop.f32.mrb[18].mxu1  ;;  %v1144_v31 = vadd.f32 %v9253_v9, %v9273_v14 }
 0x10c   :  { %v9394_v15 = vadd.f32 %v1287_v23, %v9378_v60  ;;  %v9397_v16 = vadd.f32 %v1354_v26, %v9383_v52  ;;  %v1356_v1 = vpop.f32.mrb[19].mxu1  ;;  %v1215_v26 = vadd.f32 %v9275_v39, %v9260_v40  ;;  %v7230_v39 = vmul.f32 -1.442695, %v1213_v47 }
 0x10d   :  { %v9400_v56 = vadd.f32 %v1356_v1, %v9388_v34  ;;  %v7228_v1 = vmul.f32 -1.442695, %v1142_v41  ;;  %v7229_v9 = vmul.f32 -1.442695, %v1144_v31 }
 0x10f   :  { %8073 = vpow2.f32 %v7228_v1 }
 0x110   :  { %v1291_v38 = vpop.f32.mrb[20].mxu0  ;;  %8075 = vpow2.f32 %v7229_v9 }
 0x111   :  { %v9409_v23 = vadd.f32 %v1291_v38, %v9373_v2  ;;  %v1293_v18 = vpop.f32.mrb[21].mxu0  ;;  %v1360_v3 = vpop.f32.mrb[20].mxu1  ;;  %8077 = vpow2.f32 %v7230_v39 }
 0x112   :  { %v9414_v8 = vadd.f32 %v1293_v18, %v9378_v60  ;;  %v1295_v24 = vpop.f32.mrb[22].mxu0  ;;  %v9417_v30 = vadd.f32 %v1360_v3, %v9383_v52  ;;  %v1362_v14 = vpop.f32.mrb[21].mxu1  ;;  %v7231_v3 = vmul.f32 -1.442695, %v1215_v26 }
 0x113   :  { %15230 = vst [vmem:[#allocation74_spill] sm:$0xff] %v9409_v23  ;;  %v9420_v0 = vadd.f32 %v1295_v24, %v9373_v2  ;;  %v1297_v22 = vpop.f32.mrb[23].mxu0  ;;  %v9423_v38 = vadd.f32 %v1362_v14, %v9388_v34  ;;  %v1364_v23 = vpop.f32.mrb[22].mxu1 }
 0x114   :  { %15231 = vst [vmem:[#allocation75_spill] sm:$0xff] %v9414_v8  ;;  %15232 = vst [vmem:[#allocation76_spill] sm:$0xff] %v9417_v30  ;;  %v9426_v40 = vadd.f32 %v1297_v22, %v9378_v60  ;;  %v9429_v18 = vadd.f32 %v1364_v23, %v9383_v52  ;;  %v1366_v41 = vpop.f32.mrb[23].mxu1  ;;  %8079 = vpow2.f32 %v7231_v3  ;;  %v15250_v30 = vsub.s32 0, %v9182_v55 }
 0x115   :  { %15233 = vst [vmem:[#allocation77_spill] sm:$0xff] %v9420_v0  ;;  %15234 = vst [vmem:[#allocation78_spill] sm:$0xff] %v9423_v38  ;;  %v9432_v8 = vadd.f32 %v1366_v41, %v9388_v34 }
 0x116   :  { %15235 = vst [vmem:[#allocation79_spill] sm:$0xff] %v9426_v40  ;;  %15236 = vst [vmem:[#allocation80_spill] sm:$0xff] %v9429_v18 }
 0x117   :  { %15237 = vst [vmem:[#allocation81_spill] sm:$0xff] %v9432_v8 }
 0x118   :  { %v1301_v31 = vpop.f32.mrb[24].mxu0 }
 0x119   :  { %v9435_v24 = vadd.f32 %v1301_v31, %v9373_v2  ;;  %v1303_v14 = vpop.f32.mrb[25].mxu0  ;;  %v1370_v22 = vpop.f32.mrb[24].mxu1 }
 0x11a   :  { %v9438_v47 = vadd.f32 %v1303_v14, %v9378_v60  ;;  %v1305_v23 = vpop.f32.mrb[26].mxu0  ;;  %v9441_v40 = vadd.f32 %v1370_v22, %v9383_v52  ;;  %v1372_v26 = vpop.f32.mrb[25].mxu1 }
 0x11b   :  { %15238 = vst [vmem:[#allocation82_spill] sm:$0xff] %v9435_v24  ;;  %v9444_v41 = vadd.f32 %v1305_v23, %v9373_v2  ;;  %v1307_v1 = vpop.f32.mrb[27].mxu0  ;;  %v9447_v9 = vadd.f32 %v1372_v26, %v9388_v34  ;;  %v1374_v39 = vpop.f32.mrb[26].mxu1 }
 0x11c   :  { %15239 = vst [vmem:[#allocation83_spill] sm:$0xff] %v9438_v47  ;;  %15240 = vst [vmem:[#allocation84_spill] sm:$0xff] %v9441_v40  ;;  %v9450_v3 = vadd.f32 %v1307_v1, %v9378_v60  ;;  %v9453_v31 = vadd.f32 %v1374_v39, %v9383_v52  ;;  %v1376_v14 = vpop.f32.mrb[27].mxu1  ;;  %v8074_v22 = vpop.eup %8073  ;;  %v9464_v1 = vld [vmem:[%s14183_s3 + $0x8] sm:$0xff] }
 0x11d   :  { %15241 = vst [vmem:[#allocation85_spill] sm:$0xff] %v9444_v41  ;;  %15242 = vst [vmem:[#allocation86_spill] sm:$0xff] %v9447_v9  ;;  %v9456_v8 = vadd.f32 %v1376_v14, %v9388_v34  ;;  %v8076_v40 = vpop.eup %8075  ;;  %v1683_v41 = vadd.f32 1.0, %v8074_v22  ;;  %v15252_v22 = vsub.s32 2, %v9182_v55 }
 0x11e   :  { %15243 = vst [vmem:[#allocation87_spill] sm:$0xff] %v9450_v3  ;;  %15244 = vst [vmem:[#allocation88_spill] sm:$0xff] %v9453_v31  ;;  %v8078_v9 = vpop.eup %8077  ;;  %v1684_v24 = vadd.f32 1.0, %v8076_v40 }
 0x11f   :  { %15245 = vst [vmem:[#allocation89_spill] sm:$0xff] %v9456_v8  ;;  %v8080_v31 = vpop.eup %8079  ;;  %v1685_v38 = vadd.f32 1.0, %v8078_v9  ;;  %8081 = vrcp.f32 %v1683_v41 }
 0x120   :  { %v1311_v47 = vpop.f32.mrb[28].mxu0  ;;  %8083 = vrcp.f32 %v1684_v24 }
 0x121   :  { %v9459_v23 = vadd.f32 %v1311_v47, %v9373_v2  ;;  %v1313_v18 = vpop.f32.mrb[29].mxu0  ;;  %v1380_v26 = vpop.f32.mrb[28].mxu1  ;;  %8085 = vrcp.f32 %v1685_v38 }
 0x122   :  { %v9467_v39 = vadd.f32 %v1313_v18, %v9378_v60  ;;  %v1315_v3 = vpop.f32.mrb[30].mxu0  ;;  %v9470_v14 = vadd.f32 %v1380_v26, %v9383_v52  ;;  %v1382_v8 = vpop.f32.mrb[29].mxu1  ;;  %v9478_v60 = vrot.slane %v9464_v1, %v15250_v30  ;;  %v1686_v18 = vadd.f32 1.0, %v8080_v31 }
 0x123   :  { %15246 = vst [vmem:[#allocation90_spill] sm:$0xff] %v9459_v23  ;;  %v1316_v2 = vpop.f32.mrb[31].mxu0  ;;  %v9473_v47 = vadd.f32 %v1382_v8, %v9388_v34  ;;  %v1384_v23 = vpop.f32.mrb[30].mxu1  ;;  %v15251_v52 = vsub.s32 1, %v9182_v55  ;;  %v9488_v8 = vrot.slane %v9464_v1, %v15252_v22  ;;  %v15253_v34 = vsub.s32 3, %v9182_v55 }
 0x124   :  { %15247 = vst [vmem:[#allocation91_spill] sm:$0xff] %v9467_v39  ;;  %15248 = vst [vmem:[#allocation92_spill] sm:$0xff] %v9470_v14  ;;  %v1385_v0 = vpop.f32.mrb[31].mxu1  ;;  %8087 = vrcp.f32 %v1686_v18 }
 0x125   :  { %15249 = vst [vmem:[#allocation93_spill] sm:$0xff] %v9473_v47  ;;  %v9483_v3 = vrot.slane %v9464_v1, %v15251_v52  ;;  %v9493_v0 = vrot.slane %v9464_v1, %v15253_v34 }
 0x128   :  { %v1421_v30 = vpop.f32.mrb[32].mxu0 }
 0x129   :  { %v1422_v40 = vadd.f32 %v1421_v30, %v9478_v60  ;;  %v1423_v9 = vpop.f32.mrb[33].mxu0  ;;  %v1492_v31 = vpop.f32.mrb[32].mxu1 }
 0x12a   :  { %v1424_v23 = vadd.f32 %v1423_v9, %v9483_v3  ;;  %v1425_v26 = vpop.f32.mrb[34].mxu0  ;;  %v1493_v2 = vadd.f32 %v1492_v31, %v9488_v8  ;;  %v1494_v52 = vpop.f32.mrb[33].mxu1 }
 0x12b   :  { %8089 = vtanh.f32 %v1422_v40  ;;  %v9499_v41 = vadd.f32 %v1425_v26, %v9478_v60  ;;  %v1427_v22 = vpop.f32.mrb[35].mxu0  ;;  %v1495_v24 = vadd.f32 %v1494_v52, %v9493_v0  ;;  %v1496_v34 = vpop.f32.mrb[34].mxu1 }
 0x12c   :  { %8091 = vtanh.f32 %v1424_v23  ;;  %v9503_v38 = vadd.f32 %v1427_v22, %v9483_v3  ;;  %v9506_v18 = vadd.f32 %v1496_v34, %v9488_v8  ;;  %v1498_v30 = vpop.f32.mrb[35].mxu1  ;;  %v8082_v31 = vpop.eup %8081 }
 0x12d   :  { %15254 = vst [vmem:[#allocation94_spill] sm:$0xff] %v9499_v41  ;;  %8093 = vtanh.f32 %v1493_v2  ;;  %v9509_v9 = vadd.f32 %v1498_v30, %v9493_v0  ;;  %v8084_v23 = vpop.eup %8083 }
 0x12e   :  { %15255 = vst [vmem:[#allocation95_spill] sm:$0xff] %v9503_v38  ;;  %15256 = vst [vmem:[#allocation96_spill] sm:$0xff] %v9506_v18  ;;  %8095 = vtanh.f32 %v1495_v24  ;;  %v8086_v14 = vpop.eup %8085 }
 0x12f   :  { %15257 = vst [vmem:[#allocation97_spill] sm:$0xff] %v9509_v9 }
 0x130   :  { %v1431_v40 = vpop.f32.mrb[36].mxu0 }
 0x131   :  { %v9512_v26 = vadd.f32 %v1431_v40, %v9478_v60  ;;  %v1433_v52 = vpop.f32.mrb[37].mxu0  ;;  %v1502_v47 = vpop.f32.mrb[36].mxu1 }
 0x132   :  { %v9515_v22 = vadd.f32 %v1433_v52, %v9483_v3  ;;  %v1435_v39 = vpop.f32.mrb[38].mxu0  ;;  %v9518_v34 = vadd.f32 %v1502_v47, %v9488_v8  ;;  %v1504_v2 = vpop.f32.mrb[37].mxu1 }
 0x133   :  { %15258 = vst [vmem:[#allocation98_spill] sm:$0xff] %v9512_v26  ;;  %v9521_v30 = vadd.f32 %v1435_v39, %v9478_v60  ;;  %v1437_v24 = vpop.f32.mrb[39].mxu0  ;;  %v9524_v9 = vadd.f32 %v1504_v2, %v9493_v0  ;;  %v1506_v40 = vpop.f32.mrb[38].mxu1 }
 0x134   :  { %15259 = vst [vmem:[#allocation99_spill] sm:$0xff] %v9515_v22  ;;  %15260 = vst [vmem:[#allocation100_spill] sm:$0xff] %v9518_v34  ;;  %v8088_v26 = vpop.eup %8087  ;;  %v9527_v38 = vadd.f32 %v1437_v24, %v9483_v3  ;;  %v9530_v52 = vadd.f32 %v1506_v40, %v9488_v8  ;;  %v1508_v22 = vpop.f32.mrb[39].mxu1 }
 0x135   :  { %15261 = vst [vmem:[#allocation101_spill] sm:$0xff] %v9521_v30  ;;  %15262 = vst [vmem:[#allocation102_spill] sm:$0xff] %v9524_v9  ;;  %v8090_v47 = vpop.eup %8089  ;;  %v9533_v34 = vadd.f32 %v1508_v22, %v9493_v0 }
 0x136   :  { %15263 = vst [vmem:[#allocation103_spill] sm:$0xff] %v9527_v38  ;;  %15264 = vst [vmem:[#allocation104_spill] sm:$0xff] %v9530_v52  ;;  %v8092_v18 = vpop.eup %8091  ;;  %v9535_v39 = vmul.f32 %v8090_v47, %v8082_v31 }
 0x137   :  { %15265 = vst [vmem:[#allocation105_spill] sm:$0xff] %v9533_v34  ;;  %v8094_v30 = vpop.eup %8093  ;;  %v9537_v41 = vmul.f32 %v8092_v18, %v8084_v23 }
 0x138   :  { %15266 = vst [vmem:[#allocation106_spill] sm:$0xff] %v9535_v39  ;;  %v8096_v2 = vpop.eup %8095  ;;  %v9539_v9 = vmul.f32 %v8094_v30, %v8086_v14  ;;  %v1441_v4 = vpop.f32.mrb[40].mxu0 }
 0x139   :  { %15267 = vst [vmem:[#allocation107_spill] sm:$0xff] %v9537_v41  ;;  %v9542_v24 = vadd.f32 %v1441_v4, %v9478_v60  ;;  %v9544_v40 = vmul.f32 %v8096_v2, %v8088_v26  ;;  %v1443_v38 = vpop.f32.mrb[41].mxu0  ;;  %v1512_v52 = vpop.f32.mrb[40].mxu1 }
 0x13a   :  { %15268 = vst [vmem:[#allocation108_spill] sm:$0xff] %v9539_v9  ;;  %v9547_v22 = vadd.f32 %v1443_v38, %v9483_v3  ;;  %v1445_v34 = vpop.f32.mrb[42].mxu0  ;;  %v9550_v31 = vadd.f32 %v1512_v52, %v9488_v8  ;;  %v1514_v18 = vpop.f32.mrb[41].mxu1 }
 0x13b   :  { %15269 = vst [vmem:[#allocation109_spill] sm:$0xff] %v9542_v24  ;;  %15270 = vst [vmem:[#allocation110_spill] sm:$0xff] %v9544_v40  ;;  %v9553_v23 = vadd.f32 %v1445_v34, %v9478_v60  ;;  %v1447_v14 = vpop.f32.mrb[43].mxu0  ;;  %v9556_v30 = vadd.f32 %v1514_v18, %v9493_v0  ;;  %v1516_v4 = vpop.f32.mrb[42].mxu1 }
 0x13c   :  { %15271 = vst [vmem:[#allocation111_spill] sm:$0xff] %v9547_v22  ;;  %15272 = vst [vmem:[#allocation112_spill] sm:$0xff] %v9550_v31  ;;  %v9559_v26 = vadd.f32 %v1447_v14, %v9483_v3  ;;  %v9562_v47 = vadd.f32 %v1516_v4, %v9488_v8  ;;  %v1518_v38 = vpop.f32.mrb[43].mxu1 }
 0x13d   :  { %15273 = vst [vmem:[#allocation113_spill] sm:$0xff] %v9553_v23  ;;  %15274 = vst [vmem:[#allocation114_spill] sm:$0xff] %v9556_v30  ;;  %v9565_v2 = vadd.f32 %v1518_v38, %v9493_v0  ;;  %v15282_v23 = vsub.s32 4, %v9182_v55 }
 0x13e   :  { %15275 = vst [vmem:[#allocation115_spill] sm:$0xff] %v9559_v26  ;;  %15276 = vst [vmem:[#allocation116_spill] sm:$0xff] %v9562_v47 }
 0x13f   :  { %15277 = vst [vmem:[#allocation117_spill] sm:$0xff] %v9565_v2 }
 0x140   :  { %v1451_v52 = vpop.f32.mrb[44].mxu0 }
 0x141   :  { %v9568_v22 = vadd.f32 %v1451_v52, %v9478_v60  ;;  %v1453_v34 = vpop.f32.mrb[45].mxu0  ;;  %v1522_v31 = vpop.f32.mrb[44].mxu1  ;;  %v9582_v60 = vrot.slane %v9464_v1, %v15282_v23  ;;  %v15284_v52 = vsub.s32 5, %v9182_v55 }
 0x142   :  { %v9571_v18 = vadd.f32 %v1453_v34, %v9483_v3  ;;  %v1455_v30 = vpop.f32.mrb[46].mxu0  ;;  %v9574_v14 = vadd.f32 %v1522_v31, %v9488_v8  ;;  %v1524_v26 = vpop.f32.mrb[45].mxu1  ;;  %v15286_v8 = vsub.s32 7, %v9182_v55 }
 0x143   :  { %15278 = vst [vmem:[#allocation118_spill] sm:$0xff] %v9568_v22  ;;  %v1456_v4 = vpop.f32.mrb[47].mxu0  ;;  %v9577_v47 = vadd.f32 %v1524_v26, %v9493_v0  ;;  %v1526_v38 = vpop.f32.mrb[46].mxu1  ;;  %15283 = vst [vmem:[#allocation122_spill] sm:$0xff] %v9582_v60  ;;  %v9587_v3 = vrot.slane %v9464_v1, %v15284_v52 }
 0x144   :  { %15279 = vst [vmem:[#allocation119_spill] sm:$0xff] %v9571_v18  ;;  %15280 = vst [vmem:[#allocation120_spill] sm:$0xff] %v9574_v14  ;;  %v1527_v2 = vpop.f32.mrb[47].mxu1  ;;  %v9592_v31 = vrot.slane %v9464_v1, %v15286_v8 }
 0x145   :  { %15281 = vst [vmem:[#allocation121_spill] sm:$0xff] %v9577_v47  ;;  %15285 = vst [vmem:[#allocation123_spill] sm:$0xff] %v9587_v3 }
 0x146   :  { %15287 = vst [vmem:[#allocation124_spill] sm:$0xff] %v9592_v31 }
 0x148   :  { %v1563_v30 = vpop.f32.mrb[48].mxu0 }
 0x149   :  { %v1564_v0 = vadd.f32 %v1563_v30, %v9582_v60  ;;  %v9595_v26 = vpop.f32.mrb[48].mxu1  ;;  %v1565_v2 = vpop.f32.mrb[49].mxu0 }
 0x14a   :  { %v1566_v34 = vadd.f32 %v1565_v2, %v9587_v3  ;;  %v1636_v23 = vpop.f32.mrb[49].mxu1  ;;  %v9598_v4 = vpop.f32.mrb[50].mxu0 }
 0x14b   :  { %15288 = vst [vmem:[#allocation125_spill] sm:$0xff] %v9598_v4  ;;  %v7232_v38 = vmul.f32 -1.442695, %v1564_v0  ;;  %v1637_v52 = vadd.f32 %v1636_v23, %v9592_v31  ;;  %v9601_v47 = vpop.f32.mrb[51].mxu0  ;;  %v9603_v18 = vpop.f32.mrb[50].mxu1 }
 0x14c   :  { %15289 = vst [vmem:[#allocation126_spill] sm:$0xff] %v9601_v47  ;;  %15290 = vst [vmem:[#allocation127_spill] sm:$0xff] %v9603_v18  ;;  %v7233_v8 = vmul.f32 -1.442695, %v1566_v34  ;;  %v9605_v14 = vpop.f32.mrb[51].mxu1 }
 0x14d   :  { %15291 = vst [vmem:[#allocation128_spill] sm:$0xff] %v9605_v14  ;;  %8097 = vpow2.f32 %v7232_v38  ;;  %v7235_v30 = vmul.f32 -1.442695, %v1637_v52 }
 0x14e   :  { %8099 = vpow2.f32 %v7233_v8 }
 0x14f   :  { %8101 = vpow2.f32 %v7235_v30 }
 0x150   :  { %8103 = vtanh.f32 %v9535_v39 }
 0x151   :  { %8105 = vtanh.f32 %v9537_v41 }
 0x157   :  { %v8098_v22 = vpop.eup %8097 }
 0x158   :  { %v1711_v2 = vadd.f32 1.0, %v8098_v22  ;;  %v8100_v24 = vpop.eup %8099  ;;  %v368_v22 = vld [vmem:[%s14182_s2 + $0x880] sm:$0xff] }
 0x159   :  { %v8102_v0 = vpop.eup %8101  ;;  %v1712_v23 = vadd.f32 1.0, %v8100_v24  ;;  %v376_v24 = vld [vmem:[%s14182_s2 + $0x8c0] sm:$0xff] }
 0x15a   :  { %8107 = vrcp.f32 %v1711_v2  ;;  %v1714_v31 = vadd.f32 1.0, %v8102_v0  ;;  %v8104_v34 = vpop.eup %8103  ;;  %v377_v2 = vld [vmem:[%s14182_s2 + $0x8c8] sm:$0xff] }
 0x15b   :  { %8109 = vtanh.f32 %v9544_v40  ;;  %v8106_v38 = vpop.eup %8105  ;;  %v400_v40 = vld [vmem:[%s14182_s2 + $0x980] sm:$0xff] }
 0x15c   :  { %8111 = vrcp.f32 %v1712_v23 }
 0x15d   :  { %8113 = vrcp.f32 %v1714_v31  ;;  %v369_v31 = vld [vmem:[%s14182_s2 + $0x888] sm:$0xff] }
 0x15e   :  { %v9652_v4 = vcombine.low %v369_v31, %v377_v2 }
 0x160   :  { %15295 = vst [vmem:[#allocation132_spill] sm:$0xff] %v9652_v4 }
 0x164   :  { %v8108_v52 = vpop.eup %8107 }
 0x165   :  { %v8110_v8 = vpop.eup %8109  ;;  %v1731_v14 = vmul.f32 %v8108_v52, %v8104_v34  ;;  %v9631_v34 = vcombine.high %v368_v22, %v376_v24  ;;  %v392_v52 = vld [vmem:[%s14182_s2 + $0x940] sm:$0xff] }
 0x166   :  { %v8112_v30 = vpop.eup %8111 }
 0x167   :  { %v8114_v18 = vpop.eup %8113  ;;  %v1732_v47 = vmul.f32 %v8112_v30, %v8106_v38  ;;  %v9624_v23 = vpack.c.bf16 %v1731_v14, %v1731_v14  ;;  %15292 = vst [vmem:[#allocation129_spill] sm:$0xff] %v9631_v34  ;;  %v9633_v38 = vcombine.high %v369_v31, %v377_v2  ;;  %v393_v14 = vld [vmem:[%s14182_s2 + $0x948] sm:$0xff]  ;;  %v9650_v30 = vcombine.low %v368_v22, %v376_v24  ;;  %v408_v22 = vld [vmem:[%s14182_s2 + $0x9c0] sm:$0xff] }
 0x168   :  { %v1734_v3 = vmul.f32 %v8114_v18, %v8110_v8  ;;  %v384_v18 = vld [vmem:[%s14182_s2 + $0x900] sm:$0xff]  ;;  %v401_v24 = vld [vmem:[%s14182_s2 + $0x988] sm:$0xff] }
 0x169   :  { %v9622_v0 = vpack.c.bf16 %v1732_v47, %v1732_v47  ;;  %15293 = vst [vmem:[#allocation130_spill] sm:$0xff] %v9633_v38  ;;  %v385_v47 = vld [vmem:[%s14182_s2 + $0x908] sm:$0xff]  ;;  %15294 = vst [vmem:[#allocation131_spill] sm:$0xff] %v9650_v30  ;;  %v9656_v60 = vcombine.high %v384_v18, %v392_v52  ;;  %v9676_v2 = vcombine.low %v384_v18, %v392_v52 }
 0x16a   :  { %v9644_v8 = vpack.c.bf16 %v1734_v3, %v1734_v3  ;;  %v9658_v3 = vcombine.high %v385_v47, %v393_v14  ;;  %v409_v31 = vld [vmem:[%s14182_s2 + $0x9c8] sm:$0xff] }
 0x16b   :  { %4331 = vmatprep.mubr.bf16.mxu0 %v9622_v0  ;;  %4413 = vmatprep.mubr.bf16.mxu1 %v9622_v0  ;;  %15296 = vst [vmem:[#allocation133_spill] sm:$0xff] %v9656_v60  ;;  %15298 = vst [vmem:[#allocation135_spill] sm:$0xff] %v9676_v2  ;;  %v417_v18 = vld [vmem:[%s14182_s2 + $0xa08] sm:$0xff] }
 0x16c   :  { %4332 = vmatmul.mubr.bf16.vlgmr.msra.gmra.mrb[64].mxu0 %v9624_v23  ;;  %4414 = vmatmul.mubr.bf16.vlgmr.msra.gmra.mrb[64].mxu1 %v9624_v23  ;;  %15297 = vst [vmem:[#allocation134_spill] sm:$0xff] %v9658_v3  ;;  %v425_v52 = vld [vmem:[%s14182_s2 + $0xa48] sm:$0xff] }
 0x16d   :  { %4341 = vmatpush1.bf16.msra.mxu0 %v9289_v49  ;;  %4423 = vmatpush1.bf16.msra.mxu1 %v9301_v32  ;;  %v9684_v32 = vcombine.high %v401_v24, %v409_v31  ;;  %v416_v49 = vld [vmem:[%s14182_s2 + $0xa00] sm:$0xff] }
 0x16e   :  { %4372 = vmatprep.mubr.bf16.mxu0 %v9644_v8  ;;  %4454 = vmatprep.mubr.bf16.mxu1 %v9644_v8 }
 0x16f   :  { %4342 = vmatprep.subr.bf16.mxu0 %v9631_v34  ;;  %4424 = vmatprep.subr.bf16.mxu1 %v9633_v38  ;;  %v9678_v34 = vcombine.low %v385_v47, %v393_v14  ;;  %v9682_v38 = vcombine.high %v400_v40, %v408_v22  ;;  %15301 = vst [vmem:[#allocation138_spill] sm:$0xff] %v9684_v32 }
 0x170   :  { %v9700_v47 = vcombine.low %v400_v40, %v408_v22  ;;  %v9702_v14 = vcombine.low %v401_v24, %v409_v31  ;;  %v433_v40 = vld [vmem:[%s14182_s2 + $0xa88] sm:$0xff]  ;;  %v9726_v31 = vcombine.low %v417_v18, %v425_v52 }
 0x171   :  { %4343 = vmatpush1.bf16.msra.mxu0 %v9650_v30  ;;  %4425 = vmatpush1.bf16.msra.mxu1 %v9652_v4  ;;  %15299 = vst [vmem:[#allocation136_spill] sm:$0xff] %v9678_v34  ;;  %15300 = vst [vmem:[#allocation137_spill] sm:$0xff] %v9682_v38  ;;  %v424_v4 = vld [vmem:[%s14182_s2 + $0xa40] sm:$0xff]  ;;  %v441_v22 = vld [vmem:[%s14182_s2 + $0xac8] sm:$0xff] }
 0x172   :  { %4344 = vmatprep.subr.bf16.mxu0 %v9656_v60  ;;  %4426 = vmatprep.subr.bf16.mxu1 %v9658_v3  ;;  %15302 = vst [vmem:[#allocation139_spill] sm:$0xff] %v9700_v47  ;;  %15303 = vst [vmem:[#allocation140_spill] sm:$0xff] %v9702_v14  ;;  %v9706_v3 = vcombine.high %v416_v49, %v424_v4  ;;  %v9708_v60 = vcombine.high %v417_v18, %v425_v52  ;;  %v432_v30 = vld [vmem:[%s14182_s2 + $0xa80] sm:$0xff]  ;;  %v15310_v18 = vsub.s32 6, %v9182_v55 }
 0x173   :  { %v9724_v24 = vcombine.low %v416_v49, %v424_v4  ;;  %15307 = vst [vmem:[#allocation144_spill] sm:$0xff] %v9726_v31  ;;  %v449_v49 = vld [vmem:[%s14182_s2 + $0xb08] sm:$0xff]  ;;  %v464_v55 = vld [vmem:[%s14182_s2 + $0xb80] sm:$0xff] }
 0x174   :  { %15304 = vst [vmem:[#allocation141_spill] sm:$0xff] %v9706_v3  ;;  %15305 = vst [vmem:[#allocation142_spill] sm:$0xff] %v9708_v60  ;;  %v457_v4 = vld [vmem:[%s14182_s2 + $0xb48] sm:$0xff]  ;;  %v9749_v52 = vrot.slane %v9464_v1, %v15310_v18  ;;  %v472_v1 = vld [vmem:[%s14182_s2 + $0xbc0] sm:$0xff] }
 0x175   :  { %4345 = vmatpush1.bf16.msra.mxu0 %v9676_v2  ;;  %4427 = vmatpush1.bf16.msra.mxu1 %v9678_v34  ;;  %v440_v34 = vld [vmem:[%s14182_s2 + $0xac0] sm:$0xff]  ;;  %15306 = vst [vmem:[#allocation143_spill] sm:$0xff] %v9724_v24  ;;  %v9761_v41 = vcombine.high %v449_v49, %v457_v4  ;;  %v9781_v18 = vcombine.low %v449_v49, %v457_v4 }
 0x176   :  { %4346 = vmatprep.subr.bf16.mxu0 %v9682_v38  ;;  %4428 = vmatprep.subr.bf16.mxu1 %v9684_v32  ;;  %v9730_v32 = vcombine.high %v432_v30, %v440_v34  ;;  %v9732_v38 = vcombine.high %v433_v40, %v441_v22  ;;  %v448_v2 = vld [vmem:[%s14182_s2 + $0xb00] sm:$0xff]  ;;  %15311 = vst [vmem:[#allocation147_spill] sm:$0xff] %v9749_v52 }
 0x177   :  { %15315 = vst [vmem:[#allocation151_spill] sm:$0xff] %v9761_v41  ;;  %15317 = vst [vmem:[#allocation153_spill] sm:$0xff] %v9781_v18  ;;  %v9803_v4 = vcombine.low %v464_v55, %v472_v1 }
 0x178   :  { %15308 = vst [vmem:[#allocation145_spill] sm:$0xff] %v9730_v32  ;;  %15309 = vst [vmem:[#allocation146_spill] sm:$0xff] %v9732_v38 }
 0x179   :  { %4347 = vmatpush1.bf16.msra.mxu0 %v9700_v47  ;;  %4429 = vmatpush1.bf16.msra.mxu1 %v9702_v14  ;;  %v456_v14 = vld [vmem:[%s14182_s2 + $0xb40] sm:$0xff]  ;;  %15320 = vst [vmem:[#allocation156_spill] sm:$0xff] %v9803_v4 }
 0x17a   :  { %4348 = vmatprep.subr.bf16.mxu0 %v9706_v3  ;;  %4430 = vmatprep.subr.bf16.mxu1 %v9708_v60  ;;  %v9753_v60 = vcombine.low %v432_v30, %v440_v34  ;;  %v9755_v3 = vcombine.low %v433_v40, %v441_v22  ;;  %v9759_v47 = vcombine.high %v448_v2, %v456_v14  ;;  %v465_v34 = vld [vmem:[%s14182_s2 + $0xb88] sm:$0xff] }
 0x17b   :  { %v473_v30 = vld [vmem:[%s14182_s2 + $0xbc8] sm:$0xff]  ;;  %v1635_v40 = vadd.f32 %v9595_v26, %v9749_v52  ;;  %v9779_v22 = vcombine.low %v448_v2, %v456_v14  ;;  %v480_v26 = vld [vmem:[%s14182_s2 + $0xc00] sm:$0xff] }
 0x17c   :  { %15312 = vst [vmem:[#allocation148_spill] sm:$0xff] %v9753_v60  ;;  %15313 = vst [vmem:[#allocation149_spill] sm:$0xff] %v9755_v3  ;;  %v481_v2 = vld [vmem:[%s14182_s2 + $0xc08] sm:$0xff] }
 0x17d   :  { %4349 = vmatpush1.bf16.msra.mxu0 %v9724_v24  ;;  %4431 = vmatpush1.bf16.msra.mxu1 %v9726_v31  ;;  %15314 = vst [vmem:[#allocation150_spill] sm:$0xff] %v9759_v47  ;;  %15316 = vst [vmem:[#allocation152_spill] sm:$0xff] %v9779_v22  ;;  %v489_v14 = vld [vmem:[%s14182_s2 + $0xc48] sm:$0xff]  ;;  %v7234_v49 = vmul.f32 -1.442695, %v1635_v40  ;;  %v496_v40 = vld [vmem:[%s14182_s2 + $0xc80] sm:$0xff] }
 0x17e   :  { %4350 = vmatprep.subr.bf16.mxu0 %v9730_v32  ;;  %4432 = vmatprep.subr.bf16.mxu1 %v9732_v38  ;;  %v9785_v38 = vcombine.high %v464_v55, %v472_v1  ;;  %v9787_v32 = vcombine.high %v465_v34, %v473_v30  ;;  %v497_v55 = vld [vmem:[%s14182_s2 + $0xc88] sm:$0xff]  ;;  %v10006_v24 = vpop.f32.mrb[52].mxu0 }
 0x17f   :  { %v505_v1 = vld [vmem:[%s14182_s2 + $0xcc8] sm:$0xff]  ;;  %8115 = vpow2.f32 %v7234_v49  ;;  %v512_v49 = vld [vmem:[%s14182_s2 + $0xd00] sm:$0xff]  ;;  %15356 = vst [vmem:[#allocation192_spill] sm:$0xff] %v10006_v24 }
 0x180   :  { %15318 = vst [vmem:[#allocation154_spill] sm:$0xff] %v9785_v38  ;;  %15319 = vst [vmem:[#allocation155_spill] sm:$0xff] %v9787_v32 }
 0x181   :  { %4351 = vmatpush1.bf16.msra.mxu0 %v9753_v60  ;;  %4433 = vmatpush1.bf16.msra.mxu1 %v9755_v3  ;;  %v488_v3 = vld [vmem:[%s14182_s2 + $0xc40] sm:$0xff]  ;;  %v9811_v60 = vcombine.high %v481_v2, %v489_v14 }
 0x182   :  { %4352 = vmatprep.subr.bf16.mxu0 %v9759_v47  ;;  %4434 = vmatprep.subr.bf16.mxu1 %v9761_v41  ;;  %v9805_v41 = vcombine.low %v465_v34, %v473_v30  ;;  %v9809_v47 = vcombine.high %v480_v26, %v488_v3  ;;  %v9827_v34 = vcombine.low %v480_v26, %v488_v3  ;;  %v513_v3 = vld [vmem:[%s14182_s2 + $0xd08] sm:$0xff] }
 0x183   :  { %15323 = vst [vmem:[#allocation159_spill] sm:$0xff] %v9811_v60  ;;  %v9829_v30 = vcombine.low %v481_v2, %v489_v14  ;;  %v521_v26 = vld [vmem:[%s14182_s2 + $0xd48] sm:$0xff]  ;;  %v9853_v14 = vcombine.low %v497_v55, %v505_v1 }
 0x184   :  { %15321 = vst [vmem:[#allocation157_spill] sm:$0xff] %v9805_v41  ;;  %15322 = vst [vmem:[#allocation158_spill] sm:$0xff] %v9809_v47 }
 0x185   :  { %4353 = vmatpush1.bf16.msra.mxu0 %v9779_v22  ;;  %4435 = vmatpush1.bf16.msra.mxu1 %v9781_v18  ;;  %v504_v18 = vld [vmem:[%s14182_s2 + $0xcc0] sm:$0xff]  ;;  %15324 = vst [vmem:[#allocation160_spill] sm:$0xff] %v9827_v34  ;;  %15325 = vst [vmem:[#allocation161_spill] sm:$0xff] %v9829_v30 }
 0x186   :  { %4354 = vmatprep.subr.bf16.mxu0 %v9785_v38  ;;  %4436 = vmatprep.subr.bf16.mxu1 %v9787_v32  ;;  %v9833_v32 = vcombine.high %v496_v40, %v504_v18  ;;  %v9835_v38 = vcombine.high %v497_v55, %v505_v1  ;;  %v9851_v2 = vcombine.low %v496_v40, %v504_v18  ;;  %v529_v18 = vld [vmem:[%s14182_s2 + $0xd88] sm:$0xff]  ;;  %v544_v22 = vld [vmem:[%s14182_s2 + $0xe00] sm:$0xff] }
 0x187   :  { %15329 = vst [vmem:[#allocation165_spill] sm:$0xff] %v9853_v14  ;;  %v537_v40 = vld [vmem:[%s14182_s2 + $0xdc8] sm:$0xff]  ;;  %v9877_v1 = vcombine.low %v513_v3, %v521_v26 }
 0x188   :  { %15326 = vst [vmem:[#allocation162_spill] sm:$0xff] %v9833_v32  ;;  %15327 = vst [vmem:[#allocation163_spill] sm:$0xff] %v9835_v38 }
 0x189   :  { %4355 = vmatpush1.bf16.msra.mxu0 %v9803_v4  ;;  %4437 = vmatpush1.bf16.msra.mxu1 %v9805_v41  ;;  %v520_v41 = vld [vmem:[%s14182_s2 + $0xd40] sm:$0xff]  ;;  %15328 = vst [vmem:[#allocation164_spill] sm:$0xff] %v9851_v2  ;;  %15333 = vst [vmem:[#allocation169_spill] sm:$0xff] %v9877_v1 }
 0x18a   :  { %4356 = vmatprep.subr.bf16.mxu0 %v9809_v47  ;;  %4438 = vmatprep.subr.bf16.mxu1 %v9811_v60  ;;  %v9857_v60 = vcombine.high %v512_v49, %v520_v41  ;;  %v9859_v47 = vcombine.high %v513_v3, %v521_v26  ;;  %v528_v4 = vld [vmem:[%s14182_s2 + $0xd80] sm:$0xff]  ;;  %v9875_v55 = vcombine.low %v512_v49, %v520_v41  ;;  %v545_v49 = vld [vmem:[%s14182_s2 + $0xe08] sm:$0xff] }
 0x18b   :  { %v552_v41 = vld [vmem:[%s14182_s2 + $0xe40] sm:$0xff]  ;;  %v553_v3 = vld [vmem:[%s14182_s2 + $0xe48] sm:$0xff] }
 0x18c   :  { %15330 = vst [vmem:[#allocation166_spill] sm:$0xff] %v9857_v60  ;;  %15331 = vst [vmem:[#allocation167_spill] sm:$0xff] %v9859_v47 }
 0x18d   :  { %4357 = vmatpush1.bf16.msra.mxu0 %v9827_v34  ;;  %4439 = vmatpush1.bf16.msra.mxu1 %v9829_v30  ;;  %v536_v30 = vld [vmem:[%s14182_s2 + $0xdc0] sm:$0xff]  ;;  %15332 = vst [vmem:[#allocation168_spill] sm:$0xff] %v9875_v55  ;;  %v9883_v34 = vcombine.high %v529_v18, %v537_v40 }
 0x18e   :  { %4358 = vmatprep.subr.bf16.mxu0 %v9833_v32  ;;  %4440 = vmatprep.subr.bf16.mxu1 %v9835_v38  ;;  %v8116_v38 = vpop.eup %8115  ;;  %v9881_v32 = vcombine.high %v528_v4, %v536_v30 }
 0x18f   :  { %15335 = vst [vmem:[#allocation171_spill] sm:$0xff] %v9883_v34  ;;  %v1713_v26 = vadd.f32 1.0, %v8116_v38  ;;  %v560_v38 = vld [vmem:[%s14182_s2 + $0xe80] sm:$0xff] }
 0x190   :  { %15334 = vst [vmem:[#allocation170_spill] sm:$0xff] %v9881_v32 }
 0x191   :  { %4359 = vmatpush1.bf16.msra.mxu0 %v9851_v2  ;;  %4441 = vmatpush1.bf16.msra.mxu1 %v9853_v14  ;;  %v9905_v14 = vcombine.high %v544_v22, %v552_v41  ;;  %v9907_v2 = vcombine.high %v545_v49, %v553_v3  ;;  %8117 = vrcp.f32 %v1713_v26  ;;  %v576_v26 = vld [vmem:[%s14182_s2 + $0xf00] sm:$0xff] }
 0x192   :  { %4360 = vmatprep.subr.bf16.mxu0 %v9857_v60  ;;  %4442 = vmatprep.subr.bf16.mxu1 %v9859_v47  ;;  %v9899_v47 = vcombine.low %v528_v4, %v536_v30  ;;  %v9901_v60 = vcombine.low %v529_v18, %v537_v40  ;;  %v561_v4 = vld [vmem:[%s14182_s2 + $0xe88] sm:$0xff]  ;;  %v9923_v18 = vcombine.low %v544_v22, %v552_v41  ;;  %8119 = vtanh.f32 %v9539_v9  ;;  %v584_v22 = vld [vmem:[%s14182_s2 + $0xf40] sm:$0xff] }
 0x193   :  { %15338 = vst [vmem:[#allocation174_spill] sm:$0xff] %v9905_v14  ;;  %15339 = vst [vmem:[#allocation175_spill] sm:$0xff] %v9907_v2  ;;  %v569_v30 = vld [vmem:[%s14182_s2 + $0xec8] sm:$0xff]  ;;  %v9925_v40 = vcombine.low %v545_v49, %v553_v3 }
 0x194   :  { %15336 = vst [vmem:[#allocation172_spill] sm:$0xff] %v9899_v47  ;;  %15337 = vst [vmem:[#allocation173_spill] sm:$0xff] %v9901_v60  ;;  %v577_v41 = vld [vmem:[%s14182_s2 + $0xf08] sm:$0xff] }
 0x195   :  { %4361 = vmatpush1.bf16.msra.mxu0 %v9875_v55  ;;  %4443 = vmatpush1.bf16.msra.mxu1 %v9877_v1  ;;  %v568_v1 = vld [vmem:[%s14182_s2 + $0xec0] sm:$0xff]  ;;  %15340 = vst [vmem:[#allocation176_spill] sm:$0xff] %v9923_v18  ;;  %15341 = vst [vmem:[#allocation177_spill] sm:$0xff] %v9925_v40  ;;  %v585_v49 = vld [vmem:[%s14182_s2 + $0xf48] sm:$0xff] }
 0x196   :  { %4362 = vmatprep.subr.bf16.mxu0 %v9881_v32  ;;  %4444 = vmatprep.subr.bf16.mxu1 %v9883_v34  ;;  %v9929_v34 = vcombine.high %v560_v38, %v568_v1  ;;  %v9931_v32 = vcombine.high %v561_v4, %v569_v30  ;;  %v9948_v3 = vcombine.low %v560_v38, %v568_v1  ;;  %v593_v1 = vld [vmem:[%s14182_s2 + $0xf88] sm:$0xff] }
 0x197   :  { %v601_v38 = vld [vmem:[%s14182_s2 + $0xfc8] sm:$0xff] }
 0x198   :  { %15342 = vst [vmem:[#allocation178_spill] sm:$0xff] %v9929_v34  ;;  %15343 = vst [vmem:[#allocation179_spill] sm:$0xff] %v9931_v32 }
 0x199   :  { %4363 = vmatpush1.bf16.msra.mxu0 %v9899_v47  ;;  %4445 = vmatpush1.bf16.msra.mxu1 %v9901_v60  ;;  %15344 = vst [vmem:[#allocation180_spill] sm:$0xff] %v9948_v3  ;;  %v9956_v60 = vcombine.high %v577_v41, %v585_v49  ;;  %v592_v47 = vld [vmem:[%s14182_s2 + $0xf80] sm:$0xff] }
 0x19a   :  { %4364 = vmatprep.subr.bf16.mxu0 %v9905_v14  ;;  %4446 = vmatprep.subr.bf16.mxu1 %v9907_v2  ;;  %v9950_v2 = vcombine.low %v561_v4, %v569_v30  ;;  %v9954_v14 = vcombine.high %v576_v26, %v584_v22  ;;  %v9972_v4 = vcombine.low %v576_v26, %v584_v22  ;;  %v106_v26 = vld [vmem:[%s14182_s2 + $0x50] sm:$0xff]  ;;  %v99_v22 = vld [vmem:[%s14182_s2 + $0x18] sm:$0xff] }
 0x19b   :  { %15347 = vst [vmem:[#allocation183_spill] sm:$0xff] %v9956_v60  ;;  %v9974_v30 = vcombine.low %v577_v41, %v585_v49  ;;  %v8118_v55 = vpop.eup %8117  ;;  %v107_v41 = vld [vmem:[%s14182_s2 + $0x58] sm:$0xff] }
 0x19c   :  { %15345 = vst [vmem:[#allocation181_spill] sm:$0xff] %v9950_v2  ;;  %15346 = vst [vmem:[#allocation182_spill] sm:$0xff] %v9954_v14  ;;  %v8120_v49 = vpop.eup %8119  ;;  %v10004_v31 = vcombine.high %v99_v22, %v107_v41  ;;  %v10033_v24 = vcombine.low %v99_v22, %v107_v41 }
 0x19d   :  { %4365 = vmatpush1.bf16.msra.mxu0 %v9923_v18  ;;  %4447 = vmatpush1.bf16.msra.mxu1 %v9925_v40  ;;  %v600_v40 = vld [vmem:[%s14182_s2 + $0xfc0] sm:$0xff]  ;;  %15348 = vst [vmem:[#allocation184_spill] sm:$0xff] %v9972_v4  ;;  %15349 = vst [vmem:[#allocation185_spill] sm:$0xff] %v9974_v30  ;;  %v98_v18 = vld [vmem:[%s14182_s2 + $0x10] sm:$0xff] }
 0x19e   :  { %4366 = vmatprep.subr.bf16.mxu0 %v9929_v34  ;;  %4448 = vmatprep.subr.bf16.mxu1 %v9931_v32  ;;  %v9978_v32 = vcombine.high %v592_v47, %v600_v40  ;;  %v9980_v34 = vcombine.high %v593_v1, %v601_v38  ;;  %15355 = vst [vmem:[#allocation191_spill] sm:$0xff] %v10004_v31  ;;  %15361 = vst [vmem:[#allocation197_spill] sm:$0xff] %v10033_v24 }
 0x1a0   :  { %15350 = vst [vmem:[#allocation186_spill] sm:$0xff] %v9978_v32  ;;  %15351 = vst [vmem:[#allocation187_spill] sm:$0xff] %v9980_v34 }
 0x1a1   :  { %4367 = vmatpush1.bf16.msra.mxu0 %v9948_v3  ;;  %4449 = vmatpush1.bf16.msra.mxu1 %v9950_v2  ;;  %v1733_v2 = vmul.f32 %v8120_v49, %v8118_v55  ;;  %v10002_v3 = vcombine.high %v98_v18, %v106_v26  ;;  %v115_v55 = vld [vmem:[%s14182_s2 + $0x98] sm:$0xff] }
 0x1a2   :  { %4368 = vmatprep.subr.bf16.mxu0 %v9954_v14  ;;  %4450 = vmatprep.subr.bf16.mxu1 %v9956_v60  ;;  %v9996_v60 = vcombine.low %v592_v47, %v600_v40  ;;  %v9998_v14 = vcombine.low %v593_v1, %v601_v38  ;;  %v122_v47 = vld [vmem:[%s14182_s2 + $0xd0] sm:$0xff]  ;;  %v123_v40 = vld [vmem:[%s14182_s2 + $0xd8] sm:$0xff]  ;;  %v10026_v38 = vcombine.low %v98_v18, %v106_v26 }
 0x1a3   :  { %15354 = vst [vmem:[#allocation190_spill] sm:$0xff] %v10002_v3  ;;  %v138_v18 = vld [vmem:[%s14182_s2 + $0x150] sm:$0xff]  ;;  %v139_v26 = vld [vmem:[%s14182_s2 + $0x158] sm:$0xff]  ;;  %v10060_v41 = vcombine.low %v115_v55, %v123_v40 }
 0x1a4   :  { %15352 = vst [vmem:[#allocation188_spill] sm:$0xff] %v9996_v60  ;;  %15353 = vst [vmem:[#allocation189_spill] sm:$0xff] %v9998_v14 }
 0x1a5   :  { %4369 = vmatpush1.bf16.msra.mxu0 %v9972_v4  ;;  %4451 = vmatpush1.bf16.msra.mxu1 %v9974_v30  ;;  %v114_v4 = vld [vmem:[%s14182_s2 + $0x90] sm:$0xff]  ;;  %v10011_v30 = vpop.f32.mrb[53].mxu0  ;;  %15359 = vst [vmem:[#allocation195_spill] sm:$0xff] %v10026_v38  ;;  %15365 = vst [vmem:[#allocation201_spill] sm:$0xff] %v10060_v41 }
 0x1a6   :  { %4370 = vmatprep.subr.bf16.mxu0 %v9978_v32  ;;  %4452 = vmatprep.subr.bf16.mxu1 %v9980_v34  ;;  %15357 = vst [vmem:[#allocation193_spill] sm:$0xff] %v10011_v30  ;;  %v10022_v1 = vpop.f32.mrb[54].mxu0  ;;  %v10030_v30 = vpack.c.bf16 %v1733_v2, %v1733_v2  ;;  %v10036_v34 = vcombine.high %v114_v4, %v122_v47  ;;  %v131_v2 = vld [vmem:[%s14182_s2 + $0x118] sm:$0xff] }
 0x1a7   :  { %15358 = vst [vmem:[#allocation194_spill] sm:$0xff] %v10022_v1  ;;  %v10028_v49 = vpop.f32.mrb[55].mxu0  ;;  %v10038_v32 = vcombine.high %v115_v55, %v123_v40  ;;  %v130_v1 = vld [vmem:[%s14182_s2 + $0x110] sm:$0xff]  ;;  %v10056_v22 = vcombine.low %v114_v4, %v122_v47  ;;  %v147_v55 = vld [vmem:[%s14182_s2 + $0x198] sm:$0xff] }
 0x1a8   :  { %15360 = vst [vmem:[#allocation196_spill] sm:$0xff] %v10028_v49  ;;  %15362 = vst [vmem:[#allocation198_spill] sm:$0xff] %v10036_v34  ;;  %v10062_v49 = vcombine.high %v130_v1, %v138_v18  ;;  %v154_v4 = vld [vmem:[%s14182_s2 + $0x1d0] sm:$0xff]  ;;  %v10074_v47 = vpop.f32.mrb[56].mxu0  ;;  %v155_v40 = vld [vmem:[%s14182_s2 + $0x1d8] sm:$0xff] }
 0x1a9   :  { %4371 = vmatpush1.bf16.msra.mxu0 %v9996_v60  ;;  %4453 = vmatpush1.bf16.msra.mxu1 %v9998_v14  ;;  %15363 = vst [vmem:[#allocation199_spill] sm:$0xff] %v10038_v32  ;;  %15364 = vst [vmem:[#allocation200_spill] sm:$0xff] %v10056_v22  ;;  %v10098_v60 = vcombine.high %v147_v55, %v155_v40 }
 0x1aa   :  { %4463 = vmatprep.subr.bf16.mxu0 %v10002_v3  ;;  %4545 = vmatprep.subr.bf16.mxu1 %v10004_v31  ;;  %15366 = vst [vmem:[#allocation202_spill] sm:$0xff] %v10062_v49  ;;  %v10066_v31 = vcombine.high %v131_v2, %v139_v26  ;;  %15368 = vst [vmem:[#allocation204_spill] sm:$0xff] %v10074_v47  ;;  %v10091_v47 = vcombine.low %v131_v2, %v139_v26  ;;  %v163_v2 = vld [vmem:[%s14182_s2 + $0x218] sm:$0xff] }
 0x1ab   :  { %15375 = vst [vmem:[#allocation211_spill] sm:$0xff] %v10098_v60  ;;  %v171_v26 = vld [vmem:[%s14182_s2 + $0x258] sm:$0xff] }
 0x1ac   :  { %4373 = vmatmul.mubr.bf16.vlgmr.msra.gmra.mrb[64].mxu0 %v10030_v30  ;;  %4455 = vmatmul.mubr.bf16.vlgmr.msra.gmra.mrb[64].mxu1 %v10030_v30  ;;  %15367 = vst [vmem:[#allocation203_spill] sm:$0xff] %v10066_v31  ;;  %15372 = vst [vmem:[#allocation208_spill] sm:$0xff] %v10091_v47 }
 0x1ad   :  { %4464 = vmatpush1.bf16.msra.mxu0 %v10026_v38  ;;  %4495 = vmatprep.mubr.bf16.mxu0 %v9622_v0  ;;  %v146_v38 = vld [vmem:[%s14182_s2 + $0x190] sm:$0xff] }
 0x1ae   :  { %4546 = vmatpush1.bf16.msra.mxu1 %v10033_v24  ;;  %4577 = vmatprep.mubr.bf16.mxu1 %v9622_v0  ;;  %v10093_v3 = vcombine.high %v146_v38, %v154_v4 }
 0x1af   :  { %4465 = vmatprep.subr.bf16.mxu0 %v10036_v34  ;;  %4547 = vmatprep.subr.bf16.mxu1 %v10038_v32  ;;  %v10082_v32 = vpop.f32.mrb[57].mxu0  ;;  %v10085_v34 = vcombine.low %v130_v1, %v138_v18  ;;  %v162_v1 = vld [vmem:[%s14182_s2 + $0x210] sm:$0xff] }
 0x1b0   :  { %15369 = vst [vmem:[#allocation205_spill] sm:$0xff] %v10082_v32  ;;  %v10087_v24 = vpop.f32.mrb[58].mxu0  ;;  %15373 = vst [vmem:[#allocation209_spill] sm:$0xff] %v10093_v3  ;;  %v170_v18 = vld [vmem:[%s14182_s2 + $0x250] sm:$0xff] }
 0x1b1   :  { %4466 = vmatpush1.bf16.msra.mxu0 %v10056_v22  ;;  %15370 = vst [vmem:[#allocation206_spill] sm:$0xff] %v10085_v34  ;;  %15371 = vst [vmem:[#allocation207_spill] sm:$0xff] %v10087_v24  ;;  %v10095_v14 = vpop.f32.mrb[59].mxu0  ;;  %v10117_v24 = vcombine.low %v147_v55, %v155_v40  ;;  %v10119_v32 = vcombine.high %v162_v1, %v170_v18  ;;  %v179_v55 = vld [vmem:[%s14182_s2 + $0x298] sm:$0xff] }
 0x1b2   :  { %4548 = vmatpush1.bf16.msra.mxu1 %v10060_v41  ;;  %4467 = vmatprep.subr.bf16.mxu0 %v10062_v49  ;;  %15374 = vst [vmem:[#allocation210_spill] sm:$0xff] %v10095_v14  ;;  %v10113_v14 = vcombine.low %v146_v38, %v154_v4  ;;  %v10124_v49 = vcombine.high %v163_v2, %v171_v26  ;;  %v186_v38 = vld [vmem:[%s14182_s2 + $0x2d0] sm:$0xff]  ;;  %v187_v40 = vld [vmem:[%s14182_s2 + $0x2d8] sm:$0xff] }
 0x1b3   :  { %4549 = vmatprep.subr.bf16.mxu1 %v10066_v31  ;;  %15377 = vst [vmem:[#allocation213_spill] sm:$0xff] %v10117_v24  ;;  %15378 = vst [vmem:[#allocation214_spill] sm:$0xff] %v10119_v32  ;;  %v10121_v31 = vpop.f32.mrb[60].mxu0  ;;  %v10150_v41 = vcombine.high %v179_v55, %v187_v40 }
 0x1b4   :  { %15376 = vst [vmem:[#allocation212_spill] sm:$0xff] %v10113_v14  ;;  %15379 = vst [vmem:[#allocation215_spill] sm:$0xff] %v10121_v31  ;;  %v10132_v4 = vpop.f32.mrb[61].mxu0 }
 0x1b5   :  { %4468 = vmatpush1.bf16.msra.mxu0 %v10085_v34  ;;  %15380 = vst [vmem:[#allocation216_spill] sm:$0xff] %v10124_v49  ;;  %v178_v34 = vld [vmem:[%s14182_s2 + $0x290] sm:$0xff]  ;;  %15381 = vst [vmem:[#allocation217_spill] sm:$0xff] %v10132_v4  ;;  %v1597_v31 = vpop.f32.mrb[62].mxu0 }
 0x1b6   :  { %4550 = vmatpush1.bf16.msra.mxu1 %v10091_v47  ;;  %4469 = vmatprep.subr.bf16.mxu0 %v10093_v3  ;;  %v1598_v3 = vpop.f32.mrb[63].mxu0  ;;  %v10145_v47 = vcombine.low %v163_v2, %v171_v26  ;;  %v10147_v4 = vcombine.high %v178_v34, %v186_v38  ;;  %15385 = vst [vmem:[#allocation221_spill] sm:$0xff] %v10150_v41  ;;  %v194_v31 = vld [vmem:[%s14182_s2 + $0x310] sm:$0xff] }
 0x1b7   :  { %4551 = vmatprep.subr.bf16.mxu1 %v10098_v60  ;;  %v10141_v60 = vcombine.low %v162_v1, %v170_v18  ;;  %v202_v3 = vld [vmem:[%s14182_s2 + $0x350] sm:$0xff]  ;;  %v195_v1 = vld [vmem:[%s14182_s2 + $0x318] sm:$0xff]  ;;  %v10165_v2 = vcombine.low %v178_v34, %v186_v38  ;;  %v10169_v26 = vcombine.low %v179_v55, %v187_v40 }
 0x1b8   :  { %15383 = vst [vmem:[#allocation219_spill] sm:$0xff] %v10145_v47  ;;  %15384 = vst [vmem:[#allocation220_spill] sm:$0xff] %v10147_v4  ;;  %v203_v18 = vld [vmem:[%s14182_s2 + $0x358] sm:$0xff]  ;;  %v218_v34 = vld [vmem:[%s14182_s2 + $0x3d0] sm:$0xff]  ;;  %v10189_v40 = vcombine.low %v194_v31, %v202_v3 }
 0x1b9   :  { %4470 = vmatpush1.bf16.msra.mxu0 %v10113_v14  ;;  %15382 = vst [vmem:[#allocation218_spill] sm:$0xff] %v10141_v60  ;;  %15386 = vst [vmem:[#allocation222_spill] sm:$0xff] %v10165_v2  ;;  %v211_v38 = vld [vmem:[%s14182_s2 + $0x398] sm:$0xff] }
 0x1ba   :  { %4552 = vmatpush1.bf16.msra.mxu1 %v10117_v24  ;;  %4471 = vmatprep.subr.bf16.mxu0 %v10119_v32  ;;  %15387 = vst [vmem:[#allocation223_spill] sm:$0xff] %v10169_v26  ;;  %v10174_v32 = vcombine.high %v195_v1, %v203_v18  ;;  %v210_v24 = vld [vmem:[%s14182_s2 + $0x390] sm:$0xff]  ;;  %v219_v55 = vld [vmem:[%s14182_s2 + $0x3d8] sm:$0xff]  ;;  %15390 = vst [vmem:[#allocation226_spill] sm:$0xff] %v10189_v40 }
 0x1bb   :  { %4553 = vmatprep.subr.bf16.mxu1 %v10124_v49  ;;  %v10171_v49 = vcombine.high %v194_v31, %v202_v3  ;;  %v234_v31 = vld [vmem:[%s14182_s2 + $0x450] sm:$0xff]  ;;  %v227_v3 = vld [vmem:[%s14182_s2 + $0x418] sm:$0xff] }
 0x1bc   :  { %15389 = vst [vmem:[#allocation225_spill] sm:$0xff] %v10174_v32 }
 0x1bd   :  { %4472 = vmatpush1.bf16.msra.mxu0 %v10141_v60  ;;  %15388 = vst [vmem:[#allocation224_spill] sm:$0xff] %v10171_v49  ;;  %v226_v60 = vld [vmem:[%s14182_s2 + $0x410] sm:$0xff] }
 0x1be   :  { %4554 = vmatpush1.bf16.msra.mxu1 %v10145_v47  ;;  %4473 = vmatprep.subr.bf16.mxu0 %v10147_v4  ;;  %v10195_v4 = vcombine.high %v210_v24, %v218_v34  ;;  %v10198_v47 = vcombine.high %v211_v38, %v219_v55 }
 0x1bf   :  { %4555 = vmatprep.subr.bf16.mxu1 %v10150_v41  ;;  %v10193_v41 = vcombine.low %v195_v1, %v203_v18  ;;  %v235_v1 = vld [vmem:[%s14182_s2 + $0x458] sm:$0xff]  ;;  %v10213_v18 = vcombine.low %v210_v24, %v218_v34  ;;  %v250_v24 = vld [vmem:[%s14182_s2 + $0x4d0] sm:$0xff] }
 0x1c0   :  { %15392 = vst [vmem:[#allocation228_spill] sm:$0xff] %v10195_v4  ;;  %15393 = vst [vmem:[#allocation229_spill] sm:$0xff] %v10198_v47  ;;  %v243_v34 = vld [vmem:[%s14182_s2 + $0x498] sm:$0xff] }
 0x1c1   :  { %4474 = vmatpush1.bf16.msra.mxu0 %v10165_v2  ;;  %15391 = vst [vmem:[#allocation227_spill] sm:$0xff] %v10193_v41  ;;  %15394 = vst [vmem:[#allocation230_spill] sm:$0xff] %v10213_v18  ;;  %v242_v2 = vld [vmem:[%s14182_s2 + $0x490] sm:$0xff] }
 0x1c2   :  { %4556 = vmatpush1.bf16.msra.mxu1 %v10169_v26  ;;  %4475 = vmatprep.subr.bf16.mxu0 %v10171_v49  ;;  %v10219_v49 = vcombine.high %v226_v60, %v234_v31  ;;  %v10222_v26 = vcombine.high %v227_v3, %v235_v1 }
 0x1c3   :  { %4557 = vmatprep.subr.bf16.mxu1 %v10174_v32  ;;  %v10217_v32 = vcombine.low %v211_v38, %v219_v55  ;;  %v251_v38 = vld [vmem:[%s14182_s2 + $0x4d8] sm:$0xff]  ;;  %v10237_v55 = vcombine.low %v226_v60, %v234_v31  ;;  %v266_v60 = vld [vmem:[%s14182_s2 + $0x550] sm:$0xff] }
 0x1c4   :  { %15396 = vst [vmem:[#allocation232_spill] sm:$0xff] %v10219_v49  ;;  %15397 = vst [vmem:[#allocation233_spill] sm:$0xff] %v10222_v26  ;;  %v259_v31 = vld [vmem:[%s14182_s2 + $0x518] sm:$0xff] }
 0x1c5   :  { %4476 = vmatpush1.bf16.msra.mxu0 %v10189_v40  ;;  %15395 = vst [vmem:[#allocation231_spill] sm:$0xff] %v10217_v32  ;;  %15398 = vst [vmem:[#allocation234_spill] sm:$0xff] %v10237_v55  ;;  %v258_v40 = vld [vmem:[%s14182_s2 + $0x510] sm:$0xff] }
 0x1c6   :  { %4558 = vmatpush1.bf16.msra.mxu1 %v10193_v41  ;;  %4477 = vmatprep.subr.bf16.mxu0 %v10195_v4  ;;  %v10243_v4 = vcombine.high %v242_v2, %v250_v24  ;;  %v10246_v41 = vcombine.high %v243_v34, %v251_v38 }
 0x1c7   :  { %4559 = vmatprep.subr.bf16.mxu1 %v10198_v47  ;;  %v10241_v47 = vcombine.low %v227_v3, %v235_v1  ;;  %v267_v3 = vld [vmem:[%s14182_s2 + $0x558] sm:$0xff]  ;;  %v10261_v1 = vcombine.low %v242_v2, %v250_v24  ;;  %v282_v2 = vld [vmem:[%s14182_s2 + $0x5d0] sm:$0xff] }
 0x1c8   :  { %15400 = vst [vmem:[#allocation236_spill] sm:$0xff] %v10243_v4  ;;  %15401 = vst [vmem:[#allocation237_spill] sm:$0xff] %v10246_v41  ;;  %v275_v24 = vld [vmem:[%s14182_s2 + $0x598] sm:$0xff] }
 0x1c9   :  { %4478 = vmatpush1.bf16.msra.mxu0 %v10213_v18  ;;  %15399 = vst [vmem:[#allocation235_spill] sm:$0xff] %v10241_v47  ;;  %15402 = vst [vmem:[#allocation238_spill] sm:$0xff] %v10261_v1  ;;  %v274_v18 = vld [vmem:[%s14182_s2 + $0x590] sm:$0xff] }
 0x1ca   :  { %4560 = vmatpush1.bf16.msra.mxu1 %v10217_v32  ;;  %4479 = vmatprep.subr.bf16.mxu0 %v10219_v49  ;;  %v10267_v49 = vcombine.high %v258_v40, %v266_v60  ;;  %v10270_v32 = vcombine.high %v259_v31, %v267_v3 }
 0x1cb   :  { %4561 = vmatprep.subr.bf16.mxu1 %v10222_v26  ;;  %v10265_v26 = vcombine.low %v243_v34, %v251_v38  ;;  %v283_v34 = vld [vmem:[%s14182_s2 + $0x5d8] sm:$0xff]  ;;  %v10285_v38 = vcombine.low %v258_v40, %v266_v60  ;;  %v298_v40 = vld [vmem:[%s14182_s2 + $0x650] sm:$0xff] }
 0x1cc   :  { %15404 = vst [vmem:[#allocation240_spill] sm:$0xff] %v10267_v49  ;;  %15405 = vst [vmem:[#allocation241_spill] sm:$0xff] %v10270_v32  ;;  %v291_v60 = vld [vmem:[%s14182_s2 + $0x618] sm:$0xff] }
 0x1cd   :  { %4480 = vmatpush1.bf16.msra.mxu0 %v10237_v55  ;;  %15403 = vst [vmem:[#allocation239_spill] sm:$0xff] %v10265_v26  ;;  %15406 = vst [vmem:[#allocation242_spill] sm:$0xff] %v10285_v38  ;;  %v290_v55 = vld [vmem:[%s14182_s2 + $0x610] sm:$0xff] }
 0x1ce   :  { %4562 = vmatpush1.bf16.msra.mxu1 %v10241_v47  ;;  %4481 = vmatprep.subr.bf16.mxu0 %v10243_v4  ;;  %v10291_v4 = vcombine.high %v274_v18, %v282_v2  ;;  %v10294_v47 = vcombine.high %v275_v24, %v283_v34 }
 0x1cf   :  { %4563 = vmatprep.subr.bf16.mxu1 %v10246_v41  ;;  %v10289_v41 = vcombine.low %v259_v31, %v267_v3  ;;  %v299_v31 = vld [vmem:[%s14182_s2 + $0x658] sm:$0xff]  ;;  %v10309_v3 = vcombine.low %v274_v18, %v282_v2  ;;  %v314_v18 = vld [vmem:[%s14182_s2 + $0x6d0] sm:$0xff] }
 0x1d0   :  { %15408 = vst [vmem:[#allocation244_spill] sm:$0xff] %v10291_v4  ;;  %15409 = vst [vmem:[#allocation245_spill] sm:$0xff] %v10294_v47  ;;  %v307_v2 = vld [vmem:[%s14182_s2 + $0x698] sm:$0xff] }
 0x1d1   :  { %4482 = vmatpush1.bf16.msra.mxu0 %v10261_v1  ;;  %15407 = vst [vmem:[#allocation243_spill] sm:$0xff] %v10289_v41  ;;  %15410 = vst [vmem:[#allocation246_spill] sm:$0xff] %v10309_v3  ;;  %v306_v1 = vld [vmem:[%s14182_s2 + $0x690] sm:$0xff] }
 0x1d2   :  { %4564 = vmatpush1.bf16.msra.mxu1 %v10265_v26  ;;  %4483 = vmatprep.subr.bf16.mxu0 %v10267_v49  ;;  %v10315_v49 = vcombine.high %v290_v55, %v298_v40  ;;  %v10318_v26 = vcombine.high %v291_v60, %v299_v31 }
 0x1d3   :  { %4565 = vmatprep.subr.bf16.mxu1 %v10270_v32  ;;  %v10313_v32 = vcombine.low %v275_v24, %v283_v34  ;;  %v315_v24 = vld [vmem:[%s14182_s2 + $0x6d8] sm:$0xff]  ;;  %v10333_v34 = vcombine.low %v290_v55, %v298_v40  ;;  %v330_v55 = vld [vmem:[%s14182_s2 + $0x750] sm:$0xff] }
 0x1d4   :  { %15412 = vst [vmem:[#allocation248_spill] sm:$0xff] %v10315_v49  ;;  %15413 = vst [vmem:[#allocation249_spill] sm:$0xff] %v10318_v26  ;;  %v323_v40 = vld [vmem:[%s14182_s2 + $0x718] sm:$0xff] }
 0x1d5   :  { %4484 = vmatpush1.bf16.msra.mxu0 %v10285_v38  ;;  %15411 = vst [vmem:[#allocation247_spill] sm:$0xff] %v10313_v32  ;;  %15414 = vst [vmem:[#allocation250_spill] sm:$0xff] %v10333_v34  ;;  %v322_v38 = vld [vmem:[%s14182_s2 + $0x710] sm:$0xff] }
 0x1d6   :  { %4566 = vmatpush1.bf16.msra.mxu1 %v10289_v41  ;;  %4485 = vmatprep.subr.bf16.mxu0 %v10291_v4  ;;  %v10339_v4 = vcombine.high %v306_v1, %v314_v18  ;;  %v10342_v41 = vcombine.high %v307_v2, %v315_v24 }
 0x1d7   :  { %4567 = vmatprep.subr.bf16.mxu1 %v10294_v47  ;;  %v10337_v47 = vcombine.low %v291_v60, %v299_v31  ;;  %v331_v60 = vld [vmem:[%s14182_s2 + $0x758] sm:$0xff]  ;;  %v10357_v31 = vcombine.low %v306_v1, %v314_v18  ;;  %v346_v1 = vld [vmem:[%s14182_s2 + $0x7d0] sm:$0xff] }
 0x1d8   :  { %15416 = vst [vmem:[#allocation252_spill] sm:$0xff] %v10339_v4  ;;  %15417 = vst [vmem:[#allocation253_spill] sm:$0xff] %v10342_v41  ;;  %v339_v18 = vld [vmem:[%s14182_s2 + $0x798] sm:$0xff] }
 0x1d9   :  { %4486 = vmatpush1.bf16.msra.mxu0 %v10309_v3  ;;  %15415 = vst [vmem:[#allocation251_spill] sm:$0xff] %v10337_v47  ;;  %15418 = vst [vmem:[#allocation254_spill] sm:$0xff] %v10357_v31  ;;  %v338_v3 = vld [vmem:[%s14182_s2 + $0x790] sm:$0xff] }
 0x1da   :  { %4568 = vmatpush1.bf16.msra.mxu1 %v10313_v32  ;;  %4487 = vmatprep.subr.bf16.mxu0 %v10315_v49  ;;  %v10363_v49 = vcombine.high %v322_v38, %v330_v55  ;;  %v10366_v32 = vcombine.high %v323_v40, %v331_v60 }
 0x1db   :  { %4569 = vmatprep.subr.bf16.mxu1 %v10318_v26  ;;  %v10361_v26 = vcombine.low %v307_v2, %v315_v24  ;;  %v347_v2 = vld [vmem:[%s14182_s2 + $0x7d8] sm:$0xff]  ;;  %v10381_v24 = vcombine.low %v322_v38, %v330_v55  ;;  %v362_v38 = vld [vmem:[%s14182_s2 + $0x850] sm:$0xff] }
 0x1dc   :  { %15420 = vst [vmem:[#allocation256_spill] sm:$0xff] %v10363_v49  ;;  %15421 = vst [vmem:[#allocation257_spill] sm:$0xff] %v10366_v32  ;;  %v355_v55 = vld [vmem:[%s14182_s2 + $0x818] sm:$0xff] }
 0x1dd   :  { %4488 = vmatpush1.bf16.msra.mxu0 %v10333_v34  ;;  %15419 = vst [vmem:[#allocation255_spill] sm:$0xff] %v10361_v26  ;;  %15422 = vst [vmem:[#allocation258_spill] sm:$0xff] %v10381_v24  ;;  %v354_v34 = vld [vmem:[%s14182_s2 + $0x810] sm:$0xff] }
 0x1de   :  { %4570 = vmatpush1.bf16.msra.mxu1 %v10337_v47  ;;  %4489 = vmatprep.subr.bf16.mxu0 %v10339_v4  ;;  %v10387_v4 = vcombine.high %v338_v3, %v346_v1  ;;  %v10390_v47 = vcombine.high %v339_v18, %v347_v2 }
 0x1df   :  { %4571 = vmatprep.subr.bf16.mxu1 %v10342_v41  ;;  %v10385_v41 = vcombine.low %v323_v40, %v331_v60  ;;  %v363_v40 = vld [vmem:[%s14182_s2 + $0x858] sm:$0xff]  ;;  %v10405_v60 = vcombine.low %v338_v3, %v346_v1  ;;  %v370_v3 = vld [vmem:[%s14182_s2 + $0x890] sm:$0xff] }
 0x1e0   :  { %15424 = vst [vmem:[#allocation260_spill] sm:$0xff] %v10387_v4  ;;  %15425 = vst [vmem:[#allocation261_spill] sm:$0xff] %v10390_v47  ;;  %v378_v1 = vld [vmem:[%s14182_s2 + $0x8d0] sm:$0xff] }
 0x1e1   :  { %4490 = vmatpush1.bf16.msra.mxu0 %v10357_v31  ;;  %15423 = vst [vmem:[#allocation259_spill] sm:$0xff] %v10385_v41  ;;  %15426 = vst [vmem:[#allocation262_spill] sm:$0xff] %v10405_v60  ;;  %v10416_v31 = vcombine.high %v355_v55, %v363_v40 }
 0x1e2   :  { %4572 = vmatpush1.bf16.msra.mxu1 %v10361_v26  ;;  %4491 = vmatprep.subr.bf16.mxu0 %v10363_v49  ;;  %v10411_v49 = vcombine.high %v354_v34, %v362_v38  ;;  %v10413_v26 = vpop.f32.mrb[52].mxu1 }
 0x1e3   :  { %4573 = vmatprep.subr.bf16.mxu1 %v10366_v32  ;;  %v10409_v32 = vcombine.low %v339_v18, %v347_v2  ;;  %15429 = vst [vmem:[#allocation265_spill] sm:$0xff] %v10413_v26  ;;  %15430 = vst [vmem:[#allocation266_spill] sm:$0xff] %v10416_v31  ;;  %v10418_v14 = vpop.f32.mrb[53].mxu1  ;;  %v10429_v2 = vcombine.low %v354_v34, %v362_v38  ;;  %v371_v26 = vld [vmem:[%s14182_s2 + $0x898] sm:$0xff]  ;;  %v10444_v34 = vcombine.high %v370_v3, %v378_v1  ;;  %v386_v38 = vld [vmem:[%s14182_s2 + $0x910] sm:$0xff] }
 0x1e4   :  { %15428 = vst [vmem:[#allocation264_spill] sm:$0xff] %v10411_v49  ;;  %15431 = vst [vmem:[#allocation267_spill] sm:$0xff] %v10418_v14  ;;  %v10426_v18 = vpop.f32.mrb[54].mxu1  ;;  %v379_v14 = vld [vmem:[%s14182_s2 + $0x8d8] sm:$0xff] }
 0x1e5   :  { %4492 = vmatpush1.bf16.msra.mxu0 %v10381_v24  ;;  %15427 = vst [vmem:[#allocation263_spill] sm:$0xff] %v10409_v32  ;;  %15432 = vst [vmem:[#allocation268_spill] sm:$0xff] %v10426_v18  ;;  %v394_v18 = vld [vmem:[%s14182_s2 + $0x950] sm:$0xff] }
 0x1e6   :  { %4574 = vmatpush1.bf16.msra.mxu1 %v10385_v41  ;;  %4493 = vmatprep.subr.bf16.mxu0 %v10387_v4  ;;  %15433 = vst [vmem:[#allocation269_spill] sm:$0xff] %v10429_v2  ;;  %v10441_v4 = vcombine.low %v355_v55, %v363_v40  ;;  %15436 = vst [vmem:[#allocation272_spill] sm:$0xff] %v10444_v34  ;;  %v387_v55 = vld [vmem:[%s14182_s2 + $0x918] sm:$0xff] }
 0x1e7   :  { %4575 = vmatprep.subr.bf16.mxu1 %v10390_v47  ;;  %v10437_v47 = vpop.f32.mrb[55].mxu1  ;;  %v395_v40 = vld [vmem:[%s14182_s2 + $0x958] sm:$0xff] }
 0x1e8   :  { %15434 = vst [vmem:[#allocation270_spill] sm:$0xff] %v10437_v47  ;;  %15435 = vst [vmem:[#allocation271_spill] sm:$0xff] %v10441_v4  ;;  %v10453_v47 = vcombine.high %v371_v26, %v379_v14 }
 0x1e9   :  { %4494 = vmatpush1.bf16.msra.mxu0 %v10405_v60  ;;  %v10473_v60 = vcombine.high %v387_v55, %v395_v40 }
 0x1ea   :  { %4576 = vmatpush1.bf16.msra.mxu1 %v10409_v32  ;;  %4504 = vmatprep.subr.bf16.mxu0 %v10411_v49  ;;  %15437 = vst [vmem:[#allocation273_spill] sm:$0xff] %v10453_v47  ;;  %v10467_v49 = vcombine.low %v371_v26, %v379_v14  ;;  %v10469_v32 = vcombine.high %v386_v38, %v394_v18  ;;  %v403_v14 = vld [vmem:[%s14182_s2 + $0x998] sm:$0xff] }
 0x1eb   :  { %4586 = vmatprep.subr.bf16.mxu1 %v10416_v31  ;;  %v10463_v31 = vcombine.low %v370_v3, %v378_v1  ;;  %15441 = vst [vmem:[#allocation277_spill] sm:$0xff] %v10473_v60  ;;  %v410_v3 = vld [vmem:[%s14182_s2 + $0x9d0] sm:$0xff]  ;;  %v10481_v1 = vpop.f32.mrb[56].mxu1  ;;  %v411_v26 = vld [vmem:[%s14182_s2 + $0x9d8] sm:$0xff] }
 0x1ec   :  { %4496 = vmatmul.mubr.bf16.vlgmr.msra.gmra.mrb[68].mxu0 %v9624_v23  ;;  %15439 = vst [vmem:[#allocation275_spill] sm:$0xff] %v10467_v49  ;;  %15440 = vst [vmem:[#allocation276_spill] sm:$0xff] %v10469_v32  ;;  %v10506_v22 = vcombine.high %v403_v14, %v411_v26 }
 0x1ed   :  { %4578 = vmatmul.mubr.bf16.vlgmr.msra.gmra.mrb[68].mxu1 %v9624_v23  ;;  %4505 = vmatpush1.bf16.msra.mxu0 %v10429_v2  ;;  %15438 = vst [vmem:[#allocation274_spill] sm:$0xff] %v10463_v31  ;;  %v402_v2 = vld [vmem:[%s14182_s2 + $0x990] sm:$0xff]  ;;  %15442 = vst [vmem:[#allocation278_spill] sm:$0xff] %v10481_v1  ;;  %v10499_v1 = vcombine.low %v387_v55, %v395_v40  ;;  %v419_v55 = vld [vmem:[%s14182_s2 + $0xa18] sm:$0xff] }
 0x1ee   :  { %4536 = vmatprep.mubr.bf16.mxu0 %v9644_v8  ;;  %4587 = vmatpush1.bf16.msra.mxu1 %v10441_v4  ;;  %v10493_v4 = vcombine.low %v386_v38, %v394_v18  ;;  %15449 = vst [vmem:[#allocation285_spill] sm:$0xff] %v10506_v22  ;;  %v418_v18 = vld [vmem:[%s14182_s2 + $0xa10] sm:$0xff]  ;;  %v427_v40 = vld [vmem:[%s14182_s2 + $0xa58] sm:$0xff] }
 0x1ef   :  { %4618 = vmatprep.mubr.bf16.mxu1 %v9644_v8  ;;  %4506 = vmatprep.subr.bf16.mxu0 %v10444_v34  ;;  %v10490_v34 = vpop.f32.mrb[57].mxu1  ;;  %15446 = vst [vmem:[#allocation282_spill] sm:$0xff] %v10499_v1  ;;  %v426_v38 = vld [vmem:[%s14182_s2 + $0xa50] sm:$0xff] }
 0x1f0   :  { %4588 = vmatprep.subr.bf16.mxu1 %v10453_v47  ;;  %15443 = vst [vmem:[#allocation279_spill] sm:$0xff] %v10490_v34  ;;  %15444 = vst [vmem:[#allocation280_spill] sm:$0xff] %v10493_v4  ;;  %v10495_v41 = vpop.f32.mrb[58].mxu1  ;;  %v10501_v47 = vcombine.high %v402_v2, %v410_v3  ;;  %v10525_v34 = vcombine.low %v403_v14, %v411_v26  ;;  %v435_v14 = vld [vmem:[%s14182_s2 + $0xa98] sm:$0xff] }
 0x1f1   :  { %4507 = vmatpush1.bf16.msra.mxu0 %v10463_v31  ;;  %15445 = vst [vmem:[#allocation281_spill] sm:$0xff] %v10495_v41  ;;  %v10503_v24 = vpop.f32.mrb[59].mxu1  ;;  %v10527_v41 = vcombine.high %v418_v18, %v426_v38  ;;  %v443_v26 = vld [vmem:[%s14182_s2 + $0xad8] sm:$0xff] }
 0x1f2   :  { %4589 = vmatpush1.bf16.msra.mxu1 %v10467_v49  ;;  %4508 = vmatprep.subr.bf16.mxu0 %v10469_v32  ;;  %15447 = vst [vmem:[#allocation283_spill] sm:$0xff] %v10501_v47  ;;  %15448 = vst [vmem:[#allocation284_spill] sm:$0xff] %v10503_v24  ;;  %v10521_v24 = vcombine.low %v402_v2, %v410_v3  ;;  %v10532_v32 = vcombine.high %v419_v55, %v427_v40  ;;  %v442_v2 = vld [vmem:[%s14182_s2 + $0xad0] sm:$0xff] }
 0x1f3   :  { %4590 = vmatprep.subr.bf16.mxu1 %v10473_v60  ;;  %15451 = vst [vmem:[#allocation287_spill] sm:$0xff] %v10525_v34  ;;  %15452 = vst [vmem:[#allocation288_spill] sm:$0xff] %v10527_v41  ;;  %v10529_v60 = vpop.f32.mrb[60].mxu1  ;;  %v10558_v49 = vcombine.high %v435_v14, %v443_v26 }
 0x1f4   :  { %15450 = vst [vmem:[#allocation286_spill] sm:$0xff] %v10521_v24  ;;  %15453 = vst [vmem:[#allocation289_spill] sm:$0xff] %v10529_v60  ;;  %v10540_v3 = vpop.f32.mrb[61].mxu1 }
 0x1f5   :  { %4509 = vmatpush1.bf16.msra.mxu0 %v10493_v4  ;;  %15454 = vst [vmem:[#allocation290_spill] sm:$0xff] %v10532_v32  ;;  %v434_v4 = vld [vmem:[%s14182_s2 + $0xa90] sm:$0xff]  ;;  %15455 = vst [vmem:[#allocation291_spill] sm:$0xff] %v10540_v3  ;;  %v1668_v60 = vpop.f32.mrb[62].mxu1 }
 0x1f6   :  { %4591 = vmatpush1.bf16.msra.mxu1 %v10499_v1  ;;  %4510 = vmatprep.subr.bf16.mxu0 %v10501_v47  ;;  %v1669_v47 = vpop.f32.mrb[63].mxu1  ;;  %v10553_v1 = vcombine.low %v419_v55, %v427_v40  ;;  %v10555_v3 = vcombine.high %v434_v4, %v442_v2  ;;  %15459 = vst [vmem:[#allocation295_spill] sm:$0xff] %v10558_v49  ;;  %v450_v60 = vld [vmem:[%s14182_s2 + $0xb10] sm:$0xff] }
 0x1f7   :  { %4592 = vmatprep.subr.bf16.mxu1 %v10506_v22  ;;  %v10549_v22 = vcombine.low %v418_v18, %v426_v38  ;;  %v458_v47 = vld [vmem:[%s14182_s2 + $0xb50] sm:$0xff]  ;;  %v451_v18 = vld [vmem:[%s14182_s2 + $0xb18] sm:$0xff]  ;;  %v10573_v55 = vcombine.low %v434_v4, %v442_v2  ;;  %v10577_v40 = vcombine.low %v435_v14, %v443_v26 }
 0x1f8   :  { %15457 = vst [vmem:[#allocation293_spill] sm:$0xff] %v10553_v1  ;;  %15458 = vst [vmem:[#allocation294_spill] sm:$0xff] %v10555_v3  ;;  %v459_v38 = vld [vmem:[%s14182_s2 + $0xb58] sm:$0xff]  ;;  %v474_v4 = vld [vmem:[%s14182_s2 + $0xbd0] sm:$0xff]  ;;  %v10597_v26 = vcombine.low %v450_v60, %v458_v47 }
 0x1f9   :  { %4511 = vmatpush1.bf16.msra.mxu0 %v10521_v24  ;;  %15456 = vst [vmem:[#allocation292_spill] sm:$0xff] %v10549_v22  ;;  %15460 = vst [vmem:[#allocation296_spill] sm:$0xff] %v10573_v55  ;;  %v467_v2 = vld [vmem:[%s14182_s2 + $0xb98] sm:$0xff] }
 0x1fa   :  { %4593 = vmatpush1.bf16.msra.mxu1 %v10525_v34  ;;  %4512 = vmatprep.subr.bf16.mxu0 %v10527_v41  ;;  %15461 = vst [vmem:[#allocation297_spill] sm:$0xff] %v10577_v40  ;;  %v10582_v41 = vcombine.high %v451_v18, %v459_v38  ;;  %v466_v34 = vld [vmem:[%s14182_s2 + $0xb90] sm:$0xff]  ;;  %v475_v14 = vld [vmem:[%s14182_s2 + $0xbd8] sm:$0xff]  ;;  %15464 = vst [vmem:[#allocation300_spill] sm:$0xff] %v10597_v26 }
 0x1fb   :  { %4594 = vmatprep.subr.bf16.mxu1 %v10532_v32  ;;  %v10579_v32 = vcombine.high %v450_v60, %v458_v47  ;;  %v490_v60 = vld [vmem:[%s14182_s2 + $0xc50] sm:$0xff]  ;;  %v483_v47 = vld [vmem:[%s14182_s2 + $0xc18] sm:$0xff] }
 0x1fc   :  { %15463 = vst [vmem:[#allocation299_spill] sm:$0xff] %v10582_v41 }
 0x1fd   :  { %4513 = vmatpush1.bf16.msra.mxu0 %v10549_v22  ;;  %15462 = vst [vmem:[#allocation298_spill] sm:$0xff] %v10579_v32  ;;  %v482_v22 = vld [vmem:[%s14182_s2 + $0xc10] sm:$0xff] }
 0x1fe   :  { %4595 = vmatpush1.bf16.msra.mxu1 %v10553_v1  ;;  %4514 = vmatprep.subr.bf16.mxu0 %v10555_v3  ;;  %v10603_v3 = vcombine.high %v466_v34, %v474_v4  ;;  %v10606_v1 = vcombine.high %v467_v2, %v475_v14 }
 0x1ff   :  { %4596 = vmatprep.subr.bf16.mxu1 %v10558_v49  ;;  %v10601_v49 = vcombine.low %v451_v18, %v459_v38  ;;  %v491_v18 = vld [vmem:[%s14182_s2 + $0xc58] sm:$0xff]  ;;  %v10621_v38 = vcombine.low %v466_v34, %v474_v4  ;;  %v506_v34 = vld [vmem:[%s14182_s2 + $0xcd0] sm:$0xff] }
 0x200   :  { %15466 = vst [vmem:[#allocation302_spill] sm:$0xff] %v10603_v3  ;;  %15467 = vst [vmem:[#allocation303_spill] sm:$0xff] %v10606_v1  ;;  %v499_v4 = vld [vmem:[%s14182_s2 + $0xc98] sm:$0xff] }
 0x201   :  { %4515 = vmatpush1.bf16.msra.mxu0 %v10573_v55  ;;  %15465 = vst [vmem:[#allocation301_spill] sm:$0xff] %v10601_v49  ;;  %15468 = vst [vmem:[#allocation304_spill] sm:$0xff] %v10621_v38  ;;  %v498_v55 = vld [vmem:[%s14182_s2 + $0xc90] sm:$0xff] }
 0x202   :  { %4597 = vmatpush1.bf16.msra.mxu1 %v10577_v40  ;;  %4516 = vmatprep.subr.bf16.mxu0 %v10579_v32  ;;  %v10627_v32 = vcombine.high %v482_v22, %v490_v60  ;;  %v10630_v40 = vcombine.high %v483_v47, %v491_v18 }
 0x203   :  { %4598 = vmatprep.subr.bf16.mxu1 %v10582_v41  ;;  %v10625_v41 = vcombine.low %v467_v2, %v475_v14  ;;  %v507_v2 = vld [vmem:[%s14182_s2 + $0xcd8] sm:$0xff]  ;;  %v10645_v14 = vcombine.low %v482_v22, %v490_v60  ;;  %v522_v22 = vld [vmem:[%s14182_s2 + $0xd50] sm:$0xff] }
 0x204   :  { %15470 = vst [vmem:[#allocation306_spill] sm:$0xff] %v10627_v32  ;;  %15471 = vst [vmem:[#allocation307_spill] sm:$0xff] %v10630_v40  ;;  %v515_v60 = vld [vmem:[%s14182_s2 + $0xd18] sm:$0xff] }
 0x205   :  { %4517 = vmatpush1.bf16.msra.mxu0 %v10597_v26  ;;  %15469 = vst [vmem:[#allocation305_spill] sm:$0xff] %v10625_v41  ;;  %15472 = vst [vmem:[#allocation308_spill] sm:$0xff] %v10645_v14  ;;  %v514_v26 = vld [vmem:[%s14182_s2 + $0xd10] sm:$0xff] }
 0x206   :  { %4599 = vmatpush1.bf16.msra.mxu1 %v10601_v49  ;;  %4518 = vmatprep.subr.bf16.mxu0 %v10603_v3  ;;  %v10651_v3 = vcombine.high %v498_v55, %v506_v34  ;;  %v10654_v49 = vcombine.high %v499_v4, %v507_v2 }
 0x207   :  { %4600 = vmatprep.subr.bf16.mxu1 %v10606_v1  ;;  %v10649_v1 = vcombine.low %v483_v47, %v491_v18  ;;  %v523_v47 = vld [vmem:[%s14182_s2 + $0xd58] sm:$0xff]  ;;  %v10669_v18 = vcombine.low %v498_v55, %v506_v34  ;;  %v538_v55 = vld [vmem:[%s14182_s2 + $0xdd0] sm:$0xff] }
 0x208   :  { %15474 = vst [vmem:[#allocation310_spill] sm:$0xff] %v10651_v3  ;;  %15475 = vst [vmem:[#allocation311_spill] sm:$0xff] %v10654_v49  ;;  %v531_v34 = vld [vmem:[%s14182_s2 + $0xd98] sm:$0xff] }
 0x209   :  { %4519 = vmatpush1.bf16.msra.mxu0 %v10621_v38  ;;  %15473 = vst [vmem:[#allocation309_spill] sm:$0xff] %v10649_v1  ;;  %15476 = vst [vmem:[#allocation312_spill] sm:$0xff] %v10669_v18  ;;  %v530_v38 = vld [vmem:[%s14182_s2 + $0xd90] sm:$0xff] }
 0x20a   :  { %4601 = vmatpush1.bf16.msra.mxu1 %v10625_v41  ;;  %4520 = vmatprep.subr.bf16.mxu0 %v10627_v32  ;;  %v10675_v32 = vcombine.high %v514_v26, %v522_v22  ;;  %v10678_v41 = vcombine.high %v515_v60, %v523_v47 }
 0x20b   :  { %4602 = vmatprep.subr.bf16.mxu1 %v10630_v40  ;;  %v10673_v40 = vcombine.low %v499_v4, %v507_v2  ;;  %v539_v4 = vld [vmem:[%s14182_s2 + $0xdd8] sm:$0xff]  ;;  %v10693_v2 = vcombine.low %v514_v26, %v522_v22  ;;  %v554_v26 = vld [vmem:[%s14182_s2 + $0xe50] sm:$0xff] }
 0x20c   :  { %15478 = vst [vmem:[#allocation314_spill] sm:$0xff] %v10675_v32  ;;  %15479 = vst [vmem:[#allocation315_spill] sm:$0xff] %v10678_v41  ;;  %v547_v22 = vld [vmem:[%s14182_s2 + $0xe18] sm:$0xff] }
 0x20d   :  { %4521 = vmatpush1.bf16.msra.mxu0 %v10645_v14  ;;  %15477 = vst [vmem:[#allocation313_spill] sm:$0xff] %v10673_v40  ;;  %15480 = vst [vmem:[#allocation316_spill] sm:$0xff] %v10693_v2  ;;  %v546_v14 = vld [vmem:[%s14182_s2 + $0xe10] sm:$0xff] }
 0x20e   :  { %4603 = vmatpush1.bf16.msra.mxu1 %v10649_v1  ;;  %4522 = vmatprep.subr.bf16.mxu0 %v10651_v3  ;;  %v10699_v3 = vcombine.high %v530_v38, %v538_v55  ;;  %v10702_v1 = vcombine.high %v531_v34, %v539_v4 }
 0x20f   :  { %4604 = vmatprep.subr.bf16.mxu1 %v10654_v49  ;;  %v10697_v49 = vcombine.low %v515_v60, %v523_v47  ;;  %v555_v60 = vld [vmem:[%s14182_s2 + $0xe58] sm:$0xff]  ;;  %v10717_v47 = vcombine.low %v530_v38, %v538_v55  ;;  %v570_v38 = vld [vmem:[%s14182_s2 + $0xed0] sm:$0xff] }
 0x210   :  { %15482 = vst [vmem:[#allocation318_spill] sm:$0xff] %v10699_v3  ;;  %15483 = vst [vmem:[#allocation319_spill] sm:$0xff] %v10702_v1  ;;  %v563_v55 = vld [vmem:[%s14182_s2 + $0xe98] sm:$0xff] }
 0x211   :  { %4523 = vmatpush1.bf16.msra.mxu0 %v10669_v18  ;;  %15481 = vst [vmem:[#allocation317_spill] sm:$0xff] %v10697_v49  ;;  %15484 = vst [vmem:[#allocation320_spill] sm:$0xff] %v10717_v47  ;;  %v562_v18 = vld [vmem:[%s14182_s2 + $0xe90] sm:$0xff] }
 0x212   :  { %4605 = vmatpush1.bf16.msra.mxu1 %v10673_v40  ;;  %4524 = vmatprep.subr.bf16.mxu0 %v10675_v32  ;;  %v10723_v32 = vcombine.high %v546_v14, %v554_v26  ;;  %v10726_v40 = vcombine.high %v547_v22, %v555_v60 }
 0x213   :  { %4606 = vmatprep.subr.bf16.mxu1 %v10678_v41  ;;  %v10721_v41 = vcombine.low %v531_v34, %v539_v4  ;;  %v571_v34 = vld [vmem:[%s14182_s2 + $0xed8] sm:$0xff]  ;;  %v10741_v4 = vcombine.low %v546_v14, %v554_v26  ;;  %v586_v14 = vld [vmem:[%s14182_s2 + $0xf50] sm:$0xff] }
 0x214   :  { %15486 = vst [vmem:[#allocation322_spill] sm:$0xff] %v10723_v32  ;;  %15487 = vst [vmem:[#allocation323_spill] sm:$0xff] %v10726_v40  ;;  %v579_v26 = vld [vmem:[%s14182_s2 + $0xf18] sm:$0xff] }
 0x215   :  { %4525 = vmatpush1.bf16.msra.mxu0 %v10693_v2  ;;  %15485 = vst [vmem:[#allocation321_spill] sm:$0xff] %v10721_v41  ;;  %15488 = vst [vmem:[#allocation324_spill] sm:$0xff] %v10741_v4  ;;  %v578_v2 = vld [vmem:[%s14182_s2 + $0xf10] sm:$0xff] }
 0x216   :  { %4607 = vmatpush1.bf16.msra.mxu1 %v10697_v49  ;;  %4526 = vmatprep.subr.bf16.mxu0 %v10699_v3  ;;  %v10747_v3 = vcombine.high %v562_v18, %v570_v38  ;;  %v10750_v49 = vcombine.high %v563_v55, %v571_v34 }
 0x217   :  { %4608 = vmatprep.subr.bf16.mxu1 %v10702_v1  ;;  %v10745_v1 = vcombine.low %v547_v22, %v555_v60  ;;  %v587_v22 = vld [vmem:[%s14182_s2 + $0xf58] sm:$0xff]  ;;  %v10765_v60 = vcombine.low %v562_v18, %v570_v38  ;;  %v602_v18 = vld [vmem:[%s14182_s2 + $0xfd0] sm:$0xff] }
 0x218   :  { %15490 = vst [vmem:[#allocation326_spill] sm:$0xff] %v10747_v3  ;;  %15491 = vst [vmem:[#allocation327_spill] sm:$0xff] %v10750_v49  ;;  %v595_v38 = vld [vmem:[%s14182_s2 + $0xf98] sm:$0xff] }
 0x219   :  { %4527 = vmatpush1.bf16.msra.mxu0 %v10717_v47  ;;  %15489 = vst [vmem:[#allocation325_spill] sm:$0xff] %v10745_v1  ;;  %15492 = vst [vmem:[#allocation328_spill] sm:$0xff] %v10765_v60  ;;  %v594_v47 = vld [vmem:[%s14182_s2 + $0xf90] sm:$0xff] }
 0x21a   :  { %4609 = vmatpush1.bf16.msra.mxu1 %v10721_v41  ;;  %4528 = vmatprep.subr.bf16.mxu0 %v10723_v32  ;;  %v10771_v32 = vcombine.high %v578_v2, %v586_v14  ;;  %v10774_v41 = vcombine.high %v579_v26, %v587_v22 }
 0x21b   :  { %4610 = vmatprep.subr.bf16.mxu1 %v10726_v40  ;;  %v10769_v40 = vcombine.low %v563_v55, %v571_v34  ;;  %v603_v55 = vld [vmem:[%s14182_s2 + $0xfd8] sm:$0xff]  ;;  %v10789_v34 = vcombine.low %v578_v2, %v586_v14  ;;  %v108_v2 = vld [vmem:[%s14182_s2 + $0x60] sm:$0xff]  ;;  %v101_v14 = vld [vmem:[%s14182_s2 + $0x28] sm:$0xff] }
 0x21c   :  { %15494 = vst [vmem:[#allocation330_spill] sm:$0xff] %v10771_v32  ;;  %15495 = vst [vmem:[#allocation331_spill] sm:$0xff] %v10774_v41 }
 0x21d   :  { %4529 = vmatpush1.bf16.msra.mxu0 %v10741_v4  ;;  %15493 = vst [vmem:[#allocation329_spill] sm:$0xff] %v10769_v40  ;;  %15496 = vst [vmem:[#allocation332_spill] sm:$0xff] %v10789_v34  ;;  %v100_v4 = vld [vmem:[%s14182_s2 + $0x20] sm:$0xff] }
 0x21e   :  { %4611 = vmatpush1.bf16.msra.mxu1 %v10745_v1  ;;  %4530 = vmatprep.subr.bf16.mxu0 %v10747_v3  ;;  %v10795_v3 = vcombine.high %v594_v47, %v602_v18  ;;  %v10798_v1 = vcombine.high %v595_v38, %v603_v55 }
 0x21f   :  { %4612 = vmatprep.subr.bf16.mxu1 %v10750_v49  ;;  %v10793_v49 = vcombine.low %v579_v26, %v587_v22  ;;  %v109_v26 = vld [vmem:[%s14182_s2 + $0x68] sm:$0xff]  ;;  %v10813_v22 = vcombine.low %v594_v47, %v602_v18  ;;  %v124_v47 = vld [vmem:[%s14182_s2 + $0xe0] sm:$0xff]  ;;  %v10831_v18 = vcombine.low %v100_v4, %v108_v2 }
 0x220   :  { %15498 = vst [vmem:[#allocation334_spill] sm:$0xff] %v10795_v3  ;;  %15499 = vst [vmem:[#allocation335_spill] sm:$0xff] %v10798_v1 }
 0x221   :  { %4531 = vmatpush1.bf16.msra.mxu0 %v10765_v60  ;;  %15497 = vst [vmem:[#allocation333_spill] sm:$0xff] %v10793_v49  ;;  %15500 = vst [vmem:[#allocation336_spill] sm:$0xff] %v10813_v22  ;;  %v116_v60 = vld [vmem:[%s14182_s2 + $0xa0] sm:$0xff] }
 0x222   :  { %4613 = vmatpush1.bf16.msra.mxu1 %v10769_v40  ;;  %4532 = vmatprep.subr.bf16.mxu0 %v10771_v32  ;;  %v10819_v32 = vcombine.high %v100_v4, %v108_v2  ;;  %v10822_v40 = vcombine.high %v101_v14, %v109_v26  ;;  %15504 = vst [vmem:[#allocation340_spill] sm:$0xff] %v10831_v18  ;;  %v132_v4 = vld [vmem:[%s14182_s2 + $0x120] sm:$0xff] }
 0x223   :  { %4614 = vmatprep.subr.bf16.mxu1 %v10774_v41  ;;  %v10817_v41 = vcombine.low %v595_v38, %v603_v55  ;;  %v117_v38 = vld [vmem:[%s14182_s2 + $0xa8] sm:$0xff]  ;;  %v140_v2 = vld [vmem:[%s14182_s2 + $0x160] sm:$0xff] }
 0x224   :  { %15502 = vst [vmem:[#allocation338_spill] sm:$0xff] %v10819_v32  ;;  %15503 = vst [vmem:[#allocation339_spill] sm:$0xff] %v10822_v40  ;;  %v125_v55 = vld [vmem:[%s14182_s2 + $0xe8] sm:$0xff] }
 0x225   :  { %4533 = vmatpush1.bf16.msra.mxu0 %v10789_v34  ;;  %15501 = vst [vmem:[#allocation337_spill] sm:$0xff] %v10817_v41  ;;  %v164_v34 = vld [vmem:[%s14182_s2 + $0x220] sm:$0xff] }
 0x226   :  { %4615 = vmatpush1.bf16.msra.mxu1 %v10793_v49  ;;  %4534 = vmatprep.subr.bf16.mxu0 %v10795_v3  ;;  %v10844_v3 = vcombine.high %v116_v60, %v124_v47 }
 0x227   :  { %4616 = vmatprep.subr.bf16.mxu1 %v10798_v1  ;;  %v10841_v1 = vcombine.low %v101_v14, %v109_v26  ;;  %v133_v14 = vld [vmem:[%s14182_s2 + $0x128] sm:$0xff] }
 0x228   :  { %15506 = vst [vmem:[#allocation342_spill] sm:$0xff] %v10844_v3  ;;  %v141_v26 = vld [vmem:[%s14182_s2 + $0x168] sm:$0xff] }
 0x229   :  { %4535 = vmatpush1.bf16.msra.mxu0 %v10813_v22  ;;  %15505 = vst [vmem:[#allocation341_spill] sm:$0xff] %v10841_v1  ;;  %v10853_v22 = vcombine.high %v117_v38, %v125_v55  ;;  %v10873_v49 = vcombine.high %v133_v14, %v141_v26 }
 0x22a   :  { %4617 = vmatpush1.bf16.msra.mxu1 %v10817_v41  ;;  %4627 = vmatprep.subr.bf16.mxu0 %v10819_v32  ;;  %v10867_v32 = vcombine.low %v117_v38, %v125_v55  ;;  %v10869_v41 = vcombine.high %v132_v4, %v140_v2  ;;  %v157_v38 = vld [vmem:[%s14182_s2 + $0x1e8] sm:$0xff]  ;;  %v10889_v55 = vcombine.low %v132_v4, %v140_v2  ;;  %v172_v4 = vld [vmem:[%s14182_s2 + $0x260] sm:$0xff] }
 0x22b   :  { %4709 = vmatprep.subr.bf16.mxu1 %v10822_v40  ;;  %15507 = vst [vmem:[#allocation343_spill] sm:$0xff] %v10853_v22  ;;  %v10863_v40 = vcombine.low %v116_v60, %v124_v47  ;;  %15511 = vst [vmem:[#allocation347_spill] sm:$0xff] %v10873_v49  ;;  %v156_v60 = vld [vmem:[%s14182_s2 + $0x1e0] sm:$0xff]  ;;  %v149_v47 = vld [vmem:[%s14182_s2 + $0x1a8] sm:$0xff] }
 0x22c   :  { %4537 = vmatmul.mubr.bf16.vlgmr.msra.gmra.mrb[68].mxu0 %v10030_v30  ;;  %15509 = vst [vmem:[#allocation345_spill] sm:$0xff] %v10867_v32  ;;  %15510 = vst [vmem:[#allocation346_spill] sm:$0xff] %v10869_v41  ;;  %v165_v2 = vld [vmem:[%s14182_s2 + $0x228] sm:$0xff] }
 0x22d   :  { %4619 = vmatmul.mubr.bf16.vlgmr.msra.gmra.mrb[68].mxu1 %v10030_v30  ;;  %4628 = vmatpush1.bf16.msra.mxu0 %v10831_v18  ;;  %15508 = vst [vmem:[#allocation344_spill] sm:$0xff] %v10863_v40  ;;  %v148_v18 = vld [vmem:[%s14182_s2 + $0x1a0] sm:$0xff]  ;;  %15512 = vst [vmem:[#allocation348_spill] sm:$0xff] %v10889_v55 }
 0x22e   :  { %4659 = vmatprep.mubr.bf16.mxu0 %v9622_v0  ;;  %4710 = vmatpush1.bf16.msra.mxu1 %v10841_v1  ;;  %v10895_v1 = vcombine.high %v148_v18, %v156_v60 }
 0x22f   :  { %4741 = vmatprep.mubr.bf16.mxu1 %v9622_v0  ;;  %4629 = vmatprep.subr.bf16.mxu0 %v10844_v3  ;;  %v10893_v3 = vcombine.low %v133_v14, %v141_v26  ;;  %v173_v14 = vld [vmem:[%s14182_s2 + $0x268] sm:$0xff]  ;;  %v10913_v26 = vcombine.low %v148_v18, %v156_v60  ;;  %v188_v18 = vld [vmem:[%s14182_s2 + $0x2e0] sm:$0xff] }
 0x230   :  { %4711 = vmatprep.subr.bf16.mxu1 %v10853_v22  ;;  %15514 = vst [vmem:[#allocation350_spill] sm:$0xff] %v10895_v1  ;;  %v10898_v22 = vcombine.high %v149_v47, %v157_v38  ;;  %v181_v60 = vld [vmem:[%s14182_s2 + $0x2a8] sm:$0xff] }
 0x231   :  { %4630 = vmatpush1.bf16.msra.mxu0 %v10863_v40  ;;  %15513 = vst [vmem:[#allocation349_spill] sm:$0xff] %v10893_v3  ;;  %15516 = vst [vmem:[#allocation352_spill] sm:$0xff] %v10913_v26  ;;  %v180_v40 = vld [vmem:[%s14182_s2 + $0x2a0] sm:$0xff] }
 0x232   :  { %4712 = vmatpush1.bf16.msra.mxu1 %v10867_v32  ;;  %4631 = vmatprep.subr.bf16.mxu0 %v10869_v41  ;;  %15515 = vst [vmem:[#allocation351_spill] sm:$0xff] %v10898_v22  ;;  %v10919_v41 = vcombine.high %v164_v34, %v172_v4  ;;  %v10922_v32 = vcombine.high %v165_v2, %v173_v14 }
 0x233   :  { %4713 = vmatprep.subr.bf16.mxu1 %v10873_v49  ;;  %v10917_v49 = vcombine.low %v149_v47, %v157_v38  ;;  %v189_v47 = vld [vmem:[%s14182_s2 + $0x2e8] sm:$0xff]  ;;  %v10937_v38 = vcombine.low %v164_v34, %v172_v4  ;;  %v204_v34 = vld [vmem:[%s14182_s2 + $0x360] sm:$0xff] }
 0x234   :  { %15518 = vst [vmem:[#allocation354_spill] sm:$0xff] %v10919_v41  ;;  %15519 = vst [vmem:[#allocation355_spill] sm:$0xff] %v10922_v32  ;;  %v197_v4 = vld [vmem:[%s14182_s2 + $0x328] sm:$0xff] }
 0x235   :  { %4632 = vmatpush1.bf16.msra.mxu0 %v10889_v55  ;;  %15517 = vst [vmem:[#allocation353_spill] sm:$0xff] %v10917_v49  ;;  %15520 = vst [vmem:[#allocation356_spill] sm:$0xff] %v10937_v38  ;;  %v196_v55 = vld [vmem:[%s14182_s2 + $0x320] sm:$0xff] }
 0x236   :  { %4714 = vmatpush1.bf16.msra.mxu1 %v10893_v3  ;;  %4633 = vmatprep.subr.bf16.mxu0 %v10895_v1  ;;  %v10943_v1 = vcombine.high %v180_v40, %v188_v18  ;;  %v10946_v3 = vcombine.high %v181_v60, %v189_v47 }
 0x237   :  { %4715 = vmatprep.subr.bf16.mxu1 %v10898_v22  ;;  %v10941_v22 = vcombine.low %v165_v2, %v173_v14  ;;  %v205_v2 = vld [vmem:[%s14182_s2 + $0x368] sm:$0xff]  ;;  %v10961_v14 = vcombine.low %v180_v40, %v188_v18  ;;  %v220_v40 = vld [vmem:[%s14182_s2 + $0x3e0] sm:$0xff] }
 0x238   :  { %15522 = vst [vmem:[#allocation358_spill] sm:$0xff] %v10943_v1  ;;  %15523 = vst [vmem:[#allocation359_spill] sm:$0xff] %v10946_v3  ;;  %v213_v18 = vld [vmem:[%s14182_s2 + $0x3a8] sm:$0xff] }
 0x239   :  { %4634 = vmatpush1.bf16.msra.mxu0 %v10913_v26  ;;  %15521 = vst [vmem:[#allocation357_spill] sm:$0xff] %v10941_v22  ;;  %15524 = vst [vmem:[#allocation360_spill] sm:$0xff] %v10961_v14  ;;  %v212_v26 = vld [vmem:[%s14182_s2 + $0x3a0] sm:$0xff] }
 0x23a   :  { %4716 = vmatpush1.bf16.msra.mxu1 %v10917_v49  ;;  %4635 = vmatprep.subr.bf16.mxu0 %v10919_v41  ;;  %v10967_v41 = vcombine.high %v196_v55, %v204_v34  ;;  %v10970_v49 = vcombine.high %v197_v4, %v205_v2 }
 0x23b   :  { %4717 = vmatprep.subr.bf16.mxu1 %v10922_v32  ;;  %v10965_v32 = vcombine.low %v181_v60, %v189_v47  ;;  %v221_v60 = vld [vmem:[%s14182_s2 + $0x3e8] sm:$0xff]  ;;  %v10985_v47 = vcombine.low %v196_v55, %v204_v34  ;;  %v236_v55 = vld [vmem:[%s14182_s2 + $0x460] sm:$0xff] }
 0x23c   :  { %15526 = vst [vmem:[#allocation362_spill] sm:$0xff] %v10967_v41  ;;  %15527 = vst [vmem:[#allocation363_spill] sm:$0xff] %v10970_v49  ;;  %v229_v34 = vld [vmem:[%s14182_s2 + $0x428] sm:$0xff] }
 0x23d   :  { %4636 = vmatpush1.bf16.msra.mxu0 %v10937_v38  ;;  %15525 = vst [vmem:[#allocation361_spill] sm:$0xff] %v10965_v32  ;;  %15528 = vst [vmem:[#allocation364_spill] sm:$0xff] %v10985_v47  ;;  %v228_v38 = vld [vmem:[%s14182_s2 + $0x420] sm:$0xff] }
 0x23e   :  { %4718 = vmatpush1.bf16.msra.mxu1 %v10941_v22  ;;  %4637 = vmatprep.subr.bf16.mxu0 %v10943_v1  ;;  %v10991_v1 = vcombine.high %v212_v26, %v220_v40  ;;  %v10994_v22 = vcombine.high %v213_v18, %v221_v60 }
 0x23f   :  { %4719 = vmatprep.subr.bf16.mxu1 %v10946_v3  ;;  %v10989_v3 = vcombine.low %v197_v4, %v205_v2  ;;  %v237_v4 = vld [vmem:[%s14182_s2 + $0x468] sm:$0xff]  ;;  %v11009_v2 = vcombine.low %v212_v26, %v220_v40  ;;  %v252_v26 = vld [vmem:[%s14182_s2 + $0x4e0] sm:$0xff] }
 0x240   :  { %15530 = vst [vmem:[#allocation366_spill] sm:$0xff] %v10991_v1  ;;  %15531 = vst [vmem:[#allocation367_spill] sm:$0xff] %v10994_v22  ;;  %v245_v40 = vld [vmem:[%s14182_s2 + $0x4a8] sm:$0xff] }
 0x241   :  { %4638 = vmatpush1.bf16.msra.mxu0 %v10961_v14  ;;  %15529 = vst [vmem:[#allocation365_spill] sm:$0xff] %v10989_v3  ;;  %15532 = vst [vmem:[#allocation368_spill] sm:$0xff] %v11009_v2  ;;  %v244_v14 = vld [vmem:[%s14182_s2 + $0x4a0] sm:$0xff] }
 0x242   :  { %4720 = vmatpush1.bf16.msra.mxu1 %v10965_v32  ;;  %4639 = vmatprep.subr.bf16.mxu0 %v10967_v41  ;;  %v11015_v41 = vcombine.high %v228_v38, %v236_v55  ;;  %v11018_v32 = vcombine.high %v229_v34, %v237_v4 }
 0x243   :  { %4721 = vmatprep.subr.bf16.mxu1 %v10970_v49  ;;  %v11013_v49 = vcombine.low %v213_v18, %v221_v60  ;;  %v253_v18 = vld [vmem:[%s14182_s2 + $0x4e8] sm:$0xff]  ;;  %v11033_v60 = vcombine.low %v228_v38, %v236_v55  ;;  %v268_v38 = vld [vmem:[%s14182_s2 + $0x560] sm:$0xff] }
 0x244   :  { %15534 = vst [vmem:[#allocation370_spill] sm:$0xff] %v11015_v41  ;;  %15535 = vst [vmem:[#allocation371_spill] sm:$0xff] %v11018_v32  ;;  %v261_v55 = vld [vmem:[%s14182_s2 + $0x528] sm:$0xff] }
 0x245   :  { %4640 = vmatpush1.bf16.msra.mxu0 %v10985_v47  ;;  %15533 = vst [vmem:[#allocation369_spill] sm:$0xff] %v11013_v49  ;;  %15536 = vst [vmem:[#allocation372_spill] sm:$0xff] %v11033_v60  ;;  %v260_v47 = vld [vmem:[%s14182_s2 + $0x520] sm:$0xff] }
 0x246   :  { %4722 = vmatpush1.bf16.msra.mxu1 %v10989_v3  ;;  %4641 = vmatprep.subr.bf16.mxu0 %v10991_v1  ;;  %v11039_v1 = vcombine.high %v244_v14, %v252_v26  ;;  %v11042_v3 = vcombine.high %v245_v40, %v253_v18 }
 0x247   :  { %4723 = vmatprep.subr.bf16.mxu1 %v10994_v22  ;;  %v11037_v22 = vcombine.low %v229_v34, %v237_v4  ;;  %v269_v34 = vld [vmem:[%s14182_s2 + $0x568] sm:$0xff]  ;;  %v11057_v4 = vcombine.low %v244_v14, %v252_v26  ;;  %v284_v14 = vld [vmem:[%s14182_s2 + $0x5e0] sm:$0xff] }
 0x248   :  { %15538 = vst [vmem:[#allocation374_spill] sm:$0xff] %v11039_v1  ;;  %15539 = vst [vmem:[#allocation375_spill] sm:$0xff] %v11042_v3  ;;  %v277_v26 = vld [vmem:[%s14182_s2 + $0x5a8] sm:$0xff] }
 0x249   :  { %4642 = vmatpush1.bf16.msra.mxu0 %v11009_v2  ;;  %15537 = vst [vmem:[#allocation373_spill] sm:$0xff] %v11037_v22  ;;  %15540 = vst [vmem:[#allocation376_spill] sm:$0xff] %v11057_v4  ;;  %v276_v2 = vld [vmem:[%s14182_s2 + $0x5a0] sm:$0xff] }
 0x24a   :  { %4724 = vmatpush1.bf16.msra.mxu1 %v11013_v49  ;;  %4643 = vmatprep.subr.bf16.mxu0 %v11015_v41  ;;  %v11063_v41 = vcombine.high %v260_v47, %v268_v38  ;;  %v11066_v49 = vcombine.high %v261_v55, %v269_v34 }
 0x24b   :  { %4725 = vmatprep.subr.bf16.mxu1 %v11018_v32  ;;  %v11061_v32 = vcombine.low %v245_v40, %v253_v18  ;;  %v285_v40 = vld [vmem:[%s14182_s2 + $0x5e8] sm:$0xff]  ;;  %v11081_v18 = vcombine.low %v260_v47, %v268_v38  ;;  %v300_v47 = vld [vmem:[%s14182_s2 + $0x660] sm:$0xff] }
 0x24c   :  { %15542 = vst [vmem:[#allocation378_spill] sm:$0xff] %v11063_v41  ;;  %15543 = vst [vmem:[#allocation379_spill] sm:$0xff] %v11066_v49  ;;  %v293_v38 = vld [vmem:[%s14182_s2 + $0x628] sm:$0xff] }
 0x24d   :  { %4644 = vmatpush1.bf16.msra.mxu0 %v11033_v60  ;;  %15541 = vst [vmem:[#allocation377_spill] sm:$0xff] %v11061_v32  ;;  %15544 = vst [vmem:[#allocation380_spill] sm:$0xff] %v11081_v18  ;;  %v292_v60 = vld [vmem:[%s14182_s2 + $0x620] sm:$0xff] }
 0x24e   :  { %4726 = vmatpush1.bf16.msra.mxu1 %v11037_v22  ;;  %4645 = vmatprep.subr.bf16.mxu0 %v11039_v1  ;;  %v11087_v1 = vcombine.high %v276_v2, %v284_v14  ;;  %v11090_v22 = vcombine.high %v277_v26, %v285_v40 }
 0x24f   :  { %4727 = vmatprep.subr.bf16.mxu1 %v11042_v3  ;;  %v11085_v3 = vcombine.low %v261_v55, %v269_v34  ;;  %v301_v55 = vld [vmem:[%s14182_s2 + $0x668] sm:$0xff]  ;;  %v11105_v34 = vcombine.low %v276_v2, %v284_v14  ;;  %v316_v2 = vld [vmem:[%s14182_s2 + $0x6e0] sm:$0xff] }
 0x250   :  { %15546 = vst [vmem:[#allocation382_spill] sm:$0xff] %v11087_v1  ;;  %15547 = vst [vmem:[#allocation383_spill] sm:$0xff] %v11090_v22  ;;  %v309_v14 = vld [vmem:[%s14182_s2 + $0x6a8] sm:$0xff] }
 0x251   :  { %4646 = vmatpush1.bf16.msra.mxu0 %v11057_v4  ;;  %15545 = vst [vmem:[#allocation381_spill] sm:$0xff] %v11085_v3  ;;  %15548 = vst [vmem:[#allocation384_spill] sm:$0xff] %v11105_v34  ;;  %v308_v4 = vld [vmem:[%s14182_s2 + $0x6a0] sm:$0xff] }
 0x252   :  { %4728 = vmatpush1.bf16.msra.mxu1 %v11061_v32  ;;  %4647 = vmatprep.subr.bf16.mxu0 %v11063_v41  ;;  %v11111_v41 = vcombine.high %v292_v60, %v300_v47  ;;  %v11114_v32 = vcombine.high %v293_v38, %v301_v55 }
 0x253   :  { %4729 = vmatprep.subr.bf16.mxu1 %v11066_v49  ;;  %v11109_v49 = vcombine.low %v277_v26, %v285_v40  ;;  %v317_v26 = vld [vmem:[%s14182_s2 + $0x6e8] sm:$0xff]  ;;  %v11129_v40 = vcombine.low %v292_v60, %v300_v47  ;;  %v332_v60 = vld [vmem:[%s14182_s2 + $0x760] sm:$0xff] }
 0x254   :  { %15550 = vst [vmem:[#allocation386_spill] sm:$0xff] %v11111_v41  ;;  %15551 = vst [vmem:[#allocation387_spill] sm:$0xff] %v11114_v32  ;;  %v325_v47 = vld [vmem:[%s14182_s2 + $0x728] sm:$0xff] }
 0x255   :  { %4648 = vmatpush1.bf16.msra.mxu0 %v11081_v18  ;;  %15549 = vst [vmem:[#allocation385_spill] sm:$0xff] %v11109_v49  ;;  %15552 = vst [vmem:[#allocation388_spill] sm:$0xff] %v11129_v40  ;;  %v324_v18 = vld [vmem:[%s14182_s2 + $0x720] sm:$0xff] }
 0x256   :  { %4730 = vmatpush1.bf16.msra.mxu1 %v11085_v3  ;;  %4649 = vmatprep.subr.bf16.mxu0 %v11087_v1  ;;  %v11135_v1 = vcombine.high %v308_v4, %v316_v2  ;;  %v11138_v3 = vcombine.high %v309_v14, %v317_v26 }
 0x257   :  { %4731 = vmatprep.subr.bf16.mxu1 %v11090_v22  ;;  %v11133_v22 = vcombine.low %v293_v38, %v301_v55  ;;  %v333_v38 = vld [vmem:[%s14182_s2 + $0x768] sm:$0xff]  ;;  %v11153_v55 = vcombine.low %v308_v4, %v316_v2  ;;  %v348_v4 = vld [vmem:[%s14182_s2 + $0x7e0] sm:$0xff] }
 0x258   :  { %15554 = vst [vmem:[#allocation390_spill] sm:$0xff] %v11135_v1  ;;  %15555 = vst [vmem:[#allocation391_spill] sm:$0xff] %v11138_v3  ;;  %v341_v2 = vld [vmem:[%s14182_s2 + $0x7a8] sm:$0xff] }
 0x259   :  { %4650 = vmatpush1.bf16.msra.mxu0 %v11105_v34  ;;  %15553 = vst [vmem:[#allocation389_spill] sm:$0xff] %v11133_v22  ;;  %15556 = vst [vmem:[#allocation392_spill] sm:$0xff] %v11153_v55  ;;  %v340_v34 = vld [vmem:[%s14182_s2 + $0x7a0] sm:$0xff] }
 0x25a   :  { %4732 = vmatpush1.bf16.msra.mxu1 %v11109_v49  ;;  %4651 = vmatprep.subr.bf16.mxu0 %v11111_v41  ;;  %v11159_v41 = vcombine.high %v324_v18, %v332_v60  ;;  %v11162_v49 = vcombine.high %v325_v47, %v333_v38 }
 0x25b   :  { %4733 = vmatprep.subr.bf16.mxu1 %v11114_v32  ;;  %v11157_v32 = vcombine.low %v309_v14, %v317_v26  ;;  %v349_v14 = vld [vmem:[%s14182_s2 + $0x7e8] sm:$0xff]  ;;  %v11177_v26 = vcombine.low %v324_v18, %v332_v60  ;;  %v364_v18 = vld [vmem:[%s14182_s2 + $0x860] sm:$0xff] }
 0x25c   :  { %15558 = vst [vmem:[#allocation394_spill] sm:$0xff] %v11159_v41  ;;  %15559 = vst [vmem:[#allocation395_spill] sm:$0xff] %v11162_v49  ;;  %v357_v60 = vld [vmem:[%s14182_s2 + $0x828] sm:$0xff] }
 0x25d   :  { %4652 = vmatpush1.bf16.msra.mxu0 %v11129_v40  ;;  %15557 = vst [vmem:[#allocation393_spill] sm:$0xff] %v11157_v32  ;;  %15560 = vst [vmem:[#allocation396_spill] sm:$0xff] %v11177_v26  ;;  %v356_v40 = vld [vmem:[%s14182_s2 + $0x820] sm:$0xff] }
 0x25e   :  { %4734 = vmatpush1.bf16.msra.mxu1 %v11133_v22  ;;  %4653 = vmatprep.subr.bf16.mxu0 %v11135_v1  ;;  %v11183_v1 = vcombine.high %v340_v34, %v348_v4  ;;  %v11186_v22 = vcombine.high %v341_v2, %v349_v14 }
 0x25f   :  { %4735 = vmatprep.subr.bf16.mxu1 %v11138_v3  ;;  %v11181_v3 = vcombine.low %v325_v47, %v333_v38  ;;  %v365_v47 = vld [vmem:[%s14182_s2 + $0x868] sm:$0xff]  ;;  %v11201_v38 = vcombine.low %v340_v34, %v348_v4  ;;  %v380_v34 = vld [vmem:[%s14182_s2 + $0x8e0] sm:$0xff]  ;;  %v11219_v4 = vcombine.low %v356_v40, %v364_v18 }
 0x260   :  { %15562 = vst [vmem:[#allocation398_spill] sm:$0xff] %v11183_v1  ;;  %15563 = vst [vmem:[#allocation399_spill] sm:$0xff] %v11186_v22 }
 0x261   :  { %4654 = vmatpush1.bf16.msra.mxu0 %v11153_v55  ;;  %15561 = vst [vmem:[#allocation397_spill] sm:$0xff] %v11181_v3  ;;  %15564 = vst [vmem:[#allocation400_spill] sm:$0xff] %v11201_v38  ;;  %v372_v55 = vld [vmem:[%s14182_s2 + $0x8a0] sm:$0xff] }
 0x262   :  { %4736 = vmatpush1.bf16.msra.mxu1 %v11157_v32  ;;  %4655 = vmatprep.subr.bf16.mxu0 %v11159_v41  ;;  %v11207_v41 = vcombine.high %v356_v40, %v364_v18  ;;  %v11210_v32 = vcombine.high %v357_v60, %v365_v47  ;;  %15568 = vst [vmem:[#allocation404_spill] sm:$0xff] %v11219_v4  ;;  %v388_v40 = vld [vmem:[%s14182_s2 + $0x920] sm:$0xff] }
 0x263   :  { %4737 = vmatprep.subr.bf16.mxu1 %v11162_v49  ;;  %v11205_v49 = vcombine.low %v341_v2, %v349_v14  ;;  %v373_v2 = vld [vmem:[%s14182_s2 + $0x8a8] sm:$0xff]  ;;  %v396_v18 = vld [vmem:[%s14182_s2 + $0x960] sm:$0xff] }
 0x264   :  { %15566 = vst [vmem:[#allocation402_spill] sm:$0xff] %v11207_v41  ;;  %15567 = vst [vmem:[#allocation403_spill] sm:$0xff] %v11210_v32  ;;  %v381_v14 = vld [vmem:[%s14182_s2 + $0x8e8] sm:$0xff] }
 0x265   :  { %4656 = vmatpush1.bf16.msra.mxu0 %v11177_v26  ;;  %15565 = vst [vmem:[#allocation401_spill] sm:$0xff] %v11205_v49  ;;  %v420_v26 = vld [vmem:[%s14182_s2 + $0xa20] sm:$0xff] }
 0x266   :  { %4738 = vmatpush1.bf16.msra.mxu1 %v11181_v3  ;;  %4657 = vmatprep.subr.bf16.mxu0 %v11183_v1  ;;  %v11232_v1 = vcombine.high %v372_v55, %v380_v34 }
 0x267   :  { %4739 = vmatprep.subr.bf16.mxu1 %v11186_v22  ;;  %v11229_v22 = vcombine.low %v357_v60, %v365_v47  ;;  %v389_v60 = vld [vmem:[%s14182_s2 + $0x928] sm:$0xff] }
 0x268   :  { %15570 = vst [vmem:[#allocation406_spill] sm:$0xff] %v11232_v1  ;;  %v397_v47 = vld [vmem:[%s14182_s2 + $0x968] sm:$0xff] }
 0x269   :  { %4658 = vmatpush1.bf16.msra.mxu0 %v11201_v38  ;;  %15569 = vst [vmem:[#allocation405_spill] sm:$0xff] %v11229_v22  ;;  %v11241_v38 = vcombine.high %v373_v2, %v381_v14  ;;  %v11261_v3 = vcombine.high %v389_v60, %v397_v47 }
 0x26a   :  { %4740 = vmatpush1.bf16.msra.mxu1 %v11205_v49  ;;  %4668 = vmatprep.subr.bf16.mxu0 %v11207_v41  ;;  %v11255_v41 = vcombine.low %v373_v2, %v381_v14  ;;  %v11257_v49 = vcombine.high %v388_v40, %v396_v18  ;;  %v413_v2 = vld [vmem:[%s14182_s2 + $0x9e8] sm:$0xff]  ;;  %v11277_v14 = vcombine.low %v388_v40, %v396_v18  ;;  %v428_v40 = vld [vmem:[%s14182_s2 + $0xa60] sm:$0xff] }
 0x26b   :  { %4750 = vmatprep.subr.bf16.mxu1 %v11210_v32  ;;  %15571 = vst [vmem:[#allocation407_spill] sm:$0xff] %v11241_v38  ;;  %v11251_v32 = vcombine.low %v372_v55, %v380_v34  ;;  %15575 = vst [vmem:[#allocation411_spill] sm:$0xff] %v11261_v3  ;;  %v412_v55 = vld [vmem:[%s14182_s2 + $0x9e0] sm:$0xff]  ;;  %v405_v34 = vld [vmem:[%s14182_s2 + $0x9a8] sm:$0xff] }
 0x26c   :  { %4660 = vmatmul.mubr.bf16.vlgmr.msra.gmra.mrb[72].mxu0 %v9624_v23  ;;  %15573 = vst [vmem:[#allocation409_spill] sm:$0xff] %v11255_v41  ;;  %15574 = vst [vmem:[#allocation410_spill] sm:$0xff] %v11257_v49  ;;  %v421_v18 = vld [vmem:[%s14182_s2 + $0xa28] sm:$0xff] }
 0x26d   :  { %4742 = vmatmul.mubr.bf16.vlgmr.msra.gmra.mrb[72].mxu1 %v9624_v23  ;;  %4669 = vmatpush1.bf16.msra.mxu0 %v11219_v4  ;;  %15572 = vst [vmem:[#allocation408_spill] sm:$0xff] %v11251_v32  ;;  %v404_v4 = vld [vmem:[%s14182_s2 + $0x9a0] sm:$0xff]  ;;  %15576 = vst [vmem:[#allocation412_spill] sm:$0xff] %v11277_v14 }
 0x26e   :  { %4700 = vmatprep.mubr.bf16.mxu0 %v9644_v8  ;;  %4751 = vmatpush1.bf16.msra.mxu1 %v11229_v22  ;;  %v11283_v22 = vcombine.high %v404_v4, %v412_v55 }
 0x26f   :  { %4782 = vmatprep.mubr.bf16.mxu1 %v9644_v8  ;;  %4670 = vmatprep.subr.bf16.mxu0 %v11232_v1  ;;  %v11281_v1 = vcombine.low %v389_v60, %v397_v47  ;;  %v429_v60 = vld [vmem:[%s14182_s2 + $0xa68] sm:$0xff]  ;;  %v11301_v47 = vcombine.low %v404_v4, %v412_v55  ;;  %v444_v4 = vld [vmem:[%s14182_s2 + $0xae0] sm:$0xff] }
 0x270   :  { %4752 = vmatprep.subr.bf16.mxu1 %v11241_v38  ;;  %15578 = vst [vmem:[#allocation414_spill] sm:$0xff] %v11283_v22  ;;  %v11286_v38 = vcombine.high %v405_v34, %v413_v2  ;;  %v437_v55 = vld [vmem:[%s14182_s2 + $0xaa8] sm:$0xff] }
 0x271   :  { %4671 = vmatpush1.bf16.msra.mxu0 %v11251_v32  ;;  %15577 = vst [vmem:[#allocation413_spill] sm:$0xff] %v11281_v1  ;;  %15580 = vst [vmem:[#allocation416_spill] sm:$0xff] %v11301_v47  ;;  %v436_v32 = vld [vmem:[%s14182_s2 + $0xaa0] sm:$0xff] }
 0x272   :  { %4753 = vmatpush1.bf16.msra.mxu1 %v11255_v41  ;;  %4672 = vmatprep.subr.bf16.mxu0 %v11257_v49  ;;  %15579 = vst [vmem:[#allocation415_spill] sm:$0xff] %v11286_v38  ;;  %v11307_v49 = vcombine.high %v420_v26, %v428_v40  ;;  %v11310_v41 = vcombine.high %v421_v18, %v429_v60 }
 0x273   :  { %4754 = vmatprep.subr.bf16.mxu1 %v11261_v3  ;;  %v11305_v3 = vcombine.low %v405_v34, %v413_v2  ;;  %v445_v34 = vld [vmem:[%s14182_s2 + $0xae8] sm:$0xff]  ;;  %v11325_v2 = vcombine.low %v420_v26, %v428_v40  ;;  %v460_v26 = vld [vmem:[%s14182_s2 + $0xb60] sm:$0xff] }
 0x274   :  { %15582 = vst [vmem:[#allocation418_spill] sm:$0xff] %v11307_v49  ;;  %15583 = vst [vmem:[#allocation419_spill] sm:$0xff] %v11310_v41  ;;  %v453_v40 = vld [vmem:[%s14182_s2 + $0xb28] sm:$0xff] }
 0x275   :  { %4673 = vmatpush1.bf16.msra.mxu0 %v11277_v14  ;;  %15581 = vst [vmem:[#allocation417_spill] sm:$0xff] %v11305_v3  ;;  %15584 = vst [vmem:[#allocation420_spill] sm:$0xff] %v11325_v2  ;;  %v452_v14 = vld [vmem:[%s14182_s2 + $0xb20] sm:$0xff] }
 0x276   :  { %4755 = vmatpush1.bf16.msra.mxu1 %v11281_v1  ;;  %4674 = vmatprep.subr.bf16.mxu0 %v11283_v22  ;;  %v11331_v22 = vcombine.high %v436_v32, %v444_v4  ;;  %v11334_v1 = vcombine.high %v437_v55, %v445_v34 }
 0x277   :  { %4756 = vmatprep.subr.bf16.mxu1 %v11286_v38  ;;  %v11329_v38 = vcombine.low %v421_v18, %v429_v60  ;;  %v461_v18 = vld [vmem:[%s14182_s2 + $0xb68] sm:$0xff]  ;;  %v11349_v60 = vcombine.low %v436_v32, %v444_v4  ;;  %v476_v32 = vld [vmem:[%s14182_s2 + $0xbe0] sm:$0xff] }
 0x278   :  { %15586 = vst [vmem:[#allocation422_spill] sm:$0xff] %v11331_v22  ;;  %15587 = vst [vmem:[#allocation423_spill] sm:$0xff] %v11334_v1  ;;  %v11358_v24 = vcombine.high %v453_v40, %v461_v18  ;;  %v11389_v39 = vcombine.low %v453_v40, %v461_v18 }
 0x279   :  { %4675 = vmatpush1.bf16.msra.mxu0 %v11301_v47  ;;  %15585 = vst [vmem:[#allocation421_spill] sm:$0xff] %v11329_v38 }
 0x27a   :  { %4757 = vmatpush1.bf16.msra.mxu1 %v11305_v3  ;;  %4676 = vmatprep.subr.bf16.mxu0 %v11307_v49  ;;  %v11355_v49 = vcombine.high %v452_v14, %v460_v26  ;;  %15588 = vst [vmem:[#allocation424_spill] sm:$0xff] %v11358_v24  ;;  %15591 = vst [vmem:[#allocation427_spill] sm:$0xff] %v11389_v39 }
 0x27b   :  { %4758 = vmatprep.subr.bf16.mxu1 %v11310_v41  ;;  %v11353_v41 = vcombine.low %v437_v55, %v445_v34 }
 0x27d   :  { %4677 = vmatpush1.bf16.msra.mxu0 %v11325_v2  ;;  %v468_v2 = vld [vmem:[%s14182_s2 + $0xba0] sm:$0xff] }
 0x27e   :  { %4759 = vmatpush1.bf16.msra.mxu1 %v11329_v38  ;;  %4678 = vmatprep.subr.bf16.mxu0 %v11331_v22  ;;  %v477_v38 = vld [vmem:[%s14182_s2 + $0xbe8] sm:$0xff] }
 0x27f   :  { %v4374_v3 = vpop.f32.mrb[64].mxu0  ;;  %v4456_v47 = vpop.f32.mrb[64].mxu1  ;;  %4760 = vmatprep.subr.bf16.mxu1 %v11334_v1  ;;  %v469_v1 = vld [vmem:[%s14182_s2 + $0xba8] sm:$0xff] }
 0x280   :  { %v11367_v4 = vadd.f32 %v4374_v3, %v9287_v6  ;;  %v11370_v55 = vadd.f32 %v4456_v47, %v9295_v58  ;;  %v4376_v34 = vpop.f32.mrb[65].mxu0  ;;  %v4458_v22 = vpop.f32.mrb[65].mxu1  ;;  %v11385_v58 = vcombine.low %v452_v14, %v460_v26  ;;  %v493_v14 = vld [vmem:[%s14182_s2 + $0xc68] sm:$0xff]  ;;  %v11409_v26 = vcombine.low %v468_v2, %v476_v32 }
 0x281   :  { %v11379_v31 = vadd.f32 %v4376_v34, %v9292_v48  ;;  %v11382_v52 = vadd.f32 %v4458_v22, %v9299_v43  ;;  %v4378_v6 = vpop.f32.mrb[66].mxu0  ;;  %v4460_v3 = vpop.f32.mrb[66].mxu1  ;;  %4679 = vmatpush1.bf16.msra.mxu0 %v11349_v60  ;;  %v11394_v43 = vcombine.high %v469_v1, %v477_v38  ;;  %v484_v48 = vld [vmem:[%s14182_s2 + $0xc20] sm:$0xff]  ;;  %v11413_v40 = vcombine.low %v469_v1, %v477_v38  ;;  %v509_v1 = vld [vmem:[%s14182_s2 + $0xce8] sm:$0xff] }
 0x282   :  { %15589 = vst [vmem:[#allocation425_spill] sm:$0xff] %v11370_v55  ;;  %15590 = vst [vmem:[#allocation426_spill] sm:$0xff] %v11385_v58  ;;  %4761 = vmatpush1.bf16.msra.mxu1 %v11353_v41  ;;  %v4379_v47 = vpop.f32.mrb[67].mxu0  ;;  %v4461_v9 = vpop.f32.mrb[67].mxu1  ;;  %4680 = vmatprep.subr.bf16.mxu0 %v11355_v49  ;;  %v11391_v55 = vcombine.high %v468_v2, %v476_v32  ;;  %v492_v22 = vld [vmem:[%s14182_s2 + $0xc60] sm:$0xff]  ;;  %v501_v32 = vld [vmem:[%s14182_s2 + $0xca8] sm:$0xff] }
 0x283   :  { %4762 = vmatprep.subr.bf16.mxu1 %v11358_v24  ;;  %15593 = vst [vmem:[#allocation429_spill] sm:$0xff] %v11394_v43  ;;  %v485_v9 = vld [vmem:[%s14182_s2 + $0xc28] sm:$0xff]  ;;  %15594 = vst [vmem:[#allocation430_spill] sm:$0xff] %v11409_v26  ;;  %v11415_v18 = vcombine.high %v484_v48, %v492_v22  ;;  %v500_v6 = vld [vmem:[%s14182_s2 + $0xca0] sm:$0xff]  ;;  %v11433_v38 = vcombine.low %v484_v48, %v492_v22 }
 0x284   :  { %15592 = vst [vmem:[#allocation428_spill] sm:$0xff] %v11391_v55  ;;  %15595 = vst [vmem:[#allocation431_spill] sm:$0xff] %v11413_v40  ;;  %v11418_v34 = vcombine.high %v485_v9, %v493_v14  ;;  %v508_v2 = vld [vmem:[%s14182_s2 + $0xce0] sm:$0xff]  ;;  %v11437_v3 = vcombine.low %v485_v9, %v493_v14  ;;  %v517_v22 = vld [vmem:[%s14182_s2 + $0xd28] sm:$0xff] }
 0x285   :  { %4681 = vmatpush1.bf16.msra.mxu0 %v11385_v58  ;;  %15596 = vst [vmem:[#allocation432_spill] sm:$0xff] %v11415_v18  ;;  %15598 = vst [vmem:[#allocation434_spill] sm:$0xff] %v11433_v38  ;;  %v11439_v47 = vcombine.high %v500_v6, %v508_v2  ;;  %v524_v48 = vld [vmem:[%s14182_s2 + $0xd60] sm:$0xff]  ;;  %v525_v9 = vld [vmem:[%s14182_s2 + $0xd68] sm:$0xff]  ;;  %v11457_v14 = vcombine.low %v500_v6, %v508_v2 }
 0x286   :  { %4763 = vmatpush1.bf16.msra.mxu1 %v11389_v39  ;;  %4682 = vmatprep.subr.bf16.mxu0 %v11391_v55  ;;  %15597 = vst [vmem:[#allocation433_spill] sm:$0xff] %v11418_v34  ;;  %15599 = vst [vmem:[#allocation435_spill] sm:$0xff] %v11437_v3  ;;  %v516_v55 = vld [vmem:[%s14182_s2 + $0xd20] sm:$0xff]  ;;  %v533_v2 = vld [vmem:[%s14182_s2 + $0xda8] sm:$0xff] }
 0x287   :  { %4764 = vmatprep.subr.bf16.mxu1 %v11394_v43  ;;  %15600 = vst [vmem:[#allocation436_spill] sm:$0xff] %v11439_v47  ;;  %v11442_v43 = vcombine.high %v501_v32, %v509_v1  ;;  %15602 = vst [vmem:[#allocation438_spill] sm:$0xff] %v11457_v14  ;;  %v540_v6 = vld [vmem:[%s14182_s2 + $0xde0] sm:$0xff] }
 0x289   :  { %4683 = vmatpush1.bf16.msra.mxu0 %v11409_v26  ;;  %15601 = vst [vmem:[#allocation437_spill] sm:$0xff] %v11442_v43  ;;  %v532_v26 = vld [vmem:[%s14182_s2 + $0xda0] sm:$0xff] }
 0x28a   :  { %4765 = vmatpush1.bf16.msra.mxu1 %v11413_v40  ;;  %4684 = vmatprep.subr.bf16.mxu0 %v11415_v18  ;;  %v11463_v18 = vcombine.high %v516_v55, %v524_v48  ;;  %v11466_v40 = vcombine.high %v517_v22, %v525_v9 }
 0x28b   :  { %4766 = vmatprep.subr.bf16.mxu1 %v11418_v34  ;;  %v11461_v34 = vcombine.low %v501_v32, %v509_v1  ;;  %v541_v32 = vld [vmem:[%s14182_s2 + $0xde8] sm:$0xff]  ;;  %v11481_v1 = vcombine.low %v516_v55, %v524_v48  ;;  %v556_v55 = vld [vmem:[%s14182_s2 + $0xe60] sm:$0xff] }
 0x28c   :  { %15604 = vst [vmem:[#allocation440_spill] sm:$0xff] %v11463_v18  ;;  %15605 = vst [vmem:[#allocation441_spill] sm:$0xff] %v11466_v40  ;;  %v549_v48 = vld [vmem:[%s14182_s2 + $0xe28] sm:$0xff] }
 0x28d   :  { %4685 = vmatpush1.bf16.msra.mxu0 %v11433_v38  ;;  %15603 = vst [vmem:[#allocation439_spill] sm:$0xff] %v11461_v34  ;;  %15606 = vst [vmem:[#allocation442_spill] sm:$0xff] %v11481_v1  ;;  %v548_v38 = vld [vmem:[%s14182_s2 + $0xe20] sm:$0xff] }
 0x28e   :  { %4767 = vmatpush1.bf16.msra.mxu1 %v11437_v3  ;;  %4686 = vmatprep.subr.bf16.mxu0 %v11439_v47  ;;  %v11487_v47 = vcombine.high %v532_v26, %v540_v6  ;;  %v11490_v3 = vcombine.high %v533_v2, %v541_v32 }
 0x28f   :  { %4768 = vmatprep.subr.bf16.mxu1 %v11442_v43  ;;  %v11485_v43 = vcombine.low %v517_v22, %v525_v9  ;;  %v557_v22 = vld [vmem:[%s14182_s2 + $0xe68] sm:$0xff]  ;;  %v11505_v9 = vcombine.low %v532_v26, %v540_v6  ;;  %v572_v26 = vld [vmem:[%s14182_s2 + $0xee0] sm:$0xff] }
 0x290   :  { %15608 = vst [vmem:[#allocation444_spill] sm:$0xff] %v11487_v47  ;;  %15609 = vst [vmem:[#allocation445_spill] sm:$0xff] %v11490_v3  ;;  %v565_v6 = vld [vmem:[%s14182_s2 + $0xea8] sm:$0xff] }
 0x291   :  { %4687 = vmatpush1.bf16.msra.mxu0 %v11457_v14  ;;  %15607 = vst [vmem:[#allocation443_spill] sm:$0xff] %v11485_v43  ;;  %15610 = vst [vmem:[#allocation446_spill] sm:$0xff] %v11505_v9  ;;  %v564_v14 = vld [vmem:[%s14182_s2 + $0xea0] sm:$0xff] }
 0x292   :  { %4769 = vmatpush1.bf16.msra.mxu1 %v11461_v34  ;;  %4688 = vmatprep.subr.bf16.mxu0 %v11463_v18  ;;  %v11511_v18 = vcombine.high %v548_v38, %v556_v55  ;;  %v11514_v34 = vcombine.high %v549_v48, %v557_v22 }
 0x293   :  { %4770 = vmatprep.subr.bf16.mxu1 %v11466_v40  ;;  %v11509_v40 = vcombine.low %v533_v2, %v541_v32  ;;  %v573_v2 = vld [vmem:[%s14182_s2 + $0xee8] sm:$0xff]  ;;  %v11529_v32 = vcombine.low %v548_v38, %v556_v55  ;;  %v588_v38 = vld [vmem:[%s14182_s2 + $0xf60] sm:$0xff] }
 0x294   :  { %15612 = vst [vmem:[#allocation448_spill] sm:$0xff] %v11511_v18  ;;  %15613 = vst [vmem:[#allocation449_spill] sm:$0xff] %v11514_v34  ;;  %v581_v55 = vld [vmem:[%s14182_s2 + $0xf28] sm:$0xff] }
 0x295   :  { %4689 = vmatpush1.bf16.msra.mxu0 %v11481_v1  ;;  %15611 = vst [vmem:[#allocation447_spill] sm:$0xff] %v11509_v40  ;;  %15614 = vst [vmem:[#allocation450_spill] sm:$0xff] %v11529_v32  ;;  %v580_v1 = vld [vmem:[%s14182_s2 + $0xf20] sm:$0xff] }
 0x296   :  { %4771 = vmatpush1.bf16.msra.mxu1 %v11485_v43  ;;  %4690 = vmatprep.subr.bf16.mxu0 %v11487_v47  ;;  %v11535_v47 = vcombine.high %v564_v14, %v572_v26  ;;  %v11538_v43 = vcombine.high %v565_v6, %v573_v2 }
 0x297   :  { %4772 = vmatprep.subr.bf16.mxu1 %v11490_v3  ;;  %v11533_v3 = vcombine.low %v549_v48, %v557_v22  ;;  %v589_v48 = vld [vmem:[%s14182_s2 + $0xf68] sm:$0xff]  ;;  %v11553_v22 = vcombine.low %v564_v14, %v572_v26  ;;  %v604_v14 = vld [vmem:[%s14182_s2 + $0xfe0] sm:$0xff] }
 0x298   :  { %15616 = vst [vmem:[#allocation452_spill] sm:$0xff] %v11535_v47  ;;  %15617 = vst [vmem:[#allocation453_spill] sm:$0xff] %v11538_v43  ;;  %v597_v26 = vld [vmem:[%s14182_s2 + $0xfa8] sm:$0xff] }
 0x299   :  { %4691 = vmatpush1.bf16.msra.mxu0 %v11505_v9  ;;  %15615 = vst [vmem:[#allocation451_spill] sm:$0xff] %v11533_v3  ;;  %15618 = vst [vmem:[#allocation454_spill] sm:$0xff] %v11553_v22  ;;  %v596_v9 = vld [vmem:[%s14182_s2 + $0xfa0] sm:$0xff] }
 0x29a   :  { %4773 = vmatpush1.bf16.msra.mxu1 %v11509_v40  ;;  %4692 = vmatprep.subr.bf16.mxu0 %v11511_v18  ;;  %v11559_v18 = vcombine.high %v580_v1, %v588_v38  ;;  %v11562_v40 = vcombine.high %v581_v55, %v589_v48 }
 0x29b   :  { %4774 = vmatprep.subr.bf16.mxu1 %v11514_v34  ;;  %v11557_v34 = vcombine.low %v565_v6, %v573_v2  ;;  %v605_v6 = vld [vmem:[%s14182_s2 + $0xfe8] sm:$0xff]  ;;  %v11577_v2 = vcombine.low %v580_v1, %v588_v38  ;;  %v110_v1 = vld [vmem:[%s14182_s2 + $0x70] sm:$0xff]  ;;  %v103_v38 = vld [vmem:[%s14182_s2 + $0x38] sm:$0xff] }
 0x29c   :  { %15620 = vst [vmem:[#allocation456_spill] sm:$0xff] %v11559_v18  ;;  %15621 = vst [vmem:[#allocation457_spill] sm:$0xff] %v11562_v40 }
 0x29d   :  { %4693 = vmatpush1.bf16.msra.mxu0 %v11529_v32  ;;  %15619 = vst [vmem:[#allocation455_spill] sm:$0xff] %v11557_v34  ;;  %15622 = vst [vmem:[#allocation458_spill] sm:$0xff] %v11577_v2  ;;  %v102_v32 = vld [vmem:[%s14182_s2 + $0x30] sm:$0xff] }
 0x29e   :  { %4775 = vmatpush1.bf16.msra.mxu1 %v11533_v3  ;;  %4694 = vmatprep.subr.bf16.mxu0 %v11535_v47  ;;  %v11583_v47 = vcombine.high %v596_v9, %v604_v14  ;;  %v11586_v3 = vcombine.high %v597_v26, %v605_v6 }
 0x29f   :  { %4776 = vmatprep.subr.bf16.mxu1 %v11538_v43  ;;  %v11581_v43 = vcombine.low %v581_v55, %v589_v48  ;;  %v111_v55 = vld [vmem:[%s14182_s2 + $0x78] sm:$0xff]  ;;  %v11601_v48 = vcombine.low %v596_v9, %v604_v14  ;;  %v126_v9 = vld [vmem:[%s14182_s2 + $0xf0] sm:$0xff]  ;;  %v11619_v14 = vcombine.low %v102_v32, %v110_v1 }
 0x2a0   :  { %15624 = vst [vmem:[#allocation460_spill] sm:$0xff] %v11583_v47  ;;  %15625 = vst [vmem:[#allocation461_spill] sm:$0xff] %v11586_v3 }
 0x2a1   :  { %4695 = vmatpush1.bf16.msra.mxu0 %v11553_v22  ;;  %15623 = vst [vmem:[#allocation459_spill] sm:$0xff] %v11581_v43  ;;  %15626 = vst [vmem:[#allocation462_spill] sm:$0xff] %v11601_v48  ;;  %v118_v22 = vld [vmem:[%s14182_s2 + $0xb0] sm:$0xff] }
 0x2a2   :  { %4777 = vmatpush1.bf16.msra.mxu1 %v11557_v34  ;;  %4696 = vmatprep.subr.bf16.mxu0 %v11559_v18  ;;  %v11607_v18 = vcombine.high %v102_v32, %v110_v1  ;;  %v11610_v34 = vcombine.high %v103_v38, %v111_v55  ;;  %15630 = vst [vmem:[#allocation466_spill] sm:$0xff] %v11619_v14  ;;  %v134_v32 = vld [vmem:[%s14182_s2 + $0x130] sm:$0xff] }
 0x2a3   :  { %4778 = vmatprep.subr.bf16.mxu1 %v11562_v40  ;;  %v11605_v40 = vcombine.low %v597_v26, %v605_v6  ;;  %v119_v26 = vld [vmem:[%s14182_s2 + $0xb8] sm:$0xff]  ;;  %v142_v1 = vld [vmem:[%s14182_s2 + $0x170] sm:$0xff] }
 0x2a4   :  { %15628 = vst [vmem:[#allocation464_spill] sm:$0xff] %v11607_v18  ;;  %15629 = vst [vmem:[#allocation465_spill] sm:$0xff] %v11610_v34  ;;  %v127_v6 = vld [vmem:[%s14182_s2 + $0xf8] sm:$0xff] }
 0x2a5   :  { %4697 = vmatpush1.bf16.msra.mxu0 %v11577_v2  ;;  %15627 = vst [vmem:[#allocation463_spill] sm:$0xff] %v11605_v40 }
 0x2a6   :  { %4779 = vmatpush1.bf16.msra.mxu1 %v11581_v43  ;;  %4698 = vmatprep.subr.bf16.mxu0 %v11583_v47  ;;  %v11632_v47 = vcombine.high %v118_v22, %v126_v9 }
 0x2a7   :  { %4780 = vmatprep.subr.bf16.mxu1 %v11586_v3  ;;  %v11629_v3 = vcombine.low %v103_v38, %v111_v55  ;;  %v135_v38 = vld [vmem:[%s14182_s2 + $0x138] sm:$0xff] }
 0x2a8   :  { %15632 = vst [vmem:[#allocation468_spill] sm:$0xff] %v11632_v47  ;;  %v143_v55 = vld [vmem:[%s14182_s2 + $0x178] sm:$0xff] }
 0x2a9   :  { %4699 = vmatpush1.bf16.msra.mxu0 %v11601_v48  ;;  %15631 = vst [vmem:[#allocation467_spill] sm:$0xff] %v11629_v3  ;;  %v11641_v48 = vcombine.high %v119_v26, %v127_v6  ;;  %v11661_v43 = vcombine.high %v135_v38, %v143_v55 }
 0x2aa   :  { %4781 = vmatpush1.bf16.msra.mxu1 %v11605_v40  ;;  %4791 = vmatprep.subr.bf16.mxu0 %v11607_v18  ;;  %v11655_v18 = vcombine.low %v119_v26, %v127_v6  ;;  %v11657_v40 = vcombine.high %v134_v32, %v142_v1  ;;  %v11677_v26 = vcombine.low %v134_v32, %v142_v1  ;;  %v174_v32 = vld [vmem:[%s14182_s2 + $0x270] sm:$0xff]  ;;  %v167_v1 = vld [vmem:[%s14182_s2 + $0x238] sm:$0xff] }
 0x2ab   :  { %4873 = vmatprep.subr.bf16.mxu1 %v11610_v34  ;;  %15633 = vst [vmem:[#allocation469_spill] sm:$0xff] %v11641_v48  ;;  %v11651_v34 = vcombine.low %v118_v22, %v126_v9  ;;  %15637 = vst [vmem:[#allocation473_spill] sm:$0xff] %v11661_v43  ;;  %v158_v22 = vld [vmem:[%s14182_s2 + $0x1f0] sm:$0xff]  ;;  %v151_v9 = vld [vmem:[%s14182_s2 + $0x1b8] sm:$0xff]  ;;  %v11681_v6 = vcombine.low %v135_v38, %v143_v55 }
 0x2ac   :  { %4701 = vmatmul.mubr.bf16.vlgmr.msra.gmra.mrb[72].mxu0 %v10030_v30  ;;  %15635 = vst [vmem:[#allocation471_spill] sm:$0xff] %v11655_v18  ;;  %15636 = vst [vmem:[#allocation472_spill] sm:$0xff] %v11657_v40  ;;  %v175_v38 = vld [vmem:[%s14182_s2 + $0x278] sm:$0xff] }
 0x2ad   :  { %4783 = vmatmul.mubr.bf16.vlgmr.msra.gmra.mrb[72].mxu1 %v10030_v30  ;;  %4792 = vmatpush1.bf16.msra.mxu0 %v11619_v14  ;;  %15634 = vst [vmem:[#allocation470_spill] sm:$0xff] %v11651_v34  ;;  %v150_v14 = vld [vmem:[%s14182_s2 + $0x1b0] sm:$0xff]  ;;  %15638 = vst [vmem:[#allocation474_spill] sm:$0xff] %v11677_v26 }
 0x2ae   :  { %4823 = vmatprep.mubr.bf16.mxu0 %v9622_v0  ;;  %4874 = vmatpush1.bf16.msra.mxu1 %v11629_v3  ;;  %15639 = vst [vmem:[#allocation475_spill] sm:$0xff] %v11681_v6  ;;  %v166_v3 = vld [vmem:[%s14182_s2 + $0x230] sm:$0xff]  ;;  %v11701_v55 = vcombine.low %v150_v14, %v158_v22 }
 0x2af   :  { %4905 = vmatprep.mubr.bf16.mxu1 %v9622_v0  ;;  %4793 = vmatprep.subr.bf16.mxu0 %v11632_v47  ;;  %v159_v0 = vld [vmem:[%s14182_s2 + $0x1f8] sm:$0xff]  ;;  %v11683_v47 = vcombine.high %v150_v14, %v158_v22  ;;  %v190_v14 = vld [vmem:[%s14182_s2 + $0x2f0] sm:$0xff] }
 0x2b0   :  { %4875 = vmatprep.subr.bf16.mxu1 %v11641_v48  ;;  %v11686_v48 = vcombine.high %v151_v9, %v159_v0  ;;  %15642 = vst [vmem:[#allocation478_spill] sm:$0xff] %v11701_v55  ;;  %v183_v22 = vld [vmem:[%s14182_s2 + $0x2b8] sm:$0xff] }
 0x2b1   :  { %4794 = vmatpush1.bf16.msra.mxu0 %v11651_v34  ;;  %15640 = vst [vmem:[#allocation476_spill] sm:$0xff] %v11683_v47  ;;  %v182_v34 = vld [vmem:[%s14182_s2 + $0x2b0] sm:$0xff] }
 0x2b2   :  { %4876 = vmatpush1.bf16.msra.mxu1 %v11655_v18  ;;  %4795 = vmatprep.subr.bf16.mxu0 %v11657_v40  ;;  %15641 = vst [vmem:[#allocation477_spill] sm:$0xff] %v11686_v48  ;;  %v11707_v40 = vcombine.high %v166_v3, %v174_v32  ;;  %v11710_v18 = vcombine.high %v167_v1, %v175_v38 }
 0x2b3   :  { %4877 = vmatprep.subr.bf16.mxu1 %v11661_v43  ;;  %v11705_v43 = vcombine.low %v151_v9, %v159_v0  ;;  %v191_v9 = vld [vmem:[%s14182_s2 + $0x2f8] sm:$0xff]  ;;  %v11725_v0 = vcombine.low %v166_v3, %v174_v32  ;;  %v206_v3 = vld [vmem:[%s14182_s2 + $0x370] sm:$0xff] }
 0x2b4   :  { %15644 = vst [vmem:[#allocation480_spill] sm:$0xff] %v11707_v40  ;;  %15645 = vst [vmem:[#allocation481_spill] sm:$0xff] %v11710_v18  ;;  %v199_v32 = vld [vmem:[%s14182_s2 + $0x338] sm:$0xff] }
 0x2b5   :  { %4796 = vmatpush1.bf16.msra.mxu0 %v11677_v26  ;;  %15643 = vst [vmem:[#allocation479_spill] sm:$0xff] %v11705_v43  ;;  %15646 = vst [vmem:[#allocation482_spill] sm:$0xff] %v11725_v0  ;;  %v198_v26 = vld [vmem:[%s14182_s2 + $0x330] sm:$0xff] }
 0x2b6   :  { %4878 = vmatpush1.bf16.msra.mxu1 %v11681_v6  ;;  %4797 = vmatprep.subr.bf16.mxu0 %v11683_v47  ;;  %v11731_v47 = vcombine.high %v182_v34, %v190_v14  ;;  %v11734_v6 = vcombine.high %v183_v22, %v191_v9 }
 0x2b7   :  { %4879 = vmatprep.subr.bf16.mxu1 %v11686_v48  ;;  %v11729_v48 = vcombine.low %v167_v1, %v175_v38  ;;  %v207_v1 = vld [vmem:[%s14182_s2 + $0x378] sm:$0xff]  ;;  %v11749_v38 = vcombine.low %v182_v34, %v190_v14  ;;  %v222_v34 = vld [vmem:[%s14182_s2 + $0x3f0] sm:$0xff] }
 0x2b8   :  { %15648 = vst [vmem:[#allocation484_spill] sm:$0xff] %v11731_v47  ;;  %15649 = vst [vmem:[#allocation485_spill] sm:$0xff] %v11734_v6  ;;  %v215_v14 = vld [vmem:[%s14182_s2 + $0x3b8] sm:$0xff] }
 0x2b9   :  { %4798 = vmatpush1.bf16.msra.mxu0 %v11701_v55  ;;  %15647 = vst [vmem:[#allocation483_spill] sm:$0xff] %v11729_v48  ;;  %15650 = vst [vmem:[#allocation486_spill] sm:$0xff] %v11749_v38  ;;  %v214_v55 = vld [vmem:[%s14182_s2 + $0x3b0] sm:$0xff] }
 0x2ba   :  { %4880 = vmatpush1.bf16.msra.mxu1 %v11705_v43  ;;  %4799 = vmatprep.subr.bf16.mxu0 %v11707_v40  ;;  %v11755_v40 = vcombine.high %v198_v26, %v206_v3  ;;  %v11758_v43 = vcombine.high %v199_v32, %v207_v1 }
 0x2bb   :  { %4881 = vmatprep.subr.bf16.mxu1 %v11710_v18  ;;  %v11753_v18 = vcombine.low %v183_v22, %v191_v9  ;;  %v223_v22 = vld [vmem:[%s14182_s2 + $0x3f8] sm:$0xff]  ;;  %v11773_v9 = vcombine.low %v198_v26, %v206_v3  ;;  %v238_v26 = vld [vmem:[%s14182_s2 + $0x470] sm:$0xff] }
 0x2bc   :  { %15652 = vst [vmem:[#allocation488_spill] sm:$0xff] %v11755_v40  ;;  %15653 = vst [vmem:[#allocation489_spill] sm:$0xff] %v11758_v43  ;;  %v231_v3 = vld [vmem:[%s14182_s2 + $0x438] sm:$0xff] }
 0x2bd   :  { %4800 = vmatpush1.bf16.msra.mxu0 %v11725_v0  ;;  %15651 = vst [vmem:[#allocation487_spill] sm:$0xff] %v11753_v18  ;;  %15654 = vst [vmem:[#allocation490_spill] sm:$0xff] %v11773_v9  ;;  %v230_v0 = vld [vmem:[%s14182_s2 + $0x430] sm:$0xff] }
 0x2be   :  { %4882 = vmatpush1.bf16.msra.mxu1 %v11729_v48  ;;  %4801 = vmatprep.subr.bf16.mxu0 %v11731_v47  ;;  %v11779_v47 = vcombine.high %v214_v55, %v222_v34  ;;  %v11782_v48 = vcombine.high %v215_v14, %v223_v22 }
 0x2bf   :  { %4883 = vmatprep.subr.bf16.mxu1 %v11734_v6  ;;  %v11777_v6 = vcombine.low %v199_v32, %v207_v1  ;;  %v239_v32 = vld [vmem:[%s14182_s2 + $0x478] sm:$0xff]  ;;  %v11797_v1 = vcombine.low %v214_v55, %v222_v34  ;;  %v254_v55 = vld [vmem:[%s14182_s2 + $0x4f0] sm:$0xff] }
 0x2c0   :  { %15656 = vst [vmem:[#allocation492_spill] sm:$0xff] %v11779_v47  ;;  %15657 = vst [vmem:[#allocation493_spill] sm:$0xff] %v11782_v48  ;;  %v247_v34 = vld [vmem:[%s14182_s2 + $0x4b8] sm:$0xff] }
 0x2c1   :  { %4802 = vmatpush1.bf16.msra.mxu0 %v11749_v38  ;;  %15655 = vst [vmem:[#allocation491_spill] sm:$0xff] %v11777_v6  ;;  %15658 = vst [vmem:[#allocation494_spill] sm:$0xff] %v11797_v1  ;;  %v246_v38 = vld [vmem:[%s14182_s2 + $0x4b0] sm:$0xff] }
 0x2c2   :  { %4884 = vmatpush1.bf16.msra.mxu1 %v11753_v18  ;;  %4803 = vmatprep.subr.bf16.mxu0 %v11755_v40  ;;  %v11803_v40 = vcombine.high %v230_v0, %v238_v26  ;;  %v11806_v18 = vcombine.high %v231_v3, %v239_v32 }
 0x2c3   :  { %4885 = vmatprep.subr.bf16.mxu1 %v11758_v43  ;;  %v11801_v43 = vcombine.low %v215_v14, %v223_v22  ;;  %v255_v14 = vld [vmem:[%s14182_s2 + $0x4f8] sm:$0xff]  ;;  %v11821_v22 = vcombine.low %v230_v0, %v238_v26  ;;  %v270_v0 = vld [vmem:[%s14182_s2 + $0x570] sm:$0xff] }
 0x2c4   :  { %15660 = vst [vmem:[#allocation496_spill] sm:$0xff] %v11803_v40  ;;  %15661 = vst [vmem:[#allocation497_spill] sm:$0xff] %v11806_v18  ;;  %v263_v26 = vld [vmem:[%s14182_s2 + $0x538] sm:$0xff] }
 0x2c5   :  { %4804 = vmatpush1.bf16.msra.mxu0 %v11773_v9  ;;  %15659 = vst [vmem:[#allocation495_spill] sm:$0xff] %v11801_v43  ;;  %15662 = vst [vmem:[#allocation498_spill] sm:$0xff] %v11821_v22  ;;  %v262_v9 = vld [vmem:[%s14182_s2 + $0x530] sm:$0xff] }
 0x2c6   :  { %4886 = vmatpush1.bf16.msra.mxu1 %v11777_v6  ;;  %4805 = vmatprep.subr.bf16.mxu0 %v11779_v47  ;;  %v11827_v47 = vcombine.high %v246_v38, %v254_v55  ;;  %v11830_v6 = vcombine.high %v247_v34, %v255_v14 }
 0x2c7   :  { %4887 = vmatprep.subr.bf16.mxu1 %v11782_v48  ;;  %v11825_v48 = vcombine.low %v231_v3, %v239_v32  ;;  %v271_v3 = vld [vmem:[%s14182_s2 + $0x578] sm:$0xff]  ;;  %v11845_v32 = vcombine.low %v246_v38, %v254_v55  ;;  %v286_v38 = vld [vmem:[%s14182_s2 + $0x5f0] sm:$0xff] }
 0x2c8   :  { %15664 = vst [vmem:[#allocation500_spill] sm:$0xff] %v11827_v47  ;;  %15665 = vst [vmem:[#allocation501_spill] sm:$0xff] %v11830_v6  ;;  %v279_v55 = vld [vmem:[%s14182_s2 + $0x5b8] sm:$0xff] }
 0x2c9   :  { %4806 = vmatpush1.bf16.msra.mxu0 %v11797_v1  ;;  %15663 = vst [vmem:[#allocation499_spill] sm:$0xff] %v11825_v48  ;;  %15666 = vst [vmem:[#allocation502_spill] sm:$0xff] %v11845_v32  ;;  %v278_v1 = vld [vmem:[%s14182_s2 + $0x5b0] sm:$0xff] }
 0x2ca   :  { %4888 = vmatpush1.bf16.msra.mxu1 %v11801_v43  ;;  %4807 = vmatprep.subr.bf16.mxu0 %v11803_v40  ;;  %v11851_v40 = vcombine.high %v262_v9, %v270_v0  ;;  %v11854_v43 = vcombine.high %v263_v26, %v271_v3 }
 0x2cb   :  { %4889 = vmatprep.subr.bf16.mxu1 %v11806_v18  ;;  %v11849_v18 = vcombine.low %v247_v34, %v255_v14  ;;  %v287_v34 = vld [vmem:[%s14182_s2 + $0x5f8] sm:$0xff]  ;;  %v11869_v14 = vcombine.low %v262_v9, %v270_v0  ;;  %v302_v9 = vld [vmem:[%s14182_s2 + $0x670] sm:$0xff] }
 0x2cc   :  { %15668 = vst [vmem:[#allocation504_spill] sm:$0xff] %v11851_v40  ;;  %15669 = vst [vmem:[#allocation505_spill] sm:$0xff] %v11854_v43  ;;  %v295_v0 = vld [vmem:[%s14182_s2 + $0x638] sm:$0xff] }
 0x2cd   :  { %4808 = vmatpush1.bf16.msra.mxu0 %v11821_v22  ;;  %15667 = vst [vmem:[#allocation503_spill] sm:$0xff] %v11849_v18  ;;  %15670 = vst [vmem:[#allocation506_spill] sm:$0xff] %v11869_v14  ;;  %v294_v22 = vld [vmem:[%s14182_s2 + $0x630] sm:$0xff] }
 0x2ce   :  { %4890 = vmatpush1.bf16.msra.mxu1 %v11825_v48  ;;  %4809 = vmatprep.subr.bf16.mxu0 %v11827_v47  ;;  %v11875_v47 = vcombine.high %v278_v1, %v286_v38  ;;  %v11878_v48 = vcombine.high %v279_v55, %v287_v34 }
 0x2cf   :  { %4891 = vmatprep.subr.bf16.mxu1 %v11830_v6  ;;  %v11873_v6 = vcombine.low %v263_v26, %v271_v3  ;;  %v303_v26 = vld [vmem:[%s14182_s2 + $0x678] sm:$0xff]  ;;  %v11893_v3 = vcombine.low %v278_v1, %v286_v38  ;;  %v318_v1 = vld [vmem:[%s14182_s2 + $0x6f0] sm:$0xff] }
 0x2d0   :  { %15672 = vst [vmem:[#allocation508_spill] sm:$0xff] %v11875_v47  ;;  %15673 = vst [vmem:[#allocation509_spill] sm:$0xff] %v11878_v48  ;;  %v311_v38 = vld [vmem:[%s14182_s2 + $0x6b8] sm:$0xff] }
 0x2d1   :  { %4810 = vmatpush1.bf16.msra.mxu0 %v11845_v32  ;;  %15671 = vst [vmem:[#allocation507_spill] sm:$0xff] %v11873_v6  ;;  %15674 = vst [vmem:[#allocation510_spill] sm:$0xff] %v11893_v3  ;;  %v310_v32 = vld [vmem:[%s14182_s2 + $0x6b0] sm:$0xff] }
 0x2d2   :  { %4892 = vmatpush1.bf16.msra.mxu1 %v11849_v18  ;;  %4811 = vmatprep.subr.bf16.mxu0 %v11851_v40  ;;  %v11899_v40 = vcombine.high %v294_v22, %v302_v9  ;;  %v11902_v18 = vcombine.high %v295_v0, %v303_v26 }
 0x2d3   :  { %4893 = vmatprep.subr.bf16.mxu1 %v11854_v43  ;;  %v11897_v43 = vcombine.low %v279_v55, %v287_v34  ;;  %v319_v55 = vld [vmem:[%s14182_s2 + $0x6f8] sm:$0xff]  ;;  %v11917_v34 = vcombine.low %v294_v22, %v302_v9  ;;  %v334_v22 = vld [vmem:[%s14182_s2 + $0x770] sm:$0xff] }
 0x2d4   :  { %15676 = vst [vmem:[#allocation512_spill] sm:$0xff] %v11899_v40  ;;  %15677 = vst [vmem:[#allocation513_spill] sm:$0xff] %v11902_v18  ;;  %v327_v9 = vld [vmem:[%s14182_s2 + $0x738] sm:$0xff] }
 0x2d5   :  { %4812 = vmatpush1.bf16.msra.mxu0 %v11869_v14  ;;  %15675 = vst [vmem:[#allocation511_spill] sm:$0xff] %v11897_v43  ;;  %15678 = vst [vmem:[#allocation514_spill] sm:$0xff] %v11917_v34  ;;  %v326_v14 = vld [vmem:[%s14182_s2 + $0x730] sm:$0xff] }
 0x2d6   :  { %4894 = vmatpush1.bf16.msra.mxu1 %v11873_v6  ;;  %4813 = vmatprep.subr.bf16.mxu0 %v11875_v47  ;;  %v11923_v47 = vcombine.high %v310_v32, %v318_v1  ;;  %v11926_v6 = vcombine.high %v311_v38, %v319_v55 }
 0x2d7   :  { %4895 = vmatprep.subr.bf16.mxu1 %v11878_v48  ;;  %v11921_v48 = vcombine.low %v295_v0, %v303_v26  ;;  %v335_v0 = vld [vmem:[%s14182_s2 + $0x778] sm:$0xff]  ;;  %v11941_v26 = vcombine.low %v310_v32, %v318_v1  ;;  %v350_v32 = vld [vmem:[%s14182_s2 + $0x7f0] sm:$0xff] }
 0x2d8   :  { %15680 = vst [vmem:[#allocation516_spill] sm:$0xff] %v11923_v47  ;;  %15681 = vst [vmem:[#allocation517_spill] sm:$0xff] %v11926_v6  ;;  %v343_v1 = vld [vmem:[%s14182_s2 + $0x7b8] sm:$0xff] }
 0x2d9   :  { %4814 = vmatpush1.bf16.msra.mxu0 %v11893_v3  ;;  %15679 = vst [vmem:[#allocation515_spill] sm:$0xff] %v11921_v48  ;;  %15682 = vst [vmem:[#allocation518_spill] sm:$0xff] %v11941_v26  ;;  %v342_v3 = vld [vmem:[%s14182_s2 + $0x7b0] sm:$0xff] }
 0x2da   :  { %4896 = vmatpush1.bf16.msra.mxu1 %v11897_v43  ;;  %4815 = vmatprep.subr.bf16.mxu0 %v11899_v40  ;;  %v11947_v40 = vcombine.high %v326_v14, %v334_v22  ;;  %v11950_v43 = vcombine.high %v327_v9, %v335_v0 }
 0x2db   :  { %4897 = vmatprep.subr.bf16.mxu1 %v11902_v18  ;;  %v11945_v18 = vcombine.low %v311_v38, %v319_v55  ;;  %v351_v38 = vld [vmem:[%s14182_s2 + $0x7f8] sm:$0xff]  ;;  %v11965_v55 = vcombine.low %v326_v14, %v334_v22  ;;  %v366_v14 = vld [vmem:[%s14182_s2 + $0x870] sm:$0xff] }
 0x2dc   :  { %15684 = vst [vmem:[#allocation520_spill] sm:$0xff] %v11947_v40  ;;  %15685 = vst [vmem:[#allocation521_spill] sm:$0xff] %v11950_v43  ;;  %v359_v22 = vld [vmem:[%s14182_s2 + $0x838] sm:$0xff] }
 0x2dd   :  { %4816 = vmatpush1.bf16.msra.mxu0 %v11917_v34  ;;  %15683 = vst [vmem:[#allocation519_spill] sm:$0xff] %v11945_v18  ;;  %15686 = vst [vmem:[#allocation522_spill] sm:$0xff] %v11965_v55  ;;  %v358_v34 = vld [vmem:[%s14182_s2 + $0x830] sm:$0xff] }
 0x2de   :  { %4898 = vmatpush1.bf16.msra.mxu1 %v11921_v48  ;;  %4817 = vmatprep.subr.bf16.mxu0 %v11923_v47  ;;  %v11971_v47 = vcombine.high %v342_v3, %v350_v32  ;;  %v11974_v48 = vcombine.high %v343_v1, %v351_v38 }
 0x2df   :  { %4899 = vmatprep.subr.bf16.mxu1 %v11926_v6  ;;  %v11969_v6 = vcombine.low %v327_v9, %v335_v0  ;;  %v367_v9 = vld [vmem:[%s14182_s2 + $0x878] sm:$0xff]  ;;  %v11989_v0 = vcombine.low %v342_v3, %v350_v32  ;;  %v382_v3 = vld [vmem:[%s14182_s2 + $0x8f0] sm:$0xff]  ;;  %v12007_v32 = vcombine.low %v358_v34, %v366_v14 }
 0x2e0   :  { %15688 = vst [vmem:[#allocation524_spill] sm:$0xff] %v11971_v47  ;;  %15689 = vst [vmem:[#allocation525_spill] sm:$0xff] %v11974_v48 }
 0x2e1   :  { %4818 = vmatpush1.bf16.msra.mxu0 %v11941_v26  ;;  %15687 = vst [vmem:[#allocation523_spill] sm:$0xff] %v11969_v6  ;;  %15690 = vst [vmem:[#allocation526_spill] sm:$0xff] %v11989_v0  ;;  %v374_v26 = vld [vmem:[%s14182_s2 + $0x8b0] sm:$0xff] }
 0x2e2   :  { %4900 = vmatpush1.bf16.msra.mxu1 %v11945_v18  ;;  %4819 = vmatprep.subr.bf16.mxu0 %v11947_v40  ;;  %v11995_v40 = vcombine.high %v358_v34, %v366_v14  ;;  %v11998_v18 = vcombine.high %v359_v22, %v367_v9  ;;  %15694 = vst [vmem:[#allocation530_spill] sm:$0xff] %v12007_v32  ;;  %v390_v34 = vld [vmem:[%s14182_s2 + $0x930] sm:$0xff] }
 0x2e3   :  { %4901 = vmatprep.subr.bf16.mxu1 %v11950_v43  ;;  %v11993_v43 = vcombine.low %v343_v1, %v351_v38  ;;  %v375_v1 = vld [vmem:[%s14182_s2 + $0x8b8] sm:$0xff]  ;;  %v398_v14 = vld [vmem:[%s14182_s2 + $0x970] sm:$0xff] }
 0x2e4   :  { %15692 = vst [vmem:[#allocation528_spill] sm:$0xff] %v11995_v40  ;;  %15693 = vst [vmem:[#allocation529_spill] sm:$0xff] %v11998_v18  ;;  %v383_v38 = vld [vmem:[%s14182_s2 + $0x8f8] sm:$0xff] }
 0x2e5   :  { %4820 = vmatpush1.bf16.msra.mxu0 %v11965_v55  ;;  %15691 = vst [vmem:[#allocation527_spill] sm:$0xff] %v11993_v43 }
 0x2e6   :  { %4902 = vmatpush1.bf16.msra.mxu1 %v11969_v6  ;;  %4821 = vmatprep.subr.bf16.mxu0 %v11971_v47  ;;  %v12020_v47 = vcombine.high %v374_v26, %v382_v3 }
 0x2e7   :  { %4903 = vmatprep.subr.bf16.mxu1 %v11974_v48  ;;  %v12017_v48 = vcombine.low %v359_v22, %v367_v9  ;;  %v391_v22 = vld [vmem:[%s14182_s2 + $0x938] sm:$0xff] }
 0x2e8   :  { %15696 = vst [vmem:[#allocation532_spill] sm:$0xff] %v12020_v47  ;;  %v399_v9 = vld [vmem:[%s14182_s2 + $0x978] sm:$0xff] }
 0x2e9   :  { %4822 = vmatpush1.bf16.msra.mxu0 %v11989_v0  ;;  %15695 = vst [vmem:[#allocation531_spill] sm:$0xff] %v12017_v48  ;;  %v12029_v0 = vcombine.high %v375_v1, %v383_v38  ;;  %v12049_v6 = vcombine.high %v391_v22, %v399_v9 }
 0x2ea   :  { %4904 = vmatpush1.bf16.msra.mxu1 %v11993_v43  ;;  %4832 = vmatprep.subr.bf16.mxu0 %v11995_v40  ;;  %v12043_v40 = vcombine.low %v375_v1, %v383_v38  ;;  %v12045_v43 = vcombine.high %v390_v34, %v398_v14  ;;  %v12065_v1 = vcombine.low %v390_v34, %v398_v14  ;;  %v430_v34 = vld [vmem:[%s14182_s2 + $0xa70] sm:$0xff]  ;;  %v423_v14 = vld [vmem:[%s14182_s2 + $0xa38] sm:$0xff] }
 0x2eb   :  { %4914 = vmatprep.subr.bf16.mxu1 %v11998_v18  ;;  %15697 = vst [vmem:[#allocation533_spill] sm:$0xff] %v12029_v0  ;;  %v12039_v18 = vcombine.low %v374_v26, %v382_v3  ;;  %15701 = vst [vmem:[#allocation537_spill] sm:$0xff] %v12049_v6  ;;  %v414_v26 = vld [vmem:[%s14182_s2 + $0x9f0] sm:$0xff]  ;;  %v407_v3 = vld [vmem:[%s14182_s2 + $0x9b8] sm:$0xff]  ;;  %v12069_v38 = vcombine.low %v391_v22, %v399_v9 }
 0x2ec   :  { %4824 = vmatmul.mubr.bf16.vlgmr.msra.gmra.mrb[76].mxu0 %v9624_v23  ;;  %15699 = vst [vmem:[#allocation535_spill] sm:$0xff] %v12043_v40  ;;  %15700 = vst [vmem:[#allocation536_spill] sm:$0xff] %v12045_v43  ;;  %v431_v22 = vld [vmem:[%s14182_s2 + $0xa78] sm:$0xff] }
 0x2ed   :  { %4906 = vmatmul.mubr.bf16.vlgmr.msra.gmra.mrb[76].mxu1 %v9624_v23  ;;  %4833 = vmatpush1.bf16.msra.mxu0 %v12007_v32  ;;  %15698 = vst [vmem:[#allocation534_spill] sm:$0xff] %v12039_v18  ;;  %v406_v23 = vld [vmem:[%s14182_s2 + $0x9b0] sm:$0xff]  ;;  %15702 = vst [vmem:[#allocation538_spill] sm:$0xff] %v12065_v1 }
 0x2ee   :  { %4864 = vmatprep.mubr.bf16.mxu0 %v9644_v8  ;;  %4915 = vmatpush1.bf16.msra.mxu1 %v12017_v48  ;;  %15703 = vst [vmem:[#allocation539_spill] sm:$0xff] %v12069_v38  ;;  %v422_v48 = vld [vmem:[%s14182_s2 + $0xa30] sm:$0xff]  ;;  %v12089_v9 = vcombine.low %v406_v23, %v414_v26 }
 0x2ef   :  { %4946 = vmatprep.mubr.bf16.mxu1 %v9644_v8  ;;  %4834 = vmatprep.subr.bf16.mxu0 %v12020_v47  ;;  %v415_v8 = vld [vmem:[%s14182_s2 + $0x9f8] sm:$0xff]  ;;  %v12071_v47 = vcombine.high %v406_v23, %v414_v26  ;;  %v446_v23 = vld [vmem:[%s14182_s2 + $0xaf0] sm:$0xff] }
 0x2f0   :  { %4916 = vmatprep.subr.bf16.mxu1 %v12029_v0  ;;  %v12074_v0 = vcombine.high %v407_v3, %v415_v8  ;;  %15706 = vst [vmem:[#allocation542_spill] sm:$0xff] %v12089_v9  ;;  %v439_v26 = vld [vmem:[%s14182_s2 + $0xab8] sm:$0xff]  ;;  %v470_v32 = vld [vmem:[%s14182_s2 + $0xbb0] sm:$0xff] }
 0x2f1   :  { %4835 = vmatpush1.bf16.msra.mxu0 %v12039_v18  ;;  %15704 = vst [vmem:[#allocation540_spill] sm:$0xff] %v12071_v47  ;;  %v438_v18 = vld [vmem:[%s14182_s2 + $0xab0] sm:$0xff] }
 0x2f2   :  { %4917 = vmatpush1.bf16.msra.mxu1 %v12043_v40  ;;  %4836 = vmatprep.subr.bf16.mxu0 %v12045_v43  ;;  %15705 = vst [vmem:[#allocation541_spill] sm:$0xff] %v12074_v0  ;;  %v12095_v43 = vcombine.high %v422_v48, %v430_v34  ;;  %v12098_v40 = vcombine.high %v423_v14, %v431_v22 }
 0x2f3   :  { %4918 = vmatprep.subr.bf16.mxu1 %v12049_v6  ;;  %v12093_v6 = vcombine.low %v407_v3, %v415_v8  ;;  %v447_v3 = vld [vmem:[%s14182_s2 + $0xaf8] sm:$0xff]  ;;  %v12113_v8 = vcombine.low %v422_v48, %v430_v34  ;;  %v462_v48 = vld [vmem:[%s14182_s2 + $0xb70] sm:$0xff] }
 0x2f4   :  { %15708 = vst [vmem:[#allocation544_spill] sm:$0xff] %v12095_v43  ;;  %15709 = vst [vmem:[#allocation545_spill] sm:$0xff] %v12098_v40  ;;  %v455_v34 = vld [vmem:[%s14182_s2 + $0xb38] sm:$0xff] }
 0x2f5   :  { %4837 = vmatpush1.bf16.msra.mxu0 %v12065_v1  ;;  %15707 = vst [vmem:[#allocation543_spill] sm:$0xff] %v12093_v6  ;;  %15710 = vst [vmem:[#allocation546_spill] sm:$0xff] %v12113_v8  ;;  %v454_v1 = vld [vmem:[%s14182_s2 + $0xb30] sm:$0xff] }
 0x2f6   :  { %4919 = vmatpush1.bf16.msra.mxu1 %v12069_v38  ;;  %4838 = vmatprep.subr.bf16.mxu0 %v12071_v47  ;;  %v12119_v47 = vcombine.high %v438_v18, %v446_v23  ;;  %v12122_v38 = vcombine.high %v439_v26, %v447_v3 }
 0x2f7   :  { %4920 = vmatprep.subr.bf16.mxu1 %v12074_v0  ;;  %v12117_v0 = vcombine.low %v423_v14, %v431_v22  ;;  %v463_v14 = vld [vmem:[%s14182_s2 + $0xb78] sm:$0xff]  ;;  %v12137_v22 = vcombine.low %v438_v18, %v446_v23  ;;  %v478_v18 = vld [vmem:[%s14182_s2 + $0xbf0] sm:$0xff] }
 0x2f8   :  { %15712 = vst [vmem:[#allocation548_spill] sm:$0xff] %v12119_v47  ;;  %15713 = vst [vmem:[#allocation549_spill] sm:$0xff] %v12122_v38 }
 0x2f9   :  { %4839 = vmatpush1.bf16.msra.mxu0 %v12089_v9  ;;  %15711 = vst [vmem:[#allocation547_spill] sm:$0xff] %v12117_v0  ;;  %v12146_v9 = vcombine.high %v455_v34, %v463_v14 }
 0x2fa   :  { %4921 = vmatpush1.bf16.msra.mxu1 %v12093_v6  ;;  %4840 = vmatprep.subr.bf16.mxu0 %v12095_v43  ;;  %v12143_v43 = vcombine.high %v454_v1, %v462_v48 }
 0x2fb   :  { %4922 = vmatprep.subr.bf16.mxu1 %v12098_v40  ;;  %v12141_v40 = vcombine.low %v439_v26, %v447_v3 }
 0x2fd   :  { %4841 = vmatpush1.bf16.msra.mxu0 %v12113_v8 }
 0x2fe   :  { %4923 = vmatpush1.bf16.msra.mxu1 %v12117_v0  ;;  %4842 = vmatprep.subr.bf16.mxu0 %v12119_v47  ;;  %v471_v47 = vld [vmem:[%s14182_s2 + $0xbb8] sm:$0xff] }
 0x2ff   :  { %v4538_v6 = vpop.f32.mrb[68].mxu0  ;;  %4924 = vmatprep.subr.bf16.mxu1 %v12122_v38  ;;  %v479_v38 = vld [vmem:[%s14182_s2 + $0xbf8] sm:$0xff] }
 0x300   :  { %v12155_v23 = vadd.f32 %v4538_v6, %v9391_v57  ;;  %v4620_v26 = vpop.f32.mrb[68].mxu1  ;;  %v4540_v3 = vpop.f32.mrb[69].mxu0  ;;  %v12170_v57 = vcombine.low %v454_v1, %v462_v48  ;;  %v12197_v1 = vcombine.low %v470_v32, %v478_v18  ;;  %v12201_v48 = vcombine.low %v471_v47, %v479_v38 }
 0x301   :  { %v12164_v0 = vadd.f32 %v4620_v26, %v9397_v16  ;;  %v12167_v8 = vadd.f32 %v4540_v3, %v9394_v15  ;;  %v4622_v55 = vpop.f32.mrb[69].mxu1  ;;  %v4542_v2 = vpop.f32.mrb[70].mxu0  ;;  %4843 = vmatpush1.bf16.msra.mxu0 %v12137_v22  ;;  %v12177_v16 = vcombine.low %v455_v34, %v463_v14  ;;  %v12179_v26 = vcombine.high %v470_v32, %v478_v18  ;;  %v502_v3 = vld [vmem:[%s14182_s2 + $0xcb0] sm:$0xff]  ;;  %v503_v18 = vld [vmem:[%s14182_s2 + $0xcb8] sm:$0xff] }
 0x302   :  { %15714 = vst [vmem:[#allocation550_spill] sm:$0xff] %v12170_v57  ;;  %v12173_v6 = vadd.f32 %v4622_v55, %v9400_v56  ;;  %v4624_v39 = vpop.f32.mrb[70].mxu1  ;;  %4925 = vmatpush1.bf16.msra.mxu1 %v12141_v40  ;;  %v4543_v58 = vpop.f32.mrb[71].mxu0  ;;  %4844 = vmatprep.subr.bf16.mxu0 %v12143_v43  ;;  %v12182_v2 = vcombine.high %v471_v47, %v479_v38  ;;  %v486_v56 = vld [vmem:[%s14182_s2 + $0xc30] sm:$0xff]  ;;  %v495_v55 = vld [vmem:[%s14182_s2 + $0xc78] sm:$0xff]  ;;  %15718 = vst [vmem:[#allocation554_spill] sm:$0xff] %v12197_v1 }
 0x303   :  { %15715 = vst [vmem:[#allocation551_spill] sm:$0xff] %v12177_v16  ;;  %15716 = vst [vmem:[#allocation552_spill] sm:$0xff] %v12179_v26  ;;  %v4625_v15 = vpop.f32.mrb[71].mxu1  ;;  %4926 = vmatprep.subr.bf16.mxu1 %v12146_v9  ;;  %v494_v39 = vld [vmem:[%s14182_s2 + $0xc70] sm:$0xff]  ;;  %v487_v58 = vld [vmem:[%s14182_s2 + $0xc38] sm:$0xff] }
 0x304   :  { %15717 = vst [vmem:[#allocation553_spill] sm:$0xff] %v12182_v2  ;;  %15719 = vst [vmem:[#allocation555_spill] sm:$0xff] %v12201_v48  ;;  %v12203_v34 = vcombine.high %v486_v56, %v494_v39  ;;  %v12206_v14 = vcombine.high %v487_v58, %v495_v55  ;;  %v510_v32 = vld [vmem:[%s14182_s2 + $0xcf0] sm:$0xff]  ;;  %v511_v47 = vld [vmem:[%s14182_s2 + $0xcf8] sm:$0xff]  ;;  %v12221_v38 = vcombine.low %v486_v56, %v494_v39 }
 0x305   :  { %4845 = vmatpush1.bf16.msra.mxu0 %v12170_v57  ;;  %v12225_v15 = vcombine.low %v487_v58, %v495_v55  ;;  %v526_v56 = vld [vmem:[%s14182_s2 + $0xd70] sm:$0xff]  ;;  %v519_v39 = vld [vmem:[%s14182_s2 + $0xd38] sm:$0xff]  ;;  %v12245_v55 = vcombine.low %v502_v3, %v510_v32 }
 0x306   :  { %4927 = vmatpush1.bf16.msra.mxu1 %v12177_v16  ;;  %4846 = vmatprep.subr.bf16.mxu0 %v12179_v26  ;;  %15720 = vst [vmem:[#allocation556_spill] sm:$0xff] %v12203_v34  ;;  %15721 = vst [vmem:[#allocation557_spill] sm:$0xff] %v12206_v14  ;;  %v12230_v26 = vcombine.high %v503_v18, %v511_v47  ;;  %v518_v16 = vld [vmem:[%s14182_s2 + $0xd30] sm:$0xff]  ;;  %v527_v58 = vld [vmem:[%s14182_s2 + $0xd78] sm:$0xff] }
 0x307   :  { %4928 = vmatprep.subr.bf16.mxu1 %v12182_v2  ;;  %15722 = vst [vmem:[#allocation558_spill] sm:$0xff] %v12221_v38  ;;  %15723 = vst [vmem:[#allocation559_spill] sm:$0xff] %v12225_v15  ;;  %v12227_v2 = vcombine.high %v502_v3, %v510_v32  ;;  %v542_v3 = vld [vmem:[%s14182_s2 + $0xdf0] sm:$0xff]  ;;  %v535_v32 = vld [vmem:[%s14182_s2 + $0xdb8] sm:$0xff] }
 0x308   :  { %15725 = vst [vmem:[#allocation561_spill] sm:$0xff] %v12230_v26  ;;  %15726 = vst [vmem:[#allocation562_spill] sm:$0xff] %v12245_v55 }
 0x309   :  { %4847 = vmatpush1.bf16.msra.mxu0 %v12197_v1  ;;  %15724 = vst [vmem:[#allocation560_spill] sm:$0xff] %v12227_v2  ;;  %v534_v1 = vld [vmem:[%s14182_s2 + $0xdb0] sm:$0xff] }
 0x30a   :  { %4929 = vmatpush1.bf16.msra.mxu1 %v12201_v48  ;;  %4848 = vmatprep.subr.bf16.mxu0 %v12203_v34  ;;  %v12251_v34 = vcombine.high %v518_v16, %v526_v56  ;;  %v12254_v48 = vcombine.high %v519_v39, %v527_v58 }
 0x30b   :  { %4930 = vmatprep.subr.bf16.mxu1 %v12206_v14  ;;  %v12249_v14 = vcombine.low %v503_v18, %v511_v47  ;;  %v543_v18 = vld [vmem:[%s14182_s2 + $0xdf8] sm:$0xff]  ;;  %v12269_v47 = vcombine.low %v518_v16, %v526_v56  ;;  %v558_v16 = vld [vmem:[%s14182_s2 + $0xe70] sm:$0xff] }
 0x30c   :  { %15728 = vst [vmem:[#allocation564_spill] sm:$0xff] %v12251_v34  ;;  %15729 = vst [vmem:[#allocation565_spill] sm:$0xff] %v12254_v48  ;;  %v551_v56 = vld [vmem:[%s14182_s2 + $0xe38] sm:$0xff] }
 0x30d   :  { %4849 = vmatpush1.bf16.msra.mxu0 %v12221_v38  ;;  %15727 = vst [vmem:[#allocation563_spill] sm:$0xff] %v12249_v14  ;;  %15730 = vst [vmem:[#allocation566_spill] sm:$0xff] %v12269_v47  ;;  %v550_v38 = vld [vmem:[%s14182_s2 + $0xe30] sm:$0xff] }
 0x30e   :  { %4931 = vmatpush1.bf16.msra.mxu1 %v12225_v15  ;;  %4850 = vmatprep.subr.bf16.mxu0 %v12227_v2  ;;  %v12275_v2 = vcombine.high %v534_v1, %v542_v3  ;;  %v12278_v15 = vcombine.high %v535_v32, %v543_v18 }
 0x30f   :  { %4932 = vmatprep.subr.bf16.mxu1 %v12230_v26  ;;  %v12273_v26 = vcombine.low %v519_v39, %v527_v58  ;;  %v559_v39 = vld [vmem:[%s14182_s2 + $0xe78] sm:$0xff]  ;;  %v12293_v58 = vcombine.low %v534_v1, %v542_v3  ;;  %v574_v1 = vld [vmem:[%s14182_s2 + $0xef0] sm:$0xff] }
 0x310   :  { %15732 = vst [vmem:[#allocation568_spill] sm:$0xff] %v12275_v2  ;;  %15733 = vst [vmem:[#allocation569_spill] sm:$0xff] %v12278_v15  ;;  %v567_v3 = vld [vmem:[%s14182_s2 + $0xeb8] sm:$0xff] }
 0x311   :  { %4851 = vmatpush1.bf16.msra.mxu0 %v12245_v55  ;;  %15731 = vst [vmem:[#allocation567_spill] sm:$0xff] %v12273_v26  ;;  %15734 = vst [vmem:[#allocation570_spill] sm:$0xff] %v12293_v58  ;;  %v566_v55 = vld [vmem:[%s14182_s2 + $0xeb0] sm:$0xff] }
 0x312   :  { %4933 = vmatpush1.bf16.msra.mxu1 %v12249_v14  ;;  %4852 = vmatprep.subr.bf16.mxu0 %v12251_v34  ;;  %v12299_v34 = vcombine.high %v550_v38, %v558_v16  ;;  %v12302_v14 = vcombine.high %v551_v56, %v559_v39 }
 0x313   :  { %4934 = vmatprep.subr.bf16.mxu1 %v12254_v48  ;;  %v12297_v48 = vcombine.low %v535_v32, %v543_v18  ;;  %v575_v32 = vld [vmem:[%s14182_s2 + $0xef8] sm:$0xff]  ;;  %v12317_v18 = vcombine.low %v550_v38, %v558_v16  ;;  %v590_v38 = vld [vmem:[%s14182_s2 + $0xf70] sm:$0xff] }
 0x314   :  { %15736 = vst [vmem:[#allocation572_spill] sm:$0xff] %v12299_v34  ;;  %15737 = vst [vmem:[#allocation573_spill] sm:$0xff] %v12302_v14  ;;  %v583_v16 = vld [vmem:[%s14182_s2 + $0xf38] sm:$0xff] }
 0x315   :  { %4853 = vmatpush1.bf16.msra.mxu0 %v12269_v47  ;;  %15735 = vst [vmem:[#allocation571_spill] sm:$0xff] %v12297_v48  ;;  %15738 = vst [vmem:[#allocation574_spill] sm:$0xff] %v12317_v18  ;;  %v582_v47 = vld [vmem:[%s14182_s2 + $0xf30] sm:$0xff] }
 0x316   :  { %4935 = vmatpush1.bf16.msra.mxu1 %v12273_v26  ;;  %4854 = vmatprep.subr.bf16.mxu0 %v12275_v2  ;;  %v12323_v2 = vcombine.high %v566_v55, %v574_v1  ;;  %v12326_v26 = vcombine.high %v567_v3, %v575_v32 }
 0x317   :  { %4936 = vmatprep.subr.bf16.mxu1 %v12278_v15  ;;  %v12321_v15 = vcombine.low %v551_v56, %v559_v39  ;;  %v591_v56 = vld [vmem:[%s14182_s2 + $0xf78] sm:$0xff]  ;;  %v12341_v39 = vcombine.low %v566_v55, %v574_v1  ;;  %v606_v55 = vld [vmem:[%s14182_s2 + $0xff0] sm:$0xff] }
 0x318   :  { %15740 = vst [vmem:[#allocation576_spill] sm:$0xff] %v12323_v2  ;;  %15741 = vst [vmem:[#allocation577_spill] sm:$0xff] %v12326_v26  ;;  %v599_v1 = vld [vmem:[%s14182_s2 + $0xfb8] sm:$0xff] }
 0x319   :  { %4855 = vmatpush1.bf16.msra.mxu0 %v12293_v58  ;;  %15739 = vst [vmem:[#allocation575_spill] sm:$0xff] %v12321_v15  ;;  %v598_v58 = vld [vmem:[%s14182_s2 + $0xfb0] sm:$0xff] }
 0x31a   :  { %4937 = vmatpush1.bf16.msra.mxu1 %v12297_v48  ;;  %4856 = vmatprep.subr.bf16.mxu0 %v12299_v34  ;;  %v12347_v34 = vcombine.high %v582_v47, %v590_v38  ;;  %v12350_v48 = vcombine.high %v583_v16, %v591_v56 }
 0x31b   :  { %4938 = vmatprep.subr.bf16.mxu1 %v12302_v14  ;;  %v12345_v14 = vcombine.low %v567_v3, %v575_v32  ;;  %v607_v3 = vld [vmem:[%s14182_s2 + $0xff8] sm:$0xff]  ;;  %v12365_v32 = vcombine.low %v582_v47, %v590_v38 }
 0x31c   :  { %v12381_v47 = vcombine.low %v599_v1, %v607_v3  ;;  %v15744_v38 = vld [vmem:[#allocation18_spill] sm:$0xff] }
 0x31d   :  { %4857 = vmatpush1.bf16.msra.mxu0 %v12317_v18  ;;  %v12377_v18 = vcombine.low %v598_v58, %v606_v55 }
 0x31e   :  { %4939 = vmatpush1.bf16.msra.mxu1 %v12321_v15  ;;  %4858 = vmatprep.subr.bf16.mxu0 %v12323_v2  ;;  %v12371_v2 = vcombine.high %v598_v58, %v606_v55  ;;  %v12374_v15 = vcombine.high %v599_v1, %v607_v3  ;;  %v15743_v58 = vld [vmem:[#allocation17_spill] sm:$0xff]  ;;  %v15747_v55 = vld [vmem:[#allocation20_spill] sm:$0xff]  ;;  %v15748_v1 = vld [vmem:[#allocation22_spill] sm:$0xff] }
 0x31f   :  { %4940 = vmatprep.subr.bf16.mxu1 %v12326_v26  ;;  %v12369_v26 = vcombine.low %v583_v16, %v591_v56  ;;  %v15745_v16 = vld [vmem:[#allocation21_spill] sm:$0xff]  ;;  %v15746_v56 = vld [vmem:[#allocation19_spill] sm:$0xff] }
 0x320   :  { %v15749_v3 = vld [vmem:[#allocation25_spill] sm:$0xff] }
 0x321   :  { %4859 = vmatpush1.bf16.msra.mxu0 %v12341_v39 }
 0x322   :  { %4941 = vmatpush1.bf16.msra.mxu1 %v12345_v14  ;;  %4860 = vmatprep.subr.bf16.mxu0 %v12347_v34 }
 0x323   :  { %4942 = vmatprep.subr.bf16.mxu1 %v12350_v48 }
 0x325   :  { %4861 = vmatpush1.bf16.msra.mxu0 %v12365_v32 }
 0x326   :  { %4943 = vmatpush1.bf16.msra.mxu1 %v12369_v26  ;;  %4862 = vmatprep.subr.bf16.mxu0 %v12371_v2 }
 0x327   :  { %4944 = vmatprep.subr.bf16.mxu1 %v12374_v15 }
 0x329   :  { %4863 = vmatpush1.bf16.msra.mxu0 %v12377_v18 }
 0x32a   :  { %4945 = vmatpush1.bf16.msra.mxu1 %v12381_v47  ;;  %5071 = vmatprep.subr.bf16.mxu0 %v8858_v10 }
 0x32b   :  { %5153 = vmatprep.subr.bf16.mxu1 %v8867_v13 }
 0x32c   :  { %4865 = vmatmul.mubr.bf16.vlgmr.msra.gmra.mrb[76].mxu0 %v10030_v30 }
 0x32d   :  { %4947 = vmatmul.mubr.bf16.vlgmr.msra.gmra.mrb[76].mxu1 %v10030_v30  ;;  %5072 = vmatpush1.bf16.msra.mxu0 %v8863_v12  ;;  %v15742_v30 = vld [vmem:[#allocation14_spill] sm:$0xff] }
 0x32e   :  { %5154 = vmatpush1.bf16.msra.mxu1 %v8865_v11  ;;  %5073 = vmatprep.subr.bf16.mxu0 %v8882_v17 }
 0x32f   :  { %5155 = vmatprep.subr.bf16.mxu1 %v8891_v21 }
 0x331   :  { %5074 = vmatpush1.bf16.msra.mxu0 %v8887_v19 }
 0x332   :  { %5156 = vmatpush1.bf16.msra.mxu1 %v8889_v20  ;;  %5075 = vmatprep.subr.bf16.mxu0 %v8906_v25 }
 0x333   :  { %5157 = vmatprep.subr.bf16.mxu1 %v8915_v29 }
 0x335   :  { %5076 = vmatpush1.bf16.msra.mxu0 %v8911_v27 }
 0x336   :  { %5158 = vmatpush1.bf16.msra.mxu1 %v8913_v28  ;;  %5077 = vmatprep.subr.bf16.mxu0 %v8930_v33 }
 0x337   :  { %5159 = vmatprep.subr.bf16.mxu1 %v8939_v37 }
 0x339   :  { %5078 = vmatpush1.bf16.msra.mxu0 %v8935_v35 }
 0x33a   :  { %5160 = vmatpush1.bf16.msra.mxu1 %v8937_v36  ;;  %5079 = vmatprep.subr.bf16.mxu0 %v8954_v42 }
 0x33b   :  { %5161 = vmatprep.subr.bf16.mxu1 %v8964_v46 }
 0x33d   :  { %5080 = vmatpush1.bf16.msra.mxu0 %v8959_v44 }
 0x33e   :  { %5162 = vmatpush1.bf16.msra.mxu1 %v8961_v45  ;;  %5081 = vmatprep.subr.bf16.mxu0 %v8979_v51 }
 0x33f   :  { %5163 = vmatprep.subr.bf16.mxu1 %v8987_v54 }
 0x341   :  { %5082 = vmatpush1.bf16.msra.mxu0 %v8977_v50  ;;  %v15786_v50 = vld [vmem:[#allocation110_spill] sm:$0xff] }
 0x342   :  { %5164 = vmatpush1.bf16.msra.mxu1 %v8985_v53  ;;  %5083 = vmatprep.subr.bf16.mxu0 %v9001_v59 }
 0x343   :  { %5165 = vmatprep.subr.bf16.mxu1 %v9011_v63  ;;  %v15781_v63 = vld [vmem:[#allocation95_spill] sm:$0xff] }
 0x345   :  { %5084 = vmatpush1.bf16.msra.mxu0 %v9007_v61  ;;  %v15772_v61 = vld [vmem:[#allocation44_spill] sm:$0xff] }
 0x346   :  { %5166 = vmatpush1.bf16.msra.mxu1 %v9009_v62  ;;  %5085 = vmatprep.subr.bf16.mxu0 %v9027_v5  ;;  %v15750_v62 = vld [vmem:[#allocation23_spill] sm:$0xff]  ;;  %v15751_v5 = vld [vmem:[#allocation24_spill] sm:$0xff] }
 0x347   :  { %5167 = vmatprep.subr.bf16.mxu1 %v9032_v7  ;;  %v15752_v7 = vld [vmem:[#allocation26_spill] sm:$0xff] }
 0x349   :  { %5086 = vmatpush1.bf16.msra.mxu0 %v15742_v30  ;;  %v15753_v30 = vld [vmem:[#allocation29_spill] sm:$0xff] }
 0x34a   :  { %5168 = vmatpush1.bf16.msra.mxu1 %v15743_v58  ;;  %5087 = vmatprep.subr.bf16.mxu0 %v15744_v38  ;;  %v15754_v58 = vld [vmem:[#allocation27_spill] sm:$0xff]  ;;  %v15755_v38 = vld [vmem:[#allocation28_spill] sm:$0xff] }
 0x34b   :  { %5169 = vmatprep.subr.bf16.mxu1 %v15745_v16  ;;  %v15756_v16 = vld [vmem:[#allocation30_spill] sm:$0xff] }
 0x34d   :  { %5088 = vmatpush1.bf16.msra.mxu0 %v15746_v56  ;;  %v15757_v56 = vld [vmem:[#allocation33_spill] sm:$0xff] }
 0x34e   :  { %5170 = vmatpush1.bf16.msra.mxu1 %v15747_v55  ;;  %5089 = vmatprep.subr.bf16.mxu0 %v15748_v1  ;;  %v15758_v55 = vld [vmem:[#allocation31_spill] sm:$0xff]  ;;  %v15759_v1 = vld [vmem:[#allocation32_spill] sm:$0xff] }
 0x34f   :  { %5171 = vmatprep.subr.bf16.mxu1 %v15749_v3  ;;  %v15760_v3 = vld [vmem:[#allocation34_spill] sm:$0xff] }
 0x351   :  { %5090 = vmatpush1.bf16.msra.mxu0 %v15750_v62  ;;  %v15761_v62 = vld [vmem:[#allocation37_spill] sm:$0xff] }
 0x352   :  { %5172 = vmatpush1.bf16.msra.mxu1 %v15751_v5  ;;  %5091 = vmatprep.subr.bf16.mxu0 %v15752_v7  ;;  %v15762_v5 = vld [vmem:[#allocation35_spill] sm:$0xff]  ;;  %v15763_v7 = vld [vmem:[#allocation36_spill] sm:$0xff] }
 0x353   :  { %5173 = vmatprep.subr.bf16.mxu1 %v15753_v30  ;;  %v15764_v30 = vld [vmem:[#allocation38_spill] sm:$0xff] }
 0x355   :  { %5092 = vmatpush1.bf16.msra.mxu0 %v15754_v58  ;;  %v15765_v58 = vld [vmem:[#allocation41_spill] sm:$0xff] }
 0x356   :  { %5174 = vmatpush1.bf16.msra.mxu1 %v15755_v38  ;;  %5093 = vmatprep.subr.bf16.mxu0 %v15756_v16  ;;  %v15766_v38 = vld [vmem:[#allocation39_spill] sm:$0xff]  ;;  %v15767_v16 = vld [vmem:[#allocation40_spill] sm:$0xff] }
 0x357   :  { %5175 = vmatprep.subr.bf16.mxu1 %v15757_v56  ;;  %v15768_v56 = vld [vmem:[#allocation42_spill] sm:$0xff] }
 0x359   :  { %5094 = vmatpush1.bf16.msra.mxu0 %v15758_v55  ;;  %v15769_v55 = vld [vmem:[#allocation45_spill] sm:$0xff] }
 0x35a   :  { %5176 = vmatpush1.bf16.msra.mxu1 %v15759_v1  ;;  %5095 = vmatprep.subr.bf16.mxu0 %v15760_v3  ;;  %v7748_v3 = vmul.f32 -1.442695, %v11367_v4  ;;  %v15770_v1 = vld [vmem:[#allocation43_spill] sm:$0xff]  ;;  %v7758_v4 = vmul.f32 -1.442695, %v12164_v0 }
 0x35b   :  { %5177 = vmatprep.subr.bf16.mxu1 %v15761_v62  ;;  %v15771_v62 = vld [vmem:[#allocation425_spill] sm:$0xff] }
 0x35c   :  { %8121 = vpow2.f32 %v7748_v3 }
 0x35d   :  { %5096 = vmatpush1.bf16.msra.mxu0 %v15762_v5  ;;  %v7750_v5 = vmul.f32 -1.442695, %v15771_v62  ;;  %v15777_v62 = vld [vmem:[#allocation50_spill] sm:$0xff] }
 0x35e   :  { %5178 = vmatpush1.bf16.msra.mxu1 %v15763_v7  ;;  %5097 = vmatprep.subr.bf16.mxu0 %v15764_v30  ;;  %v15773_v7 = vld [vmem:[#allocation46_spill] sm:$0xff]  ;;  %v15774_v30 = vld [vmem:[#allocation49_spill] sm:$0xff] }
 0x35f   :  { %5179 = vmatprep.subr.bf16.mxu1 %v15765_v58  ;;  %v7749_v58 = vmul.f32 -1.442695, %v11379_v31  ;;  %8123 = vpow2.f32 %v7750_v5  ;;  %v15778_v31 = vld [vmem:[#allocation53_spill] sm:$0xff] }
 0x361   :  { %5098 = vmatpush1.bf16.msra.mxu0 %v15766_v38  ;;  %8125 = vpow2.f32 %v7749_v58 }
 0x362   :  { %5180 = vmatpush1.bf16.msra.mxu1 %v15767_v16  ;;  %5099 = vmatprep.subr.bf16.mxu0 %v15768_v56  ;;  %v7751_v16 = vmul.f32 -1.442695, %v11382_v52  ;;  %v7756_v56 = vmul.f32 -1.442695, %v12155_v23  ;;  %v7759_v52 = vmul.f32 -1.442695, %v12173_v6 }
 0x363   :  { %5181 = vmatprep.subr.bf16.mxu1 %v15769_v55  ;;  %v15775_v55 = vld [vmem:[#allocation47_spill] sm:$0xff] }
 0x364   :  { %8127 = vpow2.f32 %v7751_v16 }
 0x365   :  { %5100 = vmatpush1.bf16.msra.mxu0 %v15770_v1  ;;  %v15776_v1 = vld [vmem:[#allocation48_spill] sm:$0xff]  ;;  %8129 = vpow2.f32 %v7756_v56 }
 0x366   :  { %5182 = vmatpush1.bf16.msra.mxu1 %v15772_v61  ;;  %5101 = vmatprep.subr.bf16.mxu0 %v15773_v7  ;;  %v7757_v7 = vmul.f32 -1.442695, %v12167_v8  ;;  %8131 = vpow2.f32 %v7758_v4  ;;  %v8122_v23 = vpop.eup %8121 }
 0x367   :  { %5183 = vmatprep.subr.bf16.mxu1 %v15774_v30 }
 0x368   :  { %8133 = vpow2.f32 %v7757_v7 }
 0x369   :  { %5102 = vmatpush1.bf16.msra.mxu0 %v15775_v55  ;;  %8135 = vpow2.f32 %v7759_v52  ;;  %v8124_v5 = vpop.eup %8123  ;;  %v4983_v55 = vadd.f32 1.0, %v8122_v23  ;;  %v15779_v52 = vld [vmem:[#allocation94_spill] sm:$0xff] }
 0x36a   :  { %5184 = vmatpush1.bf16.msra.mxu1 %v15776_v1  ;;  %5112 = vmatprep.subr.bf16.mxu0 %v15777_v62  ;;  %v4985_v30 = vadd.f32 1.0, %v8124_v5 }
 0x36b   :  { %5194 = vmatprep.subr.bf16.mxu1 %v15778_v31  ;;  %v8126_v3 = vpop.eup %8125  ;;  %8137 = vrcp.f32 %v4983_v55 }
 0x36c   :  { %v4984_v58 = vadd.f32 1.0, %v8126_v3  ;;  %8139 = vrcp.f32 %v4985_v30  ;;  %v15780_v3 = vld [vmem:[#allocation96_spill] sm:$0xff] }
 0x36e   :  { %v8128_v0 = vpop.eup %8127  ;;  %8141 = vrcp.f32 %v4984_v58 }
 0x36f   :  { %v8130_v1 = vpop.eup %8129  ;;  %v4986_v8 = vadd.f32 1.0, %v8128_v0 }
 0x370   :  { %v8132_v62 = vpop.eup %8131  ;;  %v5035_v16 = vadd.f32 1.0, %v8130_v1 }
 0x371   :  { %v5037_v6 = vadd.f32 1.0, %v8132_v62  ;;  %8143 = vrcp.f32 %v4986_v8  ;;  %v15782_v62 = vld [vmem:[#allocation97_spill] sm:$0xff] }
 0x372   :  { %v8134_v61 = vpop.eup %8133  ;;  %8145 = vrcp.f32 %v5035_v16 }
 0x373   :  { %v8136_v38 = vpop.eup %8135  ;;  %v5036_v56 = vadd.f32 1.0, %v8134_v61  ;;  %8147 = vrcp.f32 %v5037_v6 }
 0x374   :  { %v5038_v7 = vadd.f32 1.0, %v8136_v38 }
 0x375   :  { %8149 = vrcp.f32 %v5036_v56  ;;  %v8138_v16 = vpop.eup %8137 }
 0x376   :  { %8151 = vrcp.f32 %v5038_v7  ;;  %v8140_v6 = vpop.eup %8139 }
 0x378   :  { %v8142_v56 = vpop.eup %8141 }
 0x37f   :  { %v4702_v4 = vpop.f32.mrb[72].mxu0 }
 0x380   :  { %v4963_v23 = vadd.f32 %v4702_v4, %v15779_v52  ;;  %v4784_v5 = vpop.f32.mrb[72].mxu1  ;;  %v4704_v31 = vpop.f32.mrb[73].mxu0 }
 0x381   :  { %v4965_v0 = vadd.f32 %v4784_v5, %v15780_v3  ;;  %v4964_v55 = vadd.f32 %v4704_v31, %v15781_v63  ;;  %v4786_v1 = vpop.f32.mrb[73].mxu1  ;;  %v4706_v30 = vpop.f32.mrb[74].mxu0 }
 0x382   :  { %8153 = vtanh.f32 %v4963_v23  ;;  %v4966_v61 = vadd.f32 %v4786_v1, %v15782_v62  ;;  %v4788_v58 = vpop.f32.mrb[74].mxu1  ;;  %v4707_v38 = vpop.f32.mrb[75].mxu0  ;;  %v15783_v30 = vld [vmem:[#allocation106_spill] sm:$0xff]  ;;  %v15784_v62 = vld [vmem:[#allocation108_spill] sm:$0xff] }
 0x383   :  { %8155 = vtanh.f32 %v4965_v0  ;;  %v4789_v8 = vpop.f32.mrb[75].mxu1  ;;  %v8144_v4 = vpop.eup %8143 }
 0x384   :  { %8157 = vtanh.f32 %v4964_v55  ;;  %v8146_v7 = vpop.eup %8145  ;;  %v15785_v8 = vld [vmem:[#allocation107_spill] sm:$0xff] }
 0x385   :  { %8159 = vtanh.f32 %v4966_v61  ;;  %v8148_v52 = vpop.eup %8147  ;;  %v5047_v23 = vmul.f32 %v8146_v7, %v15783_v30  ;;  %v15788_v7 = vld [vmem:[#allocation125_spill] sm:$0xff]  ;;  %v15791_v30 = vld [vmem:[#allocation147_spill] sm:$0xff] }
 0x386   :  { %v8150_v5 = vpop.eup %8149  ;;  %v5049_v58 = vmul.f32 %v8148_v52, %v15784_v62  ;;  %v15789_v52 = vld [vmem:[#allocation123_spill] sm:$0xff] }
 0x387   :  { %v8152_v3 = vpop.eup %8151  ;;  %v5048_v55 = vmul.f32 %v8150_v5, %v15785_v8  ;;  %v15792_v5 = vld [vmem:[#allocation127_spill] sm:$0xff] }
 0x388   :  { %v5050_v54 = vmul.f32 %v8152_v3, %v15786_v50 }
 0x38c   :  { %v8154_v63 = vpop.eup %8153 }
 0x38d   :  { %v8156_v31 = vpop.eup %8155  ;;  %v5051_v59 = vmul.f32 %v8154_v63, %v8138_v16  ;;  %v15787_v16 = vld [vmem:[#allocation122_spill] sm:$0xff] }
 0x38e   :  { %v8158_v1 = vpop.eup %8157  ;;  %v5053_v0 = vmul.f32 %v8156_v31, %v8140_v6  ;;  %v1568_v63 = vadd.f32 %v15788_v7, %v15787_v16  ;;  %v15790_v6 = vld [vmem:[#allocation126_spill] sm:$0xff] }
 0x38f   :  { %v8160_v38 = vpop.eup %8159  ;;  %v12469_v53 = vadd.f32 %v5051_v59, %v5047_v23  ;;  %v5052_v61 = vmul.f32 %v8158_v1, %v8142_v56  ;;  %v1570_v31 = vadd.f32 %v15790_v6, %v15789_v52  ;;  %v1639_v59 = vadd.f32 %v15792_v5, %v15791_v30  ;;  %v15793_v56 = vld [vmem:[#allocation124_spill] sm:$0xff] }
 0x390   :  { %v12472_v51 = vadd.f32 %v5053_v0, %v5049_v58  ;;  %v5054_v45 = vmul.f32 %v8160_v38, %v8144_v4  ;;  %v15794_v1 = vld [vmem:[#allocation128_spill] sm:$0xff] }
 0x391   :  { %v12474_v44 = vadd.f32 %v5052_v61, %v5048_v55  ;;  %v1641_v50 = vadd.f32 %v15794_v1, %v15793_v56 }
 0x392   :  { %v12476_v46 = vadd.f32 %v5054_v45, %v5050_v54 }
 0x3ff   :  { %v4866_v23 = vpop.f32.mrb[76].mxu0 }
 0x400   :  { %v4967_v3 = vadd.f32 %v4866_v23, %v1568_v63  ;;  %v4948_v62 = vpop.f32.mrb[76].mxu1  ;;  %v4868_v4 = vpop.f32.mrb[77].mxu0 }
 0x401   :  { %v12486_v58 = vadd.f32 %v4948_v62, %v1639_v59  ;;  %v4968_v45 = vadd.f32 %v4868_v4, %v1570_v31  ;;  %v4950_v54 = vpop.f32.mrb[77].mxu1  ;;  %v4870_v0 = vpop.f32.mrb[78].mxu0 }
 0x402   :  { %v7752_v38 = vmul.f32 -1.442695, %v4967_v3  ;;  %v4970_v8 = vadd.f32 %v4950_v54, %v1641_v50  ;;  %v4952_v55 = vpop.f32.mrb[78].mxu1  ;;  %v4871_v61 = vpop.f32.mrb[79].mxu0 }
 0x403   :  { %v7753_v7 = vmul.f32 -1.442695, %v4968_v45  ;;  %v4953_v6 = vpop.f32.mrb[79].mxu1 }
 0x404   :  { %8161 = vpow2.f32 %v7752_v38  ;;  %v7755_v5 = vmul.f32 -1.442695, %v4970_v8  ;;  %v15796_v6 = vld [vmem:[#allocation52_spill] sm:$0xff] }
 0x405   :  { %8163 = vpow2.f32 %v7753_v7  ;;  %v15795_v7 = vld [vmem:[#allocation51_spill] sm:$0xff] }
 0x406   :  { %8165 = vpow2.f32 %v7755_v5  ;;  %v15797_v5 = vld [vmem:[#allocation129_spill] sm:$0xff] }
 0x407   :  { %8167 = vtanh.f32 %v12469_v53 }
 0x408   :  { %8169 = vtanh.f32 %v12474_v44 }
 0x40e   :  { %v8162_v30 = vpop.eup %8161 }
 0x40f   :  { %v5011_v63 = vadd.f32 1.0, %v8162_v30  ;;  %v8164_v23 = vpop.eup %8163 }
 0x410   :  { %v8166_v31 = vpop.eup %8165  ;;  %v5012_v59 = vadd.f32 1.0, %v8164_v23  ;;  %v15799_v23 = vld [vmem:[#allocation131_spill] sm:$0xff] }
 0x411   :  { %8171 = vrcp.f32 %v5011_v63  ;;  %v5014_v1 = vadd.f32 1.0, %v8166_v31  ;;  %v8168_v50 = vpop.eup %8167  ;;  %v15798_v63 = vld [vmem:[#allocation130_spill] sm:$0xff]  ;;  %v15800_v31 = vld [vmem:[#allocation132_spill] sm:$0xff] }
 0x412   :  { %8173 = vtanh.f32 %v12476_v46  ;;  %v8170_v3 = vpop.eup %8169 }
 0x413   :  { %8175 = vrcp.f32 %v5012_v59  ;;  %v15801_v59 = vld [vmem:[#allocation133_spill] sm:$0xff] }
 0x414   :  { %8177 = vrcp.f32 %v5014_v1  ;;  %v15802_v1 = vld [vmem:[#allocation134_spill] sm:$0xff] }
 0x41b   :  { %v8172_v62 = vpop.eup %8171 }
 0x41c   :  { %v8174_v4 = vpop.eup %8173  ;;  %v5063_v54 = vmul.f32 %v8172_v62, %v8168_v50  ;;  %v15803_v50 = vld [vmem:[#allocation135_spill] sm:$0xff]  ;;  %v15805_v62 = vld [vmem:[#allocation137_spill] sm:$0xff] }
 0x41d   :  { %v8176_v45 = vpop.eup %8175 }
 0x41e   :  { %v8178_v0 = vpop.eup %8177  ;;  %v5064_v38 = vmul.f32 %v8176_v45, %v8170_v3  ;;  %v12493_v55 = vpack.c.bf16 %v5063_v54, %v5063_v54  ;;  %v15804_v3 = vld [vmem:[#allocation136_spill] sm:$0xff]  ;;  %v15807_v45 = vld [vmem:[#allocation139_spill] sm:$0xff] }
 0x41f   :  { %v5066_v30 = vmul.f32 %v8178_v0, %v8174_v4  ;;  %v15806_v4 = vld [vmem:[#allocation138_spill] sm:$0xff]  ;;  %v15808_v54 = vld [vmem:[#allocation140_spill] sm:$0xff]  ;;  %v15809_v0 = vld [vmem:[#allocation141_spill] sm:$0xff] }
 0x420   :  { %v12491_v8 = vpack.c.bf16 %v5064_v38, %v5064_v38  ;;  %v15810_v38 = vld [vmem:[#allocation142_spill] sm:$0xff] }
 0x421   :  { %v12497_v61 = vpack.c.bf16 %v5066_v30, %v5066_v30  ;;  %v15811_v30 = vld [vmem:[#allocation143_spill] sm:$0xff] }
 0x422   :  { %5103 = vmatprep.mubr.bf16.mxu0 %v12491_v8  ;;  %5185 = vmatprep.mubr.bf16.mxu1 %v12491_v8 }
 0x423   :  { %5104 = vmatmul.mubr.bf16.vlgmr.msra.gmra.mrb[80].mxu0 %v12493_v55  ;;  %5186 = vmatmul.mubr.bf16.vlgmr.msra.gmra.mrb[80].mxu1 %v12493_v55 }
 0x424   :  { %5113 = vmatpush1.bf16.msra.mxu0 %v15795_v7  ;;  %5195 = vmatpush1.bf16.msra.mxu1 %v15796_v6 }
 0x425   :  { %5144 = vmatprep.mubr.bf16.mxu0 %v12497_v61  ;;  %5226 = vmatprep.mubr.bf16.mxu1 %v12497_v61 }
 0x426   :  { %5114 = vmatprep.subr.bf16.mxu0 %v15797_v5  ;;  %5196 = vmatprep.subr.bf16.mxu1 %v15798_v63  ;;  %v16073_v63 = vld [vmem:[#allocation55_spill] sm:$0xff] }
 0x428   :  { %5115 = vmatpush1.bf16.msra.mxu0 %v15799_v23  ;;  %5197 = vmatpush1.bf16.msra.mxu1 %v15800_v31  ;;  %v16070_v31 = vld [vmem:[#allocation423_spill] sm:$0xff] }
 0x429   :  { %5116 = vmatprep.subr.bf16.mxu0 %v15801_v59  ;;  %5198 = vmatprep.subr.bf16.mxu1 %v15802_v1  ;;  %v15812_v59 = vld [vmem:[#allocation144_spill] sm:$0xff]  ;;  %v15813_v1 = vld [vmem:[#allocation145_spill] sm:$0xff] }
 0x42c   :  { %5117 = vmatpush1.bf16.msra.mxu0 %v15803_v50  ;;  %5199 = vmatpush1.bf16.msra.mxu1 %v15804_v3  ;;  %v15814_v50 = vld [vmem:[#allocation146_spill] sm:$0xff]  ;;  %v15815_v3 = vld [vmem:[#allocation148_spill] sm:$0xff] }
 0x42d   :  { %5118 = vmatprep.subr.bf16.mxu0 %v15805_v62  ;;  %5200 = vmatprep.subr.bf16.mxu1 %v15806_v4  ;;  %v15816_v62 = vld [vmem:[#allocation149_spill] sm:$0xff]  ;;  %v15817_v4 = vld [vmem:[#allocation150_spill] sm:$0xff] }
 0x430   :  { %5119 = vmatpush1.bf16.msra.mxu0 %v15807_v45  ;;  %5201 = vmatpush1.bf16.msra.mxu1 %v15808_v54  ;;  %v15818_v45 = vld [vmem:[#allocation151_spill] sm:$0xff]  ;;  %v15819_v54 = vld [vmem:[#allocation152_spill] sm:$0xff] }
 0x431   :  { %5120 = vmatprep.subr.bf16.mxu0 %v15809_v0  ;;  %5202 = vmatprep.subr.bf16.mxu1 %v15810_v38  ;;  %v7754_v0 = vmul.f32 -1.442695, %v12486_v58  ;;  %v15820_v38 = vld [vmem:[#allocation153_spill] sm:$0xff] }
 0x432   :  { %v15828_v58 = vld [vmem:[#allocation161_spill] sm:$0xff] }
 0x433   :  { %8179 = vpow2.f32 %v7754_v0 }
 0x434   :  { %5121 = vmatpush1.bf16.msra.mxu0 %v15811_v30  ;;  %5203 = vmatpush1.bf16.msra.mxu1 %v15812_v59  ;;  %v15821_v30 = vld [vmem:[#allocation154_spill] sm:$0xff]  ;;  %v15822_v59 = vld [vmem:[#allocation155_spill] sm:$0xff] }
 0x435   :  { %5122 = vmatprep.subr.bf16.mxu0 %v15813_v1  ;;  %5204 = vmatprep.subr.bf16.mxu1 %v15814_v50  ;;  %v15823_v50 = vld [vmem:[#allocation156_spill] sm:$0xff] }
 0x436   :  { %v15835_v1 = vld [vmem:[#allocation168_spill] sm:$0xff] }
 0x438   :  { %5123 = vmatpush1.bf16.msra.mxu0 %v15815_v3  ;;  %5205 = vmatpush1.bf16.msra.mxu1 %v15816_v62  ;;  %v15824_v3 = vld [vmem:[#allocation157_spill] sm:$0xff]  ;;  %v15825_v62 = vld [vmem:[#allocation158_spill] sm:$0xff] }
 0x439   :  { %5124 = vmatprep.subr.bf16.mxu0 %v15817_v4  ;;  %5206 = vmatprep.subr.bf16.mxu1 %v15818_v45  ;;  %v15826_v4 = vld [vmem:[#allocation159_spill] sm:$0xff]  ;;  %v15827_v45 = vld [vmem:[#allocation160_spill] sm:$0xff] }
 0x43c   :  { %5125 = vmatpush1.bf16.msra.mxu0 %v15819_v54  ;;  %5207 = vmatpush1.bf16.msra.mxu1 %v15820_v38  ;;  %v15829_v54 = vld [vmem:[#allocation162_spill] sm:$0xff]  ;;  %v15830_v38 = vld [vmem:[#allocation163_spill] sm:$0xff] }
 0x43d   :  { %5126 = vmatprep.subr.bf16.mxu0 %v15821_v30  ;;  %5208 = vmatprep.subr.bf16.mxu1 %v15822_v59  ;;  %v15831_v30 = vld [vmem:[#allocation164_spill] sm:$0xff]  ;;  %v15832_v59 = vld [vmem:[#allocation165_spill] sm:$0xff]  ;;  %v8180_v0 = vpop.eup %8179 }
 0x440   :  { %5127 = vmatpush1.bf16.msra.mxu0 %v15823_v50  ;;  %5209 = vmatpush1.bf16.msra.mxu1 %v15824_v3  ;;  %v15833_v50 = vld [vmem:[#allocation166_spill] sm:$0xff]  ;;  %v15834_v3 = vld [vmem:[#allocation167_spill] sm:$0xff] }
 0x441   :  { %5128 = vmatprep.subr.bf16.mxu0 %v15825_v62  ;;  %5210 = vmatprep.subr.bf16.mxu1 %v15826_v4  ;;  %v5013_v62 = vadd.f32 1.0, %v8180_v0  ;;  %v15836_v4 = vld [vmem:[#allocation169_spill] sm:$0xff]  ;;  %v15843_v0 = vld [vmem:[#allocation176_spill] sm:$0xff] }
 0x443   :  { %8181 = vrcp.f32 %v5013_v62  ;;  %v15848_v62 = vld [vmem:[#allocation181_spill] sm:$0xff] }
 0x444   :  { %5129 = vmatpush1.bf16.msra.mxu0 %v15827_v45  ;;  %5211 = vmatpush1.bf16.msra.mxu1 %v15828_v58  ;;  %v15837_v45 = vld [vmem:[#allocation170_spill] sm:$0xff]  ;;  %v15838_v58 = vld [vmem:[#allocation171_spill] sm:$0xff]  ;;  %8183 = vtanh.f32 %v12472_v51 }
 0x445   :  { %5130 = vmatprep.subr.bf16.mxu0 %v15829_v54  ;;  %5212 = vmatprep.subr.bf16.mxu1 %v15830_v38  ;;  %v15839_v38 = vld [vmem:[#allocation172_spill] sm:$0xff]  ;;  %v15842_v54 = vld [vmem:[#allocation175_spill] sm:$0xff] }
 0x448   :  { %5131 = vmatpush1.bf16.msra.mxu0 %v15831_v30  ;;  %5213 = vmatpush1.bf16.msra.mxu1 %v15832_v59  ;;  %v15840_v30 = vld [vmem:[#allocation173_spill] sm:$0xff]  ;;  %v15841_v59 = vld [vmem:[#allocation174_spill] sm:$0xff] }
 0x449   :  { %5132 = vmatprep.subr.bf16.mxu0 %v15833_v50  ;;  %5214 = vmatprep.subr.bf16.mxu1 %v15834_v3  ;;  %v15851_v3 = vld [vmem:[#allocation184_spill] sm:$0xff]  ;;  %v15852_v50 = vld [vmem:[#allocation185_spill] sm:$0xff] }
 0x44c   :  { %5133 = vmatpush1.bf16.msra.mxu0 %v15835_v1  ;;  %5215 = vmatpush1.bf16.msra.mxu1 %v15836_v4  ;;  %v15844_v1 = vld [vmem:[#allocation177_spill] sm:$0xff]  ;;  %v15845_v4 = vld [vmem:[#allocation178_spill] sm:$0xff] }
 0x44d   :  { %5134 = vmatprep.subr.bf16.mxu0 %v15837_v45  ;;  %5216 = vmatprep.subr.bf16.mxu1 %v15838_v58  ;;  %v15846_v45 = vld [vmem:[#allocation179_spill] sm:$0xff]  ;;  %v15847_v58 = vld [vmem:[#allocation180_spill] sm:$0xff] }
 0x450   :  { %5135 = vmatpush1.bf16.msra.mxu0 %v15839_v38  ;;  %5217 = vmatpush1.bf16.msra.mxu1 %v15840_v30  ;;  %v15849_v38 = vld [vmem:[#allocation182_spill] sm:$0xff]  ;;  %v15850_v30 = vld [vmem:[#allocation183_spill] sm:$0xff] }
 0x451   :  { %5136 = vmatprep.subr.bf16.mxu0 %v15841_v59  ;;  %5218 = vmatprep.subr.bf16.mxu1 %v15842_v54  ;;  %v8182_v59 = vpop.eup %8181 }
 0x452   :  { %v8184_v54 = vpop.eup %8183 }
 0x454   :  { %5137 = vmatpush1.bf16.msra.mxu0 %v15843_v0  ;;  %5219 = vmatpush1.bf16.msra.mxu1 %v15844_v1  ;;  %v5065_v0 = vmul.f32 %v8184_v54, %v8182_v59  ;;  %v15853_v1 = vld [vmem:[#allocation186_spill] sm:$0xff]  ;;  %v15860_v59 = vld [vmem:[#allocation197_spill] sm:$0xff] }
 0x455   :  { %5138 = vmatprep.subr.bf16.mxu0 %v15845_v4  ;;  %5220 = vmatprep.subr.bf16.mxu1 %v15846_v45  ;;  %v15854_v4 = vld [vmem:[#allocation187_spill] sm:$0xff]  ;;  %v15855_v45 = vld [vmem:[#allocation188_spill] sm:$0xff]  ;;  %v15861_v54 = vld [vmem:[#allocation198_spill] sm:$0xff] }
 0x458   :  { %5139 = vmatpush1.bf16.msra.mxu0 %v15847_v58  ;;  %5221 = vmatpush1.bf16.msra.mxu1 %v15848_v62  ;;  %v15856_v58 = vld [vmem:[#allocation189_spill] sm:$0xff]  ;;  %v12567_v62 = vpack.c.bf16 %v5065_v0, %v5065_v0  ;;  %v15862_v0 = vld [vmem:[#allocation199_spill] sm:$0xff] }
 0x459   :  { %5140 = vmatprep.subr.bf16.mxu0 %v15849_v38  ;;  %5222 = vmatprep.subr.bf16.mxu1 %v15850_v30  ;;  %v15857_v38 = vld [vmem:[#allocation190_spill] sm:$0xff]  ;;  %v15858_v30 = vld [vmem:[#allocation191_spill] sm:$0xff] }
 0x45c   :  { %5141 = vmatpush1.bf16.msra.mxu0 %v15851_v3  ;;  %5223 = vmatpush1.bf16.msra.mxu1 %v15852_v50  ;;  %v15859_v50 = vld [vmem:[#allocation195_spill] sm:$0xff]  ;;  %v15871_v3 = vld [vmem:[#allocation212_spill] sm:$0xff] }
 0x45d   :  { %5142 = vmatprep.subr.bf16.mxu0 %v15853_v1  ;;  %5224 = vmatprep.subr.bf16.mxu1 %v15854_v4  ;;  %v15867_v4 = vld [vmem:[#allocation206_spill] sm:$0xff]  ;;  %v15869_v1 = vld [vmem:[#allocation209_spill] sm:$0xff] }
 0x460   :  { %5143 = vmatpush1.bf16.msra.mxu0 %v15855_v45  ;;  %5225 = vmatpush1.bf16.msra.mxu1 %v15856_v58  ;;  %v15863_v58 = vld [vmem:[#allocation200_spill] sm:$0xff]  ;;  %v15866_v45 = vld [vmem:[#allocation203_spill] sm:$0xff] }
 0x461   :  { %5235 = vmatprep.subr.bf16.mxu0 %v15857_v38  ;;  %5317 = vmatprep.subr.bf16.mxu1 %v15858_v30  ;;  %v15864_v38 = vld [vmem:[#allocation201_spill] sm:$0xff]  ;;  %v15865_v30 = vld [vmem:[#allocation202_spill] sm:$0xff] }
 0x463   :  { %5145 = vmatmul.mubr.bf16.vlgmr.msra.gmra.mrb[80].mxu0 %v12567_v62  ;;  %5227 = vmatmul.mubr.bf16.vlgmr.msra.gmra.mrb[80].mxu1 %v12567_v62 }
 0x464   :  { %5236 = vmatpush1.bf16.msra.mxu0 %v15859_v50  ;;  %5267 = vmatprep.mubr.bf16.mxu0 %v12491_v8  ;;  %v15868_v50 = vld [vmem:[#allocation208_spill] sm:$0xff] }
 0x465   :  { %5318 = vmatpush1.bf16.msra.mxu1 %v15860_v59  ;;  %5349 = vmatprep.mubr.bf16.mxu1 %v12491_v8  ;;  %v15870_v59 = vld [vmem:[#allocation211_spill] sm:$0xff] }
 0x466   :  { %5237 = vmatprep.subr.bf16.mxu0 %v15861_v54  ;;  %5319 = vmatprep.subr.bf16.mxu1 %v15862_v0  ;;  %v15872_v54 = vld [vmem:[#allocation213_spill] sm:$0xff]  ;;  %v15873_v0 = vld [vmem:[#allocation214_spill] sm:$0xff] }
 0x468   :  { %5238 = vmatpush1.bf16.msra.mxu0 %v15863_v58  ;;  %v15874_v58 = vld [vmem:[#allocation216_spill] sm:$0xff] }
 0x469   :  { %5320 = vmatpush1.bf16.msra.mxu1 %v15864_v38  ;;  %5239 = vmatprep.subr.bf16.mxu0 %v15865_v30  ;;  %v15875_v38 = vld [vmem:[#allocation218_spill] sm:$0xff]  ;;  %v15876_v30 = vld [vmem:[#allocation219_spill] sm:$0xff] }
 0x46a   :  { %5321 = vmatprep.subr.bf16.mxu1 %v15866_v45  ;;  %v15877_v45 = vld [vmem:[#allocation220_spill] sm:$0xff] }
 0x46c   :  { %5240 = vmatpush1.bf16.msra.mxu0 %v15867_v4  ;;  %v15878_v4 = vld [vmem:[#allocation221_spill] sm:$0xff] }
 0x46d   :  { %5322 = vmatpush1.bf16.msra.mxu1 %v15868_v50  ;;  %5241 = vmatprep.subr.bf16.mxu0 %v15869_v1  ;;  %v15879_v50 = vld [vmem:[#allocation222_spill] sm:$0xff]  ;;  %v15880_v1 = vld [vmem:[#allocation223_spill] sm:$0xff] }
 0x46e   :  { %5323 = vmatprep.subr.bf16.mxu1 %v15870_v59  ;;  %v15881_v59 = vld [vmem:[#allocation224_spill] sm:$0xff] }
 0x470   :  { %5242 = vmatpush1.bf16.msra.mxu0 %v15871_v3  ;;  %v15882_v3 = vld [vmem:[#allocation225_spill] sm:$0xff] }
 0x471   :  { %5324 = vmatpush1.bf16.msra.mxu1 %v15872_v54  ;;  %5243 = vmatprep.subr.bf16.mxu0 %v15873_v0  ;;  %v15883_v54 = vld [vmem:[#allocation226_spill] sm:$0xff]  ;;  %v15884_v0 = vld [vmem:[#allocation227_spill] sm:$0xff] }
 0x472   :  { %5325 = vmatprep.subr.bf16.mxu1 %v15874_v58  ;;  %v15885_v58 = vld [vmem:[#allocation228_spill] sm:$0xff] }
 0x474   :  { %5244 = vmatpush1.bf16.msra.mxu0 %v15875_v38  ;;  %v15886_v38 = vld [vmem:[#allocation229_spill] sm:$0xff] }
 0x475   :  { %5326 = vmatpush1.bf16.msra.mxu1 %v15876_v30  ;;  %5245 = vmatprep.subr.bf16.mxu0 %v15877_v45  ;;  %v15887_v30 = vld [vmem:[#allocation230_spill] sm:$0xff]  ;;  %v15888_v45 = vld [vmem:[#allocation231_spill] sm:$0xff] }
 0x476   :  { %5327 = vmatprep.subr.bf16.mxu1 %v15878_v4  ;;  %v15889_v4 = vld [vmem:[#allocation232_spill] sm:$0xff] }
 0x478   :  { %5246 = vmatpush1.bf16.msra.mxu0 %v15879_v50  ;;  %v15890_v50 = vld [vmem:[#allocation233_spill] sm:$0xff] }
 0x479   :  { %5328 = vmatpush1.bf16.msra.mxu1 %v15880_v1  ;;  %5247 = vmatprep.subr.bf16.mxu0 %v15881_v59  ;;  %v15891_v1 = vld [vmem:[#allocation234_spill] sm:$0xff]  ;;  %v15892_v59 = vld [vmem:[#allocation235_spill] sm:$0xff] }
 0x47a   :  { %5329 = vmatprep.subr.bf16.mxu1 %v15882_v3  ;;  %v15893_v3 = vld [vmem:[#allocation236_spill] sm:$0xff] }
 0x47c   :  { %5248 = vmatpush1.bf16.msra.mxu0 %v15883_v54  ;;  %v15894_v54 = vld [vmem:[#allocation237_spill] sm:$0xff] }
 0x47d   :  { %5330 = vmatpush1.bf16.msra.mxu1 %v15884_v0  ;;  %5249 = vmatprep.subr.bf16.mxu0 %v15885_v58  ;;  %v15895_v0 = vld [vmem:[#allocation238_spill] sm:$0xff]  ;;  %v15896_v58 = vld [vmem:[#allocation239_spill] sm:$0xff] }
 0x47e   :  { %5331 = vmatprep.subr.bf16.mxu1 %v15886_v38  ;;  %v15897_v38 = vld [vmem:[#allocation240_spill] sm:$0xff] }
 0x480   :  { %5250 = vmatpush1.bf16.msra.mxu0 %v15887_v30  ;;  %v15898_v30 = vld [vmem:[#allocation241_spill] sm:$0xff] }
 0x481   :  { %5332 = vmatpush1.bf16.msra.mxu1 %v15888_v45  ;;  %5251 = vmatprep.subr.bf16.mxu0 %v15889_v4  ;;  %v15899_v45 = vld [vmem:[#allocation242_spill] sm:$0xff]  ;;  %v15900_v4 = vld [vmem:[#allocation243_spill] sm:$0xff] }
 0x482   :  { %5333 = vmatprep.subr.bf16.mxu1 %v15890_v50  ;;  %v15901_v50 = vld [vmem:[#allocation244_spill] sm:$0xff] }
 0x484   :  { %5252 = vmatpush1.bf16.msra.mxu0 %v15891_v1  ;;  %v15902_v1 = vld [vmem:[#allocation245_spill] sm:$0xff] }
 0x485   :  { %5334 = vmatpush1.bf16.msra.mxu1 %v15892_v59  ;;  %5253 = vmatprep.subr.bf16.mxu0 %v15893_v3  ;;  %v15903_v59 = vld [vmem:[#allocation246_spill] sm:$0xff]  ;;  %v15904_v3 = vld [vmem:[#allocation247_spill] sm:$0xff] }
 0x486   :  { %5335 = vmatprep.subr.bf16.mxu1 %v15894_v54  ;;  %v15905_v54 = vld [vmem:[#allocation248_spill] sm:$0xff] }
 0x488   :  { %5254 = vmatpush1.bf16.msra.mxu0 %v15895_v0  ;;  %v15906_v0 = vld [vmem:[#allocation249_spill] sm:$0xff] }
 0x489   :  { %5336 = vmatpush1.bf16.msra.mxu1 %v15896_v58  ;;  %5255 = vmatprep.subr.bf16.mxu0 %v15897_v38  ;;  %v15907_v58 = vld [vmem:[#allocation250_spill] sm:$0xff]  ;;  %v15908_v38 = vld [vmem:[#allocation251_spill] sm:$0xff] }
 0x48a   :  { %5337 = vmatprep.subr.bf16.mxu1 %v15898_v30  ;;  %v15909_v30 = vld [vmem:[#allocation252_spill] sm:$0xff] }
 0x48c   :  { %5256 = vmatpush1.bf16.msra.mxu0 %v15899_v45  ;;  %v15910_v45 = vld [vmem:[#allocation253_spill] sm:$0xff] }
 0x48d   :  { %5338 = vmatpush1.bf16.msra.mxu1 %v15900_v4  ;;  %5257 = vmatprep.subr.bf16.mxu0 %v15901_v50  ;;  %v15911_v4 = vld [vmem:[#allocation254_spill] sm:$0xff]  ;;  %v15912_v50 = vld [vmem:[#allocation255_spill] sm:$0xff] }
 0x48e   :  { %5339 = vmatprep.subr.bf16.mxu1 %v15902_v1  ;;  %v15913_v1 = vld [vmem:[#allocation256_spill] sm:$0xff] }
 0x490   :  { %5258 = vmatpush1.bf16.msra.mxu0 %v15903_v59  ;;  %v15914_v59 = vld [vmem:[#allocation257_spill] sm:$0xff] }
 0x491   :  { %5340 = vmatpush1.bf16.msra.mxu1 %v15904_v3  ;;  %5259 = vmatprep.subr.bf16.mxu0 %v15905_v54  ;;  %v15915_v3 = vld [vmem:[#allocation258_spill] sm:$0xff]  ;;  %v15916_v54 = vld [vmem:[#allocation259_spill] sm:$0xff] }
 0x492   :  { %5341 = vmatprep.subr.bf16.mxu1 %v15906_v0  ;;  %v15917_v0 = vld [vmem:[#allocation260_spill] sm:$0xff] }
 0x494   :  { %5260 = vmatpush1.bf16.msra.mxu0 %v15907_v58  ;;  %v15918_v58 = vld [vmem:[#allocation261_spill] sm:$0xff] }
 0x495   :  { %5342 = vmatpush1.bf16.msra.mxu1 %v15908_v38  ;;  %5261 = vmatprep.subr.bf16.mxu0 %v15909_v30  ;;  %v15919_v38 = vld [vmem:[#allocation262_spill] sm:$0xff]  ;;  %v15920_v30 = vld [vmem:[#allocation263_spill] sm:$0xff] }
 0x496   :  { %5343 = vmatprep.subr.bf16.mxu1 %v15910_v45  ;;  %v15921_v45 = vld [vmem:[#allocation264_spill] sm:$0xff] }
 0x498   :  { %5262 = vmatpush1.bf16.msra.mxu0 %v15911_v4  ;;  %v15922_v4 = vld [vmem:[#allocation266_spill] sm:$0xff] }
 0x499   :  { %5344 = vmatpush1.bf16.msra.mxu1 %v15912_v50  ;;  %5263 = vmatprep.subr.bf16.mxu0 %v15913_v1  ;;  %v15933_v1 = vld [vmem:[#allocation283_spill] sm:$0xff]  ;;  %v15935_v50 = vld [vmem:[#allocation286_spill] sm:$0xff] }
 0x49a   :  { %5345 = vmatprep.subr.bf16.mxu1 %v15914_v59  ;;  %v15923_v59 = vld [vmem:[#allocation269_spill] sm:$0xff] }
 0x49c   :  { %5264 = vmatpush1.bf16.msra.mxu0 %v15915_v3  ;;  %v15931_v3 = vld [vmem:[#allocation280_spill] sm:$0xff] }
 0x49d   :  { %5346 = vmatpush1.bf16.msra.mxu1 %v15916_v54  ;;  %5265 = vmatprep.subr.bf16.mxu0 %v15917_v0  ;;  %v15924_v54 = vld [vmem:[#allocation271_spill] sm:$0xff]  ;;  %v15930_v0 = vld [vmem:[#allocation277_spill] sm:$0xff] }
 0x49e   :  { %5347 = vmatprep.subr.bf16.mxu1 %v15918_v58  ;;  %v15925_v58 = vld [vmem:[#allocation272_spill] sm:$0xff] }
 0x4a0   :  { %5266 = vmatpush1.bf16.msra.mxu0 %v15919_v38  ;;  %v15926_v38 = vld [vmem:[#allocation273_spill] sm:$0xff] }
 0x4a1   :  { %5348 = vmatpush1.bf16.msra.mxu1 %v15920_v30  ;;  %5276 = vmatprep.subr.bf16.mxu0 %v15921_v45  ;;  %v15927_v30 = vld [vmem:[#allocation274_spill] sm:$0xff]  ;;  %v15928_v45 = vld [vmem:[#allocation275_spill] sm:$0xff] }
 0x4a2   :  { %5358 = vmatprep.subr.bf16.mxu1 %v15922_v4  ;;  %v15929_v4 = vld [vmem:[#allocation276_spill] sm:$0xff] }
 0x4a3   :  { %5268 = vmatmul.mubr.bf16.vlgmr.msra.gmra.mrb[84].mxu0 %v12493_v55 }
 0x4a4   :  { %5350 = vmatmul.mubr.bf16.vlgmr.msra.gmra.mrb[84].mxu1 %v12493_v55  ;;  %5277 = vmatpush1.bf16.msra.mxu0 %v15923_v59  ;;  %v15932_v59 = vld [vmem:[#allocation282_spill] sm:$0xff] }
 0x4a5   :  { %5308 = vmatprep.mubr.bf16.mxu0 %v12497_v61  ;;  %5359 = vmatpush1.bf16.msra.mxu1 %v15924_v54  ;;  %v15934_v54 = vld [vmem:[#allocation285_spill] sm:$0xff] }
 0x4a6   :  { %5390 = vmatprep.mubr.bf16.mxu1 %v12497_v61  ;;  %5278 = vmatprep.subr.bf16.mxu0 %v15925_v58  ;;  %v15936_v58 = vld [vmem:[#allocation287_spill] sm:$0xff] }
 0x4a7   :  { %5360 = vmatprep.subr.bf16.mxu1 %v15926_v38  ;;  %v15937_v38 = vld [vmem:[#allocation288_spill] sm:$0xff] }
 0x4a8   :  { %5279 = vmatpush1.bf16.msra.mxu0 %v15927_v30  ;;  %v15938_v30 = vld [vmem:[#allocation290_spill] sm:$0xff] }
 0x4a9   :  { %5361 = vmatpush1.bf16.msra.mxu1 %v15928_v45  ;;  %5280 = vmatprep.subr.bf16.mxu0 %v15929_v4  ;;  %v15939_v45 = vld [vmem:[#allocation292_spill] sm:$0xff]  ;;  %v15940_v4 = vld [vmem:[#allocation293_spill] sm:$0xff] }
 0x4aa   :  { %5362 = vmatprep.subr.bf16.mxu1 %v15930_v0  ;;  %v15941_v0 = vld [vmem:[#allocation294_spill] sm:$0xff] }
 0x4ac   :  { %5281 = vmatpush1.bf16.msra.mxu0 %v15931_v3  ;;  %v15942_v3 = vld [vmem:[#allocation295_spill] sm:$0xff] }
 0x4ad   :  { %5363 = vmatpush1.bf16.msra.mxu1 %v15932_v59  ;;  %5282 = vmatprep.subr.bf16.mxu0 %v15933_v1  ;;  %v15943_v59 = vld [vmem:[#allocation296_spill] sm:$0xff]  ;;  %v15944_v1 = vld [vmem:[#allocation297_spill] sm:$0xff] }
 0x4ae   :  { %5364 = vmatprep.subr.bf16.mxu1 %v15934_v54  ;;  %v15945_v54 = vld [vmem:[#allocation298_spill] sm:$0xff] }
 0x4b0   :  { %5283 = vmatpush1.bf16.msra.mxu0 %v15935_v50  ;;  %v15946_v50 = vld [vmem:[#allocation299_spill] sm:$0xff] }
 0x4b1   :  { %5365 = vmatpush1.bf16.msra.mxu1 %v15936_v58  ;;  %5284 = vmatprep.subr.bf16.mxu0 %v15937_v38  ;;  %v15947_v58 = vld [vmem:[#allocation300_spill] sm:$0xff]  ;;  %v15948_v38 = vld [vmem:[#allocation301_spill] sm:$0xff] }
 0x4b2   :  { %5366 = vmatprep.subr.bf16.mxu1 %v15938_v30  ;;  %v15949_v30 = vld [vmem:[#allocation302_spill] sm:$0xff] }
 0x4b4   :  { %5285 = vmatpush1.bf16.msra.mxu0 %v15939_v45  ;;  %v15950_v45 = vld [vmem:[#allocation303_spill] sm:$0xff] }
 0x4b5   :  { %5367 = vmatpush1.bf16.msra.mxu1 %v15940_v4  ;;  %5286 = vmatprep.subr.bf16.mxu0 %v15941_v0  ;;  %v15951_v4 = vld [vmem:[#allocation304_spill] sm:$0xff]  ;;  %v15952_v0 = vld [vmem:[#allocation305_spill] sm:$0xff] }
 0x4b6   :  { %5368 = vmatprep.subr.bf16.mxu1 %v15942_v3  ;;  %v15953_v3 = vld [vmem:[#allocation306_spill] sm:$0xff] }
 0x4b8   :  { %5287 = vmatpush1.bf16.msra.mxu0 %v15943_v59  ;;  %v15954_v59 = vld [vmem:[#allocation307_spill] sm:$0xff] }
 0x4b9   :  { %5369 = vmatpush1.bf16.msra.mxu1 %v15944_v1  ;;  %5288 = vmatprep.subr.bf16.mxu0 %v15945_v54  ;;  %v15955_v1 = vld [vmem:[#allocation308_spill] sm:$0xff]  ;;  %v15956_v54 = vld [vmem:[#allocation309_spill] sm:$0xff] }
 0x4ba   :  { %5370 = vmatprep.subr.bf16.mxu1 %v15946_v50  ;;  %v15957_v50 = vld [vmem:[#allocation310_spill] sm:$0xff] }
 0x4bc   :  { %5289 = vmatpush1.bf16.msra.mxu0 %v15947_v58  ;;  %v15958_v58 = vld [vmem:[#allocation311_spill] sm:$0xff] }
 0x4bd   :  { %5371 = vmatpush1.bf16.msra.mxu1 %v15948_v38  ;;  %5290 = vmatprep.subr.bf16.mxu0 %v15949_v30  ;;  %v15959_v38 = vld [vmem:[#allocation312_spill] sm:$0xff]  ;;  %v15960_v30 = vld [vmem:[#allocation313_spill] sm:$0xff] }
 0x4be   :  { %5372 = vmatprep.subr.bf16.mxu1 %v15950_v45  ;;  %v15961_v45 = vld [vmem:[#allocation314_spill] sm:$0xff] }
 0x4c0   :  { %5291 = vmatpush1.bf16.msra.mxu0 %v15951_v4  ;;  %v15962_v4 = vld [vmem:[#allocation315_spill] sm:$0xff] }
 0x4c1   :  { %5373 = vmatpush1.bf16.msra.mxu1 %v15952_v0  ;;  %5292 = vmatprep.subr.bf16.mxu0 %v15953_v3  ;;  %v15963_v0 = vld [vmem:[#allocation316_spill] sm:$0xff]  ;;  %v15964_v3 = vld [vmem:[#allocation317_spill] sm:$0xff] }
 0x4c2   :  { %5374 = vmatprep.subr.bf16.mxu1 %v15954_v59  ;;  %v15965_v59 = vld [vmem:[#allocation318_spill] sm:$0xff] }
 0x4c4   :  { %5293 = vmatpush1.bf16.msra.mxu0 %v15955_v1  ;;  %v15966_v1 = vld [vmem:[#allocation319_spill] sm:$0xff] }
 0x4c5   :  { %5375 = vmatpush1.bf16.msra.mxu1 %v15956_v54  ;;  %5294 = vmatprep.subr.bf16.mxu0 %v15957_v50  ;;  %v15967_v54 = vld [vmem:[#allocation320_spill] sm:$0xff]  ;;  %v15968_v50 = vld [vmem:[#allocation321_spill] sm:$0xff] }
 0x4c6   :  { %5376 = vmatprep.subr.bf16.mxu1 %v15958_v58  ;;  %v15969_v58 = vld [vmem:[#allocation322_spill] sm:$0xff] }
 0x4c8   :  { %5295 = vmatpush1.bf16.msra.mxu0 %v15959_v38  ;;  %v15970_v38 = vld [vmem:[#allocation323_spill] sm:$0xff] }
 0x4c9   :  { %5377 = vmatpush1.bf16.msra.mxu1 %v15960_v30  ;;  %5296 = vmatprep.subr.bf16.mxu0 %v15961_v45  ;;  %v15971_v30 = vld [vmem:[#allocation324_spill] sm:$0xff]  ;;  %v15972_v45 = vld [vmem:[#allocation325_spill] sm:$0xff] }
 0x4ca   :  { %5378 = vmatprep.subr.bf16.mxu1 %v15962_v4  ;;  %v15973_v4 = vld [vmem:[#allocation326_spill] sm:$0xff] }
 0x4cc   :  { %5297 = vmatpush1.bf16.msra.mxu0 %v15963_v0  ;;  %v15974_v0 = vld [vmem:[#allocation327_spill] sm:$0xff] }
 0x4cd   :  { %5379 = vmatpush1.bf16.msra.mxu1 %v15964_v3  ;;  %5298 = vmatprep.subr.bf16.mxu0 %v15965_v59  ;;  %v15975_v3 = vld [vmem:[#allocation328_spill] sm:$0xff]  ;;  %v15976_v59 = vld [vmem:[#allocation329_spill] sm:$0xff] }
 0x4ce   :  { %5380 = vmatprep.subr.bf16.mxu1 %v15966_v1  ;;  %v15977_v1 = vld [vmem:[#allocation330_spill] sm:$0xff] }
 0x4d0   :  { %5299 = vmatpush1.bf16.msra.mxu0 %v15967_v54  ;;  %v15978_v54 = vld [vmem:[#allocation331_spill] sm:$0xff] }
 0x4d1   :  { %5381 = vmatpush1.bf16.msra.mxu1 %v15968_v50  ;;  %5300 = vmatprep.subr.bf16.mxu0 %v15969_v58  ;;  %v15979_v50 = vld [vmem:[#allocation332_spill] sm:$0xff]  ;;  %v15980_v58 = vld [vmem:[#allocation333_spill] sm:$0xff] }
 0x4d2   :  { %5382 = vmatprep.subr.bf16.mxu1 %v15970_v38  ;;  %v15981_v38 = vld [vmem:[#allocation334_spill] sm:$0xff] }
 0x4d4   :  { %5301 = vmatpush1.bf16.msra.mxu0 %v15971_v30  ;;  %v15982_v30 = vld [vmem:[#allocation335_spill] sm:$0xff] }
 0x4d5   :  { %5383 = vmatpush1.bf16.msra.mxu1 %v15972_v45  ;;  %5302 = vmatprep.subr.bf16.mxu0 %v15973_v4  ;;  %v15983_v45 = vld [vmem:[#allocation336_spill] sm:$0xff]  ;;  %v15984_v4 = vld [vmem:[#allocation337_spill] sm:$0xff] }
 0x4d6   :  { %5384 = vmatprep.subr.bf16.mxu1 %v15974_v0  ;;  %v15985_v0 = vld [vmem:[#allocation338_spill] sm:$0xff] }
 0x4d8   :  { %5303 = vmatpush1.bf16.msra.mxu0 %v15975_v3  ;;  %v15986_v3 = vld [vmem:[#allocation339_spill] sm:$0xff] }
 0x4d9   :  { %5385 = vmatpush1.bf16.msra.mxu1 %v15976_v59  ;;  %5304 = vmatprep.subr.bf16.mxu0 %v15977_v1  ;;  %v15997_v1 = vld [vmem:[#allocation350_spill] sm:$0xff]  ;;  %v15999_v59 = vld [vmem:[#allocation352_spill] sm:$0xff] }
 0x4da   :  { %5386 = vmatprep.subr.bf16.mxu1 %v15978_v54  ;;  %v15987_v54 = vld [vmem:[#allocation340_spill] sm:$0xff] }
 0x4dc   :  { %5305 = vmatpush1.bf16.msra.mxu0 %v15979_v50  ;;  %v15995_v50 = vld [vmem:[#allocation348_spill] sm:$0xff] }
 0x4dd   :  { %5387 = vmatpush1.bf16.msra.mxu1 %v15980_v58  ;;  %5306 = vmatprep.subr.bf16.mxu0 %v15981_v38  ;;  %v15988_v58 = vld [vmem:[#allocation341_spill] sm:$0xff]  ;;  %v15994_v38 = vld [vmem:[#allocation347_spill] sm:$0xff] }
 0x4de   :  { %5388 = vmatprep.subr.bf16.mxu1 %v15982_v30  ;;  %v15989_v30 = vld [vmem:[#allocation342_spill] sm:$0xff] }
 0x4e0   :  { %5307 = vmatpush1.bf16.msra.mxu0 %v15983_v45  ;;  %v15990_v45 = vld [vmem:[#allocation343_spill] sm:$0xff] }
 0x4e1   :  { %5389 = vmatpush1.bf16.msra.mxu1 %v15984_v4  ;;  %5399 = vmatprep.subr.bf16.mxu0 %v15985_v0  ;;  %v15991_v4 = vld [vmem:[#allocation344_spill] sm:$0xff]  ;;  %v15992_v0 = vld [vmem:[#allocation345_spill] sm:$0xff] }
 0x4e2   :  { %5481 = vmatprep.subr.bf16.mxu1 %v15986_v3  ;;  %v15993_v3 = vld [vmem:[#allocation346_spill] sm:$0xff] }
 0x4e3   :  { %5309 = vmatmul.mubr.bf16.vlgmr.msra.gmra.mrb[84].mxu0 %v12567_v62 }
 0x4e4   :  { %5391 = vmatmul.mubr.bf16.vlgmr.msra.gmra.mrb[84].mxu1 %v12567_v62  ;;  %5400 = vmatpush1.bf16.msra.mxu0 %v15987_v54  ;;  %v15996_v54 = vld [vmem:[#allocation349_spill] sm:$0xff] }
 0x4e5   :  { %5431 = vmatprep.mubr.bf16.mxu0 %v12491_v8  ;;  %5482 = vmatpush1.bf16.msra.mxu1 %v15988_v58  ;;  %v15998_v58 = vld [vmem:[#allocation351_spill] sm:$0xff] }
 0x4e6   :  { %5513 = vmatprep.mubr.bf16.mxu1 %v12491_v8  ;;  %5401 = vmatprep.subr.bf16.mxu0 %v15989_v30  ;;  %v16000_v30 = vld [vmem:[#allocation353_spill] sm:$0xff] }
 0x4e7   :  { %5483 = vmatprep.subr.bf16.mxu1 %v15990_v45  ;;  %v16001_v45 = vld [vmem:[#allocation354_spill] sm:$0xff] }
 0x4e8   :  { %5402 = vmatpush1.bf16.msra.mxu0 %v15991_v4  ;;  %v16002_v4 = vld [vmem:[#allocation355_spill] sm:$0xff] }
 0x4e9   :  { %5484 = vmatpush1.bf16.msra.mxu1 %v15992_v0  ;;  %5403 = vmatprep.subr.bf16.mxu0 %v15993_v3  ;;  %v16003_v0 = vld [vmem:[#allocation356_spill] sm:$0xff]  ;;  %v16004_v3 = vld [vmem:[#allocation357_spill] sm:$0xff] }
 0x4ea   :  { %5485 = vmatprep.subr.bf16.mxu1 %v15994_v38  ;;  %v16005_v38 = vld [vmem:[#allocation358_spill] sm:$0xff] }
 0x4ec   :  { %5404 = vmatpush1.bf16.msra.mxu0 %v15995_v50  ;;  %v16006_v50 = vld [vmem:[#allocation359_spill] sm:$0xff] }
 0x4ed   :  { %5486 = vmatpush1.bf16.msra.mxu1 %v15996_v54  ;;  %5405 = vmatprep.subr.bf16.mxu0 %v15997_v1  ;;  %v16007_v54 = vld [vmem:[#allocation360_spill] sm:$0xff]  ;;  %v16008_v1 = vld [vmem:[#allocation361_spill] sm:$0xff] }
 0x4ee   :  { %5487 = vmatprep.subr.bf16.mxu1 %v15998_v58  ;;  %v16009_v58 = vld [vmem:[#allocation362_spill] sm:$0xff] }
 0x4f0   :  { %5406 = vmatpush1.bf16.msra.mxu0 %v15999_v59  ;;  %v16010_v59 = vld [vmem:[#allocation363_spill] sm:$0xff] }
 0x4f1   :  { %5488 = vmatpush1.bf16.msra.mxu1 %v16000_v30  ;;  %5407 = vmatprep.subr.bf16.mxu0 %v16001_v45  ;;  %v16011_v30 = vld [vmem:[#allocation364_spill] sm:$0xff]  ;;  %v16012_v45 = vld [vmem:[#allocation365_spill] sm:$0xff] }
 0x4f2   :  { %5489 = vmatprep.subr.bf16.mxu1 %v16002_v4  ;;  %v16013_v4 = vld [vmem:[#allocation366_spill] sm:$0xff] }
 0x4f4   :  { %5408 = vmatpush1.bf16.msra.mxu0 %v16003_v0  ;;  %v16014_v0 = vld [vmem:[#allocation367_spill] sm:$0xff] }
 0x4f5   :  { %5490 = vmatpush1.bf16.msra.mxu1 %v16004_v3  ;;  %5409 = vmatprep.subr.bf16.mxu0 %v16005_v38  ;;  %v16015_v3 = vld [vmem:[#allocation368_spill] sm:$0xff]  ;;  %v16016_v38 = vld [vmem:[#allocation369_spill] sm:$0xff] }
 0x4f6   :  { %5491 = vmatprep.subr.bf16.mxu1 %v16006_v50  ;;  %v16017_v50 = vld [vmem:[#allocation370_spill] sm:$0xff] }
 0x4f8   :  { %5410 = vmatpush1.bf16.msra.mxu0 %v16007_v54  ;;  %v16018_v54 = vld [vmem:[#allocation371_spill] sm:$0xff] }
 0x4f9   :  { %5492 = vmatpush1.bf16.msra.mxu1 %v16008_v1  ;;  %5411 = vmatprep.subr.bf16.mxu0 %v16009_v58  ;;  %v16019_v1 = vld [vmem:[#allocation372_spill] sm:$0xff]  ;;  %v16020_v58 = vld [vmem:[#allocation373_spill] sm:$0xff] }
 0x4fa   :  { %5493 = vmatprep.subr.bf16.mxu1 %v16010_v59  ;;  %v16021_v59 = vld [vmem:[#allocation374_spill] sm:$0xff] }
 0x4fc   :  { %5412 = vmatpush1.bf16.msra.mxu0 %v16011_v30  ;;  %v16022_v30 = vld [vmem:[#allocation375_spill] sm:$0xff] }
 0x4fd   :  { %5494 = vmatpush1.bf16.msra.mxu1 %v16012_v45  ;;  %5413 = vmatprep.subr.bf16.mxu0 %v16013_v4  ;;  %v16023_v45 = vld [vmem:[#allocation376_spill] sm:$0xff]  ;;  %v16024_v4 = vld [vmem:[#allocation377_spill] sm:$0xff] }
 0x4fe   :  { %5495 = vmatprep.subr.bf16.mxu1 %v16014_v0  ;;  %v16025_v0 = vld [vmem:[#allocation378_spill] sm:$0xff] }
 0x500   :  { %5414 = vmatpush1.bf16.msra.mxu0 %v16015_v3  ;;  %v16026_v3 = vld [vmem:[#allocation379_spill] sm:$0xff] }
 0x501   :  { %5496 = vmatpush1.bf16.msra.mxu1 %v16016_v38  ;;  %5415 = vmatprep.subr.bf16.mxu0 %v16017_v50  ;;  %v16027_v38 = vld [vmem:[#allocation380_spill] sm:$0xff]  ;;  %v16028_v50 = vld [vmem:[#allocation381_spill] sm:$0xff] }
 0x502   :  { %5497 = vmatprep.subr.bf16.mxu1 %v16018_v54  ;;  %v16029_v54 = vld [vmem:[#allocation382_spill] sm:$0xff] }
 0x504   :  { %5416 = vmatpush1.bf16.msra.mxu0 %v16019_v1  ;;  %v16030_v1 = vld [vmem:[#allocation383_spill] sm:$0xff] }
 0x505   :  { %5498 = vmatpush1.bf16.msra.mxu1 %v16020_v58  ;;  %5417 = vmatprep.subr.bf16.mxu0 %v16021_v59  ;;  %v16031_v58 = vld [vmem:[#allocation384_spill] sm:$0xff]  ;;  %v16032_v59 = vld [vmem:[#allocation385_spill] sm:$0xff] }
 0x506   :  { %5499 = vmatprep.subr.bf16.mxu1 %v16022_v30  ;;  %v16033_v30 = vld [vmem:[#allocation386_spill] sm:$0xff] }
 0x508   :  { %5418 = vmatpush1.bf16.msra.mxu0 %v16023_v45  ;;  %v16034_v45 = vld [vmem:[#allocation387_spill] sm:$0xff] }
 0x509   :  { %5500 = vmatpush1.bf16.msra.mxu1 %v16024_v4  ;;  %5419 = vmatprep.subr.bf16.mxu0 %v16025_v0  ;;  %v16035_v4 = vld [vmem:[#allocation388_spill] sm:$0xff]  ;;  %v16036_v0 = vld [vmem:[#allocation389_spill] sm:$0xff] }
 0x50a   :  { %5501 = vmatprep.subr.bf16.mxu1 %v16026_v3  ;;  %v16037_v3 = vld [vmem:[#allocation390_spill] sm:$0xff] }
 0x50c   :  { %5420 = vmatpush1.bf16.msra.mxu0 %v16027_v38  ;;  %v16038_v38 = vld [vmem:[#allocation391_spill] sm:$0xff] }
 0x50d   :  { %5502 = vmatpush1.bf16.msra.mxu1 %v16028_v50  ;;  %5421 = vmatprep.subr.bf16.mxu0 %v16029_v54  ;;  %v16039_v50 = vld [vmem:[#allocation392_spill] sm:$0xff]  ;;  %v16040_v54 = vld [vmem:[#allocation393_spill] sm:$0xff] }
 0x50e   :  { %5503 = vmatprep.subr.bf16.mxu1 %v16030_v1  ;;  %v16041_v1 = vld [vmem:[#allocation394_spill] sm:$0xff] }
 0x510   :  { %5422 = vmatpush1.bf16.msra.mxu0 %v16031_v58  ;;  %v16042_v58 = vld [vmem:[#allocation395_spill] sm:$0xff] }
 0x511   :  { %5504 = vmatpush1.bf16.msra.mxu1 %v16032_v59  ;;  %5423 = vmatprep.subr.bf16.mxu0 %v16033_v30  ;;  %v16043_v59 = vld [vmem:[#allocation396_spill] sm:$0xff]  ;;  %v16044_v30 = vld [vmem:[#allocation397_spill] sm:$0xff] }
 0x512   :  { %5505 = vmatprep.subr.bf16.mxu1 %v16034_v45  ;;  %v16045_v45 = vld [vmem:[#allocation398_spill] sm:$0xff] }
 0x514   :  { %5424 = vmatpush1.bf16.msra.mxu0 %v16035_v4  ;;  %v16046_v4 = vld [vmem:[#allocation399_spill] sm:$0xff] }
 0x515   :  { %5506 = vmatpush1.bf16.msra.mxu1 %v16036_v0  ;;  %5425 = vmatprep.subr.bf16.mxu0 %v16037_v3  ;;  %v16047_v0 = vld [vmem:[#allocation400_spill] sm:$0xff]  ;;  %v16048_v3 = vld [vmem:[#allocation401_spill] sm:$0xff] }
 0x516   :  { %5507 = vmatprep.subr.bf16.mxu1 %v16038_v38  ;;  %v16049_v38 = vld [vmem:[#allocation402_spill] sm:$0xff] }
 0x518   :  { %5426 = vmatpush1.bf16.msra.mxu0 %v16039_v50  ;;  %v16050_v50 = vld [vmem:[#allocation403_spill] sm:$0xff] }
 0x519   :  { %5508 = vmatpush1.bf16.msra.mxu1 %v16040_v54  ;;  %5427 = vmatprep.subr.bf16.mxu0 %v16041_v1  ;;  %v16061_v1 = vld [vmem:[#allocation414_spill] sm:$0xff]  ;;  %v16063_v54 = vld [vmem:[#allocation416_spill] sm:$0xff] }
 0x51a   :  { %5509 = vmatprep.subr.bf16.mxu1 %v16042_v58  ;;  %v16051_v58 = vld [vmem:[#allocation404_spill] sm:$0xff] }
 0x51c   :  { %5428 = vmatpush1.bf16.msra.mxu0 %v16043_v59  ;;  %v16059_v59 = vld [vmem:[#allocation412_spill] sm:$0xff] }
 0x51d   :  { %5510 = vmatpush1.bf16.msra.mxu1 %v16044_v30  ;;  %5429 = vmatprep.subr.bf16.mxu0 %v16045_v45  ;;  %v16052_v30 = vld [vmem:[#allocation405_spill] sm:$0xff]  ;;  %v16058_v45 = vld [vmem:[#allocation411_spill] sm:$0xff] }
 0x51e   :  { %5511 = vmatprep.subr.bf16.mxu1 %v16046_v4  ;;  %v16053_v4 = vld [vmem:[#allocation406_spill] sm:$0xff] }
 0x520   :  { %5430 = vmatpush1.bf16.msra.mxu0 %v16047_v0  ;;  %v16054_v0 = vld [vmem:[#allocation407_spill] sm:$0xff] }
 0x521   :  { %5512 = vmatpush1.bf16.msra.mxu1 %v16048_v3  ;;  %5440 = vmatprep.subr.bf16.mxu0 %v16049_v38  ;;  %v16055_v3 = vld [vmem:[#allocation408_spill] sm:$0xff]  ;;  %v16056_v38 = vld [vmem:[#allocation409_spill] sm:$0xff] }
 0x522   :  { %5522 = vmatprep.subr.bf16.mxu1 %v16050_v50  ;;  %v16057_v50 = vld [vmem:[#allocation410_spill] sm:$0xff] }
 0x523   :  { %5432 = vmatmul.mubr.bf16.vlgmr.msra.gmra.mrb[88].mxu0 %v12493_v55 }
 0x524   :  { %5514 = vmatmul.mubr.bf16.vlgmr.msra.gmra.mrb[88].mxu1 %v12493_v55  ;;  %5441 = vmatpush1.bf16.msra.mxu0 %v16051_v58  ;;  %v16060_v58 = vld [vmem:[#allocation413_spill] sm:$0xff] }
 0x525   :  { %5472 = vmatprep.mubr.bf16.mxu0 %v12497_v61  ;;  %5523 = vmatpush1.bf16.msra.mxu1 %v16052_v30  ;;  %v16062_v30 = vld [vmem:[#allocation415_spill] sm:$0xff] }
 0x526   :  { %5554 = vmatprep.mubr.bf16.mxu1 %v12497_v61  ;;  %5442 = vmatprep.subr.bf16.mxu0 %v16053_v4  ;;  %v16064_v4 = vld [vmem:[#allocation417_spill] sm:$0xff] }
 0x527   :  { %5524 = vmatprep.subr.bf16.mxu1 %v16054_v0  ;;  %v16065_v0 = vld [vmem:[#allocation418_spill] sm:$0xff] }
 0x528   :  { %5443 = vmatpush1.bf16.msra.mxu0 %v16055_v3  ;;  %v16066_v3 = vld [vmem:[#allocation419_spill] sm:$0xff] }
 0x529   :  { %5525 = vmatpush1.bf16.msra.mxu1 %v16056_v38  ;;  %5444 = vmatprep.subr.bf16.mxu0 %v16057_v50  ;;  %v16067_v38 = vld [vmem:[#allocation420_spill] sm:$0xff]  ;;  %v16068_v50 = vld [vmem:[#allocation421_spill] sm:$0xff] }
 0x52a   :  { %5526 = vmatprep.subr.bf16.mxu1 %v16058_v45  ;;  %v16069_v45 = vld [vmem:[#allocation422_spill] sm:$0xff] }
 0x52c   :  { %5445 = vmatpush1.bf16.msra.mxu0 %v16059_v59 }
 0x52d   :  { %5527 = vmatpush1.bf16.msra.mxu1 %v16060_v58  ;;  %5446 = vmatprep.subr.bf16.mxu0 %v16061_v1  ;;  %v16071_v1 = vld [vmem:[#allocation54_spill] sm:$0xff] }
 0x52e   :  { %5528 = vmatprep.subr.bf16.mxu1 %v16062_v30 }
 0x530   :  { %5447 = vmatpush1.bf16.msra.mxu0 %v16063_v54  ;;  %v16072_v54 = vld [vmem:[#allocation56_spill] sm:$0xff] }
 0x531   :  { %5529 = vmatpush1.bf16.msra.mxu1 %v16064_v4  ;;  %5448 = vmatprep.subr.bf16.mxu0 %v16065_v0 }
 0x532   :  { %5530 = vmatprep.subr.bf16.mxu1 %v16066_v3 }
 0x534   :  { %5449 = vmatpush1.bf16.msra.mxu0 %v16067_v38  ;;  %v16074_v38 = vld [vmem:[#allocation58_spill] sm:$0xff] }
 0x535   :  { %5531 = vmatpush1.bf16.msra.mxu1 %v16068_v50  ;;  %5450 = vmatprep.subr.bf16.mxu0 %v16069_v45 }
 0x536   :  { %v5146_v59 = vpop.f32.mrb[80].mxu0  ;;  %v5228_v58 = vpop.f32.mrb[80].mxu1  ;;  %5532 = vmatprep.subr.bf16.mxu1 %v16070_v31 }
 0x537   :  { %v12800_v30 = vadd.f32 %v5146_v59, %v16071_v1  ;;  %v12803_v23 = vadd.f32 %v5228_v58, %v16072_v54  ;;  %v5148_v4 = vpop.f32.mrb[81].mxu0  ;;  %v5230_v0 = vpop.f32.mrb[81].mxu1  ;;  %v16075_v58 = vld [vmem:[#allocation426_spill] sm:$0xff]  ;;  %v16076_v59 = vld [vmem:[#allocation427_spill] sm:$0xff] }
 0x538   :  { %v12806_v3 = vadd.f32 %v5148_v4, %v16073_v63  ;;  %v12809_v5 = vadd.f32 %v5230_v0, %v16074_v38  ;;  %v5150_v50 = vpop.f32.mrb[82].mxu0  ;;  %v5232_v45 = vpop.f32.mrb[82].mxu1  ;;  %5451 = vmatpush1.bf16.msra.mxu0 %v11349_v60  ;;  %v16077_v63 = vld [vmem:[#allocation428_spill] sm:$0xff]  ;;  %v16078_v4 = vld [vmem:[#allocation429_spill] sm:$0xff]  ;;  %v16083_v54 = vld [vmem:[#allocation434_spill] sm:$0xff] }
 0x539   :  { %5533 = vmatpush1.bf16.msra.mxu1 %v11353_v41  ;;  %v5151_v31 = vpop.f32.mrb[83].mxu0  ;;  %v5233_v1 = vpop.f32.mrb[83].mxu1  ;;  %5452 = vmatprep.subr.bf16.mxu0 %v11355_v49  ;;  %v16079_v50 = vld [vmem:[#allocation430_spill] sm:$0xff]  ;;  %v16080_v45 = vld [vmem:[#allocation431_spill] sm:$0xff]  ;;  %v16081_v38 = vld [vmem:[#allocation432_spill] sm:$0xff] }
 0x53a   :  { %5534 = vmatprep.subr.bf16.mxu1 %v11358_v24  ;;  %v16082_v31 = vld [vmem:[#allocation433_spill] sm:$0xff]  ;;  %v16084_v0 = vld [vmem:[#allocation435_spill] sm:$0xff]  ;;  %v16085_v1 = vld [vmem:[#allocation436_spill] sm:$0xff] }
 0x53c   :  { %5453 = vmatpush1.bf16.msra.mxu0 %v16075_v58  ;;  %v16086_v58 = vld [vmem:[#allocation437_spill] sm:$0xff] }
 0x53d   :  { %5535 = vmatpush1.bf16.msra.mxu1 %v16076_v59  ;;  %5454 = vmatprep.subr.bf16.mxu0 %v16077_v63  ;;  %v16087_v59 = vld [vmem:[#allocation438_spill] sm:$0xff]  ;;  %v16088_v63 = vld [vmem:[#allocation439_spill] sm:$0xff] }
 0x53e   :  { %5536 = vmatprep.subr.bf16.mxu1 %v16078_v4  ;;  %v16089_v4 = vld [vmem:[#allocation440_spill] sm:$0xff] }
 0x540   :  { %5455 = vmatpush1.bf16.msra.mxu0 %v16079_v50  ;;  %v16090_v50 = vld [vmem:[#allocation441_spill] sm:$0xff] }
 0x541   :  { %5537 = vmatpush1.bf16.msra.mxu1 %v16080_v45  ;;  %5456 = vmatprep.subr.bf16.mxu0 %v16081_v38  ;;  %v16091_v45 = vld [vmem:[#allocation442_spill] sm:$0xff]  ;;  %v16092_v38 = vld [vmem:[#allocation443_spill] sm:$0xff] }
 0x542   :  { %5538 = vmatprep.subr.bf16.mxu1 %v16082_v31  ;;  %v16093_v31 = vld [vmem:[#allocation444_spill] sm:$0xff] }
 0x544   :  { %5457 = vmatpush1.bf16.msra.mxu0 %v16083_v54  ;;  %v16094_v54 = vld [vmem:[#allocation445_spill] sm:$0xff] }
 0x545   :  { %5539 = vmatpush1.bf16.msra.mxu1 %v16084_v0  ;;  %5458 = vmatprep.subr.bf16.mxu0 %v16085_v1  ;;  %v16095_v0 = vld [vmem:[#allocation446_spill] sm:$0xff]  ;;  %v16096_v1 = vld [vmem:[#allocation447_spill] sm:$0xff] }
 0x546   :  { %5540 = vmatprep.subr.bf16.mxu1 %v16086_v58  ;;  %v16097_v58 = vld [vmem:[#allocation448_spill] sm:$0xff] }
 0x548   :  { %5459 = vmatpush1.bf16.msra.mxu0 %v16087_v59  ;;  %v16098_v59 = vld [vmem:[#allocation449_spill] sm:$0xff] }
 0x549   :  { %5541 = vmatpush1.bf16.msra.mxu1 %v16088_v63  ;;  %5460 = vmatprep.subr.bf16.mxu0 %v16089_v4  ;;  %v16099_v63 = vld [vmem:[#allocation450_spill] sm:$0xff]  ;;  %v16100_v4 = vld [vmem:[#allocation451_spill] sm:$0xff] }
 0x54a   :  { %5542 = vmatprep.subr.bf16.mxu1 %v16090_v50  ;;  %v16101_v50 = vld [vmem:[#allocation452_spill] sm:$0xff] }
 0x54c   :  { %5461 = vmatpush1.bf16.msra.mxu0 %v16091_v45  ;;  %v16102_v45 = vld [vmem:[#allocation453_spill] sm:$0xff] }
 0x54d   :  { %5543 = vmatpush1.bf16.msra.mxu1 %v16092_v38  ;;  %5462 = vmatprep.subr.bf16.mxu0 %v16093_v31  ;;  %v16103_v38 = vld [vmem:[#allocation454_spill] sm:$0xff]  ;;  %v16104_v31 = vld [vmem:[#allocation455_spill] sm:$0xff] }
 0x54e   :  { %5544 = vmatprep.subr.bf16.mxu1 %v16094_v54  ;;  %v16105_v54 = vld [vmem:[#allocation456_spill] sm:$0xff] }
 0x550   :  { %5463 = vmatpush1.bf16.msra.mxu0 %v16095_v0  ;;  %v16106_v0 = vld [vmem:[#allocation457_spill] sm:$0xff] }
 0x551   :  { %5545 = vmatpush1.bf16.msra.mxu1 %v16096_v1  ;;  %5464 = vmatprep.subr.bf16.mxu0 %v16097_v58  ;;  %v16107_v1 = vld [vmem:[#allocation458_spill] sm:$0xff]  ;;  %v16108_v58 = vld [vmem:[#allocation459_spill] sm:$0xff] }
 0x552   :  { %5546 = vmatprep.subr.bf16.mxu1 %v16098_v59  ;;  %v16109_v59 = vld [vmem:[#allocation460_spill] sm:$0xff] }
 0x554   :  { %5465 = vmatpush1.bf16.msra.mxu0 %v16099_v63  ;;  %v16110_v63 = vld [vmem:[#allocation461_spill] sm:$0xff] }
 0x555   :  { %5547 = vmatpush1.bf16.msra.mxu1 %v16100_v4  ;;  %5466 = vmatprep.subr.bf16.mxu0 %v16101_v50  ;;  %v16111_v4 = vld [vmem:[#allocation462_spill] sm:$0xff]  ;;  %v16112_v50 = vld [vmem:[#allocation463_spill] sm:$0xff] }
 0x556   :  { %5548 = vmatprep.subr.bf16.mxu1 %v16102_v45  ;;  %v16113_v45 = vld [vmem:[#allocation464_spill] sm:$0xff] }
 0x558   :  { %5467 = vmatpush1.bf16.msra.mxu0 %v16103_v38  ;;  %v16114_v38 = vld [vmem:[#allocation465_spill] sm:$0xff] }
 0x559   :  { %5549 = vmatpush1.bf16.msra.mxu1 %v16104_v31  ;;  %5468 = vmatprep.subr.bf16.mxu0 %v16105_v54  ;;  %v16125_v54 = vld [vmem:[#allocation476_spill] sm:$0xff] }
 0x55a   :  { %5550 = vmatprep.subr.bf16.mxu1 %v16106_v0  ;;  %v16115_v0 = vld [vmem:[#allocation466_spill] sm:$0xff] }
 0x55c   :  { %5469 = vmatpush1.bf16.msra.mxu0 %v16107_v1  ;;  %v16123_v1 = vld [vmem:[#allocation474_spill] sm:$0xff] }
 0x55d   :  { %5551 = vmatpush1.bf16.msra.mxu1 %v16108_v58  ;;  %5470 = vmatprep.subr.bf16.mxu0 %v16109_v59  ;;  %v16116_v58 = vld [vmem:[#allocation467_spill] sm:$0xff]  ;;  %v16122_v59 = vld [vmem:[#allocation473_spill] sm:$0xff] }
 0x55e   :  { %5552 = vmatprep.subr.bf16.mxu1 %v16110_v63  ;;  %v16117_v63 = vld [vmem:[#allocation468_spill] sm:$0xff] }
 0x560   :  { %5471 = vmatpush1.bf16.msra.mxu0 %v16111_v4  ;;  %v16118_v4 = vld [vmem:[#allocation469_spill] sm:$0xff] }
 0x561   :  { %5553 = vmatpush1.bf16.msra.mxu1 %v16112_v50  ;;  %5563 = vmatprep.subr.bf16.mxu0 %v16113_v45  ;;  %v16119_v50 = vld [vmem:[#allocation470_spill] sm:$0xff]  ;;  %v16120_v45 = vld [vmem:[#allocation471_spill] sm:$0xff] }
 0x562   :  { %5645 = vmatprep.subr.bf16.mxu1 %v16114_v38  ;;  %v16121_v38 = vld [vmem:[#allocation472_spill] sm:$0xff] }
 0x563   :  { %5473 = vmatmul.mubr.bf16.vlgmr.msra.gmra.mrb[88].mxu0 %v12567_v62 }
 0x564   :  { %5555 = vmatmul.mubr.bf16.vlgmr.msra.gmra.mrb[88].mxu1 %v12567_v62  ;;  %5564 = vmatpush1.bf16.msra.mxu0 %v16115_v0  ;;  %v16124_v0 = vld [vmem:[#allocation475_spill] sm:$0xff] }
 0x565   :  { %5595 = vmatprep.mubr.bf16.mxu0 %v12491_v8  ;;  %5646 = vmatpush1.bf16.msra.mxu1 %v16116_v58  ;;  %v16126_v58 = vld [vmem:[#allocation477_spill] sm:$0xff] }
 0x566   :  { %5677 = vmatprep.mubr.bf16.mxu1 %v12491_v8  ;;  %5565 = vmatprep.subr.bf16.mxu0 %v16117_v63  ;;  %v16127_v8 = vld [vmem:[#allocation478_spill] sm:$0xff]  ;;  %v16128_v63 = vld [vmem:[#allocation479_spill] sm:$0xff] }
 0x567   :  { %5647 = vmatprep.subr.bf16.mxu1 %v16118_v4  ;;  %v16129_v4 = vld [vmem:[#allocation480_spill] sm:$0xff] }
 0x568   :  { %5566 = vmatpush1.bf16.msra.mxu0 %v16119_v50  ;;  %v16130_v50 = vld [vmem:[#allocation481_spill] sm:$0xff] }
 0x569   :  { %5648 = vmatpush1.bf16.msra.mxu1 %v16120_v45  ;;  %5567 = vmatprep.subr.bf16.mxu0 %v16121_v38  ;;  %v16131_v45 = vld [vmem:[#allocation482_spill] sm:$0xff]  ;;  %v16132_v38 = vld [vmem:[#allocation483_spill] sm:$0xff] }
 0x56a   :  { %5649 = vmatprep.subr.bf16.mxu1 %v16122_v59  ;;  %v16133_v59 = vld [vmem:[#allocation484_spill] sm:$0xff] }
 0x56c   :  { %5568 = vmatpush1.bf16.msra.mxu0 %v16123_v1  ;;  %v16134_v1 = vld [vmem:[#allocation485_spill] sm:$0xff] }
 0x56d   :  { %5650 = vmatpush1.bf16.msra.mxu1 %v16124_v0  ;;  %5569 = vmatprep.subr.bf16.mxu0 %v16125_v54  ;;  %v16135_v0 = vld [vmem:[#allocation486_spill] sm:$0xff]  ;;  %v16136_v54 = vld [vmem:[#allocation487_spill] sm:$0xff] }
 0x56e   :  { %5651 = vmatprep.subr.bf16.mxu1 %v16126_v58  ;;  %v16137_v58 = vld [vmem:[#allocation488_spill] sm:$0xff] }
 0x570   :  { %5570 = vmatpush1.bf16.msra.mxu0 %v16127_v8  ;;  %v16138_v8 = vld [vmem:[#allocation489_spill] sm:$0xff] }
 0x571   :  { %5652 = vmatpush1.bf16.msra.mxu1 %v16128_v63  ;;  %5571 = vmatprep.subr.bf16.mxu0 %v16129_v4  ;;  %v16139_v63 = vld [vmem:[#allocation490_spill] sm:$0xff]  ;;  %v16140_v4 = vld [vmem:[#allocation491_spill] sm:$0xff] }
 0x572   :  { %5653 = vmatprep.subr.bf16.mxu1 %v16130_v50  ;;  %v16141_v50 = vld [vmem:[#allocation492_spill] sm:$0xff] }
 0x574   :  { %5572 = vmatpush1.bf16.msra.mxu0 %v16131_v45  ;;  %v16142_v45 = vld [vmem:[#allocation493_spill] sm:$0xff] }
 0x575   :  { %5654 = vmatpush1.bf16.msra.mxu1 %v16132_v38  ;;  %5573 = vmatprep.subr.bf16.mxu0 %v16133_v59  ;;  %v16143_v38 = vld [vmem:[#allocation494_spill] sm:$0xff]  ;;  %v16144_v59 = vld [vmem:[#allocation495_spill] sm:$0xff] }
 0x576   :  { %5655 = vmatprep.subr.bf16.mxu1 %v16134_v1  ;;  %v16145_v1 = vld [vmem:[#allocation496_spill] sm:$0xff] }
 0x578   :  { %5574 = vmatpush1.bf16.msra.mxu0 %v16135_v0  ;;  %v16146_v0 = vld [vmem:[#allocation497_spill] sm:$0xff] }
 0x579   :  { %5656 = vmatpush1.bf16.msra.mxu1 %v16136_v54  ;;  %5575 = vmatprep.subr.bf16.mxu0 %v16137_v58  ;;  %v16147_v54 = vld [vmem:[#allocation498_spill] sm:$0xff]  ;;  %v16148_v58 = vld [vmem:[#allocation499_spill] sm:$0xff] }
 0x57a   :  { %5657 = vmatprep.subr.bf16.mxu1 %v16138_v8  ;;  %v16149_v8 = vld [vmem:[#allocation500_spill] sm:$0xff] }
 0x57c   :  { %5576 = vmatpush1.bf16.msra.mxu0 %v16139_v63  ;;  %v16150_v63 = vld [vmem:[#allocation501_spill] sm:$0xff] }
 0x57d   :  { %5658 = vmatpush1.bf16.msra.mxu1 %v16140_v4  ;;  %5577 = vmatprep.subr.bf16.mxu0 %v16141_v50  ;;  %v16151_v4 = vld [vmem:[#allocation502_spill] sm:$0xff]  ;;  %v16152_v50 = vld [vmem:[#allocation503_spill] sm:$0xff] }
 0x57e   :  { %5659 = vmatprep.subr.bf16.mxu1 %v16142_v45  ;;  %v16153_v45 = vld [vmem:[#allocation504_spill] sm:$0xff] }
 0x580   :  { %5578 = vmatpush1.bf16.msra.mxu0 %v16143_v38  ;;  %v16154_v38 = vld [vmem:[#allocation505_spill] sm:$0xff] }
 0x581   :  { %5660 = vmatpush1.bf16.msra.mxu1 %v16144_v59  ;;  %5579 = vmatprep.subr.bf16.mxu0 %v16145_v1  ;;  %v16155_v59 = vld [vmem:[#allocation506_spill] sm:$0xff]  ;;  %v16156_v1 = vld [vmem:[#allocation507_spill] sm:$0xff] }
 0x582   :  { %5661 = vmatprep.subr.bf16.mxu1 %v16146_v0  ;;  %v16157_v0 = vld [vmem:[#allocation508_spill] sm:$0xff] }
 0x584   :  { %5580 = vmatpush1.bf16.msra.mxu0 %v16147_v54  ;;  %v16158_v54 = vld [vmem:[#allocation509_spill] sm:$0xff] }
 0x585   :  { %5662 = vmatpush1.bf16.msra.mxu1 %v16148_v58  ;;  %5581 = vmatprep.subr.bf16.mxu0 %v16149_v8  ;;  %v16159_v58 = vld [vmem:[#allocation510_spill] sm:$0xff]  ;;  %v16160_v8 = vld [vmem:[#allocation511_spill] sm:$0xff] }
 0x586   :  { %5663 = vmatprep.subr.bf16.mxu1 %v16150_v63  ;;  %v16161_v63 = vld [vmem:[#allocation512_spill] sm:$0xff] }
 0x588   :  { %5582 = vmatpush1.bf16.msra.mxu0 %v16151_v4  ;;  %v16162_v4 = vld [vmem:[#allocation513_spill] sm:$0xff] }
 0x589   :  { %5664 = vmatpush1.bf16.msra.mxu1 %v16152_v50  ;;  %5583 = vmatprep.subr.bf16.mxu0 %v16153_v45  ;;  %v16163_v50 = vld [vmem:[#allocation514_spill] sm:$0xff]  ;;  %v16164_v45 = vld [vmem:[#allocation515_spill] sm:$0xff] }
 0x58a   :  { %5665 = vmatprep.subr.bf16.mxu1 %v16154_v38  ;;  %v16165_v38 = vld [vmem:[#allocation516_spill] sm:$0xff] }
 0x58c   :  { %5584 = vmatpush1.bf16.msra.mxu0 %v16155_v59  ;;  %v16166_v59 = vld [vmem:[#allocation517_spill] sm:$0xff] }
 0x58d   :  { %5666 = vmatpush1.bf16.msra.mxu1 %v16156_v1  ;;  %5585 = vmatprep.subr.bf16.mxu0 %v16157_v0  ;;  %v16167_v1 = vld [vmem:[#allocation518_spill] sm:$0xff]  ;;  %v16168_v0 = vld [vmem:[#allocation519_spill] sm:$0xff] }
 0x58e   :  { %5667 = vmatprep.subr.bf16.mxu1 %v16158_v54  ;;  %v16169_v54 = vld [vmem:[#allocation520_spill] sm:$0xff] }
 0x590   :  { %5586 = vmatpush1.bf16.msra.mxu0 %v16159_v58  ;;  %v16170_v58 = vld [vmem:[#allocation521_spill] sm:$0xff] }
 0x591   :  { %5668 = vmatpush1.bf16.msra.mxu1 %v16160_v8  ;;  %5587 = vmatprep.subr.bf16.mxu0 %v16161_v63  ;;  %v16171_v8 = vld [vmem:[#allocation522_spill] sm:$0xff]  ;;  %v16172_v63 = vld [vmem:[#allocation523_spill] sm:$0xff] }
 0x592   :  { %5669 = vmatprep.subr.bf16.mxu1 %v16162_v4  ;;  %v16173_v4 = vld [vmem:[#allocation524_spill] sm:$0xff] }
 0x594   :  { %5588 = vmatpush1.bf16.msra.mxu0 %v16163_v50  ;;  %v16174_v50 = vld [vmem:[#allocation525_spill] sm:$0xff] }
 0x595   :  { %5670 = vmatpush1.bf16.msra.mxu1 %v16164_v45  ;;  %5589 = vmatprep.subr.bf16.mxu0 %v16165_v38  ;;  %v16175_v45 = vld [vmem:[#allocation526_spill] sm:$0xff]  ;;  %v16176_v38 = vld [vmem:[#allocation527_spill] sm:$0xff] }
 0x596   :  { %5671 = vmatprep.subr.bf16.mxu1 %v16166_v59  ;;  %v16177_v59 = vld [vmem:[#allocation528_spill] sm:$0xff] }
 0x598   :  { %5590 = vmatpush1.bf16.msra.mxu0 %v16167_v1  ;;  %v16178_v1 = vld [vmem:[#allocation529_spill] sm:$0xff] }
 0x599   :  { %5672 = vmatpush1.bf16.msra.mxu1 %v16168_v0  ;;  %5591 = vmatprep.subr.bf16.mxu0 %v16169_v54  ;;  %v16200_v0 = vld [vmem:[#allocation76_spill] sm:$0xff] }
 0x59a   :  { %5673 = vmatprep.subr.bf16.mxu1 %v16170_v58  ;;  %v16179_v58 = vld [vmem:[#allocation530_spill] sm:$0xff] }
 0x59c   :  { %5592 = vmatpush1.bf16.msra.mxu0 %v16171_v8  ;;  %v16189_v8 = vld [vmem:[#allocation540_spill] sm:$0xff] }
 0x59d   :  { %5674 = vmatpush1.bf16.msra.mxu1 %v16172_v63  ;;  %5593 = vmatprep.subr.bf16.mxu0 %v16173_v4  ;;  %v16180_v63 = vld [vmem:[#allocation531_spill] sm:$0xff]  ;;  %v16186_v4 = vld [vmem:[#allocation537_spill] sm:$0xff] }
 0x59e   :  { %5675 = vmatprep.subr.bf16.mxu1 %v16174_v50  ;;  %v16181_v50 = vld [vmem:[#allocation532_spill] sm:$0xff] }
 0x5a0   :  { %5594 = vmatpush1.bf16.msra.mxu0 %v16175_v45  ;;  %v16182_v45 = vld [vmem:[#allocation533_spill] sm:$0xff] }
 0x5a1   :  { %5676 = vmatpush1.bf16.msra.mxu1 %v16176_v38  ;;  %5604 = vmatprep.subr.bf16.mxu0 %v16177_v59  ;;  %v16183_v38 = vld [vmem:[#allocation534_spill] sm:$0xff]  ;;  %v16184_v59 = vld [vmem:[#allocation535_spill] sm:$0xff] }
 0x5a2   :  { %5686 = vmatprep.subr.bf16.mxu1 %v16178_v1  ;;  %v16185_v1 = vld [vmem:[#allocation536_spill] sm:$0xff] }
 0x5a3   :  { %5596 = vmatmul.mubr.bf16.vlgmr.msra.gmra.mrb[92].mxu0 %v12493_v55 }
 0x5a4   :  { %5678 = vmatmul.mubr.bf16.vlgmr.msra.gmra.mrb[92].mxu1 %v12493_v55  ;;  %5605 = vmatpush1.bf16.msra.mxu0 %v16179_v58  ;;  %v16187_v55 = vld [vmem:[#allocation538_spill] sm:$0xff]  ;;  %v16188_v58 = vld [vmem:[#allocation539_spill] sm:$0xff] }
 0x5a5   :  { %5636 = vmatprep.mubr.bf16.mxu0 %v12497_v61  ;;  %5687 = vmatpush1.bf16.msra.mxu1 %v16180_v63  ;;  %v16190_v63 = vld [vmem:[#allocation541_spill] sm:$0xff] }
 0x5a6   :  { %5718 = vmatprep.mubr.bf16.mxu1 %v12497_v61  ;;  %5606 = vmatprep.subr.bf16.mxu0 %v16181_v50  ;;  %v16191_v61 = vld [vmem:[#allocation542_spill] sm:$0xff]  ;;  %v16192_v50 = vld [vmem:[#allocation543_spill] sm:$0xff] }
 0x5a7   :  { %5688 = vmatprep.subr.bf16.mxu1 %v16182_v45  ;;  %v16193_v45 = vld [vmem:[#allocation544_spill] sm:$0xff] }
 0x5a8   :  { %5607 = vmatpush1.bf16.msra.mxu0 %v16183_v38  ;;  %v16194_v38 = vld [vmem:[#allocation545_spill] sm:$0xff] }
 0x5a9   :  { %5689 = vmatpush1.bf16.msra.mxu1 %v16184_v59  ;;  %5608 = vmatprep.subr.bf16.mxu0 %v16185_v1  ;;  %v16195_v59 = vld [vmem:[#allocation546_spill] sm:$0xff]  ;;  %v16196_v1 = vld [vmem:[#allocation547_spill] sm:$0xff] }
 0x5aa   :  { %5690 = vmatprep.subr.bf16.mxu1 %v16186_v4  ;;  %v16197_v4 = vld [vmem:[#allocation548_spill] sm:$0xff] }
 0x5ac   :  { %5609 = vmatpush1.bf16.msra.mxu0 %v16187_v55 }
 0x5ad   :  { %5691 = vmatpush1.bf16.msra.mxu1 %v16188_v58  ;;  %5610 = vmatprep.subr.bf16.mxu0 %v16189_v8  ;;  %v16198_v58 = vld [vmem:[#allocation549_spill] sm:$0xff]  ;;  %v16199_v8 = vld [vmem:[#allocation74_spill] sm:$0xff] }
 0x5ae   :  { %5692 = vmatprep.subr.bf16.mxu1 %v16190_v63 }
 0x5b0   :  { %5611 = vmatpush1.bf16.msra.mxu0 %v16191_v61 }
 0x5b1   :  { %5693 = vmatpush1.bf16.msra.mxu1 %v16192_v50  ;;  %5612 = vmatprep.subr.bf16.mxu0 %v16193_v45  ;;  %v16201_v45 = vld [vmem:[#allocation75_spill] sm:$0xff] }
 0x5b2   :  { %5694 = vmatprep.subr.bf16.mxu1 %v16194_v38 }
 0x5b4   :  { %5613 = vmatpush1.bf16.msra.mxu0 %v16195_v59 }
 0x5b5   :  { %5695 = vmatpush1.bf16.msra.mxu1 %v16196_v1  ;;  %5614 = vmatprep.subr.bf16.mxu0 %v16197_v4  ;;  %v16202_v1 = vld [vmem:[#allocation78_spill] sm:$0xff] }
 0x5b6   :  { %v5310_v55 = vpop.f32.mrb[84].mxu0  ;;  %5696 = vmatprep.subr.bf16.mxu1 %v16198_v58 }
 0x5b7   :  { %v12948_v54 = vadd.f32 %v5310_v55, %v16199_v8  ;;  %v5392_v63 = vpop.f32.mrb[84].mxu1  ;;  %v5312_v61 = vpop.f32.mrb[85].mxu0 }
 0x5b8   :  { %v12951_v50 = vadd.f32 %v5392_v63, %v16200_v0  ;;  %v12954_v31 = vadd.f32 %v5312_v61, %v16201_v45  ;;  %v5394_v38 = vpop.f32.mrb[85].mxu1  ;;  %v5314_v59 = vpop.f32.mrb[86].mxu0  ;;  %5615 = vmatpush1.bf16.msra.mxu0 %v12137_v22  ;;  %v16203_v63 = vld [vmem:[#allocation551_spill] sm:$0xff]  ;;  %v16204_v45 = vld [vmem:[#allocation552_spill] sm:$0xff]  ;;  %v16206_v0 = vld [vmem:[#allocation554_spill] sm:$0xff] }
 0x5b9   :  { %v12958_v4 = vadd.f32 %v5394_v38, %v16202_v1  ;;  %v5396_v24 = vpop.f32.mrb[86].mxu1  ;;  %5697 = vmatpush1.bf16.msra.mxu1 %v12141_v40  ;;  %v5315_v8 = vpop.f32.mrb[87].mxu0  ;;  %5616 = vmatprep.subr.bf16.mxu0 %v12143_v43  ;;  %v16205_v59 = vld [vmem:[#allocation553_spill] sm:$0xff]  ;;  %v16207_v38 = vld [vmem:[#allocation555_spill] sm:$0xff]  ;;  %v16210_v61 = vld [vmem:[#allocation558_spill] sm:$0xff] }
 0x5ba   :  { %v5397_v55 = vpop.f32.mrb[87].mxu1  ;;  %5698 = vmatprep.subr.bf16.mxu1 %v12146_v9  ;;  %v16208_v24 = vld [vmem:[#allocation556_spill] sm:$0xff]  ;;  %v16209_v1 = vld [vmem:[#allocation557_spill] sm:$0xff]  ;;  %v16211_v8 = vld [vmem:[#allocation559_spill] sm:$0xff] }
 0x5bb   :  { %v16212_v55 = vld [vmem:[#allocation560_spill] sm:$0xff] }
 0x5bc   :  { %5617 = vmatpush1.bf16.msra.mxu0 %v12170_v57  ;;  %v16213_v57 = vld [vmem:[#allocation561_spill] sm:$0xff] }
 0x5bd   :  { %5699 = vmatpush1.bf16.msra.mxu1 %v16203_v63  ;;  %5618 = vmatprep.subr.bf16.mxu0 %v16204_v45  ;;  %v16214_v63 = vld [vmem:[#allocation562_spill] sm:$0xff]  ;;  %v16215_v45 = vld [vmem:[#allocation563_spill] sm:$0xff] }
 0x5be   :  { %5700 = vmatprep.subr.bf16.mxu1 %v16205_v59  ;;  %v16216_v59 = vld [vmem:[#allocation564_spill] sm:$0xff] }
 0x5c0   :  { %5619 = vmatpush1.bf16.msra.mxu0 %v16206_v0  ;;  %v16217_v0 = vld [vmem:[#allocation565_spill] sm:$0xff] }
 0x5c1   :  { %5701 = vmatpush1.bf16.msra.mxu1 %v16207_v38  ;;  %5620 = vmatprep.subr.bf16.mxu0 %v16208_v24  ;;  %v16218_v38 = vld [vmem:[#allocation566_spill] sm:$0xff]  ;;  %v16219_v24 = vld [vmem:[#allocation567_spill] sm:$0xff] }
 0x5c2   :  { %5702 = vmatprep.subr.bf16.mxu1 %v16209_v1  ;;  %v16220_v1 = vld [vmem:[#allocation568_spill] sm:$0xff] }
 0x5c4   :  { %5621 = vmatpush1.bf16.msra.mxu0 %v16210_v61  ;;  %v16221_v61 = vld [vmem:[#allocation569_spill] sm:$0xff] }
 0x5c5   :  { %5703 = vmatpush1.bf16.msra.mxu1 %v16211_v8  ;;  %5622 = vmatprep.subr.bf16.mxu0 %v16212_v55  ;;  %v16222_v8 = vld [vmem:[#allocation570_spill] sm:$0xff]  ;;  %v16223_v55 = vld [vmem:[#allocation571_spill] sm:$0xff] }
 0x5c6   :  { %5704 = vmatprep.subr.bf16.mxu1 %v16213_v57  ;;  %v16224_v57 = vld [vmem:[#allocation572_spill] sm:$0xff] }
 0x5c8   :  { %5623 = vmatpush1.bf16.msra.mxu0 %v16214_v63  ;;  %v16225_v63 = vld [vmem:[#allocation573_spill] sm:$0xff] }
 0x5c9   :  { %5705 = vmatpush1.bf16.msra.mxu1 %v16215_v45  ;;  %5624 = vmatprep.subr.bf16.mxu0 %v16216_v59  ;;  %v16226_v45 = vld [vmem:[#allocation574_spill] sm:$0xff]  ;;  %v16227_v59 = vld [vmem:[#allocation575_spill] sm:$0xff] }
 0x5ca   :  { %5706 = vmatprep.subr.bf16.mxu1 %v16217_v0  ;;  %v16228_v0 = vld [vmem:[#allocation576_spill] sm:$0xff] }
 0x5cc   :  { %5625 = vmatpush1.bf16.msra.mxu0 %v16218_v38  ;;  %v16229_v38 = vld [vmem:[#allocation577_spill] sm:$0xff] }
 0x5cd   :  { %5707 = vmatpush1.bf16.msra.mxu1 %v16219_v24  ;;  %5626 = vmatprep.subr.bf16.mxu0 %v16220_v1 }
 0x5ce   :  { %5708 = vmatprep.subr.bf16.mxu1 %v16221_v61 }
 0x5d0   :  { %5627 = vmatpush1.bf16.msra.mxu0 %v16222_v8 }
 0x5d1   :  { %5709 = vmatpush1.bf16.msra.mxu1 %v16223_v55  ;;  %5628 = vmatprep.subr.bf16.mxu0 %v16224_v57 }
 0x5d2   :  { %5710 = vmatprep.subr.bf16.mxu1 %v16225_v63 }
 0x5d4   :  { %5629 = vmatpush1.bf16.msra.mxu0 %v16226_v45 }
 0x5d5   :  { %5711 = vmatpush1.bf16.msra.mxu1 %v16227_v59  ;;  %5630 = vmatprep.subr.bf16.mxu0 %v16228_v0 }
 0x5d6   :  { %5712 = vmatprep.subr.bf16.mxu1 %v16229_v38 }
 0x5d8   :  { %5631 = vmatpush1.bf16.msra.mxu0 %v12341_v39 }
 0x5d9   :  { %5713 = vmatpush1.bf16.msra.mxu1 %v12345_v14  ;;  %5632 = vmatprep.subr.bf16.mxu0 %v12347_v34 }
 0x5da   :  { %5714 = vmatprep.subr.bf16.mxu1 %v12350_v48 }
 0x5dc   :  { %5633 = vmatpush1.bf16.msra.mxu0 %v12365_v32 }
 0x5dd   :  { %5715 = vmatpush1.bf16.msra.mxu1 %v12369_v26  ;;  %5634 = vmatprep.subr.bf16.mxu0 %v12371_v2 }
 0x5de   :  { %5716 = vmatprep.subr.bf16.mxu1 %v12374_v15 }
 0x5e0   :  { %5635 = vmatpush1.bf16.msra.mxu0 %v12377_v18 }
 0x5e1   :  { %5717 = vmatpush1.bf16.msra.mxu1 %v12381_v47  ;;  %5843 = vmatprep.subr.bf16.mxu0 %v8858_v10  ;;  %v16230_v10 = vld [vmem:[#allocation5_spill] sm:$0xff] }
 0x5e2   :  { %5925 = vmatprep.subr.bf16.mxu1 %v8867_v13  ;;  %v16233_v13 = vld [vmem:[#allocation7_spill] sm:$0xff] }
 0x5e3   :  { %5637 = vmatmul.mubr.bf16.vlgmr.msra.gmra.mrb[92].mxu0 %v12567_v62 }
 0x5e4   :  { %5719 = vmatmul.mubr.bf16.vlgmr.msra.gmra.mrb[92].mxu1 %v12567_v62  ;;  %5844 = vmatpush1.bf16.msra.mxu0 %v8863_v12  ;;  %v16231_v12 = vld [vmem:[#allocation3_spill] sm:$0xff] }
 0x5e5   :  { %5926 = vmatpush1.bf16.msra.mxu1 %v8865_v11  ;;  %5845 = vmatprep.subr.bf16.mxu0 %v8882_v17  ;;  %v16232_v11 = vld [vmem:[#allocation4_spill] sm:$0xff]  ;;  %v16234_v17 = vld [vmem:[#allocation9_spill] sm:$0xff]  ;;  %v16247_v62 = vld [vmem:[#allocation19_spill] sm:$0xff] }
 0x5e6   :  { %5927 = vmatprep.subr.bf16.mxu1 %v8891_v21  ;;  %v16237_v21 = vld [vmem:[#allocation10_spill] sm:$0xff] }
 0x5e8   :  { %5846 = vmatpush1.bf16.msra.mxu0 %v8887_v19  ;;  %v16235_v19 = vld [vmem:[#allocation6_spill] sm:$0xff] }
 0x5e9   :  { %5928 = vmatpush1.bf16.msra.mxu1 %v8889_v20  ;;  %5847 = vmatprep.subr.bf16.mxu0 %v8906_v25  ;;  %v16236_v20 = vld [vmem:[#allocation8_spill] sm:$0xff]  ;;  %v16238_v25 = vld [vmem:[#allocation13_spill] sm:$0xff] }
 0x5ea   :  { %5929 = vmatprep.subr.bf16.mxu1 %v8915_v29  ;;  %v16241_v29 = vld [vmem:[#allocation15_spill] sm:$0xff] }
 0x5ec   :  { %5848 = vmatpush1.bf16.msra.mxu0 %v8911_v27  ;;  %v16239_v27 = vld [vmem:[#allocation11_spill] sm:$0xff] }
 0x5ed   :  { %5930 = vmatpush1.bf16.msra.mxu1 %v8913_v28  ;;  %5849 = vmatprep.subr.bf16.mxu0 %v8930_v33  ;;  %v16240_v28 = vld [vmem:[#allocation12_spill] sm:$0xff] }
 0x5ee   :  { %5931 = vmatprep.subr.bf16.mxu1 %v8939_v37  ;;  %v16242_v33 = vld [vmem:[#allocation16_spill] sm:$0xff]  ;;  %v16245_v37 = vld [vmem:[#allocation18_spill] sm:$0xff] }
 0x5f0   :  { %5850 = vmatpush1.bf16.msra.mxu0 %v8935_v35  ;;  %v16243_v35 = vld [vmem:[#allocation14_spill] sm:$0xff] }
 0x5f1   :  { %5932 = vmatpush1.bf16.msra.mxu1 %v8937_v36  ;;  %5851 = vmatprep.subr.bf16.mxu0 %v8954_v42  ;;  %v16244_v36 = vld [vmem:[#allocation17_spill] sm:$0xff] }
 0x5f2   :  { %5933 = vmatprep.subr.bf16.mxu1 %v16230_v10  ;;  %v16246_v42 = vld [vmem:[#allocation21_spill] sm:$0xff]  ;;  %v16248_v10 = vld [vmem:[#allocation20_spill] sm:$0xff] }
 0x5f4   :  { %5852 = vmatpush1.bf16.msra.mxu0 %v16231_v12  ;;  %v16249_v12 = vld [vmem:[#allocation22_spill] sm:$0xff] }
 0x5f5   :  { %5934 = vmatpush1.bf16.msra.mxu1 %v16232_v11  ;;  %5853 = vmatprep.subr.bf16.mxu0 %v16233_v13  ;;  %v16250_v11 = vld [vmem:[#allocation25_spill] sm:$0xff]  ;;  %v16251_v13 = vld [vmem:[#allocation23_spill] sm:$0xff] }
 0x5f6   :  { %5935 = vmatprep.subr.bf16.mxu1 %v16234_v17  ;;  %v16252_v17 = vld [vmem:[#allocation24_spill] sm:$0xff] }
 0x5f8   :  { %5854 = vmatpush1.bf16.msra.mxu0 %v16235_v19  ;;  %v16253_v19 = vld [vmem:[#allocation26_spill] sm:$0xff] }
 0x5f9   :  { %5936 = vmatpush1.bf16.msra.mxu1 %v16236_v20  ;;  %5855 = vmatprep.subr.bf16.mxu0 %v16237_v21  ;;  %v16254_v20 = vld [vmem:[#allocation29_spill] sm:$0xff]  ;;  %v16255_v21 = vld [vmem:[#allocation27_spill] sm:$0xff] }
 0x5fa   :  { %5937 = vmatprep.subr.bf16.mxu1 %v16238_v25  ;;  %v16256_v25 = vld [vmem:[#allocation28_spill] sm:$0xff] }
 0x5fc   :  { %5856 = vmatpush1.bf16.msra.mxu0 %v16239_v27  ;;  %v16257_v27 = vld [vmem:[#allocation30_spill] sm:$0xff] }
 0x5fd   :  { %5938 = vmatpush1.bf16.msra.mxu1 %v16240_v28  ;;  %5857 = vmatprep.subr.bf16.mxu0 %v16241_v29  ;;  %v16258_v28 = vld [vmem:[#allocation33_spill] sm:$0xff]  ;;  %v16259_v29 = vld [vmem:[#allocation31_spill] sm:$0xff] }
 0x5fe   :  { %5939 = vmatprep.subr.bf16.mxu1 %v16242_v33  ;;  %v16260_v33 = vld [vmem:[#allocation32_spill] sm:$0xff] }
 0x600   :  { %5858 = vmatpush1.bf16.msra.mxu0 %v16243_v35  ;;  %v16261_v35 = vld [vmem:[#allocation34_spill] sm:$0xff] }
 0x601   :  { %5940 = vmatpush1.bf16.msra.mxu1 %v16244_v36  ;;  %5859 = vmatprep.subr.bf16.mxu0 %v16245_v37  ;;  %v16262_v36 = vld [vmem:[#allocation37_spill] sm:$0xff]  ;;  %v16263_v37 = vld [vmem:[#allocation35_spill] sm:$0xff] }
 0x602   :  { %5941 = vmatprep.subr.bf16.mxu1 %v16246_v42  ;;  %v16264_v42 = vld [vmem:[#allocation36_spill] sm:$0xff] }
 0x604   :  { %5860 = vmatpush1.bf16.msra.mxu0 %v16247_v62  ;;  %v16265_v62 = vld [vmem:[#allocation38_spill] sm:$0xff] }
 0x605   :  { %5942 = vmatpush1.bf16.msra.mxu1 %v16248_v10  ;;  %5861 = vmatprep.subr.bf16.mxu0 %v16249_v12  ;;  %v16266_v10 = vld [vmem:[#allocation41_spill] sm:$0xff]  ;;  %v16267_v12 = vld [vmem:[#allocation39_spill] sm:$0xff] }
 0x606   :  { %5943 = vmatprep.subr.bf16.mxu1 %v16250_v11  ;;  %v16268_v11 = vld [vmem:[#allocation40_spill] sm:$0xff] }
 0x608   :  { %5862 = vmatpush1.bf16.msra.mxu0 %v16251_v13  ;;  %v16269_v13 = vld [vmem:[#allocation42_spill] sm:$0xff] }
 0x609   :  { %5944 = vmatpush1.bf16.msra.mxu1 %v16252_v17  ;;  %5863 = vmatprep.subr.bf16.mxu0 %v16253_v19  ;;  %v16270_v17 = vld [vmem:[#allocation45_spill] sm:$0xff]  ;;  %v7760_v19 = vmul.f32 -1.442695, %v12800_v30  ;;  %v7770_v30 = vmul.f32 -1.442695, %v12951_v50 }
 0x60a   :  { %5945 = vmatprep.subr.bf16.mxu1 %v16254_v20  ;;  %v16271_v20 = vld [vmem:[#allocation43_spill] sm:$0xff] }
 0x60b   :  { %8185 = vpow2.f32 %v7760_v19 }
 0x60c   :  { %5864 = vmatpush1.bf16.msra.mxu0 %v16255_v21  ;;  %v7762_v21 = vmul.f32 -1.442695, %v12803_v23  ;;  %v16277_v23 = vld [vmem:[#allocation50_spill] sm:$0xff] }
 0x60d   :  { %5946 = vmatpush1.bf16.msra.mxu1 %v16256_v25  ;;  %5865 = vmatprep.subr.bf16.mxu0 %v16257_v27  ;;  %v16272_v25 = vld [vmem:[#allocation44_spill] sm:$0xff]  ;;  %v16273_v27 = vld [vmem:[#allocation46_spill] sm:$0xff] }
 0x60e   :  { %5947 = vmatprep.subr.bf16.mxu1 %v16258_v28  ;;  %v7761_v28 = vmul.f32 -1.442695, %v12806_v3  ;;  %8187 = vpow2.f32 %v7762_v21  ;;  %v16278_v3 = vld [vmem:[#allocation53_spill] sm:$0xff] }
 0x610   :  { %5866 = vmatpush1.bf16.msra.mxu0 %v16259_v29  ;;  %v16274_v29 = vld [vmem:[#allocation49_spill] sm:$0xff]  ;;  %8189 = vpow2.f32 %v7761_v28 }
 0x611   :  { %5948 = vmatpush1.bf16.msra.mxu1 %v16260_v33  ;;  %5867 = vmatprep.subr.bf16.mxu0 %v16261_v35  ;;  %v7763_v33 = vmul.f32 -1.442695, %v12809_v5  ;;  %v7768_v35 = vmul.f32 -1.442695, %v12948_v54  ;;  %v7771_v5 = vmul.f32 -1.442695, %v12958_v4 }
 0x612   :  { %5949 = vmatprep.subr.bf16.mxu1 %v16262_v36  ;;  %v16275_v36 = vld [vmem:[#allocation47_spill] sm:$0xff] }
 0x613   :  { %8191 = vpow2.f32 %v7763_v33  ;;  %v16279_v33 = vld [vmem:[#allocation98_spill] sm:$0xff] }
 0x614   :  { %5868 = vmatpush1.bf16.msra.mxu0 %v16263_v37  ;;  %v16276_v37 = vld [vmem:[#allocation48_spill] sm:$0xff]  ;;  %8193 = vpow2.f32 %v7768_v35 }
 0x615   :  { %5950 = vmatpush1.bf16.msra.mxu1 %v16264_v42  ;;  %5869 = vmatprep.subr.bf16.mxu0 %v16265_v62  ;;  %v7769_v42 = vmul.f32 -1.442695, %v12954_v31  ;;  %8195 = vpow2.f32 %v7770_v30  ;;  %v8186_v54 = vpop.eup %8185 }
 0x616   :  { %5951 = vmatprep.subr.bf16.mxu1 %v16266_v10 }
 0x617   :  { %8197 = vpow2.f32 %v7769_v42  ;;  %v16281_v42 = vld [vmem:[#allocation99_spill] sm:$0xff] }
 0x618   :  { %5870 = vmatpush1.bf16.msra.mxu0 %v16267_v12  ;;  %8199 = vpow2.f32 %v7771_v5  ;;  %v8188_v62 = vpop.eup %8187  ;;  %v5755_v12 = vadd.f32 1.0, %v8186_v54 }
 0x619   :  { %5952 = vmatpush1.bf16.msra.mxu1 %v16268_v11  ;;  %5871 = vmatprep.subr.bf16.mxu0 %v16269_v13  ;;  %v5757_v13 = vadd.f32 1.0, %v8188_v62  ;;  %v16282_v62 = vld [vmem:[#allocation102_spill] sm:$0xff] }
 0x61a   :  { %5953 = vmatprep.subr.bf16.mxu1 %v16270_v17  ;;  %v8190_v10 = vpop.eup %8189  ;;  %8201 = vrcp.f32 %v5755_v12 }
 0x61b   :  { %v5756_v19 = vadd.f32 1.0, %v8190_v10  ;;  %8203 = vrcp.f32 %v5757_v13 }
 0x61c   :  { %5872 = vmatpush1.bf16.msra.mxu0 %v16271_v20 }
 0x61d   :  { %5954 = vmatpush1.bf16.msra.mxu1 %v16272_v25  ;;  %5873 = vmatprep.subr.bf16.mxu0 %v16273_v27  ;;  %v8192_v50 = vpop.eup %8191  ;;  %8205 = vrcp.f32 %v5756_v19 }
 0x61e   :  { %5955 = vmatprep.subr.bf16.mxu1 %v16274_v29  ;;  %v8194_v11 = vpop.eup %8193  ;;  %v5758_v31 = vadd.f32 1.0, %v8192_v50 }
 0x61f   :  { %v8196_v17 = vpop.eup %8195  ;;  %v5807_v25 = vadd.f32 1.0, %v8194_v11 }
 0x620   :  { %5874 = vmatpush1.bf16.msra.mxu0 %v16275_v36  ;;  %v5809_v4 = vadd.f32 1.0, %v8196_v17  ;;  %8207 = vrcp.f32 %v5758_v31 }
 0x621   :  { %5956 = vmatpush1.bf16.msra.mxu1 %v16276_v37  ;;  %5884 = vmatprep.subr.bf16.mxu0 %v16277_v23  ;;  %v8198_v20 = vpop.eup %8197  ;;  %8209 = vrcp.f32 %v5807_v25  ;;  %v16280_v37 = vld [vmem:[#allocation100_spill] sm:$0xff] }
 0x622   :  { %5966 = vmatprep.subr.bf16.mxu1 %v16278_v3  ;;  %v8200_v21 = vpop.eup %8199  ;;  %v5808_v27 = vadd.f32 1.0, %v8198_v20  ;;  %8211 = vrcp.f32 %v5809_v4 }
 0x623   :  { %v5810_v28 = vadd.f32 1.0, %v8200_v21 }
 0x624   :  { %8213 = vrcp.f32 %v5808_v27  ;;  %v8202_v13 = vpop.eup %8201 }
 0x625   :  { %8215 = vrcp.f32 %v5810_v28  ;;  %v8204_v17 = vpop.eup %8203 }
 0x627   :  { %v8206_v19 = vpop.eup %8205 }
 0x62a   :  { %v8208_v20 = vpop.eup %8207 }
 0x62b   :  { %v8210_v31 = vpop.eup %8209 }
 0x62c   :  { %v8212_v21 = vpop.eup %8211 }
 0x62e   :  { %v8214_v25 = vpop.eup %8213 }
 0x62f   :  { %v8216_v4 = vpop.eup %8215 }
 0x636   :  { %v5474_v29 = vpop.f32.mrb[88].mxu0 }
 0x637   :  { %v5735_v35 = vadd.f32 %v5474_v29, %v16279_v33  ;;  %v5556_v36 = vpop.f32.mrb[88].mxu1  ;;  %v5476_v30 = vpop.f32.mrb[89].mxu0  ;;  %v5819_v29 = vmul.f32 %v8210_v31, %v12469_v53  ;;  %v16287_v53 = vld [vmem:[#allocation192_spill] sm:$0xff] }
 0x638   :  { %v5737_v23 = vadd.f32 %v5556_v36, %v16280_v37  ;;  %v5736_v3 = vadd.f32 %v5476_v30, %v16281_v42  ;;  %v5558_v5 = vpop.f32.mrb[89].mxu1  ;;  %v5478_v54 = vpop.f32.mrb[90].mxu0  ;;  %v5821_v36 = vmul.f32 %v8212_v21, %v12472_v51  ;;  %v16288_v51 = vld [vmem:[#allocation193_spill] sm:$0xff] }
 0x639   :  { %8217 = vtanh.f32 %v5735_v35  ;;  %v5738_v10 = vadd.f32 %v5558_v5, %v16282_v62  ;;  %v5560_v50 = vpop.f32.mrb[90].mxu1  ;;  %v5479_v12 = vpop.f32.mrb[91].mxu0  ;;  %v5822_v5 = vmul.f32 %v8216_v4, %v12476_v46 }
 0x63a   :  { %8219 = vtanh.f32 %v5737_v23  ;;  %v5561_v11 = vpop.f32.mrb[91].mxu1  ;;  %v5820_v23 = vmul.f32 %v8214_v25, %v12474_v44  ;;  %v1574_v12 = vadd.f32 %v16287_v53, %v15787_v16  ;;  %v16290_v44 = vld [vmem:[#allocation265_spill] sm:$0xff] }
 0x63b   :  { %8221 = vtanh.f32 %v5736_v3  ;;  %v1576_v11 = vadd.f32 %v16288_v51, %v15789_v52  ;;  %v16713_v52 = vld [vmem:[#allocation92_spill] sm:$0xff] }
 0x63c   :  { %8223 = vtanh.f32 %v5738_v10 }
 0x643   :  { %v8218_v27 = vpop.eup %8217 }
 0x644   :  { %v8220_v28 = vpop.eup %8219  ;;  %v5823_v33 = vmul.f32 %v8218_v27, %v8202_v13  ;;  %v16289_v13 = vld [vmem:[#allocation147_spill] sm:$0xff] }
 0x645   :  { %v8222_v35 = vpop.eup %8221  ;;  %v5825_v30 = vmul.f32 %v8220_v28, %v8204_v17  ;;  %v1645_v17 = vadd.f32 %v16290_v44, %v16289_v13 }
 0x646   :  { %v8224_v37 = vpop.eup %8223  ;;  %v13084_v42 = vadd.f32 %v5823_v33, %v5819_v29  ;;  %v5824_v3 = vmul.f32 %v8222_v35, %v8206_v19  ;;  %v16291_v19 = vld [vmem:[#allocation267_spill] sm:$0xff] }
 0x647   :  { %v13087_v54 = vadd.f32 %v5825_v30, %v5821_v36  ;;  %v5826_v62 = vmul.f32 %v8224_v37, %v8208_v20  ;;  %v1647_v46 = vadd.f32 %v16291_v19, %v15793_v56  ;;  %v16591_v56 = vld [vmem:[#allocation434_spill] sm:$0xff] }
 0x648   :  { %16283 = vst [vmem:[#allocation425_spill] sm:$0xff] %v13084_v42  ;;  %v13089_v10 = vadd.f32 %v5824_v3, %v5820_v23 }
 0x649   :  { %16284 = vst [vmem:[#allocation94_spill] sm:$0xff] %v13087_v54  ;;  %v13091_v50 = vadd.f32 %v5826_v62, %v5822_v5 }
 0x64a   :  { %16285 = vst [vmem:[#allocation96_spill] sm:$0xff] %v13089_v10 }
 0x64b   :  { %16286 = vst [vmem:[#allocation95_spill] sm:$0xff] %v13091_v50 }
 0x6b6   :  { %v5638_v31 = vpop.f32.mrb[92].mxu0 }
 0x6b7   :  { %v5739_v21 = vadd.f32 %v5638_v31, %v1574_v12  ;;  %v5720_v25 = vpop.f32.mrb[92].mxu1  ;;  %v5640_v20 = vpop.f32.mrb[93].mxu0 }
 0x6b8   :  { %v13101_v4 = vadd.f32 %v5720_v25, %v1645_v17  ;;  %v5740_v27 = vadd.f32 %v5640_v20, %v1576_v11  ;;  %v5722_v28 = vpop.f32.mrb[93].mxu1  ;;  %v5642_v29 = vpop.f32.mrb[94].mxu0 }
 0x6b9   :  { %v7764_v33 = vmul.f32 -1.442695, %v5739_v21  ;;  %v5742_v35 = vadd.f32 %v5722_v28, %v1647_v46  ;;  %v5724_v36 = vpop.f32.mrb[94].mxu1  ;;  %v5643_v30 = vpop.f32.mrb[95].mxu0 }
 0x6ba   :  { %v7765_v37 = vmul.f32 -1.442695, %v5740_v27  ;;  %v5725_v23 = vpop.f32.mrb[95].mxu1  ;;  %v16293_v36 = vld [vmem:[#allocation130_spill] sm:$0xff]  ;;  %v16294_v30 = vld [vmem:[#allocation131_spill] sm:$0xff] }
 0x6bb   :  { %8225 = vpow2.f32 %v7764_v33  ;;  %v7767_v3 = vmul.f32 -1.442695, %v5742_v35  ;;  %v16292_v35 = vld [vmem:[#allocation129_spill] sm:$0xff] }
 0x6bc   :  { %8227 = vpow2.f32 %v7765_v37  ;;  %v16295_v37 = vld [vmem:[#allocation132_spill] sm:$0xff]  ;;  %v16296_v23 = vld [vmem:[#allocation133_spill] sm:$0xff] }
 0x6bd   :  { %8229 = vpow2.f32 %v7767_v3  ;;  %v16297_v3 = vld [vmem:[#allocation134_spill] sm:$0xff] }
 0x6be   :  { %8231 = vtanh.f32 %v13084_v42 }
 0x6bf   :  { %8233 = vtanh.f32 %v13089_v10 }
 0x6c5   :  { %v8226_v5 = vpop.eup %8225 }
 0x6c6   :  { %v5783_v62 = vadd.f32 1.0, %v8226_v5  ;;  %v8228_v53 = vpop.eup %8227  ;;  %v16298_v5 = vld [vmem:[#allocation135_spill] sm:$0xff] }
 0x6c7   :  { %v8230_v12 = vpop.eup %8229  ;;  %v5784_v51 = vadd.f32 1.0, %v8228_v53  ;;  %v16302_v53 = vld [vmem:[#allocation139_spill] sm:$0xff] }
 0x6c8   :  { %8235 = vrcp.f32 %v5783_v62  ;;  %v5786_v11 = vadd.f32 1.0, %v8230_v12  ;;  %v8232_v44 = vpop.eup %8231  ;;  %v16301_v62 = vld [vmem:[#allocation138_spill] sm:$0xff]  ;;  %v16303_v12 = vld [vmem:[#allocation140_spill] sm:$0xff] }
 0x6c9   :  { %8237 = vtanh.f32 %v13091_v50  ;;  %v8234_v17 = vpop.eup %8233 }
 0x6ca   :  { %8239 = vrcp.f32 %v5784_v51  ;;  %v16304_v51 = vld [vmem:[#allocation141_spill] sm:$0xff] }
 0x6cb   :  { %8241 = vrcp.f32 %v5786_v11  ;;  %v16305_v11 = vld [vmem:[#allocation142_spill] sm:$0xff] }
 0x6d2   :  { %v8236_v31 = vpop.eup %8235 }
 0x6d3   :  { %v8238_v19 = vpop.eup %8237  ;;  %v5835_v21 = vmul.f32 %v8236_v31, %v8232_v44  ;;  %v16306_v44 = vld [vmem:[#allocation143_spill] sm:$0xff]  ;;  %v16308_v31 = vld [vmem:[#allocation145_spill] sm:$0xff] }
 0x6d4   :  { %v8240_v46 = vpop.eup %8239 }
 0x6d5   :  { %v8242_v25 = vpop.eup %8241  ;;  %v5836_v20 = vmul.f32 %v8240_v46, %v8234_v17  ;;  %v13108_v29 = vpack.c.bf16 %v5835_v21, %v5835_v21  ;;  %v16307_v17 = vld [vmem:[#allocation144_spill] sm:$0xff]  ;;  %v16311_v21 = vld [vmem:[#allocation149_spill] sm:$0xff] }
 0x6d6   :  { %v5838_v27 = vmul.f32 %v8242_v25, %v8238_v19  ;;  %v16309_v19 = vld [vmem:[#allocation146_spill] sm:$0xff]  ;;  %v16310_v46 = vld [vmem:[#allocation148_spill] sm:$0xff] }
 0x6d7   :  { %v13106_v28 = vpack.c.bf16 %v5836_v20, %v5836_v20  ;;  %v16312_v25 = vld [vmem:[#allocation150_spill] sm:$0xff]  ;;  %v16313_v20 = vld [vmem:[#allocation151_spill] sm:$0xff] }
 0x6d8   :  { %v13112_v33 = vpack.c.bf16 %v5838_v27, %v5838_v27  ;;  %v7766_v27 = vmul.f32 -1.442695, %v13101_v4  ;;  %v16323_v4 = vld [vmem:[#allocation161_spill] sm:$0xff] }
 0x6d9   :  { %5875 = vmatprep.mubr.bf16.mxu0 %v13106_v28  ;;  %5957 = vmatprep.mubr.bf16.mxu1 %v13106_v28 }
 0x6da   :  { %5876 = vmatmul.mubr.bf16.vlgmr.msra.gmra.mrb[96].mxu0 %v13108_v29  ;;  %5958 = vmatmul.mubr.bf16.vlgmr.msra.gmra.mrb[96].mxu1 %v13108_v29  ;;  %8243 = vpow2.f32 %v7766_v27  ;;  %v16335_v27 = vld [vmem:[#allocation173_spill] sm:$0xff] }
 0x6db   :  { %5885 = vmatpush1.bf16.msra.mxu0 %v15795_v7  ;;  %5967 = vmatpush1.bf16.msra.mxu1 %v15796_v6  ;;  %v16299_v7 = vld [vmem:[#allocation136_spill] sm:$0xff]  ;;  %v16300_v6 = vld [vmem:[#allocation137_spill] sm:$0xff] }
 0x6dc   :  { %5916 = vmatprep.mubr.bf16.mxu0 %v13112_v33  ;;  %5998 = vmatprep.mubr.bf16.mxu1 %v13112_v33 }
 0x6dd   :  { %5886 = vmatprep.subr.bf16.mxu0 %v16292_v35  ;;  %5968 = vmatprep.subr.bf16.mxu1 %v16293_v36  ;;  %v16314_v35 = vld [vmem:[#allocation152_spill] sm:$0xff]  ;;  %v16315_v36 = vld [vmem:[#allocation153_spill] sm:$0xff] }
 0x6df   :  { %5887 = vmatpush1.bf16.msra.mxu0 %v16294_v30  ;;  %5969 = vmatpush1.bf16.msra.mxu1 %v16295_v37  ;;  %v16316_v30 = vld [vmem:[#allocation154_spill] sm:$0xff]  ;;  %v16317_v37 = vld [vmem:[#allocation155_spill] sm:$0xff] }
 0x6e0   :  { %5888 = vmatprep.subr.bf16.mxu0 %v16296_v23  ;;  %5970 = vmatprep.subr.bf16.mxu1 %v16297_v3  ;;  %v16318_v23 = vld [vmem:[#allocation156_spill] sm:$0xff]  ;;  %v16319_v3 = vld [vmem:[#allocation157_spill] sm:$0xff] }
 0x6e3   :  { %5889 = vmatpush1.bf16.msra.mxu0 %v16298_v5  ;;  %5971 = vmatpush1.bf16.msra.mxu1 %v16299_v7  ;;  %v16320_v5 = vld [vmem:[#allocation158_spill] sm:$0xff]  ;;  %v16321_v7 = vld [vmem:[#allocation159_spill] sm:$0xff] }
 0x6e4   :  { %5890 = vmatprep.subr.bf16.mxu0 %v16300_v6  ;;  %5972 = vmatprep.subr.bf16.mxu1 %v16301_v62  ;;  %v16322_v6 = vld [vmem:[#allocation160_spill] sm:$0xff]  ;;  %v16324_v62 = vld [vmem:[#allocation162_spill] sm:$0xff] }
 0x6e7   :  { %5891 = vmatpush1.bf16.msra.mxu0 %v16302_v53  ;;  %5973 = vmatpush1.bf16.msra.mxu1 %v16303_v12  ;;  %v16325_v53 = vld [vmem:[#allocation163_spill] sm:$0xff]  ;;  %v16326_v12 = vld [vmem:[#allocation164_spill] sm:$0xff] }
 0x6e8   :  { %5892 = vmatprep.subr.bf16.mxu0 %v16304_v51  ;;  %5974 = vmatprep.subr.bf16.mxu1 %v16305_v11  ;;  %v16327_v51 = vld [vmem:[#allocation165_spill] sm:$0xff]  ;;  %v8244_v11 = vpop.eup %8243 }
 0x6eb   :  { %5893 = vmatpush1.bf16.msra.mxu0 %v16306_v44  ;;  %5975 = vmatpush1.bf16.msra.mxu1 %v16307_v17  ;;  %v16328_v44 = vld [vmem:[#allocation166_spill] sm:$0xff]  ;;  %v16329_v17 = vld [vmem:[#allocation167_spill] sm:$0xff] }
 0x6ec   :  { %5894 = vmatprep.subr.bf16.mxu0 %v16308_v31  ;;  %5976 = vmatprep.subr.bf16.mxu1 %v16309_v19  ;;  %v5785_v31 = vadd.f32 1.0, %v8244_v11  ;;  %v16330_v19 = vld [vmem:[#allocation168_spill] sm:$0xff] }
 0x6ee   :  { %8245 = vrcp.f32 %v5785_v31  ;;  %v16350_v31 = vld [vmem:[#allocation188_spill] sm:$0xff] }
 0x6ef   :  { %5895 = vmatpush1.bf16.msra.mxu0 %v16310_v46  ;;  %5977 = vmatpush1.bf16.msra.mxu1 %v16311_v21  ;;  %v16331_v46 = vld [vmem:[#allocation169_spill] sm:$0xff]  ;;  %v16332_v21 = vld [vmem:[#allocation170_spill] sm:$0xff]  ;;  %8247 = vtanh.f32 %v13087_v54 }
 0x6f0   :  { %5896 = vmatprep.subr.bf16.mxu0 %v16312_v25  ;;  %5978 = vmatprep.subr.bf16.mxu1 %v16313_v20  ;;  %v16333_v25 = vld [vmem:[#allocation171_spill] sm:$0xff]  ;;  %v16334_v20 = vld [vmem:[#allocation172_spill] sm:$0xff]  ;;  %v16720_v54 = vld [vmem:[#allocation81_spill] sm:$0xff] }
 0x6f3   :  { %5897 = vmatpush1.bf16.msra.mxu0 %v16314_v35  ;;  %5979 = vmatpush1.bf16.msra.mxu1 %v16315_v36  ;;  %v16336_v35 = vld [vmem:[#allocation174_spill] sm:$0xff]  ;;  %v16337_v36 = vld [vmem:[#allocation175_spill] sm:$0xff] }
 0x6f4   :  { %5898 = vmatprep.subr.bf16.mxu0 %v16316_v30  ;;  %5980 = vmatprep.subr.bf16.mxu1 %v16317_v37  ;;  %v16338_v30 = vld [vmem:[#allocation176_spill] sm:$0xff]  ;;  %v16339_v37 = vld [vmem:[#allocation177_spill] sm:$0xff] }
 0x6f7   :  { %5899 = vmatpush1.bf16.msra.mxu0 %v16318_v23  ;;  %5981 = vmatpush1.bf16.msra.mxu1 %v16319_v3  ;;  %v16340_v23 = vld [vmem:[#allocation178_spill] sm:$0xff]  ;;  %v16341_v3 = vld [vmem:[#allocation179_spill] sm:$0xff] }
 0x6f8   :  { %5900 = vmatprep.subr.bf16.mxu0 %v16320_v5  ;;  %5982 = vmatprep.subr.bf16.mxu1 %v16321_v7  ;;  %v16342_v5 = vld [vmem:[#allocation180_spill] sm:$0xff]  ;;  %v16343_v7 = vld [vmem:[#allocation181_spill] sm:$0xff] }
 0x6fb   :  { %5901 = vmatpush1.bf16.msra.mxu0 %v16322_v6  ;;  %5983 = vmatpush1.bf16.msra.mxu1 %v16323_v4  ;;  %v16344_v6 = vld [vmem:[#allocation182_spill] sm:$0xff]  ;;  %v16345_v4 = vld [vmem:[#allocation183_spill] sm:$0xff] }
 0x6fc   :  { %5902 = vmatprep.subr.bf16.mxu0 %v16324_v62  ;;  %5984 = vmatprep.subr.bf16.mxu1 %v16325_v53  ;;  %v8246_v62 = vpop.eup %8245 }
 0x6fd   :  { %v8248_v53 = vpop.eup %8247 }
 0x6fe   :  { %v5837_v11 = vmul.f32 %v8248_v53, %v8246_v62  ;;  %v16366_v62 = vld [vmem:[#allocation212_spill] sm:$0xff]  ;;  %v16367_v53 = vld [vmem:[#allocation213_spill] sm:$0xff] }
 0x6ff   :  { %5903 = vmatpush1.bf16.msra.mxu0 %v16326_v12  ;;  %5985 = vmatpush1.bf16.msra.mxu1 %v16327_v51  ;;  %v16346_v12 = vld [vmem:[#allocation184_spill] sm:$0xff]  ;;  %v16347_v51 = vld [vmem:[#allocation185_spill] sm:$0xff] }
 0x700   :  { %5904 = vmatprep.subr.bf16.mxu0 %v16328_v44  ;;  %5986 = vmatprep.subr.bf16.mxu1 %v16329_v17  ;;  %v16348_v44 = vld [vmem:[#allocation186_spill] sm:$0xff]  ;;  %v16349_v17 = vld [vmem:[#allocation187_spill] sm:$0xff] }
 0x703   :  { %5905 = vmatpush1.bf16.msra.mxu0 %v16330_v19  ;;  %5987 = vmatpush1.bf16.msra.mxu1 %v16331_v46  ;;  %v16351_v19 = vld [vmem:[#allocation189_spill] sm:$0xff]  ;;  %v13182_v46 = vpack.c.bf16 %v5837_v11, %v5837_v11  ;;  %v16370_v11 = vld [vmem:[#allocation218_spill] sm:$0xff] }
 0x704   :  { %5906 = vmatprep.subr.bf16.mxu0 %v16332_v21  ;;  %5988 = vmatprep.subr.bf16.mxu1 %v16333_v25  ;;  %v16352_v21 = vld [vmem:[#allocation190_spill] sm:$0xff]  ;;  %v16353_v25 = vld [vmem:[#allocation191_spill] sm:$0xff] }
 0x707   :  { %5907 = vmatpush1.bf16.msra.mxu0 %v16334_v20  ;;  %5989 = vmatpush1.bf16.msra.mxu1 %v16335_v27  ;;  %v16354_v20 = vld [vmem:[#allocation195_spill] sm:$0xff]  ;;  %v16355_v27 = vld [vmem:[#allocation197_spill] sm:$0xff] }
 0x708   :  { %5908 = vmatprep.subr.bf16.mxu0 %v16336_v35  ;;  %5990 = vmatprep.subr.bf16.mxu1 %v16337_v36  ;;  %v16356_v35 = vld [vmem:[#allocation198_spill] sm:$0xff]  ;;  %v16357_v36 = vld [vmem:[#allocation199_spill] sm:$0xff] }
 0x70b   :  { %5909 = vmatpush1.bf16.msra.mxu0 %v16338_v30  ;;  %5991 = vmatpush1.bf16.msra.mxu1 %v16339_v37  ;;  %v16358_v30 = vld [vmem:[#allocation200_spill] sm:$0xff]  ;;  %v16359_v37 = vld [vmem:[#allocation201_spill] sm:$0xff] }
 0x70c   :  { %5910 = vmatprep.subr.bf16.mxu0 %v16340_v23  ;;  %5992 = vmatprep.subr.bf16.mxu1 %v16341_v3  ;;  %v16360_v23 = vld [vmem:[#allocation202_spill] sm:$0xff]  ;;  %v16361_v3 = vld [vmem:[#allocation203_spill] sm:$0xff] }
 0x70f   :  { %5911 = vmatpush1.bf16.msra.mxu0 %v16342_v5  ;;  %5993 = vmatpush1.bf16.msra.mxu1 %v16343_v7  ;;  %v16362_v5 = vld [vmem:[#allocation206_spill] sm:$0xff]  ;;  %v16363_v7 = vld [vmem:[#allocation208_spill] sm:$0xff] }
 0x710   :  { %5912 = vmatprep.subr.bf16.mxu0 %v16344_v6  ;;  %5994 = vmatprep.subr.bf16.mxu1 %v16345_v4  ;;  %v16364_v6 = vld [vmem:[#allocation209_spill] sm:$0xff]  ;;  %v16365_v4 = vld [vmem:[#allocation211_spill] sm:$0xff] }
 0x713   :  { %5913 = vmatpush1.bf16.msra.mxu0 %v16346_v12  ;;  %5995 = vmatpush1.bf16.msra.mxu1 %v16347_v51  ;;  %v16368_v12 = vld [vmem:[#allocation214_spill] sm:$0xff]  ;;  %v16369_v51 = vld [vmem:[#allocation216_spill] sm:$0xff] }
 0x714   :  { %5914 = vmatprep.subr.bf16.mxu0 %v16348_v44  ;;  %5996 = vmatprep.subr.bf16.mxu1 %v16349_v17  ;;  %v16371_v44 = vld [vmem:[#allocation219_spill] sm:$0xff]  ;;  %v16372_v17 = vld [vmem:[#allocation220_spill] sm:$0xff] }
 0x717   :  { %5915 = vmatpush1.bf16.msra.mxu0 %v16350_v31  ;;  %5997 = vmatpush1.bf16.msra.mxu1 %v16351_v19  ;;  %v16373_v31 = vld [vmem:[#allocation221_spill] sm:$0xff]  ;;  %v16374_v19 = vld [vmem:[#allocation222_spill] sm:$0xff] }
 0x718   :  { %6007 = vmatprep.subr.bf16.mxu0 %v16352_v21  ;;  %6089 = vmatprep.subr.bf16.mxu1 %v16353_v25  ;;  %v16375_v21 = vld [vmem:[#allocation223_spill] sm:$0xff]  ;;  %v16376_v25 = vld [vmem:[#allocation224_spill] sm:$0xff] }
 0x71a   :  { %5917 = vmatmul.mubr.bf16.vlgmr.msra.gmra.mrb[96].mxu0 %v13182_v46  ;;  %5999 = vmatmul.mubr.bf16.vlgmr.msra.gmra.mrb[96].mxu1 %v13182_v46 }
 0x71b   :  { %6008 = vmatpush1.bf16.msra.mxu0 %v16354_v20  ;;  %6039 = vmatprep.mubr.bf16.mxu0 %v13106_v28  ;;  %v16377_v20 = vld [vmem:[#allocation225_spill] sm:$0xff] }
 0x71c   :  { %6090 = vmatpush1.bf16.msra.mxu1 %v16355_v27  ;;  %6121 = vmatprep.mubr.bf16.mxu1 %v13106_v28  ;;  %v16378_v27 = vld [vmem:[#allocation226_spill] sm:$0xff] }
 0x71d   :  { %6009 = vmatprep.subr.bf16.mxu0 %v16356_v35  ;;  %6091 = vmatprep.subr.bf16.mxu1 %v16357_v36  ;;  %v16379_v35 = vld [vmem:[#allocation227_spill] sm:$0xff]  ;;  %v16380_v36 = vld [vmem:[#allocation228_spill] sm:$0xff] }
 0x71f   :  { %6010 = vmatpush1.bf16.msra.mxu0 %v16358_v30  ;;  %v16381_v30 = vld [vmem:[#allocation229_spill] sm:$0xff] }
 0x720   :  { %6092 = vmatpush1.bf16.msra.mxu1 %v16359_v37  ;;  %6011 = vmatprep.subr.bf16.mxu0 %v16360_v23  ;;  %v16382_v37 = vld [vmem:[#allocation230_spill] sm:$0xff]  ;;  %v16383_v23 = vld [vmem:[#allocation231_spill] sm:$0xff] }
 0x721   :  { %6093 = vmatprep.subr.bf16.mxu1 %v16361_v3  ;;  %v16384_v3 = vld [vmem:[#allocation232_spill] sm:$0xff] }
 0x723   :  { %6012 = vmatpush1.bf16.msra.mxu0 %v16362_v5  ;;  %v16385_v5 = vld [vmem:[#allocation233_spill] sm:$0xff] }
 0x724   :  { %6094 = vmatpush1.bf16.msra.mxu1 %v16363_v7  ;;  %6013 = vmatprep.subr.bf16.mxu0 %v16364_v6  ;;  %v16386_v7 = vld [vmem:[#allocation234_spill] sm:$0xff]  ;;  %v16387_v6 = vld [vmem:[#allocation235_spill] sm:$0xff] }
 0x725   :  { %6095 = vmatprep.subr.bf16.mxu1 %v16365_v4  ;;  %v16388_v4 = vld [vmem:[#allocation236_spill] sm:$0xff] }
 0x727   :  { %6014 = vmatpush1.bf16.msra.mxu0 %v16366_v62  ;;  %v16389_v62 = vld [vmem:[#allocation237_spill] sm:$0xff] }
 0x728   :  { %6096 = vmatpush1.bf16.msra.mxu1 %v16367_v53  ;;  %6015 = vmatprep.subr.bf16.mxu0 %v16368_v12  ;;  %v16390_v53 = vld [vmem:[#allocation238_spill] sm:$0xff]  ;;  %v16391_v12 = vld [vmem:[#allocation239_spill] sm:$0xff] }
 0x729   :  { %6097 = vmatprep.subr.bf16.mxu1 %v16369_v51  ;;  %v16392_v51 = vld [vmem:[#allocation240_spill] sm:$0xff] }
 0x72b   :  { %6016 = vmatpush1.bf16.msra.mxu0 %v16370_v11  ;;  %v16393_v11 = vld [vmem:[#allocation241_spill] sm:$0xff] }
 0x72c   :  { %6098 = vmatpush1.bf16.msra.mxu1 %v16371_v44  ;;  %6017 = vmatprep.subr.bf16.mxu0 %v16372_v17  ;;  %v16394_v44 = vld [vmem:[#allocation242_spill] sm:$0xff]  ;;  %v16395_v17 = vld [vmem:[#allocation243_spill] sm:$0xff] }
 0x72d   :  { %6099 = vmatprep.subr.bf16.mxu1 %v16373_v31  ;;  %v16396_v31 = vld [vmem:[#allocation244_spill] sm:$0xff] }
 0x72f   :  { %6018 = vmatpush1.bf16.msra.mxu0 %v16374_v19  ;;  %v16397_v19 = vld [vmem:[#allocation245_spill] sm:$0xff] }
 0x730   :  { %6100 = vmatpush1.bf16.msra.mxu1 %v16375_v21  ;;  %6019 = vmatprep.subr.bf16.mxu0 %v16376_v25  ;;  %v16398_v21 = vld [vmem:[#allocation246_spill] sm:$0xff]  ;;  %v16399_v25 = vld [vmem:[#allocation247_spill] sm:$0xff] }
 0x731   :  { %6101 = vmatprep.subr.bf16.mxu1 %v16377_v20  ;;  %v16400_v20 = vld [vmem:[#allocation248_spill] sm:$0xff] }
 0x733   :  { %6020 = vmatpush1.bf16.msra.mxu0 %v16378_v27  ;;  %v16401_v27 = vld [vmem:[#allocation249_spill] sm:$0xff] }
 0x734   :  { %6102 = vmatpush1.bf16.msra.mxu1 %v16379_v35  ;;  %6021 = vmatprep.subr.bf16.mxu0 %v16380_v36  ;;  %v16402_v35 = vld [vmem:[#allocation250_spill] sm:$0xff]  ;;  %v16403_v36 = vld [vmem:[#allocation251_spill] sm:$0xff] }
 0x735   :  { %6103 = vmatprep.subr.bf16.mxu1 %v16381_v30  ;;  %v16404_v30 = vld [vmem:[#allocation252_spill] sm:$0xff] }
 0x737   :  { %6022 = vmatpush1.bf16.msra.mxu0 %v16382_v37  ;;  %v16405_v37 = vld [vmem:[#allocation253_spill] sm:$0xff] }
 0x738   :  { %6104 = vmatpush1.bf16.msra.mxu1 %v16383_v23  ;;  %6023 = vmatprep.subr.bf16.mxu0 %v16384_v3  ;;  %v16406_v23 = vld [vmem:[#allocation254_spill] sm:$0xff]  ;;  %v16407_v3 = vld [vmem:[#allocation255_spill] sm:$0xff] }
 0x739   :  { %6105 = vmatprep.subr.bf16.mxu1 %v16385_v5  ;;  %v16408_v5 = vld [vmem:[#allocation256_spill] sm:$0xff] }
 0x73b   :  { %6024 = vmatpush1.bf16.msra.mxu0 %v16386_v7  ;;  %v16409_v7 = vld [vmem:[#allocation257_spill] sm:$0xff] }
 0x73c   :  { %6106 = vmatpush1.bf16.msra.mxu1 %v16387_v6  ;;  %6025 = vmatprep.subr.bf16.mxu0 %v16388_v4  ;;  %v16410_v6 = vld [vmem:[#allocation258_spill] sm:$0xff]  ;;  %v16411_v4 = vld [vmem:[#allocation259_spill] sm:$0xff] }
 0x73d   :  { %6107 = vmatprep.subr.bf16.mxu1 %v16389_v62  ;;  %v16412_v62 = vld [vmem:[#allocation260_spill] sm:$0xff] }
 0x73f   :  { %6026 = vmatpush1.bf16.msra.mxu0 %v16390_v53  ;;  %v16413_v53 = vld [vmem:[#allocation261_spill] sm:$0xff] }
 0x740   :  { %6108 = vmatpush1.bf16.msra.mxu1 %v16391_v12  ;;  %6027 = vmatprep.subr.bf16.mxu0 %v16392_v51  ;;  %v16414_v12 = vld [vmem:[#allocation262_spill] sm:$0xff]  ;;  %v16415_v51 = vld [vmem:[#allocation263_spill] sm:$0xff] }
 0x741   :  { %6109 = vmatprep.subr.bf16.mxu1 %v16393_v11  ;;  %v16416_v11 = vld [vmem:[#allocation264_spill] sm:$0xff] }
 0x743   :  { %6028 = vmatpush1.bf16.msra.mxu0 %v16394_v44  ;;  %v16417_v44 = vld [vmem:[#allocation266_spill] sm:$0xff] }
 0x744   :  { %6110 = vmatpush1.bf16.msra.mxu1 %v16395_v17  ;;  %6029 = vmatprep.subr.bf16.mxu0 %v16396_v31  ;;  %v16418_v17 = vld [vmem:[#allocation269_spill] sm:$0xff]  ;;  %v16419_v31 = vld [vmem:[#allocation271_spill] sm:$0xff] }
 0x745   :  { %6111 = vmatprep.subr.bf16.mxu1 %v16397_v19  ;;  %v16420_v19 = vld [vmem:[#allocation272_spill] sm:$0xff] }
 0x747   :  { %6030 = vmatpush1.bf16.msra.mxu0 %v16398_v21  ;;  %v16421_v21 = vld [vmem:[#allocation273_spill] sm:$0xff] }
 0x748   :  { %6112 = vmatpush1.bf16.msra.mxu1 %v16399_v25  ;;  %6031 = vmatprep.subr.bf16.mxu0 %v16400_v20  ;;  %v16422_v25 = vld [vmem:[#allocation274_spill] sm:$0xff]  ;;  %v16423_v20 = vld [vmem:[#allocation275_spill] sm:$0xff] }
 0x749   :  { %6113 = vmatprep.subr.bf16.mxu1 %v16401_v27  ;;  %v16424_v27 = vld [vmem:[#allocation276_spill] sm:$0xff] }
 0x74b   :  { %6032 = vmatpush1.bf16.msra.mxu0 %v16402_v35  ;;  %v16425_v35 = vld [vmem:[#allocation277_spill] sm:$0xff] }
 0x74c   :  { %6114 = vmatpush1.bf16.msra.mxu1 %v16403_v36  ;;  %6033 = vmatprep.subr.bf16.mxu0 %v16404_v30  ;;  %v16426_v36 = vld [vmem:[#allocation280_spill] sm:$0xff]  ;;  %v16427_v30 = vld [vmem:[#allocation282_spill] sm:$0xff] }
 0x74d   :  { %6115 = vmatprep.subr.bf16.mxu1 %v16405_v37  ;;  %v16428_v37 = vld [vmem:[#allocation283_spill] sm:$0xff] }
 0x74f   :  { %6034 = vmatpush1.bf16.msra.mxu0 %v16406_v23  ;;  %v16429_v23 = vld [vmem:[#allocation285_spill] sm:$0xff] }
 0x750   :  { %6116 = vmatpush1.bf16.msra.mxu1 %v16407_v3  ;;  %6035 = vmatprep.subr.bf16.mxu0 %v16408_v5  ;;  %v16430_v3 = vld [vmem:[#allocation286_spill] sm:$0xff]  ;;  %v16431_v5 = vld [vmem:[#allocation287_spill] sm:$0xff] }
 0x751   :  { %6117 = vmatprep.subr.bf16.mxu1 %v16409_v7  ;;  %v16432_v7 = vld [vmem:[#allocation288_spill] sm:$0xff] }
 0x753   :  { %6036 = vmatpush1.bf16.msra.mxu0 %v16410_v6  ;;  %v16433_v6 = vld [vmem:[#allocation290_spill] sm:$0xff] }
 0x754   :  { %6118 = vmatpush1.bf16.msra.mxu1 %v16411_v4  ;;  %6037 = vmatprep.subr.bf16.mxu0 %v16412_v62  ;;  %v16434_v4 = vld [vmem:[#allocation292_spill] sm:$0xff]  ;;  %v16435_v62 = vld [vmem:[#allocation293_spill] sm:$0xff] }
 0x755   :  { %6119 = vmatprep.subr.bf16.mxu1 %v16413_v53  ;;  %v16436_v53 = vld [vmem:[#allocation294_spill] sm:$0xff] }
 0x757   :  { %6038 = vmatpush1.bf16.msra.mxu0 %v16414_v12  ;;  %v16437_v12 = vld [vmem:[#allocation295_spill] sm:$0xff] }
 0x758   :  { %6120 = vmatpush1.bf16.msra.mxu1 %v16415_v51  ;;  %6048 = vmatprep.subr.bf16.mxu0 %v16416_v11  ;;  %v16438_v51 = vld [vmem:[#allocation296_spill] sm:$0xff]  ;;  %v16439_v11 = vld [vmem:[#allocation297_spill] sm:$0xff] }
 0x759   :  { %6130 = vmatprep.subr.bf16.mxu1 %v16417_v44  ;;  %v16440_v44 = vld [vmem:[#allocation298_spill] sm:$0xff] }
 0x75a   :  { %6040 = vmatmul.mubr.bf16.vlgmr.msra.gmra.mrb[100].mxu0 %v13108_v29 }
 0x75b   :  { %6122 = vmatmul.mubr.bf16.vlgmr.msra.gmra.mrb[100].mxu1 %v13108_v29  ;;  %6049 = vmatpush1.bf16.msra.mxu0 %v16418_v17  ;;  %v16441_v17 = vld [vmem:[#allocation299_spill] sm:$0xff] }
 0x75c   :  { %6080 = vmatprep.mubr.bf16.mxu0 %v13112_v33  ;;  %6131 = vmatpush1.bf16.msra.mxu1 %v16419_v31  ;;  %v16442_v31 = vld [vmem:[#allocation300_spill] sm:$0xff] }
 0x75d   :  { %6162 = vmatprep.mubr.bf16.mxu1 %v13112_v33  ;;  %6050 = vmatprep.subr.bf16.mxu0 %v16420_v19  ;;  %v16443_v19 = vld [vmem:[#allocation301_spill] sm:$0xff] }
 0x75e   :  { %6132 = vmatprep.subr.bf16.mxu1 %v16421_v21  ;;  %v16444_v21 = vld [vmem:[#allocation302_spill] sm:$0xff] }
 0x75f   :  { %6051 = vmatpush1.bf16.msra.mxu0 %v16422_v25  ;;  %v16445_v25 = vld [vmem:[#allocation303_spill] sm:$0xff] }
 0x760   :  { %6133 = vmatpush1.bf16.msra.mxu1 %v16423_v20  ;;  %6052 = vmatprep.subr.bf16.mxu0 %v16424_v27  ;;  %v16446_v20 = vld [vmem:[#allocation304_spill] sm:$0xff]  ;;  %v16447_v27 = vld [vmem:[#allocation305_spill] sm:$0xff] }
 0x761   :  { %6134 = vmatprep.subr.bf16.mxu1 %v16425_v35  ;;  %v16448_v35 = vld [vmem:[#allocation306_spill] sm:$0xff] }
 0x763   :  { %6053 = vmatpush1.bf16.msra.mxu0 %v16426_v36  ;;  %v16449_v36 = vld [vmem:[#allocation307_spill] sm:$0xff] }
 0x764   :  { %6135 = vmatpush1.bf16.msra.mxu1 %v16427_v30  ;;  %6054 = vmatprep.subr.bf16.mxu0 %v16428_v37  ;;  %v16450_v30 = vld [vmem:[#allocation308_spill] sm:$0xff]  ;;  %v16451_v37 = vld [vmem:[#allocation309_spill] sm:$0xff] }
 0x765   :  { %6136 = vmatprep.subr.bf16.mxu1 %v16429_v23  ;;  %v16452_v23 = vld [vmem:[#allocation310_spill] sm:$0xff] }
 0x767   :  { %6055 = vmatpush1.bf16.msra.mxu0 %v16430_v3  ;;  %v16453_v3 = vld [vmem:[#allocation311_spill] sm:$0xff] }
 0x768   :  { %6137 = vmatpush1.bf16.msra.mxu1 %v16431_v5  ;;  %6056 = vmatprep.subr.bf16.mxu0 %v16432_v7  ;;  %v16454_v5 = vld [vmem:[#allocation312_spill] sm:$0xff]  ;;  %v16455_v7 = vld [vmem:[#allocation313_spill] sm:$0xff] }
 0x769   :  { %6138 = vmatprep.subr.bf16.mxu1 %v16433_v6  ;;  %v16456_v6 = vld [vmem:[#allocation314_spill] sm:$0xff] }
 0x76b   :  { %6057 = vmatpush1.bf16.msra.mxu0 %v16434_v4  ;;  %v16457_v4 = vld [vmem:[#allocation315_spill] sm:$0xff] }
 0x76c   :  { %6139 = vmatpush1.bf16.msra.mxu1 %v16435_v62  ;;  %6058 = vmatprep.subr.bf16.mxu0 %v16436_v53  ;;  %v16458_v62 = vld [vmem:[#allocation316_spill] sm:$0xff]  ;;  %v16459_v53 = vld [vmem:[#allocation317_spill] sm:$0xff] }
 0x76d   :  { %6140 = vmatprep.subr.bf16.mxu1 %v16437_v12  ;;  %v16460_v12 = vld [vmem:[#allocation318_spill] sm:$0xff] }
 0x76f   :  { %6059 = vmatpush1.bf16.msra.mxu0 %v16438_v51  ;;  %v16461_v51 = vld [vmem:[#allocation319_spill] sm:$0xff] }
 0x770   :  { %6141 = vmatpush1.bf16.msra.mxu1 %v16439_v11  ;;  %6060 = vmatprep.subr.bf16.mxu0 %v16440_v44  ;;  %v16462_v11 = vld [vmem:[#allocation320_spill] sm:$0xff]  ;;  %v16463_v44 = vld [vmem:[#allocation321_spill] sm:$0xff] }
 0x771   :  { %6142 = vmatprep.subr.bf16.mxu1 %v16441_v17  ;;  %v16464_v17 = vld [vmem:[#allocation322_spill] sm:$0xff] }
 0x773   :  { %6061 = vmatpush1.bf16.msra.mxu0 %v16442_v31  ;;  %v16465_v31 = vld [vmem:[#allocation323_spill] sm:$0xff] }
 0x774   :  { %6143 = vmatpush1.bf16.msra.mxu1 %v16443_v19  ;;  %6062 = vmatprep.subr.bf16.mxu0 %v16444_v21  ;;  %v16466_v19 = vld [vmem:[#allocation324_spill] sm:$0xff]  ;;  %v16467_v21 = vld [vmem:[#allocation325_spill] sm:$0xff] }
 0x775   :  { %6144 = vmatprep.subr.bf16.mxu1 %v16445_v25  ;;  %v16468_v25 = vld [vmem:[#allocation326_spill] sm:$0xff] }
 0x777   :  { %6063 = vmatpush1.bf16.msra.mxu0 %v16446_v20  ;;  %v16469_v20 = vld [vmem:[#allocation327_spill] sm:$0xff] }
 0x778   :  { %6145 = vmatpush1.bf16.msra.mxu1 %v16447_v27  ;;  %6064 = vmatprep.subr.bf16.mxu0 %v16448_v35  ;;  %v16470_v27 = vld [vmem:[#allocation328_spill] sm:$0xff]  ;;  %v16471_v35 = vld [vmem:[#allocation329_spill] sm:$0xff] }
 0x779   :  { %6146 = vmatprep.subr.bf16.mxu1 %v16449_v36  ;;  %v16472_v36 = vld [vmem:[#allocation330_spill] sm:$0xff] }
 0x77b   :  { %6065 = vmatpush1.bf16.msra.mxu0 %v16450_v30  ;;  %v16473_v30 = vld [vmem:[#allocation331_spill] sm:$0xff] }
 0x77c   :  { %6147 = vmatpush1.bf16.msra.mxu1 %v16451_v37  ;;  %6066 = vmatprep.subr.bf16.mxu0 %v16452_v23  ;;  %v16474_v37 = vld [vmem:[#allocation332_spill] sm:$0xff]  ;;  %v16475_v23 = vld [vmem:[#allocation333_spill] sm:$0xff] }
 0x77d   :  { %6148 = vmatprep.subr.bf16.mxu1 %v16453_v3  ;;  %v16476_v3 = vld [vmem:[#allocation334_spill] sm:$0xff] }
 0x77f   :  { %6067 = vmatpush1.bf16.msra.mxu0 %v16454_v5  ;;  %v16477_v5 = vld [vmem:[#allocation335_spill] sm:$0xff] }
 0x780   :  { %6149 = vmatpush1.bf16.msra.mxu1 %v16455_v7  ;;  %6068 = vmatprep.subr.bf16.mxu0 %v16456_v6  ;;  %v16478_v7 = vld [vmem:[#allocation336_spill] sm:$0xff]  ;;  %v16479_v6 = vld [vmem:[#allocation337_spill] sm:$0xff] }
 0x781   :  { %6150 = vmatprep.subr.bf16.mxu1 %v16457_v4  ;;  %v16480_v4 = vld [vmem:[#allocation338_spill] sm:$0xff] }
 0x783   :  { %6069 = vmatpush1.bf16.msra.mxu0 %v16458_v62  ;;  %v16481_v62 = vld [vmem:[#allocation339_spill] sm:$0xff] }
 0x784   :  { %6151 = vmatpush1.bf16.msra.mxu1 %v16459_v53  ;;  %6070 = vmatprep.subr.bf16.mxu0 %v16460_v12  ;;  %v16482_v53 = vld [vmem:[#allocation340_spill] sm:$0xff]  ;;  %v16483_v12 = vld [vmem:[#allocation341_spill] sm:$0xff] }
 0x785   :  { %6152 = vmatprep.subr.bf16.mxu1 %v16461_v51  ;;  %v16484_v51 = vld [vmem:[#allocation342_spill] sm:$0xff] }
 0x787   :  { %6071 = vmatpush1.bf16.msra.mxu0 %v16462_v11  ;;  %v16485_v11 = vld [vmem:[#allocation343_spill] sm:$0xff] }
 0x788   :  { %6153 = vmatpush1.bf16.msra.mxu1 %v16463_v44  ;;  %6072 = vmatprep.subr.bf16.mxu0 %v16464_v17  ;;  %v16486_v44 = vld [vmem:[#allocation344_spill] sm:$0xff]  ;;  %v16487_v17 = vld [vmem:[#allocation345_spill] sm:$0xff] }
 0x789   :  { %6154 = vmatprep.subr.bf16.mxu1 %v16465_v31  ;;  %v16488_v31 = vld [vmem:[#allocation346_spill] sm:$0xff] }
 0x78b   :  { %6073 = vmatpush1.bf16.msra.mxu0 %v16466_v19  ;;  %v16489_v19 = vld [vmem:[#allocation347_spill] sm:$0xff] }
 0x78c   :  { %6155 = vmatpush1.bf16.msra.mxu1 %v16467_v21  ;;  %6074 = vmatprep.subr.bf16.mxu0 %v16468_v25  ;;  %v16490_v21 = vld [vmem:[#allocation348_spill] sm:$0xff]  ;;  %v16491_v25 = vld [vmem:[#allocation349_spill] sm:$0xff] }
 0x78d   :  { %6156 = vmatprep.subr.bf16.mxu1 %v16469_v20  ;;  %v16492_v20 = vld [vmem:[#allocation350_spill] sm:$0xff] }
 0x78f   :  { %6075 = vmatpush1.bf16.msra.mxu0 %v16470_v27  ;;  %v16493_v27 = vld [vmem:[#allocation351_spill] sm:$0xff] }
 0x790   :  { %6157 = vmatpush1.bf16.msra.mxu1 %v16471_v35  ;;  %6076 = vmatprep.subr.bf16.mxu0 %v16472_v36  ;;  %v16494_v35 = vld [vmem:[#allocation352_spill] sm:$0xff]  ;;  %v16495_v36 = vld [vmem:[#allocation353_spill] sm:$0xff] }
 0x791   :  { %6158 = vmatprep.subr.bf16.mxu1 %v16473_v30  ;;  %v16496_v30 = vld [vmem:[#allocation354_spill] sm:$0xff] }
 0x793   :  { %6077 = vmatpush1.bf16.msra.mxu0 %v16474_v37  ;;  %v16497_v37 = vld [vmem:[#allocation355_spill] sm:$0xff] }
 0x794   :  { %6159 = vmatpush1.bf16.msra.mxu1 %v16475_v23  ;;  %6078 = vmatprep.subr.bf16.mxu0 %v16476_v3  ;;  %v16498_v23 = vld [vmem:[#allocation356_spill] sm:$0xff]  ;;  %v16499_v3 = vld [vmem:[#allocation357_spill] sm:$0xff] }
 0x795   :  { %6160 = vmatprep.subr.bf16.mxu1 %v16477_v5  ;;  %v16500_v5 = vld [vmem:[#allocation358_spill] sm:$0xff] }
 0x797   :  { %6079 = vmatpush1.bf16.msra.mxu0 %v16478_v7  ;;  %v16501_v7 = vld [vmem:[#allocation359_spill] sm:$0xff] }
 0x798   :  { %6161 = vmatpush1.bf16.msra.mxu1 %v16479_v6  ;;  %6171 = vmatprep.subr.bf16.mxu0 %v16480_v4  ;;  %v16502_v6 = vld [vmem:[#allocation360_spill] sm:$0xff]  ;;  %v16503_v4 = vld [vmem:[#allocation361_spill] sm:$0xff] }
 0x799   :  { %6253 = vmatprep.subr.bf16.mxu1 %v16481_v62  ;;  %v16504_v62 = vld [vmem:[#allocation362_spill] sm:$0xff] }
 0x79a   :  { %6081 = vmatmul.mubr.bf16.vlgmr.msra.gmra.mrb[100].mxu0 %v13182_v46 }
 0x79b   :  { %6163 = vmatmul.mubr.bf16.vlgmr.msra.gmra.mrb[100].mxu1 %v13182_v46  ;;  %6172 = vmatpush1.bf16.msra.mxu0 %v16482_v53  ;;  %v16505_v53 = vld [vmem:[#allocation363_spill] sm:$0xff] }
 0x79c   :  { %6203 = vmatprep.mubr.bf16.mxu0 %v13106_v28  ;;  %6254 = vmatpush1.bf16.msra.mxu1 %v16483_v12  ;;  %v16506_v12 = vld [vmem:[#allocation364_spill] sm:$0xff] }
 0x79d   :  { %6285 = vmatprep.mubr.bf16.mxu1 %v13106_v28  ;;  %6173 = vmatprep.subr.bf16.mxu0 %v16484_v51  ;;  %v16507_v51 = vld [vmem:[#allocation365_spill] sm:$0xff] }
 0x79e   :  { %6255 = vmatprep.subr.bf16.mxu1 %v16485_v11  ;;  %v16508_v11 = vld [vmem:[#allocation366_spill] sm:$0xff] }
 0x79f   :  { %6174 = vmatpush1.bf16.msra.mxu0 %v16486_v44  ;;  %v16509_v44 = vld [vmem:[#allocation367_spill] sm:$0xff] }
 0x7a0   :  { %6256 = vmatpush1.bf16.msra.mxu1 %v16487_v17  ;;  %6175 = vmatprep.subr.bf16.mxu0 %v16488_v31  ;;  %v16510_v17 = vld [vmem:[#allocation368_spill] sm:$0xff]  ;;  %v16511_v31 = vld [vmem:[#allocation369_spill] sm:$0xff] }
 0x7a1   :  { %6257 = vmatprep.subr.bf16.mxu1 %v16489_v19  ;;  %v16512_v19 = vld [vmem:[#allocation370_spill] sm:$0xff] }
 0x7a3   :  { %6176 = vmatpush1.bf16.msra.mxu0 %v16490_v21  ;;  %v16513_v21 = vld [vmem:[#allocation371_spill] sm:$0xff] }
 0x7a4   :  { %6258 = vmatpush1.bf16.msra.mxu1 %v16491_v25  ;;  %6177 = vmatprep.subr.bf16.mxu0 %v16492_v20  ;;  %v16514_v25 = vld [vmem:[#allocation372_spill] sm:$0xff]  ;;  %v16515_v20 = vld [vmem:[#allocation373_spill] sm:$0xff] }
 0x7a5   :  { %6259 = vmatprep.subr.bf16.mxu1 %v16493_v27  ;;  %v16516_v27 = vld [vmem:[#allocation374_spill] sm:$0xff] }
 0x7a7   :  { %6178 = vmatpush1.bf16.msra.mxu0 %v16494_v35  ;;  %v16517_v35 = vld [vmem:[#allocation375_spill] sm:$0xff] }
 0x7a8   :  { %6260 = vmatpush1.bf16.msra.mxu1 %v16495_v36  ;;  %6179 = vmatprep.subr.bf16.mxu0 %v16496_v30  ;;  %v16518_v36 = vld [vmem:[#allocation376_spill] sm:$0xff]  ;;  %v16519_v30 = vld [vmem:[#allocation377_spill] sm:$0xff] }
 0x7a9   :  { %6261 = vmatprep.subr.bf16.mxu1 %v16497_v37  ;;  %v16520_v37 = vld [vmem:[#allocation378_spill] sm:$0xff] }
 0x7ab   :  { %6180 = vmatpush1.bf16.msra.mxu0 %v16498_v23  ;;  %v16521_v23 = vld [vmem:[#allocation379_spill] sm:$0xff] }
 0x7ac   :  { %6262 = vmatpush1.bf16.msra.mxu1 %v16499_v3  ;;  %6181 = vmatprep.subr.bf16.mxu0 %v16500_v5  ;;  %v16522_v3 = vld [vmem:[#allocation380_spill] sm:$0xff]  ;;  %v16523_v5 = vld [vmem:[#allocation381_spill] sm:$0xff] }
 0x7ad   :  { %6263 = vmatprep.subr.bf16.mxu1 %v16501_v7  ;;  %v16524_v7 = vld [vmem:[#allocation382_spill] sm:$0xff] }
 0x7af   :  { %6182 = vmatpush1.bf16.msra.mxu0 %v16502_v6  ;;  %v16525_v6 = vld [vmem:[#allocation383_spill] sm:$0xff] }
 0x7b0   :  { %6264 = vmatpush1.bf16.msra.mxu1 %v16503_v4  ;;  %6183 = vmatprep.subr.bf16.mxu0 %v16504_v62  ;;  %v16526_v4 = vld [vmem:[#allocation384_spill] sm:$0xff]  ;;  %v16527_v62 = vld [vmem:[#allocation385_spill] sm:$0xff] }
 0x7b1   :  { %6265 = vmatprep.subr.bf16.mxu1 %v16505_v53  ;;  %v16528_v53 = vld [vmem:[#allocation386_spill] sm:$0xff] }
 0x7b3   :  { %6184 = vmatpush1.bf16.msra.mxu0 %v16506_v12  ;;  %v16529_v12 = vld [vmem:[#allocation387_spill] sm:$0xff] }
 0x7b4   :  { %6266 = vmatpush1.bf16.msra.mxu1 %v16507_v51  ;;  %6185 = vmatprep.subr.bf16.mxu0 %v16508_v11  ;;  %v16530_v51 = vld [vmem:[#allocation388_spill] sm:$0xff]  ;;  %v16531_v11 = vld [vmem:[#allocation389_spill] sm:$0xff] }
 0x7b5   :  { %6267 = vmatprep.subr.bf16.mxu1 %v16509_v44  ;;  %v16532_v44 = vld [vmem:[#allocation390_spill] sm:$0xff] }
 0x7b7   :  { %6186 = vmatpush1.bf16.msra.mxu0 %v16510_v17  ;;  %v16533_v17 = vld [vmem:[#allocation391_spill] sm:$0xff] }
 0x7b8   :  { %6268 = vmatpush1.bf16.msra.mxu1 %v16511_v31  ;;  %6187 = vmatprep.subr.bf16.mxu0 %v16512_v19  ;;  %v16534_v31 = vld [vmem:[#allocation392_spill] sm:$0xff]  ;;  %v16535_v19 = vld [vmem:[#allocation393_spill] sm:$0xff] }
 0x7b9   :  { %6269 = vmatprep.subr.bf16.mxu1 %v16513_v21  ;;  %v16536_v21 = vld [vmem:[#allocation394_spill] sm:$0xff] }
 0x7bb   :  { %6188 = vmatpush1.bf16.msra.mxu0 %v16514_v25  ;;  %v16537_v25 = vld [vmem:[#allocation395_spill] sm:$0xff] }
 0x7bc   :  { %6270 = vmatpush1.bf16.msra.mxu1 %v16515_v20  ;;  %6189 = vmatprep.subr.bf16.mxu0 %v16516_v27  ;;  %v16538_v20 = vld [vmem:[#allocation396_spill] sm:$0xff]  ;;  %v16539_v27 = vld [vmem:[#allocation397_spill] sm:$0xff] }
 0x7bd   :  { %6271 = vmatprep.subr.bf16.mxu1 %v16517_v35  ;;  %v16540_v35 = vld [vmem:[#allocation398_spill] sm:$0xff] }
 0x7bf   :  { %6190 = vmatpush1.bf16.msra.mxu0 %v16518_v36  ;;  %v16541_v36 = vld [vmem:[#allocation399_spill] sm:$0xff] }
 0x7c0   :  { %6272 = vmatpush1.bf16.msra.mxu1 %v16519_v30  ;;  %6191 = vmatprep.subr.bf16.mxu0 %v16520_v37  ;;  %v16542_v30 = vld [vmem:[#allocation400_spill] sm:$0xff]  ;;  %v16543_v37 = vld [vmem:[#allocation401_spill] sm:$0xff] }
 0x7c1   :  { %6273 = vmatprep.subr.bf16.mxu1 %v16521_v23  ;;  %v16544_v23 = vld [vmem:[#allocation402_spill] sm:$0xff] }
 0x7c3   :  { %6192 = vmatpush1.bf16.msra.mxu0 %v16522_v3  ;;  %v16545_v3 = vld [vmem:[#allocation403_spill] sm:$0xff] }
 0x7c4   :  { %6274 = vmatpush1.bf16.msra.mxu1 %v16523_v5  ;;  %6193 = vmatprep.subr.bf16.mxu0 %v16524_v7  ;;  %v16546_v5 = vld [vmem:[#allocation404_spill] sm:$0xff]  ;;  %v16547_v7 = vld [vmem:[#allocation405_spill] sm:$0xff] }
 0x7c5   :  { %6275 = vmatprep.subr.bf16.mxu1 %v16525_v6  ;;  %v16548_v6 = vld [vmem:[#allocation406_spill] sm:$0xff] }
 0x7c7   :  { %6194 = vmatpush1.bf16.msra.mxu0 %v16526_v4  ;;  %v16549_v4 = vld [vmem:[#allocation407_spill] sm:$0xff] }
 0x7c8   :  { %6276 = vmatpush1.bf16.msra.mxu1 %v16527_v62  ;;  %6195 = vmatprep.subr.bf16.mxu0 %v16528_v53  ;;  %v16550_v62 = vld [vmem:[#allocation408_spill] sm:$0xff]  ;;  %v16551_v53 = vld [vmem:[#allocation409_spill] sm:$0xff] }
 0x7c9   :  { %6277 = vmatprep.subr.bf16.mxu1 %v16529_v12  ;;  %v16552_v12 = vld [vmem:[#allocation410_spill] sm:$0xff] }
 0x7cb   :  { %6196 = vmatpush1.bf16.msra.mxu0 %v16530_v51  ;;  %v16553_v51 = vld [vmem:[#allocation411_spill] sm:$0xff] }
 0x7cc   :  { %6278 = vmatpush1.bf16.msra.mxu1 %v16531_v11  ;;  %6197 = vmatprep.subr.bf16.mxu0 %v16532_v44  ;;  %v16554_v11 = vld [vmem:[#allocation412_spill] sm:$0xff]  ;;  %v16555_v44 = vld [vmem:[#allocation413_spill] sm:$0xff] }
 0x7cd   :  { %6279 = vmatprep.subr.bf16.mxu1 %v16533_v17  ;;  %v16556_v17 = vld [vmem:[#allocation414_spill] sm:$0xff] }
 0x7cf   :  { %6198 = vmatpush1.bf16.msra.mxu0 %v16534_v31  ;;  %v16557_v31 = vld [vmem:[#allocation415_spill] sm:$0xff] }
 0x7d0   :  { %6280 = vmatpush1.bf16.msra.mxu1 %v16535_v19  ;;  %6199 = vmatprep.subr.bf16.mxu0 %v16536_v21  ;;  %v16558_v19 = vld [vmem:[#allocation416_spill] sm:$0xff]  ;;  %v16559_v21 = vld [vmem:[#allocation417_spill] sm:$0xff] }
 0x7d1   :  { %6281 = vmatprep.subr.bf16.mxu1 %v16537_v25  ;;  %v16560_v25 = vld [vmem:[#allocation418_spill] sm:$0xff] }
 0x7d3   :  { %6200 = vmatpush1.bf16.msra.mxu0 %v16538_v20  ;;  %v16561_v20 = vld [vmem:[#allocation419_spill] sm:$0xff] }
 0x7d4   :  { %6282 = vmatpush1.bf16.msra.mxu1 %v16539_v27  ;;  %6201 = vmatprep.subr.bf16.mxu0 %v16540_v35  ;;  %v16562_v27 = vld [vmem:[#allocation420_spill] sm:$0xff]  ;;  %v16563_v35 = vld [vmem:[#allocation421_spill] sm:$0xff] }
 0x7d5   :  { %6283 = vmatprep.subr.bf16.mxu1 %v16541_v36  ;;  %v16564_v36 = vld [vmem:[#allocation422_spill] sm:$0xff] }
 0x7d7   :  { %6202 = vmatpush1.bf16.msra.mxu0 %v16542_v30 }
 0x7d8   :  { %6284 = vmatpush1.bf16.msra.mxu1 %v16543_v37  ;;  %6212 = vmatprep.subr.bf16.mxu0 %v16544_v23  ;;  %v16565_v23 = vld [vmem:[#allocation423_spill] sm:$0xff] }
 0x7d9   :  { %6294 = vmatprep.subr.bf16.mxu1 %v16545_v3  ;;  %v16566_v3 = vld [vmem:[#allocation57_spill] sm:$0xff] }
 0x7da   :  { %6204 = vmatmul.mubr.bf16.vlgmr.msra.gmra.mrb[104].mxu0 %v13108_v29 }
 0x7db   :  { %6286 = vmatmul.mubr.bf16.vlgmr.msra.gmra.mrb[104].mxu1 %v13108_v29  ;;  %6213 = vmatpush1.bf16.msra.mxu0 %v16546_v5 }
 0x7dc   :  { %6244 = vmatprep.mubr.bf16.mxu0 %v13112_v33  ;;  %6295 = vmatpush1.bf16.msra.mxu1 %v16547_v7  ;;  %v16567_v7 = vld [vmem:[#allocation62_spill] sm:$0xff] }
 0x7dd   :  { %6326 = vmatprep.mubr.bf16.mxu1 %v13112_v33  ;;  %6214 = vmatprep.subr.bf16.mxu0 %v16548_v6 }
 0x7de   :  { %6296 = vmatprep.subr.bf16.mxu1 %v16549_v4  ;;  %v16568_v4 = vld [vmem:[#allocation65_spill] sm:$0xff] }
 0x7df   :  { %6215 = vmatpush1.bf16.msra.mxu0 %v16550_v62 }
 0x7e0   :  { %6297 = vmatpush1.bf16.msra.mxu1 %v16551_v53  ;;  %6216 = vmatprep.subr.bf16.mxu0 %v16552_v12  ;;  %v16569_v53 = vld [vmem:[#allocation70_spill] sm:$0xff] }
 0x7e1   :  { %6298 = vmatprep.subr.bf16.mxu1 %v16553_v51 }
 0x7e3   :  { %6217 = vmatpush1.bf16.msra.mxu0 %v16554_v11 }
 0x7e4   :  { %6299 = vmatpush1.bf16.msra.mxu1 %v16555_v44  ;;  %6218 = vmatprep.subr.bf16.mxu0 %v16556_v17  ;;  %v16570_v44 = vld [vmem:[#allocation60_spill] sm:$0xff] }
 0x7e5   :  { %6300 = vmatprep.subr.bf16.mxu1 %v16557_v31  ;;  %v16571_v31 = vld [vmem:[#allocation64_spill] sm:$0xff] }
 0x7e7   :  { %6219 = vmatpush1.bf16.msra.mxu0 %v16558_v19 }
 0x7e8   :  { %6301 = vmatpush1.bf16.msra.mxu1 %v16559_v21  ;;  %6220 = vmatprep.subr.bf16.mxu0 %v16560_v25  ;;  %v16572_v21 = vld [vmem:[#allocation68_spill] sm:$0xff] }
 0x7e9   :  { %6302 = vmatprep.subr.bf16.mxu1 %v16561_v20  ;;  %v16573_v20 = vld [vmem:[#allocation72_spill] sm:$0xff] }
 0x7eb   :  { %6221 = vmatpush1.bf16.msra.mxu0 %v16562_v27 }
 0x7ec   :  { %6303 = vmatpush1.bf16.msra.mxu1 %v16563_v35  ;;  %6222 = vmatprep.subr.bf16.mxu0 %v16564_v36 }
 0x7ed   :  { %v5918_v30 = vpop.f32.mrb[96].mxu0  ;;  %v6000_v37 = vpop.f32.mrb[96].mxu1  ;;  %6304 = vmatprep.subr.bf16.mxu1 %v16565_v23 }
 0x7ee   :  { %v13415_v5 = vadd.f32 %v5918_v30, %v16566_v3  ;;  %v13418_v6 = vadd.f32 %v5918_v30, %v16567_v7  ;;  %v13421_v62 = vadd.f32 %v5918_v30, %v16568_v4  ;;  %v13424_v12 = vadd.f32 %v5918_v30, %v16569_v53  ;;  %v5920_v51 = vpop.f32.mrb[97].mxu0  ;;  %v6002_v11 = vpop.f32.mrb[97].mxu1  ;;  %v16574_v30 = vld [vmem:[#allocation59_spill] sm:$0xff]  ;;  %v16576_v4 = vld [vmem:[#allocation424_spill] sm:$0xff] }
 0x7ef   :  { %v13427_v17 = vadd.f32 %v6000_v37, %v16570_v44  ;;  %v13430_v19 = vadd.f32 %v6000_v37, %v16571_v31  ;;  %v13433_v25 = vadd.f32 %v6000_v37, %v16572_v21  ;;  %v13436_v27 = vadd.f32 %v6000_v37, %v16573_v20  ;;  %v5922_v35 = vpop.f32.mrb[98].mxu0  ;;  %v6004_v36 = vpop.f32.mrb[98].mxu1  ;;  %6223 = vmatpush1.bf16.msra.mxu0 %v11349_v60  ;;  %v16575_v3 = vld [vmem:[#allocation63_spill] sm:$0xff]  ;;  %v16579_v60 = vld [vmem:[#allocation426_spill] sm:$0xff] }
 0x7f0   :  { %v13440_v23 = vadd.f32 %v5920_v51, %v16574_v30  ;;  %6305 = vmatpush1.bf16.msra.mxu1 %v11353_v41  ;;  %6224 = vmatprep.subr.bf16.mxu0 %v11355_v49  ;;  %v13445_v7 = vadd.f32 %v5920_v51, %v16575_v3  ;;  %v16577_v53 = vld [vmem:[#allocation67_spill] sm:$0xff]  ;;  %v5923_v37 = vpop.f32.mrb[99].mxu0  ;;  %v6005_v31 = vpop.f32.mrb[99].mxu1  ;;  %v16580_v35 = vld [vmem:[#allocation61_spill] sm:$0xff]  ;;  %v16581_v41 = vld [vmem:[#allocation66_spill] sm:$0xff] }
 0x7f1   :  { %6306 = vmatprep.subr.bf16.mxu1 %v16576_v4  ;;  %v13449_v44 = vadd.f32 %v5920_v51, %v16577_v53  ;;  %v16578_v21 = vld [vmem:[#allocation71_spill] sm:$0xff]  ;;  %v13456_v36 = vadd.f32 %v6002_v11, %v16580_v35  ;;  %v13459_v49 = vadd.f32 %v6002_v11, %v16581_v41  ;;  %v16583_v3 = vld [vmem:[#allocation428_spill] sm:$0xff]  ;;  %v16584_v4 = vld [vmem:[#allocation69_spill] sm:$0xff] }
 0x7f2   :  { %v13452_v20 = vadd.f32 %v5920_v51, %v16578_v21  ;;  %v16582_v30 = vld [vmem:[#allocation427_spill] sm:$0xff]  ;;  %v13464_v53 = vadd.f32 %v6002_v11, %v16584_v4  ;;  %v16585_v37 = vld [vmem:[#allocation73_spill] sm:$0xff]  ;;  %v16587_v21 = vld [vmem:[#allocation430_spill] sm:$0xff] }
 0x7f3   :  { %6225 = vmatpush1.bf16.msra.mxu0 %v16579_v60  ;;  %v13467_v31 = vadd.f32 %v6002_v11, %v16585_v37  ;;  %v16586_v51 = vld [vmem:[#allocation429_spill] sm:$0xff]  ;;  %v16588_v60 = vld [vmem:[#allocation431_spill] sm:$0xff]  ;;  %v16589_v35 = vld [vmem:[#allocation432_spill] sm:$0xff] }
 0x7f4   :  { %6307 = vmatpush1.bf16.msra.mxu1 %v16582_v30  ;;  %6226 = vmatprep.subr.bf16.mxu0 %v16583_v3  ;;  %v16590_v41 = vld [vmem:[#allocation433_spill] sm:$0xff]  ;;  %v16592_v30 = vld [vmem:[#allocation435_spill] sm:$0xff]  ;;  %v16593_v3 = vld [vmem:[#allocation436_spill] sm:$0xff] }
 0x7f5   :  { %6308 = vmatprep.subr.bf16.mxu1 %v16586_v51  ;;  %v16594_v4 = vld [vmem:[#allocation437_spill] sm:$0xff]  ;;  %v16595_v11 = vld [vmem:[#allocation438_spill] sm:$0xff]  ;;  %v16596_v37 = vld [vmem:[#allocation439_spill] sm:$0xff] }
 0x7f6   :  { %v16597_v51 = vld [vmem:[#allocation440_spill] sm:$0xff] }
 0x7f7   :  { %6227 = vmatpush1.bf16.msra.mxu0 %v16587_v21  ;;  %v16598_v21 = vld [vmem:[#allocation441_spill] sm:$0xff] }
 0x7f8   :  { %6309 = vmatpush1.bf16.msra.mxu1 %v16588_v60  ;;  %6228 = vmatprep.subr.bf16.mxu0 %v16589_v35  ;;  %v16599_v60 = vld [vmem:[#allocation442_spill] sm:$0xff]  ;;  %v16600_v35 = vld [vmem:[#allocation443_spill] sm:$0xff] }
 0x7f9   :  { %6310 = vmatprep.subr.bf16.mxu1 %v16590_v41  ;;  %v16601_v41 = vld [vmem:[#allocation444_spill] sm:$0xff] }
 0x7fb   :  { %6229 = vmatpush1.bf16.msra.mxu0 %v16591_v56  ;;  %v16602_v56 = vld [vmem:[#allocation445_spill] sm:$0xff] }
 0x7fc   :  { %6311 = vmatpush1.bf16.msra.mxu1 %v16592_v30  ;;  %6230 = vmatprep.subr.bf16.mxu0 %v16593_v3  ;;  %v16603_v30 = vld [vmem:[#allocation446_spill] sm:$0xff]  ;;  %v16604_v3 = vld [vmem:[#allocation447_spill] sm:$0xff] }
 0x7fd   :  { %6312 = vmatprep.subr.bf16.mxu1 %v16594_v4  ;;  %v16605_v4 = vld [vmem:[#allocation448_spill] sm:$0xff] }
 0x7ff   :  { %6231 = vmatpush1.bf16.msra.mxu0 %v16595_v11  ;;  %v16606_v11 = vld [vmem:[#allocation449_spill] sm:$0xff] }
 0x800   :  { %6313 = vmatpush1.bf16.msra.mxu1 %v16596_v37  ;;  %6232 = vmatprep.subr.bf16.mxu0 %v16597_v51  ;;  %v16607_v37 = vld [vmem:[#allocation450_spill] sm:$0xff]  ;;  %v16608_v51 = vld [vmem:[#allocation451_spill] sm:$0xff] }
 0x801   :  { %6314 = vmatprep.subr.bf16.mxu1 %v16598_v21  ;;  %v16609_v21 = vld [vmem:[#allocation452_spill] sm:$0xff] }
 0x803   :  { %6233 = vmatpush1.bf16.msra.mxu0 %v16599_v60  ;;  %v16610_v60 = vld [vmem:[#allocation453_spill] sm:$0xff] }
 0x804   :  { %6315 = vmatpush1.bf16.msra.mxu1 %v16600_v35  ;;  %6234 = vmatprep.subr.bf16.mxu0 %v16601_v41  ;;  %v16611_v35 = vld [vmem:[#allocation454_spill] sm:$0xff]  ;;  %v16612_v41 = vld [vmem:[#allocation455_spill] sm:$0xff] }
 0x805   :  { %6316 = vmatprep.subr.bf16.mxu1 %v16602_v56  ;;  %v16613_v56 = vld [vmem:[#allocation456_spill] sm:$0xff] }
 0x807   :  { %6235 = vmatpush1.bf16.msra.mxu0 %v16603_v30  ;;  %v16614_v30 = vld [vmem:[#allocation457_spill] sm:$0xff] }
 0x808   :  { %6317 = vmatpush1.bf16.msra.mxu1 %v16604_v3  ;;  %6236 = vmatprep.subr.bf16.mxu0 %v16605_v4  ;;  %v16615_v3 = vld [vmem:[#allocation458_spill] sm:$0xff]  ;;  %v16616_v4 = vld [vmem:[#allocation459_spill] sm:$0xff] }
 0x809   :  { %6318 = vmatprep.subr.bf16.mxu1 %v16606_v11  ;;  %v16617_v11 = vld [vmem:[#allocation460_spill] sm:$0xff] }
 0x80b   :  { %6237 = vmatpush1.bf16.msra.mxu0 %v16607_v37  ;;  %v16618_v37 = vld [vmem:[#allocation461_spill] sm:$0xff] }
 0x80c   :  { %6319 = vmatpush1.bf16.msra.mxu1 %v16608_v51  ;;  %6238 = vmatprep.subr.bf16.mxu0 %v16609_v21  ;;  %v16619_v51 = vld [vmem:[#allocation462_spill] sm:$0xff]  ;;  %v16620_v21 = vld [vmem:[#allocation463_spill] sm:$0xff] }
 0x80d   :  { %6320 = vmatprep.subr.bf16.mxu1 %v16610_v60  ;;  %v16621_v60 = vld [vmem:[#allocation464_spill] sm:$0xff] }
 0x80f   :  { %6239 = vmatpush1.bf16.msra.mxu0 %v16611_v35  ;;  %v16622_v35 = vld [vmem:[#allocation465_spill] sm:$0xff] }
 0x810   :  { %6321 = vmatpush1.bf16.msra.mxu1 %v16612_v41  ;;  %6240 = vmatprep.subr.bf16.mxu0 %v16613_v56  ;;  %v16623_v41 = vld [vmem:[#allocation466_spill] sm:$0xff]  ;;  %v16624_v56 = vld [vmem:[#allocation467_spill] sm:$0xff] }
 0x811   :  { %6322 = vmatprep.subr.bf16.mxu1 %v16614_v30  ;;  %v16625_v30 = vld [vmem:[#allocation468_spill] sm:$0xff] }
 0x813   :  { %6241 = vmatpush1.bf16.msra.mxu0 %v16615_v3  ;;  %v16626_v3 = vld [vmem:[#allocation469_spill] sm:$0xff] }
 0x814   :  { %6323 = vmatpush1.bf16.msra.mxu1 %v16616_v4  ;;  %6242 = vmatprep.subr.bf16.mxu0 %v16617_v11  ;;  %v16627_v4 = vld [vmem:[#allocation470_spill] sm:$0xff]  ;;  %v16628_v11 = vld [vmem:[#allocation471_spill] sm:$0xff] }
 0x815   :  { %6324 = vmatprep.subr.bf16.mxu1 %v16618_v37  ;;  %v16629_v37 = vld [vmem:[#allocation472_spill] sm:$0xff] }
 0x817   :  { %6243 = vmatpush1.bf16.msra.mxu0 %v16619_v51  ;;  %v16630_v51 = vld [vmem:[#allocation473_spill] sm:$0xff] }
 0x818   :  { %6325 = vmatpush1.bf16.msra.mxu1 %v16620_v21  ;;  %6335 = vmatprep.subr.bf16.mxu0 %v16621_v60  ;;  %v16631_v21 = vld [vmem:[#allocation474_spill] sm:$0xff]  ;;  %v16632_v60 = vld [vmem:[#allocation475_spill] sm:$0xff] }
 0x819   :  { %6417 = vmatprep.subr.bf16.mxu1 %v16622_v35  ;;  %v16633_v35 = vld [vmem:[#allocation476_spill] sm:$0xff] }
 0x81a   :  { %6245 = vmatmul.mubr.bf16.vlgmr.msra.gmra.mrb[104].mxu0 %v13182_v46 }
 0x81b   :  { %6327 = vmatmul.mubr.bf16.vlgmr.msra.gmra.mrb[104].mxu1 %v13182_v46  ;;  %6336 = vmatpush1.bf16.msra.mxu0 %v16623_v41  ;;  %v16634_v41 = vld [vmem:[#allocation477_spill] sm:$0xff] }
 0x81c   :  { %6367 = vmatprep.mubr.bf16.mxu0 %v13106_v28  ;;  %6418 = vmatpush1.bf16.msra.mxu1 %v16624_v56  ;;  %v16636_v56 = vld [vmem:[#allocation479_spill] sm:$0xff] }
 0x81d   :  { %6449 = vmatprep.mubr.bf16.mxu1 %v13106_v28  ;;  %6337 = vmatprep.subr.bf16.mxu0 %v16625_v30  ;;  %v16635_v28 = vld [vmem:[#allocation478_spill] sm:$0xff]  ;;  %v16637_v30 = vld [vmem:[#allocation480_spill] sm:$0xff] }
 0x81e   :  { %6419 = vmatprep.subr.bf16.mxu1 %v16626_v3  ;;  %v16638_v3 = vld [vmem:[#allocation481_spill] sm:$0xff] }
 0x81f   :  { %6338 = vmatpush1.bf16.msra.mxu0 %v16627_v4  ;;  %v16639_v4 = vld [vmem:[#allocation482_spill] sm:$0xff] }
 0x820   :  { %6420 = vmatpush1.bf16.msra.mxu1 %v16628_v11  ;;  %6339 = vmatprep.subr.bf16.mxu0 %v16629_v37  ;;  %v16640_v11 = vld [vmem:[#allocation483_spill] sm:$0xff]  ;;  %v16641_v37 = vld [vmem:[#allocation484_spill] sm:$0xff] }
 0x821   :  { %6421 = vmatprep.subr.bf16.mxu1 %v16630_v51  ;;  %v16642_v51 = vld [vmem:[#allocation485_spill] sm:$0xff] }
 0x823   :  { %6340 = vmatpush1.bf16.msra.mxu0 %v16631_v21  ;;  %v16643_v21 = vld [vmem:[#allocation486_spill] sm:$0xff] }
 0x824   :  { %6422 = vmatpush1.bf16.msra.mxu1 %v16632_v60  ;;  %6341 = vmatprep.subr.bf16.mxu0 %v16633_v35  ;;  %v16644_v60 = vld [vmem:[#allocation487_spill] sm:$0xff]  ;;  %v16645_v35 = vld [vmem:[#allocation488_spill] sm:$0xff] }
 0x825   :  { %6423 = vmatprep.subr.bf16.mxu1 %v16634_v41  ;;  %v16646_v41 = vld [vmem:[#allocation489_spill] sm:$0xff] }
 0x827   :  { %6342 = vmatpush1.bf16.msra.mxu0 %v16635_v28  ;;  %v16647_v28 = vld [vmem:[#allocation490_spill] sm:$0xff] }
 0x828   :  { %6424 = vmatpush1.bf16.msra.mxu1 %v16636_v56  ;;  %6343 = vmatprep.subr.bf16.mxu0 %v16637_v30  ;;  %v16648_v56 = vld [vmem:[#allocation491_spill] sm:$0xff]  ;;  %v16649_v30 = vld [vmem:[#allocation492_spill] sm:$0xff] }
 0x829   :  { %6425 = vmatprep.subr.bf16.mxu1 %v16638_v3  ;;  %v16650_v3 = vld [vmem:[#allocation493_spill] sm:$0xff] }
 0x82b   :  { %6344 = vmatpush1.bf16.msra.mxu0 %v16639_v4  ;;  %v16651_v4 = vld [vmem:[#allocation494_spill] sm:$0xff] }
 0x82c   :  { %6426 = vmatpush1.bf16.msra.mxu1 %v16640_v11  ;;  %6345 = vmatprep.subr.bf16.mxu0 %v16641_v37  ;;  %v16652_v11 = vld [vmem:[#allocation495_spill] sm:$0xff]  ;;  %v16653_v37 = vld [vmem:[#allocation496_spill] sm:$0xff] }
 0x82d   :  { %6427 = vmatprep.subr.bf16.mxu1 %v16642_v51  ;;  %v16654_v51 = vld [vmem:[#allocation497_spill] sm:$0xff] }
 0x82f   :  { %6346 = vmatpush1.bf16.msra.mxu0 %v16643_v21  ;;  %v16655_v21 = vld [vmem:[#allocation498_spill] sm:$0xff] }
 0x830   :  { %6428 = vmatpush1.bf16.msra.mxu1 %v16644_v60  ;;  %6347 = vmatprep.subr.bf16.mxu0 %v16645_v35  ;;  %v16656_v60 = vld [vmem:[#allocation499_spill] sm:$0xff]  ;;  %v16657_v35 = vld [vmem:[#allocation500_spill] sm:$0xff] }
 0x831   :  { %6429 = vmatprep.subr.bf16.mxu1 %v16646_v41  ;;  %v16658_v41 = vld [vmem:[#allocation501_spill] sm:$0xff] }
 0x833   :  { %6348 = vmatpush1.bf16.msra.mxu0 %v16647_v28  ;;  %v16659_v28 = vld [vmem:[#allocation502_spill] sm:$0xff] }
 0x834   :  { %6430 = vmatpush1.bf16.msra.mxu1 %v16648_v56  ;;  %6349 = vmatprep.subr.bf16.mxu0 %v16649_v30  ;;  %v16660_v56 = vld [vmem:[#allocation503_spill] sm:$0xff]  ;;  %v16661_v30 = vld [vmem:[#allocation504_spill] sm:$0xff] }
 0x835   :  { %6431 = vmatprep.subr.bf16.mxu1 %v16650_v3  ;;  %v16662_v3 = vld [vmem:[#allocation505_spill] sm:$0xff] }
 0x837   :  { %6350 = vmatpush1.bf16.msra.mxu0 %v16651_v4  ;;  %v16663_v4 = vld [vmem:[#allocation506_spill] sm:$0xff] }
 0x838   :  { %6432 = vmatpush1.bf16.msra.mxu1 %v16652_v11  ;;  %6351 = vmatprep.subr.bf16.mxu0 %v16653_v37  ;;  %v16664_v11 = vld [vmem:[#allocation507_spill] sm:$0xff]  ;;  %v16665_v37 = vld [vmem:[#allocation508_spill] sm:$0xff] }
 0x839   :  { %6433 = vmatprep.subr.bf16.mxu1 %v16654_v51  ;;  %v16666_v51 = vld [vmem:[#allocation509_spill] sm:$0xff] }
 0x83b   :  { %6352 = vmatpush1.bf16.msra.mxu0 %v16655_v21  ;;  %v16667_v21 = vld [vmem:[#allocation510_spill] sm:$0xff] }
 0x83c   :  { %6434 = vmatpush1.bf16.msra.mxu1 %v16656_v60  ;;  %6353 = vmatprep.subr.bf16.mxu0 %v16657_v35  ;;  %v16668_v60 = vld [vmem:[#allocation511_spill] sm:$0xff]  ;;  %v16669_v35 = vld [vmem:[#allocation512_spill] sm:$0xff] }
 0x83d   :  { %6435 = vmatprep.subr.bf16.mxu1 %v16658_v41  ;;  %v16670_v41 = vld [vmem:[#allocation513_spill] sm:$0xff] }
 0x83f   :  { %6354 = vmatpush1.bf16.msra.mxu0 %v16659_v28  ;;  %v16671_v28 = vld [vmem:[#allocation514_spill] sm:$0xff] }
 0x840   :  { %6436 = vmatpush1.bf16.msra.mxu1 %v16660_v56  ;;  %6355 = vmatprep.subr.bf16.mxu0 %v16661_v30  ;;  %v16672_v56 = vld [vmem:[#allocation515_spill] sm:$0xff]  ;;  %v16673_v30 = vld [vmem:[#allocation516_spill] sm:$0xff] }
 0x841   :  { %6437 = vmatprep.subr.bf16.mxu1 %v16662_v3  ;;  %v16674_v3 = vld [vmem:[#allocation517_spill] sm:$0xff] }
 0x843   :  { %6356 = vmatpush1.bf16.msra.mxu0 %v16663_v4  ;;  %v16675_v4 = vld [vmem:[#allocation518_spill] sm:$0xff] }
 0x844   :  { %6438 = vmatpush1.bf16.msra.mxu1 %v16664_v11  ;;  %6357 = vmatprep.subr.bf16.mxu0 %v16665_v37  ;;  %v16676_v11 = vld [vmem:[#allocation519_spill] sm:$0xff]  ;;  %v16677_v37 = vld [vmem:[#allocation520_spill] sm:$0xff] }
 0x845   :  { %6439 = vmatprep.subr.bf16.mxu1 %v16666_v51  ;;  %v16678_v51 = vld [vmem:[#allocation521_spill] sm:$0xff] }
 0x847   :  { %6358 = vmatpush1.bf16.msra.mxu0 %v16667_v21  ;;  %v16679_v21 = vld [vmem:[#allocation522_spill] sm:$0xff] }
 0x848   :  { %6440 = vmatpush1.bf16.msra.mxu1 %v16668_v60  ;;  %6359 = vmatprep.subr.bf16.mxu0 %v16669_v35  ;;  %v16680_v60 = vld [vmem:[#allocation523_spill] sm:$0xff]  ;;  %v16681_v35 = vld [vmem:[#allocation524_spill] sm:$0xff] }
 0x849   :  { %6441 = vmatprep.subr.bf16.mxu1 %v16670_v41  ;;  %v16682_v41 = vld [vmem:[#allocation525_spill] sm:$0xff] }
 0x84b   :  { %6360 = vmatpush1.bf16.msra.mxu0 %v16671_v28  ;;  %v16683_v28 = vld [vmem:[#allocation526_spill] sm:$0xff] }
 0x84c   :  { %6442 = vmatpush1.bf16.msra.mxu1 %v16672_v56  ;;  %6361 = vmatprep.subr.bf16.mxu0 %v16673_v30  ;;  %v16684_v56 = vld [vmem:[#allocation527_spill] sm:$0xff]  ;;  %v16685_v30 = vld [vmem:[#allocation528_spill] sm:$0xff] }
 0x84d   :  { %6443 = vmatprep.subr.bf16.mxu1 %v16674_v3  ;;  %v16686_v3 = vld [vmem:[#allocation529_spill] sm:$0xff] }
 0x84f   :  { %6362 = vmatpush1.bf16.msra.mxu0 %v16675_v4  ;;  %v16687_v4 = vld [vmem:[#allocation530_spill] sm:$0xff] }
 0x850   :  { %6444 = vmatpush1.bf16.msra.mxu1 %v16676_v11  ;;  %6363 = vmatprep.subr.bf16.mxu0 %v16677_v37  ;;  %v16688_v11 = vld [vmem:[#allocation531_spill] sm:$0xff]  ;;  %v16689_v37 = vld [vmem:[#allocation532_spill] sm:$0xff] }
 0x851   :  { %6445 = vmatprep.subr.bf16.mxu1 %v16678_v51  ;;  %v16690_v51 = vld [vmem:[#allocation533_spill] sm:$0xff] }
 0x853   :  { %6364 = vmatpush1.bf16.msra.mxu0 %v16679_v21  ;;  %v16691_v21 = vld [vmem:[#allocation534_spill] sm:$0xff] }
 0x854   :  { %6446 = vmatpush1.bf16.msra.mxu1 %v16680_v60  ;;  %6365 = vmatprep.subr.bf16.mxu0 %v16681_v35  ;;  %v16692_v60 = vld [vmem:[#allocation535_spill] sm:$0xff]  ;;  %v16693_v35 = vld [vmem:[#allocation536_spill] sm:$0xff] }
 0x855   :  { %6447 = vmatprep.subr.bf16.mxu1 %v16682_v41  ;;  %v16694_v41 = vld [vmem:[#allocation537_spill] sm:$0xff] }
 0x857   :  { %6366 = vmatpush1.bf16.msra.mxu0 %v16683_v28  ;;  %v16696_v28 = vld [vmem:[#allocation539_spill] sm:$0xff] }
 0x858   :  { %6448 = vmatpush1.bf16.msra.mxu1 %v16684_v56  ;;  %6376 = vmatprep.subr.bf16.mxu0 %v16685_v30  ;;  %v16697_v56 = vld [vmem:[#allocation540_spill] sm:$0xff]  ;;  %v16698_v30 = vld [vmem:[#allocation541_spill] sm:$0xff] }
 0x859   :  { %6458 = vmatprep.subr.bf16.mxu1 %v16686_v3  ;;  %v16700_v3 = vld [vmem:[#allocation543_spill] sm:$0xff] }
 0x85a   :  { %6368 = vmatmul.mubr.bf16.vlgmr.msra.gmra.mrb[108].mxu0 %v13108_v29 }
 0x85b   :  { %6450 = vmatmul.mubr.bf16.vlgmr.msra.gmra.mrb[108].mxu1 %v13108_v29  ;;  %6377 = vmatpush1.bf16.msra.mxu0 %v16687_v4  ;;  %v16695_v29 = vld [vmem:[#allocation538_spill] sm:$0xff]  ;;  %v16701_v4 = vld [vmem:[#allocation544_spill] sm:$0xff] }
 0x85c   :  { %6408 = vmatprep.mubr.bf16.mxu0 %v13112_v33  ;;  %6459 = vmatpush1.bf16.msra.mxu1 %v16688_v11  ;;  %v16702_v11 = vld [vmem:[#allocation545_spill] sm:$0xff] }
 0x85d   :  { %6490 = vmatprep.mubr.bf16.mxu1 %v13112_v33  ;;  %6378 = vmatprep.subr.bf16.mxu0 %v16689_v37  ;;  %v16699_v33 = vld [vmem:[#allocation542_spill] sm:$0xff] }
 0x85e   :  { %6460 = vmatprep.subr.bf16.mxu1 %v16690_v51  ;;  %v16703_v37 = vld [vmem:[#allocation546_spill] sm:$0xff]  ;;  %v16704_v51 = vld [vmem:[#allocation547_spill] sm:$0xff] }
 0x85f   :  { %6379 = vmatpush1.bf16.msra.mxu0 %v16691_v21  ;;  %v16705_v21 = vld [vmem:[#allocation548_spill] sm:$0xff] }
 0x860   :  { %6461 = vmatpush1.bf16.msra.mxu1 %v16692_v60  ;;  %6380 = vmatprep.subr.bf16.mxu0 %v16693_v35  ;;  %v16706_v35 = vld [vmem:[#allocation77_spill] sm:$0xff] }
 0x861   :  { %6462 = vmatprep.subr.bf16.mxu1 %v16694_v41 }
 0x863   :  { %6381 = vmatpush1.bf16.msra.mxu0 %v16695_v29  ;;  %v16707_v29 = vld [vmem:[#allocation82_spill] sm:$0xff] }
 0x864   :  { %6463 = vmatpush1.bf16.msra.mxu1 %v16696_v28  ;;  %6382 = vmatprep.subr.bf16.mxu0 %v16697_v56  ;;  %v16708_v56 = vld [vmem:[#allocation85_spill] sm:$0xff] }
 0x865   :  { %6464 = vmatprep.subr.bf16.mxu1 %v16698_v30 }
 0x867   :  { %6383 = vmatpush1.bf16.msra.mxu0 %v16699_v33  ;;  %v16709_v33 = vld [vmem:[#allocation90_spill] sm:$0xff] }
 0x868   :  { %6465 = vmatpush1.bf16.msra.mxu1 %v16700_v3  ;;  %6384 = vmatprep.subr.bf16.mxu0 %v16701_v4 }
 0x869   :  { %6466 = vmatprep.subr.bf16.mxu1 %v16702_v11 }
 0x86b   :  { %6385 = vmatpush1.bf16.msra.mxu0 %v16703_v37  ;;  %v16710_v37 = vld [vmem:[#allocation80_spill] sm:$0xff] }
 0x86c   :  { %6467 = vmatpush1.bf16.msra.mxu1 %v16704_v51  ;;  %6386 = vmatprep.subr.bf16.mxu0 %v16705_v21  ;;  %v16711_v21 = vld [vmem:[#allocation84_spill] sm:$0xff] }
 0x86d   :  { %v6082_v60 = vpop.f32.mrb[100].mxu0  ;;  %6468 = vmatprep.subr.bf16.mxu1 %v16198_v58  ;;  %v16712_v58 = vld [vmem:[#allocation88_spill] sm:$0xff] }
 0x86e   :  { %v13599_v41 = vadd.f32 %v6082_v60, %v16706_v35  ;;  %v13602_v28 = vadd.f32 %v6082_v60, %v16707_v29  ;;  %v13605_v30 = vadd.f32 %v6082_v60, %v16708_v56  ;;  %v13608_v3 = vadd.f32 %v6082_v60, %v16709_v33  ;;  %v6164_v4 = vpop.f32.mrb[100].mxu1  ;;  %v6084_v11 = vpop.f32.mrb[101].mxu0  ;;  %v16714_v60 = vld [vmem:[#allocation79_spill] sm:$0xff] }
 0x86f   :  { %v13611_v51 = vadd.f32 %v6164_v4, %v16710_v37  ;;  %v13614_v13 = vadd.f32 %v6164_v4, %v16711_v21  ;;  %v13617_v35 = vadd.f32 %v6164_v4, %v16712_v58  ;;  %v13620_v29 = vadd.f32 %v6164_v4, %v16713_v52  ;;  %v6166_v16 = vpop.f32.mrb[101].mxu1  ;;  %v6086_v56 = vpop.f32.mrb[102].mxu0  ;;  %6387 = vmatpush1.bf16.msra.mxu0 %v12137_v22  ;;  %v16715_v37 = vld [vmem:[#allocation83_spill] sm:$0xff] }
 0x870   :  { %v13624_v33 = vadd.f32 %v6084_v11, %v16714_v60  ;;  %6469 = vmatpush1.bf16.msra.mxu1 %v12141_v40  ;;  %6388 = vmatprep.subr.bf16.mxu0 %v12143_v43  ;;  %v13629_v21 = vadd.f32 %v6084_v11, %v16715_v37  ;;  %v16716_v58 = vld [vmem:[#allocation87_spill] sm:$0xff]  ;;  %v6168_v52 = vpop.f32.mrb[102].mxu1  ;;  %v6087_v4 = vpop.f32.mrb[103].mxu0  ;;  %v16719_v60 = vld [vmem:[#allocation550_spill] sm:$0xff]  ;;  %v13640_v40 = vadd.f32 %v6166_v16, %v16720_v54  ;;  %v16729_v54 = vld [vmem:[#allocation556_spill] sm:$0xff] }
 0x871   :  { %6470 = vmatprep.subr.bf16.mxu1 %v12146_v9  ;;  %v13633_v50 = vadd.f32 %v6084_v11, %v16716_v58  ;;  %v16718_v56 = vld [vmem:[#allocation91_spill] sm:$0xff]  ;;  %v6169_v22 = vpop.f32.mrb[103].mxu1  ;;  %v16721_v43 = vld [vmem:[#allocation86_spill] sm:$0xff]  ;;  %v16723_v9 = vld [vmem:[#allocation552_spill] sm:$0xff] }
 0x872   :  { %v13636_v10 = vadd.f32 %v6084_v11, %v16718_v56  ;;  %v13643_v42 = vadd.f32 %v6166_v16, %v16721_v43  ;;  %v16722_v37 = vld [vmem:[#allocation551_spill] sm:$0xff]  ;;  %v16724_v58 = vld [vmem:[#allocation89_spill] sm:$0xff]  ;;  %v16727_v56 = vld [vmem:[#allocation554_spill] sm:$0xff] }
 0x873   :  { %16717 = vst [vmem:[#allocation97_spill] sm:$0xff] %v13633_v50  ;;  %6389 = vmatpush1.bf16.msra.mxu0 %v16719_v60  ;;  %v13648_v50 = vadd.f32 %v6166_v16, %v16724_v58  ;;  %v16725_v52 = vld [vmem:[#allocation93_spill] sm:$0xff]  ;;  %v16728_v22 = vld [vmem:[#allocation555_spill] sm:$0xff]  ;;  %v16731_v43 = vld [vmem:[#allocation558_spill] sm:$0xff] }
 0x874   :  { %6471 = vmatpush1.bf16.msra.mxu1 %v16722_v37  ;;  %6390 = vmatprep.subr.bf16.mxu0 %v16723_v9  ;;  %v13651_v4 = vadd.f32 %v6166_v16, %v16725_v52  ;;  %v16726_v11 = vld [vmem:[#allocation553_spill] sm:$0xff]  ;;  %v16732_v37 = vld [vmem:[#allocation559_spill] sm:$0xff]  ;;  %v16733_v9 = vld [vmem:[#allocation560_spill] sm:$0xff] }
 0x875   :  { %6472 = vmatprep.subr.bf16.mxu1 %v16726_v11  ;;  %v16730_v60 = vld [vmem:[#allocation557_spill] sm:$0xff]  ;;  %v16735_v16 = vld [vmem:[#allocation562_spill] sm:$0xff]  ;;  %v16736_v52 = vld [vmem:[#allocation563_spill] sm:$0xff] }
 0x876   :  { %v16734_v58 = vld [vmem:[#allocation561_spill] sm:$0xff]  ;;  %v16737_v11 = vld [vmem:[#allocation564_spill] sm:$0xff] }
 0x877   :  { %6391 = vmatpush1.bf16.msra.mxu0 %v16727_v56  ;;  %v16738_v56 = vld [vmem:[#allocation565_spill] sm:$0xff] }
 0x878   :  { %6473 = vmatpush1.bf16.msra.mxu1 %v16728_v22  ;;  %6392 = vmatprep.subr.bf16.mxu0 %v16729_v54  ;;  %v16739_v22 = vld [vmem:[#allocation566_spill] sm:$0xff] }
 0x879   :  { %6474 = vmatprep.subr.bf16.mxu1 %v16730_v60 }
 0x87b   :  { %6393 = vmatpush1.bf16.msra.mxu0 %v16731_v43 }
 0x87c   :  { %6475 = vmatpush1.bf16.msra.mxu1 %v16732_v37  ;;  %6394 = vmatprep.subr.bf16.mxu0 %v16733_v9 }
 0x87d   :  { %6476 = vmatprep.subr.bf16.mxu1 %v16734_v58  ;;  %v7787_v58 = vmul.f32 -1.442695, %v13467_v31  ;;  %v7808_v31 = vmul.f32 -1.442695, %v13602_v28  ;;  %v7810_v28 = vmul.f32 -1.442695, %v13614_v13 }
 0x87e   :  { %v7809_v13 = vmul.f32 -1.442695, %v13629_v21 }
 0x87f   :  { %6395 = vmatpush1.bf16.msra.mxu0 %v16735_v16 }
 0x880   :  { %6477 = vmatpush1.bf16.msra.mxu1 %v16736_v52  ;;  %6396 = vmatprep.subr.bf16.mxu0 %v16737_v11 }
 0x881   :  { %6478 = vmatprep.subr.bf16.mxu1 %v16738_v56 }
 0x883   :  { %6397 = vmatpush1.bf16.msra.mxu0 %v16739_v22 }
 0x884   :  { %6479 = vmatpush1.bf16.msra.mxu1 %v16219_v24  ;;  %6398 = vmatprep.subr.bf16.mxu0 %v16220_v1  ;;  %v7783_v24 = vmul.f32 -1.442695, %v13464_v53 }
 0x885   :  { %6480 = vmatprep.subr.bf16.mxu1 %v16221_v61 }
 0x887   :  { %6399 = vmatpush1.bf16.msra.mxu0 %v16222_v8 }
 0x888   :  { %6481 = vmatpush1.bf16.msra.mxu1 %v16223_v55  ;;  %6400 = vmatprep.subr.bf16.mxu0 %v16224_v57  ;;  %v7772_v57 = vmul.f32 -1.442695, %v13415_v5 }
 0x889   :  { %6482 = vmatprep.subr.bf16.mxu1 %v16225_v63  ;;  %v7785_v63 = vmul.f32 -1.442695, %v13452_v20 }
 0x88a   :  { %8249 = vpow2.f32 %v7772_v57 }
 0x88b   :  { %6401 = vmatpush1.bf16.msra.mxu0 %v16226_v45  ;;  %v7775_v45 = vmul.f32 -1.442695, %v13456_v36 }
 0x88c   :  { %6483 = vmatpush1.bf16.msra.mxu1 %v16227_v59  ;;  %6402 = vmatprep.subr.bf16.mxu0 %v16228_v0  ;;  %v7779_v0 = vmul.f32 -1.442695, %v13459_v49 }
 0x88d   :  { %6484 = vmatprep.subr.bf16.mxu1 %v16229_v38 }
 0x88f   :  { %6403 = vmatpush1.bf16.msra.mxu0 %v12341_v39  ;;  %v7773_v39 = vmul.f32 -1.442695, %v13440_v23 }
 0x890   :  { %6485 = vmatpush1.bf16.msra.mxu1 %v12345_v14  ;;  %6404 = vmatprep.subr.bf16.mxu0 %v12347_v34  ;;  %v7780_v34 = vmul.f32 -1.442695, %v13421_v62  ;;  %v7778_v14 = vmul.f32 -1.442695, %v13430_v19 }
 0x891   :  { %6486 = vmatprep.subr.bf16.mxu1 %v12350_v48  ;;  %v7776_v48 = vmul.f32 -1.442695, %v13418_v6 }
 0x893   :  { %6405 = vmatpush1.bf16.msra.mxu0 %v12365_v32  ;;  %8251 = vpow2.f32 %v7776_v48  ;;  %v7777_v32 = vmul.f32 -1.442695, %v13445_v7  ;;  %v7804_v48 = vmul.f32 -1.442695, %v13599_v41  ;;  %v7806_v41 = vmul.f32 -1.442695, %v13611_v51 }
 0x894   :  { %6487 = vmatpush1.bf16.msra.mxu1 %v12369_v26  ;;  %6406 = vmatprep.subr.bf16.mxu0 %v12371_v2  ;;  %v7784_v26 = vmul.f32 -1.442695, %v13424_v12  ;;  %v7774_v2 = vmul.f32 -1.442695, %v13427_v17  ;;  %8253 = vpow2.f32 %v7780_v34  ;;  %v8250_v59 = vpop.eup %8249  ;;  %v7805_v51 = vmul.f32 -1.442695, %v13624_v33 }
 0x895   :  { %6488 = vmatprep.subr.bf16.mxu1 %v12374_v15  ;;  %v7782_v15 = vmul.f32 -1.442695, %v13433_v25  ;;  %v6611_v8 = vadd.f32 1.0, %v8250_v59 }
 0x896   :  { %8255 = vpow2.f32 %v7784_v26 }
 0x897   :  { %6407 = vmatpush1.bf16.msra.mxu0 %v12377_v18  ;;  %v7786_v18 = vmul.f32 -1.442695, %v13436_v27  ;;  %8257 = vpow2.f32 %v7774_v2  ;;  %v7812_v2 = vmul.f32 -1.442695, %v13605_v30  ;;  %v7814_v30 = vmul.f32 -1.442695, %v13617_v35 }
 0x898   :  { %6489 = vmatpush1.bf16.msra.mxu1 %v12381_v47  ;;  %8259 = vpow2.f32 %v7778_v14  ;;  %v7781_v47 = vmul.f32 -1.442695, %v13449_v44 }
 0x899   :  { %8261 = vpow2.f32 %v7782_v15  ;;  %v7816_v15 = vmul.f32 -1.442695, %v13608_v3  ;;  %v7818_v3 = vmul.f32 -1.442695, %v13620_v29 }
 0x89a   :  { %6409 = vmatmul.mubr.bf16.vlgmr.msra.gmra.mrb[108].mxu0 %v13182_v46  ;;  %8263 = vpow2.f32 %v7786_v18 }
 0x89b   :  { %6491 = vmatmul.mubr.bf16.vlgmr.msra.gmra.mrb[108].mxu1 %v13182_v46  ;;  %8265 = vpow2.f32 %v7773_v39 }
 0x89c   :  { %8267 = vpow2.f32 %v7777_v32 }
 0x89d   :  { %8269 = vpow2.f32 %v7781_v47  ;;  %v8252_v38 = vpop.eup %8251 }
 0x89e   :  { %8271 = vpow2.f32 %v7785_v63  ;;  %v8254_v1 = vpop.eup %8253  ;;  %v6615_v46 = vadd.f32 1.0, %v8252_v38 }
 0x89f   :  { %8273 = vpow2.f32 %v7775_v45  ;;  %v6619_v6 = vadd.f32 1.0, %v8254_v1  ;;  %v7807_v1 = vmul.f32 -1.442695, %v13640_v40 }
 0x8a0   :  { %v8256_v61 = vpop.eup %8255  ;;  %8275 = vpow2.f32 %v7779_v0  ;;  %v16740_v0 = vld [vmem:[#allocation97_spill] sm:$0xff] }
 0x8a1   :  { %v8258_v55 = vpop.eup %8257  ;;  %8277 = vpow2.f32 %v7783_v24  ;;  %v6623_v12 = vadd.f32 1.0, %v8256_v61  ;;  %v7813_v38 = vmul.f32 -1.442695, %v16740_v0  ;;  %v7817_v24 = vmul.f32 -1.442695, %v13636_v10  ;;  %v16741_v0 = vld [vmem:[#allocation101_spill] sm:$0xff] }
 0x8a2   :  { %v8260_v5 = vpop.eup %8259  ;;  %8279 = vrcp.f32 %v6611_v8  ;;  %v6613_v19 = vadd.f32 1.0, %v8258_v55  ;;  %v7811_v61 = vmul.f32 -1.442695, %v13643_v42  ;;  %v7815_v8 = vmul.f32 -1.442695, %v13648_v50 }
 0x8a3   :  { %v8262_v62 = vpop.eup %8261  ;;  %8281 = vrcp.f32 %v6615_v46  ;;  %v6617_v27 = vadd.f32 1.0, %v8260_v5  ;;  %v7819_v46 = vmul.f32 -1.442695, %v13651_v4 }
 0x8a4   :  { %v8264_v17 = vpop.eup %8263  ;;  %8283 = vrcp.f32 %v6619_v6  ;;  %v6621_v7 = vadd.f32 1.0, %v8262_v62 }
 0x8a5   :  { %v8266_v25 = vpop.eup %8265  ;;  %8285 = vrcp.f32 %v6623_v12  ;;  %v6625_v20 = vadd.f32 1.0, %v8264_v17 }
 0x8a6   :  { %v8268_v23 = vpop.eup %8267  ;;  %8287 = vrcp.f32 %v6613_v19  ;;  %v6612_v49 = vadd.f32 1.0, %v8266_v25 }
 0x8a7   :  { %v8270_v44 = vpop.eup %8269  ;;  %8289 = vrcp.f32 %v6617_v27  ;;  %v6616_v53 = vadd.f32 1.0, %v8268_v23 }
 0x8a8   :  { %v8272_v36 = vpop.eup %8271  ;;  %8291 = vrcp.f32 %v6621_v7  ;;  %v6620_v60 = vadd.f32 1.0, %v8270_v44 }
 0x8a9   :  { %v8274_v54 = vpop.eup %8273  ;;  %8293 = vrcp.f32 %v6625_v20  ;;  %v6624_v37 = vadd.f32 1.0, %v8272_v36 }
 0x8aa   :  { %v8276_v43 = vpop.eup %8275  ;;  %8295 = vrcp.f32 %v6612_v49  ;;  %v6614_v16 = vadd.f32 1.0, %v8274_v54 }
 0x8ab   :  { %v8278_v9 = vpop.eup %8277  ;;  %8297 = vrcp.f32 %v6616_v53  ;;  %v6618_v11 = vadd.f32 1.0, %v8276_v43 }
 0x8ac   :  { %v13706_v52 = vpop.eup %8279  ;;  %8299 = vrcp.f32 %v6620_v60  ;;  %v6622_v22 = vadd.f32 1.0, %v8278_v9 }
 0x8ad   :  { %v13708_v56 = vpop.eup %8281  ;;  %8301 = vrcp.f32 %v6624_v37 }
 0x8ae   :  { %v13710_v57 = vpop.eup %8283  ;;  %8303 = vpow2.f32 %v7787_v58 }
 0x8af   :  { %v13713_v34 = vpop.eup %8285  ;;  %8305 = vrcp.f32 %v6614_v16 }
 0x8b0   :  { %v13716_v26 = vpop.eup %8287  ;;  %8307 = vrcp.f32 %v6618_v11 }
 0x8b1   :  { %v13719_v14 = vpop.eup %8289  ;;  %8309 = vrcp.f32 %v6622_v22 }
 0x8b2   :  { %v13722_v18 = vpop.eup %8291  ;;  %8311 = vpow2.f32 %v7804_v48 }
 0x8b3   :  { %v13725_v39 = vpop.eup %8293  ;;  %8313 = vpow2.f32 %v7808_v31 }
 0x8b4   :  { %v13728_v32 = vpop.eup %8295  ;;  %8315 = vpow2.f32 %v7812_v2 }
 0x8b5   :  { %v13731_v47 = vpop.eup %8297  ;;  %8317 = vpow2.f32 %v7816_v15 }
 0x8b6   :  { %v13734_v63 = vpop.eup %8299  ;;  %8319 = vpow2.f32 %v7806_v41 }
 0x8b7   :  { %v13737_v45 = vpop.eup %8301  ;;  %8321 = vpow2.f32 %v7810_v28 }
 0x8b8   :  { %v8304_v59 = vpop.eup %8303  ;;  %8323 = vpow2.f32 %v7814_v30 }
 0x8b9   :  { %v13741_v35 = vpop.eup %8305  ;;  %8325 = vpow2.f32 %v7818_v3  ;;  %v6626_v10 = vadd.f32 1.0, %v8304_v59 }
 0x8ba   :  { %v13744_v29 = vpop.eup %8307  ;;  %8327 = vpow2.f32 %v7805_v51 }
 0x8bb   :  { %v13747_v33 = vpop.eup %8309  ;;  %8329 = vpow2.f32 %v7809_v13 }
 0x8bc   :  { %v8312_v21 = vpop.eup %8311  ;;  %8331 = vpow2.f32 %v7813_v38 }
 0x8bd   :  { %v8314_v55 = vpop.eup %8313  ;;  %8333 = vpow2.f32 %v7817_v24  ;;  %v6819_v62 = vadd.f32 1.0, %v8312_v21  ;;  %v16742_v24 = vld [vmem:[#allocation109_spill] sm:$0xff] }
 0x8be   :  { %v8316_v5 = vpop.eup %8315  ;;  %8335 = vpow2.f32 %v7807_v1  ;;  %v6823_v12 = vadd.f32 1.0, %v8314_v55 }
 0x8bf   :  { %v8318_v6 = vpop.eup %8317  ;;  %8337 = vpow2.f32 %v7811_v61  ;;  %v6827_v19 = vadd.f32 1.0, %v8316_v5  ;;  %v16743_v61 = vld [vmem:[#allocation113_spill] sm:$0xff] }
 0x8c0   :  { %v8320_v40 = vpop.eup %8319  ;;  %8339 = vpow2.f32 %v7815_v8  ;;  %v6831_v25 = vadd.f32 1.0, %v8318_v6  ;;  %v16744_v8 = vld [vmem:[#allocation118_spill] sm:$0xff]  ;;  %v16745_v6 = vld [vmem:[#allocation104_spill] sm:$0xff] }
 0x8c1   :  { %v8322_v17 = vpop.eup %8321  ;;  %8341 = vpow2.f32 %v7819_v46  ;;  %v6821_v27 = vadd.f32 1.0, %v8320_v40  ;;  %v16746_v40 = vld [vmem:[#allocation112_spill] sm:$0xff] }
 0x8c2   :  { %v8324_v42 = vpop.eup %8323  ;;  %8343 = vrcp.f32 %v6626_v10  ;;  %v6825_v4 = vadd.f32 1.0, %v8322_v17  ;;  %v16747_v17 = vld [vmem:[#allocation116_spill] sm:$0xff] }
 0x8c3   :  { %v8326_v50 = vpop.eup %8325  ;;  %8345 = vrcp.f32 %v6819_v62  ;;  %v6829_v44 = vadd.f32 1.0, %v8324_v42  ;;  %v16748_v42 = vld [vmem:[#allocation120_spill] sm:$0xff] }
 0x8c4   :  { %v8328_v23 = vpop.eup %8327  ;;  %8347 = vrcp.f32 %v6823_v12  ;;  %v6833_v36 = vadd.f32 1.0, %v8326_v50 }
 0x8c5   :  { %v8330_v7 = vpop.eup %8329  ;;  %8349 = vrcp.f32 %v6827_v19  ;;  %v6820_v53 = vadd.f32 1.0, %v8328_v23 }
 0x8c6   :  { %v8332_v20 = vpop.eup %8331  ;;  %8351 = vrcp.f32 %v6831_v25  ;;  %v6824_v60 = vadd.f32 1.0, %v8330_v7 }
 0x8c7   :  { %v8334_v49 = vpop.eup %8333  ;;  %8353 = vrcp.f32 %v6821_v27  ;;  %v6828_v37 = vadd.f32 1.0, %v8332_v20 }
 0x8c8   :  { %v8336_v54 = vpop.eup %8335  ;;  %8355 = vrcp.f32 %v6825_v4  ;;  %v6832_v58 = vadd.f32 1.0, %v8334_v49  ;;  %v16749_v4 = vld [vmem:[#allocation103_spill] sm:$0xff] }
 0x8c9   :  { %v8338_v43 = vpop.eup %8337  ;;  %8357 = vrcp.f32 %v6829_v44  ;;  %v6822_v11 = vadd.f32 1.0, %v8336_v54  ;;  %v16750_v44 = vld [vmem:[#allocation111_spill] sm:$0xff] }
 0x8ca   :  { %v8340_v9 = vpop.eup %8339  ;;  %8359 = vrcp.f32 %v6833_v36  ;;  %v6826_v48 = vadd.f32 1.0, %v8338_v43  ;;  %v16751_v36 = vld [vmem:[#allocation115_spill] sm:$0xff] }
 0x8cb   :  { %v8342_v16 = vpop.eup %8341  ;;  %8361 = vrcp.f32 %v6820_v53  ;;  %v6830_v2 = vadd.f32 1.0, %v8340_v9  ;;  %v16752_v43 = vld [vmem:[#allocation119_spill] sm:$0xff]  ;;  %v16753_v9 = vld [vmem:[#allocation105_spill] sm:$0xff] }
 0x8cc   :  { %v13752_v22 = vpop.eup %8343  ;;  %8363 = vrcp.f32 %v6824_v60  ;;  %v6834_v41 = vadd.f32 1.0, %v8342_v16  ;;  %v16754_v16 = vld [vmem:[#allocation114_spill] sm:$0xff] }
 0x8cd   :  { %v13754_v31 = vpop.eup %8345  ;;  %8365 = vrcp.f32 %v6828_v37 }
 0x8ce   :  { %v13756_v15 = vpop.eup %8347  ;;  %8367 = vrcp.f32 %v6832_v58 }
 0x8cf   :  { %v13758_v28 = vpop.eup %8349  ;;  %8369 = vrcp.f32 %v6822_v11 }
 0x8d0   :  { %v13760_v30 = vpop.eup %8351  ;;  %8371 = vrcp.f32 %v6826_v48 }
 0x8d1   :  { %v13762_v3 = vpop.eup %8353  ;;  %8373 = vrcp.f32 %v6830_v2 }
 0x8d2   :  { %v13764_v51 = vpop.eup %8355  ;;  %8375 = vrcp.f32 %v6834_v41  ;;  %v16755_v41 = vld [vmem:[#allocation117_spill] sm:$0xff] }
 0x8d3   :  { %v13766_v59 = vpop.eup %8357 }
 0x8d4   :  { %v13772_v10 = vpop.eup %8359 }
 0x8d5   :  { %v13778_v23 = vpop.eup %8361 }
 0x8d6   :  { %v13783_v60 = vpop.eup %8363 }
 0x8d7   :  { %v13788_v2 = vpop.eup %8365 }
 0x8ed   :  { %v6246_v13 = vpop.f32.mrb[104].mxu0 }
 0x8ee   :  { %v6507_v38 = vadd.f32 %v6246_v13, %v16741_v0  ;;  %v6523_v1 = vadd.f32 %v6246_v13, %v16742_v24  ;;  %v6539_v21 = vadd.f32 %v6246_v13, %v16743_v61  ;;  %v6555_v55 = vadd.f32 %v6246_v13, %v16744_v8  ;;  %v6328_v46 = vpop.f32.mrb[104].mxu1  ;;  %v6248_v5 = vpop.f32.mrb[105].mxu0  ;;  %v16756_v0 = vld [vmem:[#allocation121_spill] sm:$0xff] }
 0x8ef   :  { %v6509_v62 = vadd.f32 %v6328_v46, %v16745_v6  ;;  %v6525_v12 = vadd.f32 %v6328_v46, %v16746_v40  ;;  %v6541_v19 = vadd.f32 %v6328_v46, %v16747_v17  ;;  %v6557_v25 = vadd.f32 %v6328_v46, %v16748_v42  ;;  %v6330_v50 = vpop.f32.mrb[105].mxu1  ;;  %v6250_v27 = vpop.f32.mrb[106].mxu0 }
 0x8f0   :  { %8377 = vtanh.f32 %v6507_v38  ;;  %v6508_v7 = vadd.f32 %v6248_v5, %v16749_v4  ;;  %v6524_v20 = vadd.f32 %v6248_v5, %v16750_v44  ;;  %v6540_v49 = vadd.f32 %v6248_v5, %v16751_v36  ;;  %v6332_v53 = vpop.f32.mrb[106].mxu1  ;;  %v6251_v54 = vpop.f32.mrb[107].mxu0 }
 0x8f1   :  { %8379 = vtanh.f32 %v6523_v1  ;;  %v6556_v37 = vadd.f32 %v6248_v5, %v16752_v43  ;;  %v6510_v58 = vadd.f32 %v6330_v50, %v16753_v9  ;;  %v6526_v11 = vadd.f32 %v6330_v50, %v16754_v16  ;;  %v6333_v48 = vpop.f32.mrb[107].mxu1  ;;  %v13792_v24 = vpop.eup %8367  ;;  %v16759_v9 = vld [vmem:[#allocation96_spill] sm:$0xff] }
 0x8f2   :  { %8381 = vtanh.f32 %v6539_v21  ;;  %v6542_v13 = vadd.f32 %v6330_v50, %v16755_v41  ;;  %v6558_v38 = vadd.f32 %v6330_v50, %v16756_v0  ;;  %v13794_v61 = vpop.eup %8369 }
 0x8f3   :  { %8383 = vtanh.f32 %v6555_v55  ;;  %v13796_v1 = vpop.eup %8371  ;;  %v16757_v55 = vld [vmem:[#allocation425_spill] sm:$0xff] }
 0x8f4   :  { %8385 = vtanh.f32 %v6509_v62  ;;  %v13798_v8 = vpop.eup %8373  ;;  %v6867_v62 = vmul.f32 %v13754_v31, %v16757_v55  ;;  %v6871_v17 = vmul.f32 %v13756_v15, %v16757_v55 }
 0x8f5   :  { %8387 = vtanh.f32 %v6525_v12  ;;  %v13800_v46 = vpop.eup %8375 }
 0x8f6   :  { %8389 = vtanh.f32 %v6541_v19 }
 0x8f7   :  { %8391 = vtanh.f32 %v6557_v25 }
 0x8f8   :  { %8393 = vtanh.f32 %v6508_v7 }
 0x8f9   :  { %8395 = vtanh.f32 %v6524_v20 }
 0x8fa   :  { %v8378_v21 = vpop.eup %8377  ;;  %8397 = vtanh.f32 %v6540_v49 }
 0x8fb   :  { %v8380_v5 = vpop.eup %8379  ;;  %v6883_v6 = vmul.f32 %v8378_v21, %v13706_v52  ;;  %8399 = vtanh.f32 %v6556_v37  ;;  %v6875_v52 = vmul.f32 %v13758_v28, %v16757_v55  ;;  %v659_v21 = vld [vmem:[%s14184_s4 + $0x188] sm:$0xff] }
 0x8fc   :  { %v8382_v40 = vpop.eup %8381  ;;  %v6887_v12 = vmul.f32 %v8380_v5, %v13708_v56  ;;  %8401 = vtanh.f32 %v6510_v58  ;;  %v6879_v56 = vmul.f32 %v13760_v30, %v16757_v55  ;;  %v6868_v58 = vmul.f32 %v13778_v23, %v16759_v9  ;;  %v610_v5 = vld [vmem:[%s14184_s4] sm:$0xff] }
 0x8fd   :  { %v8384_v19 = vpop.eup %8383  ;;  %v6891_v42 = vmul.f32 %v8382_v40, %v13710_v57  ;;  %8403 = vtanh.f32 %v6526_v11  ;;  %v13809_v25 = vadd.f32 %v6883_v6, %v6867_v62  ;;  %v16758_v57 = vld [vmem:[#allocation94_spill] sm:$0xff]  ;;  %v611_v6 = vld [vmem:[%s14184_s4 + $0x8] sm:$0xff] }
 0x8fe   :  { %v8386_v50 = vpop.eup %8385  ;;  %v6895_v27 = vmul.f32 %v8384_v19, %v13713_v34  ;;  %8405 = vtanh.f32 %v6542_v13  ;;  %v13814_v31 = vadd.f32 %v6887_v12, %v6871_v17  ;;  %v6869_v7 = vmul.f32 %v13762_v3, %v16758_v57  ;;  %v642_v17 = vld [vmem:[%s14184_s4 + $0x100] sm:$0xff]  ;;  %v643_v19 = vld [vmem:[%s14184_s4 + $0x108] sm:$0xff] }
 0x8ff   :  { %v8388_v4 = vpop.eup %8387  ;;  %v6885_v15 = vmul.f32 %v8386_v50, %v13716_v26  ;;  %8407 = vtanh.f32 %v6558_v38  ;;  %v13821_v44 = vadd.f32 %v6891_v42, %v6875_v52  ;;  %v6873_v34 = vmul.f32 %v13764_v51, %v16758_v57 }
 0x900   :  { %v8390_v20 = vpop.eup %8389  ;;  %v6889_v28 = vmul.f32 %v8388_v4, %v13719_v14  ;;  %v13826_v36 = vadd.f32 %v6895_v27, %v6879_v56  ;;  %v6877_v26 = vmul.f32 %v13766_v59, %v16758_v57  ;;  %v6881_v14 = vmul.f32 %v13772_v10, %v16758_v57  ;;  %v627_v10 = vld [vmem:[%s14184_s4 + $0x88] sm:$0xff] }
 0x901   :  { %v8392_v49 = vpop.eup %8391  ;;  %v6893_v30 = vmul.f32 %v8390_v20, %v13722_v18  ;;  %v13829_v53 = vadd.f32 %v6885_v15, %v6869_v7  ;;  %v6872_v59 = vmul.f32 %v13783_v60, %v16759_v9  ;;  %v6876_v60 = vmul.f32 %v13788_v2, %v16759_v9  ;;  %v16760_v2 = vld [vmem:[#allocation95_spill] sm:$0xff]  ;;  %v628_v15 = vld [vmem:[%s14184_s4 + $0x90] sm:$0xff]  ;;  %v661_v20 = vld [vmem:[%s14184_s4 + $0x198] sm:$0xff] }
 0x902   :  { %v8394_v54 = vpop.eup %8393  ;;  %v6897_v3 = vmul.f32 %v8392_v49, %v13725_v39  ;;  %v13834_v43 = vadd.f32 %v6889_v28, %v6873_v34  ;;  %v6870_v55 = vmul.f32 %v13794_v61, %v16760_v2  ;;  %v7910_v12 = vpack.c.bf16 %v611_v6, %v610_v5  ;;  %v612_v28 = vld [vmem:[%s14184_s4 + $0x10] sm:$0xff]  ;;  %v613_v34 = vld [vmem:[%s14184_s4 + $0x18] sm:$0xff] }
 0x903   :  { %v8396_v37 = vpop.eup %8395  ;;  %v6884_v51 = vmul.f32 %v8394_v54, %v13728_v32  ;;  %v13841_v18 = vadd.f32 %v6893_v30, %v6877_v26  ;;  %v626_v32 = vld [vmem:[%s14184_s4 + $0x80] sm:$0xff]  ;;  %v6874_v42 = vmul.f32 %v13796_v1, %v16760_v2  ;;  %v7942_v50 = vpack.c.bf16 %v643_v19, %v642_v17  ;;  %v660_v1 = vld [vmem:[%s14184_s4 + $0x190] sm:$0xff]  ;;  %v617_v6 = vld [vmem:[%s14184_s4 + $0x38] sm:$0xff] }
 0x904   :  { %v8398_v16 = vpop.eup %8397  ;;  %v6888_v11 = vmul.f32 %v8396_v37, %v13731_v47  ;;  %v13846_v39 = vadd.f32 %v6897_v3, %v6881_v14  ;;  %v658_v47 = vld [vmem:[%s14184_s4 + $0x180] sm:$0xff]  ;;  %v7908_v38 = vpack.c.bf16 %v627_v10, %v626_v32  ;;  %v6882_v30 = vmul.f32 %v13800_v46, %v16760_v2  ;;  %v644_v54 = vld [vmem:[%s14184_s4 + $0x110] sm:$0xff]  ;;  %v645_v3 = vld [vmem:[%s14184_s4 + $0x118] sm:$0xff] }
 0x905   :  { %v8400_v48 = vpop.eup %8399  ;;  %v6892_v41 = vmul.f32 %v8398_v16, %v13734_v63  ;;  %v13858_v23 = vadd.f32 %v6884_v51, %v6868_v58  ;;  %v6880_v63 = vmul.f32 %v13792_v24, %v16759_v9  ;;  %v7940_v40 = vpack.c.bf16 %v659_v21, %v658_v47  ;;  %v630_v46 = vld [vmem:[%s14184_s4 + $0xa0] sm:$0xff]  ;;  %v631_v9 = vld [vmem:[%s14184_s4 + $0xa8] sm:$0xff]  ;;  %v665_v21 = vld [vmem:[%s14184_s4 + $0x1b8] sm:$0xff] }
 0x906   :  { %v8402_v13 = vpop.eup %8401  ;;  %v6896_v0 = vmul.f32 %v8400_v48, %v13737_v45  ;;  %v13876_v24 = vadd.f32 %v6888_v11, %v6872_v59  ;;  %7909 = vmatprep.subr.bf16.mxu0 %v7908_v38  ;;  %v7914_v26 = vpack.c.bf16 %v613_v34, %v612_v28  ;;  %v7946_v37 = vpack.c.bf16 %v645_v3, %v644_v54  ;;  %v662_v58 = vld [vmem:[%s14184_s4 + $0x1a0] sm:$0xff]  ;;  %v663_v11 = vld [vmem:[%s14184_s4 + $0x1a8] sm:$0xff]  ;;  %v616_v5 = vld [vmem:[%s14184_s4 + $0x30] sm:$0xff] }
 0x907   :  { %v8404_v62 = vpop.eup %8403  ;;  %v6886_v45 = vmul.f32 %v8402_v13, %v13741_v35  ;;  %v13888_v27 = vadd.f32 %v6892_v41, %v6876_v60  ;;  %v6878_v35 = vmul.f32 %v13798_v8, %v16760_v2  ;;  %7941 = vmatprep.subr.bf16.mxu1 %v7940_v40  ;;  %7911 = vmatpush3.bf16.msra.mxu0 %v7910_v12  ;;  %v614_v59 = vld [vmem:[%s14184_s4 + $0x20] sm:$0xff]  ;;  %v615_v48 = vld [vmem:[%s14184_s4 + $0x28] sm:$0xff]  ;;  %v633_v13 = vld [vmem:[%s14184_s4 + $0xb8] sm:$0xff]  ;;  %8409 = vtanh.f32 %v13809_v25 }
 0x908   :  { %v8406_v52 = vpop.eup %8405  ;;  %v6890_v61 = vmul.f32 %v8404_v62, %v13744_v29  ;;  %v629_v29 = vld [vmem:[%s14184_s4 + $0x98] sm:$0xff]  ;;  %v13904_v8 = vadd.f32 %v6896_v0, %v6880_v63  ;;  %7943 = vmatpush3.bf16.msra.mxu1 %v7942_v50  ;;  %v7916_v16 = vpack.c.bf16 %v631_v9, %v630_v46  ;;  %v7948_v41 = vpack.c.bf16 %v663_v11, %v662_v58  ;;  %v646_v10 = vld [vmem:[%s14184_s4 + $0x120] sm:$0xff]  ;;  %v647_v47 = vld [vmem:[%s14184_s4 + $0x128] sm:$0xff] }
 0x909   :  { %v8408_v56 = vpop.eup %8407  ;;  %v6894_v4 = vmul.f32 %v8406_v52, %v13747_v33  ;;  %v13902_v57 = vadd.f32 %v6886_v45, %v6870_v55  ;;  %v7912_v7 = vpack.c.bf16 %v629_v29, %v628_v15  ;;  %v7918_v32 = vpack.c.bf16 %v615_v48, %v614_v59  ;;  %v632_v63 = vld [vmem:[%s14184_s4 + $0xb0] sm:$0xff]  ;;  %v649_v45 = vld [vmem:[%s14184_s4 + $0x138] sm:$0xff]  ;;  %v634_v12 = vld [vmem:[%s14184_s4 + $0xc0] sm:$0xff] }
 0x90a   :  { %v6898_v33 = vmul.f32 %v8408_v56, %v13752_v22  ;;  %v13916_v49 = vadd.f32 %v6890_v61, %v6874_v42  ;;  %v7944_v22 = vpack.c.bf16 %v661_v20, %v660_v1  ;;  %v7950_v60 = vpack.c.bf16 %v647_v47, %v646_v10  ;;  %v664_v0 = vld [vmem:[%s14184_s4 + $0x1b0] sm:$0xff]  ;;  %v635_v17 = vld [vmem:[%s14184_s4 + $0xc8] sm:$0xff]  ;;  %v666_v19 = vld [vmem:[%s14184_s4 + $0x1c0] sm:$0xff] }
 0x90b   :  { %v13926_v14 = vadd.f32 %v6894_v4, %v6878_v35  ;;  %7913 = vmatprep.subr.bf16.mxu0 %v7912_v7  ;;  %v7920_v38 = vpack.c.bf16 %v633_v13, %v632_v63  ;;  %v7952_v2 = vpack.c.bf16 %v665_v21, %v664_v0  ;;  %v7922_v55 = vpack.c.bf16 %v617_v6, %v616_v5  ;;  %v648_v62 = vld [vmem:[%s14184_s4 + $0x130] sm:$0xff]  ;;  %v667_v52 = vld [vmem:[%s14184_s4 + $0x1c8] sm:$0xff]  ;;  %v618_v61 = vld [vmem:[%s14184_s4 + $0x40] sm:$0xff] }
 0x90c   :  { %v13928_v51 = vadd.f32 %v6898_v33, %v6882_v30  ;;  %7945 = vmatprep.subr.bf16.mxu1 %v7944_v22  ;;  %7915 = vmatpush3.bf16.msra.mxu0 %v7914_v26  ;;  %v7954_v40 = vpack.c.bf16 %v649_v45, %v648_v62  ;;  %v7924_v42 = vpack.c.bf16 %v635_v17, %v634_v12  ;;  %v619_v50 = vld [vmem:[%s14184_s4 + $0x48] sm:$0xff]  ;;  %v650_v4 = vld [vmem:[%s14184_s4 + $0x140] sm:$0xff]  ;;  %v636_v1 = vld [vmem:[%s14184_s4 + $0xd0] sm:$0xff]  ;;  %8411 = vtanh.f32 %v13814_v31 }
 0x90d   :  { %7947 = vmatpush3.bf16.msra.mxu1 %v7946_v37  ;;  %7917 = vmatprep.subr.bf16.mxu0 %v7916_v16  ;;  %v7956_v35 = vpack.c.bf16 %v667_v52, %v666_v19  ;;  %v7926_v56 = vpack.c.bf16 %v619_v50, %v618_v61  ;;  %v651_v15 = vld [vmem:[%s14184_s4 + $0x148] sm:$0xff]  ;;  %v637_v33 = vld [vmem:[%s14184_s4 + $0xd8] sm:$0xff]  ;;  %v668_v7 = vld [vmem:[%s14184_s4 + $0x1d0] sm:$0xff]  ;;  %8413 = vtanh.f32 %v13821_v44 }
 0x90e   :  { %7949 = vmatprep.subr.bf16.mxu1 %v7948_v41  ;;  %v7958_v29 = vpack.c.bf16 %v651_v15, %v650_v4  ;;  %v7928_v20 = vpack.c.bf16 %v637_v33, %v636_v1  ;;  %v669_v28 = vld [vmem:[%s14184_s4 + $0x1d8] sm:$0xff]  ;;  %v620_v34 = vld [vmem:[%s14184_s4 + $0x50] sm:$0xff]  ;;  %v638_v37 = vld [vmem:[%s14184_s4 + $0xe0] sm:$0xff]  ;;  %8415 = vtanh.f32 %v13829_v53 }
 0x90f   :  { %v621_v30 = vld [vmem:[%s14184_s4 + $0x58] sm:$0xff]  ;;  %v7960_v22 = vpack.c.bf16 %v669_v28, %v668_v7  ;;  %v652_v54 = vld [vmem:[%s14184_s4 + $0x150] sm:$0xff]  ;;  %v639_v9 = vld [vmem:[%s14184_s4 + $0xe8] sm:$0xff]  ;;  %8417 = vtanh.f32 %v13834_v43 }
 0x910   :  { %7919 = vmatpush3.bf16.msra.mxu0 %v7918_v32  ;;  %v7930_v26 = vpack.c.bf16 %v621_v30, %v620_v34  ;;  %v653_v3 = vld [vmem:[%s14184_s4 + $0x158] sm:$0xff]  ;;  %v670_v58 = vld [vmem:[%s14184_s4 + $0x1e0] sm:$0xff]  ;;  %v671_v16 = vld [vmem:[%s14184_s4 + $0x1e8] sm:$0xff]  ;;  %v7932_v11 = vpack.c.bf16 %v639_v9, %v638_v37  ;;  %8419 = vtanh.f32 %v13841_v18 }
 0x911   :  { %7951 = vmatpush3.bf16.msra.mxu1 %v7950_v60  ;;  %7921 = vmatprep.subr.bf16.mxu0 %v7920_v38  ;;  %v7962_v46 = vpack.c.bf16 %v653_v3, %v652_v54  ;;  %v7964_v59 = vpack.c.bf16 %v671_v16, %v670_v58  ;;  %v622_v48 = vld [vmem:[%s14184_s4 + $0x60] sm:$0xff]  ;;  %v623_v41 = vld [vmem:[%s14184_s4 + $0x68] sm:$0xff]  ;;  %v640_v60 = vld [vmem:[%s14184_s4 + $0xf0] sm:$0xff]  ;;  %8421 = vtanh.f32 %v13826_v36 }
 0x912   :  { %7953 = vmatprep.subr.bf16.mxu1 %v7952_v2  ;;  %v654_v32 = vld [vmem:[%s14184_s4 + $0x160] sm:$0xff]  ;;  %v7934_v10 = vpack.c.bf16 %v623_v41, %v622_v48  ;;  %v655_v47 = vld [vmem:[%s14184_s4 + $0x168] sm:$0xff]  ;;  %v641_v63 = vld [vmem:[%s14184_s4 + $0xf8] sm:$0xff]  ;;  %8423 = vtanh.f32 %v13858_v23 }
 0x913   :  { %v7966_v13 = vpack.c.bf16 %v655_v47, %v654_v32  ;;  %v7936_v0 = vpack.c.bf16 %v641_v63, %v640_v60  ;;  %v672_v38 = vld [vmem:[%s14184_s4 + $0x1f0] sm:$0xff]  ;;  %v673_v21 = vld [vmem:[%s14184_s4 + $0x1f8] sm:$0xff]  ;;  %v16764_v52 = vld [vmem:[#allocation196_spill] sm:$0xff]  ;;  %8425 = vtanh.f32 %v13876_v24 }
 0x914   :  { %7923 = vmatpush3.bf16.msra.mxu0 %v7922_v55  ;;  %v624_v5 = vld [vmem:[%s14184_s4 + $0x70] sm:$0xff]  ;;  %v7968_v6 = vpack.c.bf16 %v673_v21, %v672_v38  ;;  %v625_v2 = vld [vmem:[%s14184_s4 + $0x78] sm:$0xff]  ;;  %v16765_v31 = vld [vmem:[#allocation204_spill] sm:$0xff]  ;;  %8427 = vtanh.f32 %v13846_v39 }
 0x915   :  { %7955 = vmatpush3.bf16.msra.mxu1 %v7954_v40  ;;  %7925 = vmatprep.subr.bf16.mxu0 %v7924_v42  ;;  %v656_v55 = vld [vmem:[%s14184_s4 + $0x170] sm:$0xff]  ;;  %v657_v62 = vld [vmem:[%s14184_s4 + $0x178] sm:$0xff]  ;;  %v7938_v45 = vpack.c.bf16 %v625_v2, %v624_v5  ;;  %v16763_v42 = vld [vmem:[#allocation123_spill] sm:$0xff]  ;;  %8429 = vtanh.f32 %v13888_v27 }
 0x916   :  { %7957 = vmatprep.subr.bf16.mxu1 %v7956_v35  ;;  %v7970_v40 = vpack.c.bf16 %v657_v62, %v656_v55  ;;  %v16761_v12 = vld [vmem:[#allocation122_spill] sm:$0xff]  ;;  %v1580_v25 = vadd.f32 %v16764_v52, %v16763_v42  ;;  %v16766_v44 = vld [vmem:[#allocation205_spill] sm:$0xff]  ;;  %v16767_v43 = vld [vmem:[#allocation207_spill] sm:$0xff]  ;;  %8431 = vtanh.f32 %v13902_v57 }
 0x917   :  { %v16762_v17 = vld [vmem:[#allocation194_spill] sm:$0xff]  ;;  %v1584_v61 = vadd.f32 %v16765_v31, %v16761_v12  ;;  %v1586_v53 = vadd.f32 %v16766_v44, %v16763_v42  ;;  %v1588_v18 = vadd.f32 %v16767_v43, %v16761_v12  ;;  %v16769_v35 = vld [vmem:[#allocation215_spill] sm:$0xff]  ;;  %v16770_v4 = vld [vmem:[#allocation217_spill] sm:$0xff]  ;;  %8433 = vtanh.f32 %v13904_v8 }
 0x918   :  { %7927 = vmatpush3.bf16.msra.mxu0 %v7926_v56  ;;  %v1578_v19 = vadd.f32 %v16762_v17, %v16761_v12  ;;  %v16768_v36 = vld [vmem:[#allocation210_spill] sm:$0xff]  ;;  %v1594_v23 = vadd.f32 %v16769_v35, %v16761_v12  ;;  %v14098_v56 = vpop.eup %8409  ;;  %v1596_v15 = vadd.f32 %v16770_v4, %v16763_v42  ;;  %v16772_v1 = vld [vmem:[#allocation268_spill] sm:$0xff]  ;;  %v16776_v39 = vld [vmem:[#allocation281_spill] sm:$0xff] }
 0x919   :  { %7959 = vmatpush3.bf16.msra.mxu1 %v7958_v29  ;;  %7929 = vmatprep.subr.bf16.mxu0 %v7928_v20  ;;  %v1590_v50 = vadd.f32 %v16768_v36, %v16763_v42  ;;  %v16771_v29 = vld [vmem:[#allocation147_spill] sm:$0xff]  ;;  %v16773_v24 = vld [vmem:[#allocation124_spill] sm:$0xff]  ;;  %v16774_v7 = vld [vmem:[#allocation270_spill] sm:$0xff]  ;;  %v14107_v28 = vpop.eup %8411 }
 0x91a   :  { %7961 = vmatprep.subr.bf16.mxu1 %v7960_v22  ;;  %v1649_v33 = vadd.f32 %v16772_v1, %v16771_v29  ;;  %v1651_v20 = vadd.f32 %v16774_v7, %v16773_v24  ;;  %v16775_v34 = vld [vmem:[#allocation278_spill] sm:$0xff]  ;;  %v1659_v22 = vadd.f32 %v16776_v39, %v16771_v29  ;;  %v14116_v37 = vpop.eup %8413  ;;  %v16778_v5 = vld [vmem:[#allocation279_spill] sm:$0xff] }
 0x91b   :  { %v1655_v30 = vadd.f32 %v16775_v34, %v16771_v29 }
 0x91c   :  { %7931 = vmatpush3.bf16.msra.mxu0 %v7930_v26  ;;  %v16777_v26 = vld [vmem:[#allocation289_spill] sm:$0xff] }
 0x91d   :  { %7963 = vmatpush3.bf16.msra.mxu1 %v7962_v46  ;;  %7933 = vmatprep.subr.bf16.mxu0 %v7932_v11  ;;  %v1665_v54 = vadd.f32 %v16777_v26, %v16771_v29 }
 0x91e   :  { %7965 = vmatprep.subr.bf16.mxu1 %v7964_v59  ;;  %v14118_v59 = vpop.eup %8415 }
 0x91f   :  { %v14120_v63 = vpop.eup %8417 }
 0x920   :  { %7935 = vmatpush3.bf16.msra.mxu0 %v7934_v10  ;;  %v14122_v21 = vpop.eup %8419 }
 0x921   :  { %7967 = vmatpush3.bf16.msra.mxu1 %v7966_v13  ;;  %7937 = vmatprep.subr.bf16.mxu0 %v7936_v0  ;;  %v14127_v62 = vpop.eup %8421 }
 0x922   :  { %7969 = vmatprep.subr.bf16.mxu1 %v7968_v6  ;;  %v1657_v6 = vadd.f32 %v16778_v5, %v16773_v24  ;;  %v14131_v52 = vpop.eup %8423 }
 0x923   :  { %v14135_v8 = vpop.eup %8425 }
 0x924   :  { %7939 = vmatpush3.bf16.msra.mxu0 %v7938_v45  ;;  %v16779_v45 = vld [vmem:[#allocation284_spill] sm:$0xff]  ;;  %v14137_v35 = vpop.eup %8427 }
 0x925   :  { %7971 = vmatpush3.bf16.msra.mxu1 %v7970_v40  ;;  %v1661_v40 = vadd.f32 %v16779_v45, %v16773_v24  ;;  %v14139_v29 = vpop.eup %8429 }
 0x96d   :  { %v6410_v3 = vpop.f32.mrb[108].mxu0 }
 0x96e   :  { %v6511_v46 = vadd.f32 %v6410_v3, %v1578_v19  ;;  %v6527_v9 = vadd.f32 %v6410_v3, %v1584_v61  ;;  %v6543_v58 = vadd.f32 %v6410_v3, %v1588_v18  ;;  %v6559_v27 = vadd.f32 %v6410_v3, %v1594_v23  ;;  %v6492_v16 = vpop.f32.mrb[108].mxu1  ;;  %v6412_v11 = vpop.f32.mrb[109].mxu0 }
 0x96f   :  { %v6513_v48 = vadd.f32 %v6492_v16, %v1649_v33  ;;  %v6529_v41 = vadd.f32 %v6492_v16, %v1655_v30  ;;  %v6545_v32 = vadd.f32 %v6492_v16, %v1659_v22  ;;  %v6561_v10 = vadd.f32 %v6492_v16, %v1665_v54  ;;  %v6494_v47 = vpop.f32.mrb[109].mxu1  ;;  %v6414_v60 = vpop.f32.mrb[110].mxu0 }
 0x970   :  { %v7788_v13 = vmul.f32 -1.442695, %v6511_v46  ;;  %v7792_v57 = vmul.f32 -1.442695, %v6527_v9  ;;  %v7796_v0 = vmul.f32 -1.442695, %v6543_v58  ;;  %v6512_v38 = vadd.f32 %v6412_v11, %v1580_v25  ;;  %v14141_v33 = vpop.eup %8431 }
 0x971   :  { %v7800_v2 = vmul.f32 -1.442695, %v6559_v27  ;;  %v6528_v55 = vadd.f32 %v6412_v11, %v1586_v53  ;;  %v7790_v12 = vmul.f32 -1.442695, %v6513_v48  ;;  %v6544_v17 = vadd.f32 %v6412_v11, %v1590_v50  ;;  %v6496_v19 = vpop.f32.mrb[110].mxu1  ;;  %v6415_v42 = vpop.f32.mrb[111].mxu0 }
 0x972   :  { %8435 = vpow2.f32 %v7788_v13  ;;  %v16780_v25 = vld [vmem:[#allocation291_spill] sm:$0xff]  ;;  %v7794_v61 = vmul.f32 -1.442695, %v6529_v41  ;;  %v6560_v44 = vadd.f32 %v6412_v11, %v1596_v15  ;;  %v6497_v53 = vpop.f32.mrb[111].mxu1  ;;  %v7798_v43 = vmul.f32 -1.442695, %v6545_v32  ;;  %v14143_v34 = vpop.eup %8433 }
 0x973   :  { %v1667_v31 = vadd.f32 %v16780_v25, %v16773_v24  ;;  %8437 = vpow2.f32 %v7792_v57  ;;  %v6514_v18 = vadd.f32 %v6494_v47, %v1651_v20  ;;  %v6530_v36 = vadd.f32 %v6494_v47, %v1657_v6 }
 0x974   :  { %8439 = vpow2.f32 %v7796_v0  ;;  %v7802_v50 = vmul.f32 -1.442695, %v6561_v10  ;;  %v6546_v23 = vadd.f32 %v6494_v47, %v1661_v40  ;;  %v7789_v1 = vmul.f32 -1.442695, %v6512_v38 }
 0x975   :  { %8441 = vpow2.f32 %v7800_v2  ;;  %v6562_v4 = vadd.f32 %v6494_v47, %v1667_v31  ;;  %v7793_v15 = vmul.f32 -1.442695, %v6528_v55  ;;  %v7797_v24 = vmul.f32 -1.442695, %v6544_v17 }
 0x976   :  { %8443 = vpow2.f32 %v7790_v12  ;;  %v7801_v7 = vmul.f32 -1.442695, %v6560_v44  ;;  %v7791_v20 = vmul.f32 -1.442695, %v6514_v18  ;;  %v7795_v6 = vmul.f32 -1.442695, %v6530_v36 }
 0x977   :  { %8445 = vpow2.f32 %v7794_v61  ;;  %v7799_v45 = vmul.f32 -1.442695, %v6546_v23  ;;  %v7803_v12 = vmul.f32 -1.442695, %v6562_v4 }
 0x978   :  { %8447 = vpow2.f32 %v7798_v43 }
 0x979   :  { %8449 = vpow2.f32 %v7802_v50 }
 0x97a   :  { %8451 = vpow2.f32 %v7789_v1 }
 0x97b   :  { %8453 = vpow2.f32 %v7793_v15 }
 0x97c   :  { %v8436_v30 = vpop.eup %8435  ;;  %8455 = vpow2.f32 %v7797_v24 }
 0x97d   :  { %v8438_v39 = vpop.eup %8437  ;;  %v6723_v22 = vadd.f32 1.0, %v8436_v30  ;;  %8457 = vpow2.f32 %v7801_v7 }
 0x97e   :  { %v8440_v26 = vpop.eup %8439  ;;  %v6727_v54 = vadd.f32 1.0, %v8438_v39  ;;  %8459 = vpow2.f32 %v7791_v20 }
 0x97f   :  { %v8442_v3 = vpop.eup %8441  ;;  %v6731_v46 = vadd.f32 1.0, %v8440_v26  ;;  %8461 = vrcp.f32 %v6723_v22 }
 0x980   :  { %v8444_v9 = vpop.eup %8443  ;;  %v6735_v58 = vadd.f32 1.0, %v8442_v3  ;;  %8463 = vrcp.f32 %v6727_v54 }
 0x981   :  { %v8446_v27 = vpop.eup %8445  ;;  %8465 = vrcp.f32 %v6731_v46  ;;  %v6725_v16 = vadd.f32 1.0, %v8444_v9 }
 0x982   :  { %v8448_v11 = vpop.eup %8447  ;;  %8467 = vrcp.f32 %v6735_v58  ;;  %v6729_v48 = vadd.f32 1.0, %v8446_v27  ;;  %v6948_v27 = vstv %s14185_s5 }
 0x983   :  { %v8450_v41 = vpop.eup %8449  ;;  %v6733_v32 = vadd.f32 1.0, %v8448_v11  ;;  %8469 = vrcp.f32 %v6725_v16 }
 0x984   :  { %v8452_v10 = vpop.eup %8451  ;;  %v6737_v47 = vadd.f32 1.0, %v8450_v41  ;;  %8471 = vrcp.f32 %v6729_v48 }
 0x985   :  { %v8454_v60 = vpop.eup %8453  ;;  %8473 = vrcp.f32 %v6733_v32  ;;  %v6724_v13 = vadd.f32 1.0, %v8452_v10 }
 0x986   :  { %v8456_v57 = vpop.eup %8455  ;;  %8475 = vrcp.f32 %v6737_v47  ;;  %v6728_v0 = vadd.f32 1.0, %v8454_v60 }
 0x987   :  { %v8458_v38 = vpop.eup %8457  ;;  %v6732_v5 = vadd.f32 1.0, %v8456_v57  ;;  %8477 = vrcp.f32 %v6724_v13 }
 0x988   :  { %v8460_v2 = vpop.eup %8459  ;;  %v6736_v55 = vadd.f32 1.0, %v8458_v38  ;;  %8479 = vrcp.f32 %v6728_v0 }
 0x989   :  { %v8462_v40 = vpop.eup %8461  ;;  %8481 = vrcp.f32 %v6732_v5  ;;  %v6726_v19 = vadd.f32 1.0, %v8460_v2 }
 0x98a   :  { %v8464_v17 = vpop.eup %8463  ;;  %8483 = vrcp.f32 %v6736_v55  ;;  %v6931_v42 = vmul.f32 %v8462_v40, %v14098_v56 }
 0x98b   :  { %v8466_v25 = vpop.eup %8465  ;;  %8485 = vpow2.f32 %v7795_v6  ;;  %v6935_v31 = vmul.f32 %v8464_v17, %v14107_v28 }
 0x98c   :  { %v8468_v61 = vpop.eup %8467  ;;  %8487 = vpow2.f32 %v7799_v45  ;;  %v6939_v44 = vmul.f32 %v8466_v25, %v14116_v37 }
 0x98d   :  { %v8470_v53 = vpop.eup %8469  ;;  %8489 = vpow2.f32 %v7803_v12  ;;  %v6943_v43 = vmul.f32 %v8468_v61, %v14127_v62 }
 0x98e   :  { %v8472_v18 = vpop.eup %8471  ;;  %8491 = vrcp.f32 %v6726_v19  ;;  %v6933_v36 = vmul.f32 %v8470_v53, %v14118_v59 }
 0x98f   :  { %v8474_v50 = vpop.eup %8473  ;;  %v6937_v23 = vmul.f32 %v8472_v18, %v14120_v63  ;;  %8493 = vtanh.f32 %v13916_v49 }
 0x990   :  { %v8476_v56 = vpop.eup %8475  ;;  %v6941_v4 = vmul.f32 %v8474_v50, %v14122_v21  ;;  %8495 = vtanh.f32 %v13926_v14 }
 0x991   :  { %v8478_v1 = vpop.eup %8477  ;;  %v6945_v28 = vmul.f32 %v8476_v56, %v14137_v35  ;;  %8497 = vtanh.f32 %v13928_v51 }
 0x992   :  { %v8480_v15 = vpop.eup %8479  ;;  %v6932_v37 = vmul.f32 %v8478_v1, %v14131_v52 }
 0x993   :  { %v8482_v24 = vpop.eup %8481  ;;  %v6936_v7 = vmul.f32 %v8480_v15, %v14135_v8 }
 0x994   :  { %v8484_v62 = vpop.eup %8483  ;;  %7013 = vmatprep.mubr.f32.mxu0 %v6932_v37  ;;  %v6940_v20 = vmul.f32 %v8482_v24, %v14139_v29 }
 0x995   :  { %v8486_v59 = vpop.eup %8485  ;;  %7014 = vmatmul.mubr.f32.vlgmr.msra.gmra.mrb[112].mxu0 %v6931_v42  ;;  %v6944_v63 = vmul.f32 %v8484_v62, %v14143_v34 }
 0x996   :  { %v8488_v21 = vpop.eup %8487  ;;  %v6730_v30 = vadd.f32 1.0, %v8486_v59  ;;  %7018 = vmatprep.mubr.f32.mxu0 %v6936_v7 }
 0x997   :  { %v8490_v35 = vpop.eup %8489  ;;  %v6734_v52 = vadd.f32 1.0, %v8488_v21 }
 0x998   :  { %v8492_v8 = vpop.eup %8491  ;;  %v6738_v39 = vadd.f32 1.0, %v8490_v35  ;;  %8499 = vrcp.f32 %v6730_v30 }
 0x999   :  { %8501 = vrcp.f32 %v6734_v52  ;;  %v6934_v29 = vmul.f32 %v8492_v8, %v14141_v33  ;;  %7019 = vmatmul.mubr.f32.gmra.mrb[114].mxu0 %v6935_v31  ;;  %v8494_v49 = vpop.eup %8493 }
 0x99a   :  { %8503 = vrcp.f32 %v6738_v39  ;;  %7023 = vmatprep.mubr.f32.mxu0 %v6940_v20  ;;  %v8496_v34 = vpop.eup %8495 }
 0x99b   :  { %7098 = vmatprep.mubr.f32.mxu1 %v6934_v29  ;;  %v8498_v14 = vpop.eup %8497 }
 0x99c   :  { %7099 = vmatmul.mubr.f32.vlgmr.msra.gmra.mrb[112].mxu1 %v6933_v36 }
 0x99d   :  { %7024 = vmatmul.mubr.f32.gmra.mrb[116].mxu0 %v6939_v44 }
 0x99e   :  { %7028 = vmatprep.mubr.f32.mxu0 %v6944_v63 }
 0x9a1   :  { %7029 = vmatmul.mubr.f32.gmra.mrb[118].mxu0 %v6943_v43 }
 0x9a2   :  { %v8500_v22 = vpop.eup %8499 }
 0x9a3   :  { %v8502_v26 = vpop.eup %8501  ;;  %v6938_v51 = vmul.f32 %v8500_v22, %v8494_v49 }
 0x9a4   :  { %v8504_v54 = vpop.eup %8503  ;;  %v6942_v3 = vmul.f32 %v8502_v26, %v8496_v34 }
 0x9a5   :  { %7103 = vmatprep.mubr.f32.mxu1 %v6938_v51  ;;  %v6946_v46 = vmul.f32 %v8504_v54, %v8498_v14 }
 0x9a6   :  { %7104 = vmatmul.mubr.f32.gmra.mrb[114].mxu1 %v6937_v23 }
 0x9a7   :  { %7108 = vmatprep.mubr.f32.mxu1 %v6942_v3 }
 0x9aa   :  { %7109 = vmatmul.mubr.f32.gmra.mrb[116].mxu1 %v6941_v4 }
 0x9ab   :  { %7113 = vmatprep.mubr.f32.mxu1 %v6946_v46 }
 0x9ae   :  { %7114 = vmatmul.mubr.f32.gmra.mrb[118].mxu1 %v6945_v28 }
 0xa68   :  { %v7852_v33 = vpop.f32.mrb[112].mxu0 }
 0xa69   :  { %v7853_v9 = vpop.f32.mrb[113].mxu0 }
 0xa6a   :  { %v7854_v58 = vadd.f32 %v7853_v9, %v7852_v33 }
 0xa6c   :  { %v7855_v16 = vpop.f32.mrb[114].mxu0  ;;  %v7016_v32 = vadd.f32 %v7854_v58, %v6948_v27 }
 0xa6d   :  { %v7856_v11 = vpop.f32.mrb[115].mxu0 }
 0xa6e   :  { %v7857_v48 = vadd.f32 %v7856_v11, %v7855_v16 }
 0xa6f   :  { %v7896_v41 = vpop.f32.mrb[112].mxu1 }
 0xa70   :  { %v7897_v10 = vpop.f32.mrb[113].mxu1  ;;  %v7858_v47 = vpop.f32.mrb[116].mxu0  ;;  %v7021_v55 = vadd.f32 %v7857_v48, %v6948_v27 }
 0xa71   :  { %v7898_v60 = vadd.f32 %v7897_v10, %v7896_v41  ;;  %v7859_v13 = vpop.f32.mrb[117].mxu0 }
 0xa72   :  { %v7860_v57 = vadd.f32 %v7859_v13, %v7858_v47 }
 0xa73   :  { %v7101_v0 = vadd.f32 %v7898_v60, %v7016_v32 }
 0xa74   :  { %v7861_v38 = vpop.f32.mrb[118].mxu0  ;;  %v7026_v19 = vadd.f32 %v7860_v57, %v6948_v27 }
 0xa75   :  { %7120 = vst.msk [vmem:[%s14186_s6] sm:$0xff] %vm7119_vm1, %v7101_v0  ;;  %v7862_v5 = vpop.f32.mrb[119].mxu0 }
 0xa76   :  { %v7863_v6 = vadd.f32 %v7862_v5, %v7861_v38 }
 0xa78   :  { %v7031_v44 = vadd.f32 %v7863_v6, %v6948_v27 }
 0xa79   :  { %v7899_v2 = vpop.f32.mrb[114].mxu1 }
 0xa7a   :  { %v7900_v45 = vpop.f32.mrb[115].mxu1 }
 0xa7b   :  { %v7901_v40 = vadd.f32 %v7900_v45, %v7899_v2 }
 0xa7d   :  { %v7106_v12 = vadd.f32 %v7901_v40, %v7021_v55  ;;  %v7902_v17 = vpop.f32.mrb[116].mxu1 }
 0xa7e   :  { %v7903_v42 = vpop.f32.mrb[117].mxu1 }
 0xa7f   :  { %7121 = vst.msk [vmem:[%s14186_s6 + $0x8] sm:$0xff] %vm7119_vm1, %v7106_v12  ;;  %v7904_v25 = vadd.f32 %v7903_v42, %v7902_v17 }
 0xa81   :  { %v7111_v31 = vadd.f32 %v7904_v25, %v7026_v19  ;;  %v7905_v61 = vpop.f32.mrb[118].mxu1 }
 0xa82   :  { %v7906_v53 = vpop.f32.mrb[119].mxu1 }
 0xa83   :  { %7122 = vst.msk [vmem:[%s14186_s6 + $0x10] sm:$0xff] %vm7119_vm1, %v7111_v31  ;;  %v7907_v43 = vadd.f32 %v7906_v53, %v7905_v61 }
 0xa85   :  { %v7116_v18 = vadd.f32 %v7907_v43, %v7031_v44 }
 0xa87   :  { %7123 = vst.msk [vmem:[%s14186_s6 + $0x18] sm:$0xff] %vm7119_vm1, %v7116_v18 }

</bundles_post_ra>
